<compile_context>
chip_gen: v7x
topology: tpu7x:2x2x1
jax: 0.10.0
libtpu: 0.0.40
codegen_flags: <defaults>
</compile_context>

<pallas_src>
import functools
import math

import jax
import jax.numpy as jnp
from jax import lax
from jax.experimental import pallas as pl
from jax.experimental.pallas import tpu as pltpu


_VMEM_LIMIT_BYTES = 56 * 1024 * 1024   # headroom even on v7x (64 MiB / TensorCore)
_NEG_INF = -1e9                        # finite "masked" bias (avoids NaN rows)
_INV_SQRT2 = 1.0 / math.sqrt(2.0)

# Flipped to False (fallback) if this build rejects the pl.Buffered(1) hint.
_SINGLE_BUFFER_INVARIANTS = [True]


# --------------------------------------------------------------------------
# Small helpers
# --------------------------------------------------------------------------
def _compiler_params(dimension_semantics):
    return pltpu.CompilerParams(
        dimension_semantics=dimension_semantics,
        vmem_limit_bytes=_VMEM_LIMIT_BYTES,
    )


def _const_spec(shape):
    """BlockSpec for a grid-invariant operand (always block (0, 0, ...))."""
    index_map = lambda *_: (0,) * len(shape)
    if _SINGLE_BUFFER_INVARIANTS[0]:
        try:
            # Single-buffer invariant operands: no need for double buffering.
            return pl.BlockSpec(shape, index_map, pipeline_mode=pl.Buffered(1))
        except (TypeError, AttributeError):
            _SINGLE_BUFFER_INVARIANTS[0] = False
    return pl.BlockSpec(shape, index_map)


def _row(v):
    return v.reshape(1, -1)


def _layer_norm_f32(y, gamma, beta, eps=1e-5):
    """LayerNorm over the last dim; y is f32 (rows, d); gamma/beta (1, d)."""
    d = y.shape[-1]
    mean = jnp.sum(y, axis=-1, keepdims=True) * (1.0 / d)    # XLU sum, VPU scale
    c = y - mean
    var = jnp.sum(c * c, axis=-1, keepdims=True) * (1.0 / d)
    return c * lax.rsqrt(var + eps) * gamma + beta           # rsqrt on the EUP


def _mask_to_bias(mask, B, Sq, Sk):
    """PyTorch-style mask (nonzero == attend) -> additive f32 bias (B, Sq, Sk)."""
    if mask is None:
        return jnp.zeros((B, Sq, Sk), jnp.float32)
    m = jnp.asarray(mask)
    if m.ndim == 4:                                # (B,1,Sq,Sk) / (B,1,1,Sk)
        m = m[:, 0]
    if m.ndim == 3 and m.shape[1] == 1 and Sq != 1:
        m = m[:, 0]
    if m.ndim == 2:                                # (B, Sk): broadcast over queries
        m = m[:, None, :]
    m = jnp.broadcast_to(m, (B, Sq, Sk))
    return jnp.where(m == 0, _NEG_INF, 0.0).astype(jnp.float32)


# --------------------------------------------------------------------------
# Embedding kernel: Linear(1, d_model) + sinusoidal positional encoding
# --------------------------------------------------------------------------
def _embed_kernel(x_ref, w_ref, b_ref, pos_ref, o_ref):
    xv = x_ref[0].astype(jnp.float32)                    # (S, 1)
    out = xv * w_ref[...] + b_ref[...] + pos_ref[...]    # (S, D)
    o_ref[0] = out.astype(o_ref.dtype)


def embed_forward(x, w_emb, b_emb, pos_enc):
    """x: (B, S, 1) -> (B, S, D)."""
    B, S, _ = x.shape
    D = w_emb.shape[-1]
    pos = pos_enc[:S]
    return pl.pallas_call(
        _embed_kernel,
        out_shape=jax.ShapeDtypeStruct((B, S, D), x.dtype),
        grid_spec=pltpu.PrefetchScalarGridSpec(
            num_scalar_prefetch=0,
            grid=(B,),
            in_specs=[
                pl.BlockSpec((1, S, 1), lambda b: (b, 0, 0)),
                _const_spec((1, D)),          # embedding weight (row)
                _const_spec((1, D)),          # embedding bias
                _const_spec((S, D)),          # positional encoding
            ],
            out_specs=pl.BlockSpec((1, S, D), lambda b: (b, 0, 0)),
        ),
        compiler_params=_compiler_params(("parallel",)),
    )(x, w_emb.reshape(1, D), b_emb.reshape(1, D), pos)


# --------------------------------------------------------------------------
# Fused multi-head attention block:
#   out = LN_outer(q_in + LN_attn(out_proj(attn(q_in, kv_in)) + q_in))
# (== MultiHeadAttention(...) followed by DecoderLayer.norm1/norm2, dropout=id)
# --------------------------------------------------------------------------
def _mha_kernel(q_ref, kv_ref, bias_ref, wq_ref, bq_ref, wk_ref, bk_ref,
                wv_ref, bv_ref, wo_ref, bo_ref, g_in_ref, b_in_ref,
                g_out_ref, b_out_ref, o_ref, ctx_ref, *, num_heads, head_dim):
    x = q_ref[0]                     # (Sq, D), native dtype (query / residual)
    kv = kv_ref[0]                   # (Sk, D)
    bias = bias_ref[0]               # (Sq, Sk) f32 additive mask

    # Packed per-head projections ('equal' strategy); native-dtype MXU, f32 acc.
    q = jnp.dot(x, wq_ref[...], preferred_element_type=jnp.float32) + bq_ref[...]
    k = jnp.dot(kv, wk_ref[...], preferred_element_type=jnp.float32) + bk_ref[...]
    v = jnp.dot(kv, wv_ref[...], preferred_element_type=jnp.float32) + bv_ref[...]

    # Fold the softmax scale into q once (Sq x D) instead of per-head (Sq x Sk).
    q = q * (1.0 / math.sqrt(head_dim))

    for h in range(num_heads):                            # static unroll
        lo, hi = h * head_dim, (h + 1) * head_dim
        # q_h @ k_h^T without materializing a transpose (contract last dims).
        s = lax.dot_general(q[:, lo:hi], k[:, lo:hi],
                            (((1,), (1,)), ((), ())),
                            preferred_element_type=jnp.float32)
        s = s + bias
        m = jnp.max(s, axis=-1, keepdims=True)
        e = jnp.exp(s - m)
        p = e / jnp.sum(e, axis=-1, keepdims=True)        # exact softmax
        # TODO(synk): attention-weight dropout omitted (inference -> identity).
        ctx_ref[:, lo:hi] = jnp.dot(p, v[:, lo:hi],
                                    preferred_element_type=jnp.float32)

    o = jnp.dot(ctx_ref[...].astype(wo_ref.dtype), wo_ref[...],
                preferred_element_type=jnp.float32) + bo_ref[...]

    xf = x.astype(jnp.float32)
    t = _layer_norm_f32(o + xf, g_in_ref[...], b_in_ref[...])    # attn-internal LN
    y = _layer_norm_f32(xf + t, g_out_ref[...], b_out_ref[...])  # norm1 / norm2
    o_ref[0] = y.astype(o_ref.dtype)


def mha_block(q_in, kv_in, mask, attn_p, g_out, b_out, *, num_heads):
    B, Sq, D = q_in.shape
    Sk = kv_in.shape[1]
    assert D % num_heads == 0, "strategy='equal' requires d_model % num_heads == 0"
    head_dim = D // num_heads
    bias = _mask_to_bias(mask, B, Sq, Sk)

    kernel = functools.partial(_mha_kernel, num_heads=num_heads,
                               head_dim=head_dim)
    return pl.pallas_call(
        kernel,
        out_shape=jax.ShapeDtypeStruct((B, Sq, D), q_in.dtype),
        grid_spec=pltpu.PrefetchScalarGridSpec(
            num_scalar_prefetch=0,
            grid=(B,),
            in_specs=[
                pl.BlockSpec((1, Sq, D), lambda b: (b, 0, 0)),   # query / residual
                pl.BlockSpec((1, Sk, D), lambda b: (b, 0, 0)),   # key / value src
                pl.BlockSpec((1, Sq, Sk), lambda b: (b, 0, 0)),  # additive mask
                _const_spec((D, D)), _const_spec((1, D)),        # wq, bq
                _const_spec((D, D)), _const_spec((1, D)),        # wk, bk
                _const_spec((D, D)), _const_spec((1, D)),        # wv, bv
                _const_spec((D, D)), _const_spec((1, D)),        # wo, bo
                _const_spec((1, D)), _const_spec((1, D)),        # attn-internal LN
                _const_spec((1, D)), _const_spec((1, D)),        # outer norm1/norm2
            ],
            out_specs=pl.BlockSpec((1, Sq, D), lambda b: (b, 0, 0)),
            scratch_shapes=[pltpu.VMEM((Sq, D), jnp.float32)],   # concat(head outs)
        ),
        compiler_params=_compiler_params(("parallel",)),
    )(q_in, kv_in, bias,
      attn_p["wq"], _row(attn_p["bq"]),
      attn_p["wk"], _row(attn_p["bk"]),
      attn_p["wv"], _row(attn_p["bv"]),
      attn_p["wo"], _row(attn_p["bo"]),
      _row(attn_p["ln_g"]), _row(attn_p["ln_b"]),
      _row(g_out), _row(b_out))


# --------------------------------------------------------------------------
# Fused FFN block:  out = norm3(x + LN_ff(fc2(gelu(fc1(x))) + x))
# Row tiles ("parallel") x d_ff contraction tiles ("arbitrary", accumulator).
# --------------------------------------------------------------------------
def _ffn_kernel(x_ref, w1_ref, b1_ref, w2_ref, b2_ref, gf_ref, bf_ref,
                g3_ref, b3_ref, o_ref, acc_ref):
    k = pl.program_id(1)

    @pl.when(k == 0)
    def _init():
        acc_ref[...] = jnp.zeros_like(acc_ref)

    # fc1 k-slice: (TM, D) @ (D, TF), f32 accumulation on the MXU.
    h = jnp.dot(x_ref[...], w1_ref[...],
                preferred_element_type=jnp.float32) + b1_ref[...]
    # Exact (erf) GELU in f32, matching torch.nn.GELU() (f32 VPU/EUP only on v5e).
    h = 0.5 * h * (1.0 + lax.erf(h * _INV_SQRT2))
    # TODO(synk): dropout after GELU omitted (inference/eval -> identity).
    acc_ref[...] += jnp.dot(h.astype(w2_ref.dtype), w2_ref[...],
                            preferred_element_type=jnp.float32)

    @pl.when(k == pl.num_programs(1) - 1)
    def _finalize():
        xf = x_ref[...].astype(jnp.float32)
        ff = acc_ref[...] + b2_ref[...]
        t = _layer_norm_f32(ff + xf, gf_ref[...], bf_ref[...])   # FeedForward LN
        y = _layer_norm_f32(xf + t, g3_ref[...], b3_ref[...])    # DecoderLayer norm3
        o_ref[...] = y.astype(o_ref.dtype)


def ffn_block(x, ffn_p, g_out, b_out, *, block_rows=256, block_ff=512):
    B, S, D = x.shape
    d_ff = ffn_p["w1"].shape[1]
    n_rows = B * S
    x2d = x.reshape(n_rows, D)

    # Row tile: >1 grid step at realistic sizes so the x/out DMAs pipeline
    # behind MXU compute; MXU/sublane-friendly multiples.  (Production
    # d_model/d_ff should be multiples of 128 for lane-dense stores.)
    block_rows = min(block_rows, n_rows)
    if block_rows < n_rows:
        mult = 128 if n_rows >= 128 else 8
        block_rows = max(mult, (block_rows // mult) * mult)

    # d_ff contraction tile: stream w1/w2 k-slices, VMEM independent of d_ff.
    if block_ff >= d_ff or block_ff % 128 != 0 or d_ff % block_ff != 0:
        block_ff = d_ff

    grid = (pl.cdiv(n_rows, block_rows), d_ff // block_ff)

    out2d = pl.pallas_call(
        _ffn_kernel,
        out_shape=jax.ShapeDtypeStruct((n_rows, D), x.dtype),
        grid_spec=pltpu.PrefetchScalarGridSpec(
            num_scalar_prefetch=0,
            grid=grid,
            in_specs=[
                pl.BlockSpec((block_rows, D), lambda i, k: (i, 0)),   # x rows
                pl.BlockSpec((D, block_ff), lambda i, k: (0, k)),     # w1 k-slice
                pl.BlockSpec((1, block_ff), lambda i, k: (0, k)),     # b1 k-slice
                pl.BlockSpec((block_ff, D), lambda i, k: (k, 0)),     # w2 k-slice
                _const_spec((1, D)),                                  # b2
                _const_spec((1, D)), _const_spec((1, D)),             # FFN LN g, b
                _const_spec((1, D)), _const_spec((1, D)),             # norm3 g, b
            ],
            out_specs=pl.BlockSpec((block_rows, D), lambda i, k: (i, 0)),
            scratch_shapes=[pltpu.VMEM((block_rows, D), jnp.float32)],
        ),
        compiler_params=_compiler_params(("parallel", "arbitrary")),
    )(x2d, ffn_p["w1"], _row(ffn_p["b1"]), ffn_p["w2"], _row(ffn_p["b2"]),
      _row(ffn_p["ln_g"]), _row(ffn_p["ln_b"]), _row(g_out), _row(b_out))
    return out2d.reshape(B, S, D)


# --------------------------------------------------------------------------
# Decoder forward (embedding -> N decoder layers)
# --------------------------------------------------------------------------
def decoder_layer_forward(x, enc_output, lp, *, num_heads,
                          tgt_mask=None, memory_mask=None):
    x = mha_block(x, x, tgt_mask, lp["self_attn"],
                  lp["norm1_g"], lp["norm1_b"], num_heads=num_heads)
    x = mha_block(x, enc_output, memory_mask, lp["cross_attn"],
                  lp["norm2_g"], lp["norm2_b"], num_heads=num_heads)
    x = ffn_block(x, lp["ffn"], lp["norm3_g"], lp["norm3_b"])
    return x


def decoder_forward(x, enc_output, params, *, num_heads,
                    tgt_mask=None, memory_mask=None):
    """Pallas forward of the PyTorch Decoder (eval mode; dropout == identity)."""
    h = embed_forward(x, params["emb_w"], params["emb_b"], params["pos_enc"])
    for lp in params["layers"]:
        h = decoder_layer_forward(h, enc_output, lp, num_heads=num_heads,
                                  tgt_mask=tgt_mask, memory_mask=memory_mask)
    # NOTE: Decoder.forward defines self.fc_out but never applies it; match that.
    return h


# --------------------------------------------------------------------------
# Parameter construction (PyTorch-Linear-style uniform init)
# --------------------------------------------------------------------------
def _init_linear(key, d_in, d_out):
    lim = 1.0 / math.sqrt(d_in)
    kw, kb = jax.random.split(key)
    w = jax.random.uniform(kw, (d_in, d_out), minval=-lim, maxval=lim,
                           dtype=jnp.float32)
    b = jax.random.uniform(kb, (d_out,), minval=-lim, maxval=lim,
                           dtype=jnp.float32)
    return w, b


def _init_ln(key, d, scale=0.1):
    kg, kb = jax.random.split(key)
    # nn.LayerNorm inits to (ones, zeros); perturb slightly so the self-test
    # also catches swapped / dropped gamma-beta handling.
    g = 1.0 + scale * jax.random.normal(kg, (d,), dtype=jnp.float32)
    b = scale * jax.random.normal(kb, (d,), dtype=jnp.float32)
    return g, b


def _init_mha(key, d_model):
    ks = jax.random.split(key, 5)
    wq, bq = _init_linear(ks[0], d_model, d_model)   # packed per-head linears
    wk, bk = _init_linear(ks[1], d_model, d_model)
    wv, bv = _init_linear(ks[2], d_model, d_model)
    wo, bo = _init_linear(ks[3], d_model, d_model)
    ln_g, ln_b = _init_ln(ks[4], d_model)
    return dict(wq=wq, bq=bq, wk=wk, bk=bk, wv=wv, bv=bv, wo=wo, bo=bo,
                ln_g=ln_g, ln_b=ln_b)


def _init_ffn(key, d_model, d_ff):
    ks = jax.random.split(key, 3)
    w1, b1 = _init_linear(ks[0], d_model, d_ff)
    w2, b2 = _init_linear(ks[1], d_ff, d_model)
    ln_g, ln_b = _init_ln(ks[2], d_model)
    return dict(w1=w1, b1=b1, w2=w2, b2=b2, ln_g=ln_g, ln_b=ln_b)


def _init_layer(key, d_model, d_ff):
    ks = jax.random.split(key, 6)
    n1g, n1b = _init_ln(ks[3], d_model)
    n2g, n2b = _init_ln(ks[4], d_model)
    n3g, n3b = _init_ln(ks[5], d_model)
    return dict(self_attn=_init_mha(ks[0], d_model),
                cross_attn=_init_mha(ks[1], d_model),
                ffn=_init_ffn(ks[2], d_model, d_ff),
                norm1_g=n1g, norm1_b=n1b,
                norm2_g=n2g, norm2_b=n2b,
                norm3_g=n3g, norm3_b=n3b)


def make_positional_encoding(max_len, d_model):
    pos = jnp.arange(max_len, dtype=jnp.float32)[:, None]
    div = jnp.exp(jnp.arange(0, d_model, 2, dtype=jnp.float32)
                  * (-math.log(10000.0) / d_model))
    ang = pos * div
    pe = jnp.zeros((max_len, d_model), jnp.float32)
    pe = pe.at[:, 0::2].set(jnp.sin(ang))
    pe = pe.at[:, 1::2].set(jnp.cos(ang))
    return pe


def init_decoder_params(key, d_model, d_ff, num_layers, max_len):
    keys = jax.random.split(key, num_layers + 1)
    emb_w, emb_b = _init_linear(keys[0], 1, d_model)   # Embedding(..., is_enconder=False)
    layers = [_init_layer(keys[i + 1], d_model, d_ff) for i in range(num_layers)]
    return dict(emb_w=emb_w, emb_b=emb_b,
                pos_enc=make_positional_encoding(max_len, d_model),
                layers=layers)


# --------------------------------------------------------------------------
# Pure-JAX reference (high-precision matmuls) for correctness checking
# --------------------------------------------------------------------------
_HP = lax.Precision.HIGHEST


def _ref_ln(x, g, b, eps=1e-5):
    m = jnp.mean(x, axis=-1, keepdims=True)
    v = jnp.mean((x - m) ** 2, axis=-1, keepdims=True)
    return (x - m) * lax.rsqrt(v + eps) * g + b


def _ref_mha(q_in, kv_in, mask, p, g_out, b_out, num_heads):
    B, Sq, D = q_in.shape
    Sk = kv_in.shape[1]
    dh = D // num_heads
    bias = _mask_to_bias(mask, B, Sq, Sk)
    q = jnp.matmul(q_in, p["wq"], precision=_HP) + p["bq"]
    k = jnp.matmul(kv_in, p["wk"], precision=_HP) + p["bk"]
    v = jnp.matmul(kv_in, p["wv"], precision=_HP) + p["bv"]
    q = q.reshape(B, Sq, num_heads, dh).transpose(0, 2, 1, 3)
    k = k.reshape(B, Sk, num_heads, dh).transpose(0, 2, 1, 3)
    v = v.reshape(B, Sk, num_heads, dh).transpose(0, 2, 1, 3)
    s = jnp.matmul(q, k.transpose(0, 1, 3, 2), precision=_HP) / math.sqrt(dh)
    s = s + bias[:, None]
    a = jax.nn.softmax(s, axis=-1)
    ctx = jnp.matmul(a, v, precision=_HP).transpose(0, 2, 1, 3).reshape(B, Sq, D)
    o = jnp.matmul(ctx, p["wo"], precision=_HP) + p["bo"]
    t = _ref_ln(o + q_in, p["ln_g"], p["ln_b"])
    return _ref_ln(q_in + t, g_out, b_out)


def _ref_ffn(x, p, g_out, b_out):
    h = jnp.matmul(x, p["w1"], precision=_HP) + p["b1"]
    h = 0.5 * h * (1.0 + lax.erf(h / math.sqrt(2.0)))
    y = jnp.matmul(h, p["w2"], precision=_HP) + p["b2"]
    t = _ref_ln(y + x, p["ln_g"], p["ln_b"])
    return _ref_ln(x + t, g_out, b_out)


def reference_decoder(x, enc_output, params, num_heads,
                      tgt_mask=None, memory_mask=None):
    S = x.shape[1]
    h = jnp.matmul(x, params["emb_w"], precision=_HP) + params["emb_b"]
    h = h + params["pos_enc"][:S]
    for lp in params["layers"]:
        h = _ref_mha(h, h, tgt_mask, lp["self_attn"],
                     lp["norm1_g"], lp["norm1_b"], num_heads)
        h = _ref_mha(h, enc_output, memory_mask, lp["cross_attn"],
                     lp["norm2_g"], lp["norm2_b"], num_heads)
        h = _ref_ffn(h, lp["ffn"], lp["norm3_g"], lp["norm3_b"])
    return h


# --------------------------------------------------------------------------
# Self-test
# --------------------------------------------------------------------------
if __name__ == "__main__":
    batch, tgt_seq, enc_seq = 2, 8, 12
    d_model, num_heads, d_ff, num_layers, max_len = 32, 4, 64, 2, 16

    root = jax.random.PRNGKey(0)
    k_params, k_x, k_enc = jax.random.split(root, 3)

    params = init_decoder_params(k_params, d_model, d_ff, num_layers, max_len)
    x = jax.random.normal(k_x, (batch, tgt_seq, 1), dtype=jnp.float32)
    enc_output = jax.random.normal(k_enc, (batch, enc_seq, d_model),
                                   dtype=jnp.float32)

    # Causal target mask (nonzero == attend); memory mask left as None.
    tgt_mask = jnp.broadcast_to(
        jnp.tril(jnp.ones((tgt_seq, tgt_seq), jnp.int32)),
        (batch, tgt_seq, tgt_seq))

    fwd = jax.jit(functools.partial(decoder_forward, num_heads=num_heads))
    try:
        out = jax.block_until_ready(
            fwd(x, enc_output, params, tgt_mask=tgt_mask, memory_mask=None))
    except Exception:
        # The Buffered(1) single-buffer hint is purely a VMEM optimization; if
        # this build rejects it at lowering time, retry with default buffering.
        _SINGLE_BUFFER_INVARIANTS[0] = False
        fwd = jax.jit(functools.partial(decoder_forward, num_heads=num_heads))
        out = jax.block_until_ready(
            fwd(x, enc_output, params, tgt_mask=tgt_mask, memory_mask=None))

    ref = reference_decoder(x, enc_output, params, num_heads,
                            tgt_mask=tgt_mask, memory_mask=None)

    assert out.shape == (batch, tgt_seq, d_model), out.shape
    max_err = float(jnp.max(jnp.abs(out - ref)))
    assert jnp.allclose(out, ref, atol=5e-4, rtol=5e-4), f"mismatch: {max_err}"

    print("KERNEL_OK")
</pallas_src>

<mosaic_0001>
module attributes {stable_mosaic.version = 11 : i64} {
  func.func @_embed_kernel(%arg0: i32, %arg1: memref<1x8x1xf32, #tpu.memory_space<vmem>>, %arg2: memref<1x32xf32, #tpu.memory_space<vmem>>, %arg3: memref<1x32xf32, #tpu.memory_space<vmem>>, %arg4: memref<8x32xf32, #tpu.memory_space<vmem>>, %arg5: memref<1x8x32xf32, #tpu.memory_space<vmem>>) attributes {dimension_semantics = [#tpu.dimension_semantics<parallel>], iteration_bounds = array<i64: 2>, scalar_prefetch = 0 : i64, scratch_operands = 0 : i64, tpu.core_type = #tpu.core_type<tc>, window_params = [{transform_indices = @transform_0, window_bounds = array<i64: 1, 8, 1>}, {pipeline_mode = #tpu.pipeline_mode<synchronous>, transform_indices = @transform_1, window_bounds = array<i64: 1, 32>}, {pipeline_mode = #tpu.pipeline_mode<synchronous>, transform_indices = @transform_2, window_bounds = array<i64: 1, 32>}, {pipeline_mode = #tpu.pipeline_mode<synchronous>, transform_indices = @transform_3, window_bounds = array<i64: 8, 32>}, {transform_indices = @transform_4, window_bounds = array<i64: 1, 8, 32>}]} {
    %c0 = arith.constant 0 : index
    %c0_0 = arith.constant 0 : index
    %c0_1 = arith.constant 0 : index
    %0 = vector.load %arg1[%c0, %c0_0, %c0_1] : memref<1x8x1xf32, #tpu.memory_space<vmem>>, vector<1x8x1xf32>
    %1 = vector.shape_cast %0 : vector<1x8x1xf32> to vector<8x1xf32>
    %c0_2 = arith.constant 0 : index
    %c0_3 = arith.constant 0 : index
    %2 = vector.load %arg2[%c0_2, %c0_3] : memref<1x32xf32, #tpu.memory_space<vmem>>, vector<1x32xf32>
    %3 = vector.broadcast %1 : vector<8x1xf32> to vector<8x32xf32>
    %4 = vector.broadcast %2 : vector<1x32xf32> to vector<8x32xf32>
    %5 = arith.mulf %3, %4 : vector<8x32xf32>
    %c0_4 = arith.constant 0 : index
    %c0_5 = arith.constant 0 : index
    %6 = vector.load %arg3[%c0_4, %c0_5] : memref<1x32xf32, #tpu.memory_space<vmem>>, vector<1x32xf32>
    %7 = vector.broadcast %6 : vector<1x32xf32> to vector<8x32xf32>
    %8 = arith.addf %5, %7 : vector<8x32xf32>
    %c0_6 = arith.constant 0 : index
    %c0_7 = arith.constant 0 : index
    %9 = vector.load %arg4[%c0_6, %c0_7] : memref<8x32xf32, #tpu.memory_space<vmem>>, vector<8x32xf32>
    %10 = arith.addf %8, %9 : vector<8x32xf32>
    %c0_8 = arith.constant 0 : index
    %c0_9 = arith.constant 0 : index
    %c0_10 = arith.constant 0 : index
    %11 = vector.load %arg5[%c0_8, %c0_9, %c0_10] : memref<1x8x32xf32, #tpu.memory_space<vmem>>, vector<1x8x32xf32>
    %12 = vector.shape_cast %11 : vector<1x8x32xf32> to vector<8x32xf32>
    %13 = vector.shape_cast %10 : vector<8x32xf32> to vector<1x8x32xf32>
    tpu.vector_store %arg5[%c0_8, %c0_9, %c0_10], %13 {strides = array<i32>} : memref<1x8x32xf32, #tpu.memory_space<vmem>>, vector<1x8x32xf32>,
    return
  }
  func.func @transform_0(%arg0: i32) -> (i32, i32, i32) {
    %c0_i32 = arith.constant 0 : i32
    %c0_i32_0 = arith.constant 0 : i32
    %c0_i32_1 = arith.constant 0 : i32
    return %arg0, %c0_i32, %c0_i32_0 : i32, i32, i32
  }
  func.func @transform_1(%arg0: i32) -> (i32, i32) {
    %c0_i32 = arith.constant 0 : i32
    %c0_i32_0 = arith.constant 0 : i32
    %c0_i32_1 = arith.constant 0 : i32
    return %c0_i32, %c0_i32_0 : i32, i32
  }
  func.func @transform_2(%arg0: i32) -> (i32, i32) {
    %c0_i32 = arith.constant 0 : i32
    %c0_i32_0 = arith.constant 0 : i32
    %c0_i32_1 = arith.constant 0 : i32
    return %c0_i32, %c0_i32_0 : i32, i32
  }
  func.func @transform_3(%arg0: i32) -> (i32, i32) {
    %c0_i32 = arith.constant 0 : i32
    %c0_i32_0 = arith.constant 0 : i32
    %c0_i32_1 = arith.constant 0 : i32
    return %c0_i32, %c0_i32_0 : i32, i32
  }
  func.func @transform_4(%arg0: i32) -> (i32, i32, i32) {
    %c0_i32 = arith.constant 0 : i32
    %c0_i32_0 = arith.constant 0 : i32
    %c0_i32_1 = arith.constant 0 : i32
    return %arg0, %c0_i32, %c0_i32_0 : i32, i32, i32
  }
}

module attributes {stable_mosaic.version = 11 : i64} {
  func.func @_mha_kernel(%arg0: i32, %arg1: memref<1x8x32xf32, #tpu.memory_space<vmem>>, %arg2: memref<1x8x32xf32, #tpu.memory_space<vmem>>, %arg3: memref<1x8x8xf32, #tpu.memory_space<vmem>>, %arg4: memref<32x32xf32, #tpu.memory_space<vmem>>, %arg5: memref<1x32xf32, #tpu.memory_space<vmem>>, %arg6: memref<32x32xf32, #tpu.memory_space<vmem>>, %arg7: memref<1x32xf32, #tpu.memory_space<vmem>>, %arg8: memref<32x32xf32, #tpu.memory_space<vmem>>, %arg9: memref<1x32xf32, #tpu.memory_space<vmem>>, %arg10: memref<32x32xf32, #tpu.memory_space<vmem>>, %arg11: memref<1x32xf32, #tpu.memory_space<vmem>>, %arg12: memref<1x32xf32, #tpu.memory_space<vmem>>, %arg13: memref<1x32xf32, #tpu.memory_space<vmem>>, %arg14: memref<1x32xf32, #tpu.memory_space<vmem>>, %arg15: memref<1x32xf32, #tpu.memory_space<vmem>>, %arg16: memref<1x8x32xf32, #tpu.memory_space<vmem>>, %arg17: memref<8x32xf32, #tpu.memory_space<vmem>>) attributes {dimension_semantics = [#tpu.dimension_semantics<parallel>], iteration_bounds = array<i64: 2>, scalar_prefetch = 0 : i64, scratch_operands = 1 : i64, tpu.core_type = #tpu.core_type<tc>, window_params = [{transform_indices = @transform_0, window_bounds = array<i64: 1, 8, 32>}, {transform_indices = @transform_1, window_bounds = array<i64: 1, 8, 32>}, {transform_indices = @transform_2, window_bounds = array<i64: 1, 8, 8>}, {pipeline_mode = #tpu.pipeline_mode<synchronous>, transform_indices = @transform_3, window_bounds = array<i64: 32, 32>}, {pipeline_mode = #tpu.pipeline_mode<synchronous>, transform_indices = @transform_4, window_bounds = array<i64: 1, 32>}, {pipeline_mode = #tpu.pipeline_mode<synchronous>, transform_indices = @transform_5, window_bounds = array<i64: 32, 32>}, {pipeline_mode = #tpu.pipeline_mode<synchronous>, transform_indices = @transform_6, window_bounds = array<i64: 1, 32>}, {pipeline_mode = #tpu.pipeline_mode<synchronous>, transform_indices = @transform_7, window_bounds = array<i64: 32, 32>}, {pipeline_mode = #tpu.pipeline_mode<synchronous>, transform_indices = @transform_8, window_bounds = array<i64: 1, 32>}, {pipeline_mode = #tpu.pipeline_mode<synchronous>, transform_indices = @transform_9, window_bounds = array<i64: 32, 32>}, {pipeline_mode = #tpu.pipeline_mode<synchronous>, transform_indices = @transform_10, window_bounds = array<i64: 1, 32>}, {pipeline_mode = #tpu.pipeline_mode<synchronous>, transform_indices = @transform_11, window_bounds = array<i64: 1, 32>}, {pipeline_mode = #tpu.pipeline_mode<synchronous>, transform_indices = @transform_12, window_bounds = array<i64: 1, 32>}, {pipeline_mode = #tpu.pipeline_mode<synchronous>, transform_indices = @transform_13, window_bounds = array<i64: 1, 32>}, {pipeline_mode = #tpu.pipeline_mode<synchronous>, transform_indices = @transform_14, window_bounds = array<i64: 1, 32>}, {transform_indices = @transform_15, window_bounds = array<i64: 1, 8, 32>}]} {
    %c0 = arith.constant 0 : index
    %c0_0 = arith.constant 0 : index
    %c0_1 = arith.constant 0 : index
    %0 = vector.load %arg1[%c0, %c0_0, %c0_1] : memref<1x8x32xf32, #tpu.memory_space<vmem>>, vector<1x8x32xf32>
    %1 = vector.shape_cast %0 : vector<1x8x32xf32> to vector<8x32xf32>
    %c0_2 = arith.constant 0 : index
    %c0_3 = arith.constant 0 : index
    %c0_4 = arith.constant 0 : index
    %2 = vector.load %arg2[%c0_2, %c0_3, %c0_4] : memref<1x8x32xf32, #tpu.memory_space<vmem>>, vector<1x8x32xf32>
    %3 = vector.shape_cast %2 : vector<1x8x32xf32> to vector<8x32xf32>
    %c0_5 = arith.constant 0 : index
    %c0_6 = arith.constant 0 : index
    %c0_7 = arith.constant 0 : index
    %4 = vector.load %arg3[%c0_5, %c0_6, %c0_7] : memref<1x8x8xf32, #tpu.memory_space<vmem>>, vector<1x8x8xf32>
    %5 = vector.shape_cast %4 : vector<1x8x8xf32> to vector<8x8xf32>
    %c0_8 = arith.constant 0 : index
    %c0_9 = arith.constant 0 : index
    %6 = vector.load %arg4[%c0_8, %c0_9] : memref<32x32xf32, #tpu.memory_space<vmem>>, vector<32x32xf32>
    %cst = arith.constant dense<0.000000e+00> : vector<8x32xf32>
    %7 = tpu.matmul %1, %6, %cst {dimension_numbers = #tpu.dot_dimension_numbers<[1], [0], [0], [1], [0, 0, 1, 1], [], []>} : vector<8x32xf32>, vector<32x32xf32>, vector<8x32xf32> -> vector<8x32xf32>
    %c0_10 = arith.constant 0 : index
    %c0_11 = arith.constant 0 : index
    %8 = vector.load %arg5[%c0_10, %c0_11] : memref<1x32xf32, #tpu.memory_space<vmem>>, vector<1x32xf32>
    %9 = vector.broadcast %8 : vector<1x32xf32> to vector<8x32xf32>
    %10 = arith.addf %7, %9 : vector<8x32xf32>
    %c0_12 = arith.constant 0 : index
    %c0_13 = arith.constant 0 : index
    %11 = vector.load %arg6[%c0_12, %c0_13] : memref<32x32xf32, #tpu.memory_space<vmem>>, vector<32x32xf32>
    %cst_14 = arith.constant dense<0.000000e+00> : vector<8x32xf32>
    %12 = tpu.matmul %3, %11, %cst_14 {dimension_numbers = #tpu.dot_dimension_numbers<[1], [0], [0], [1], [0, 0, 1, 1], [], []>} : vector<8x32xf32>, vector<32x32xf32>, vector<8x32xf32> -> vector<8x32xf32>
    %c0_15 = arith.constant 0 : index
    %c0_16 = arith.constant 0 : index
    %13 = vector.load %arg7[%c0_15, %c0_16] : memref<1x32xf32, #tpu.memory_space<vmem>>, vector<1x32xf32>
    %14 = vector.broadcast %13 : vector<1x32xf32> to vector<8x32xf32>
    %15 = arith.addf %12, %14 : vector<8x32xf32>
    %c0_17 = arith.constant 0 : index
    %c0_18 = arith.constant 0 : index
    %16 = vector.load %arg8[%c0_17, %c0_18] : memref<32x32xf32, #tpu.memory_space<vmem>>, vector<32x32xf32>
    %cst_19 = arith.constant dense<0.000000e+00> : vector<8x32xf32>
    %17 = tpu.matmul %3, %16, %cst_19 {dimension_numbers = #tpu.dot_dimension_numbers<[1], [0], [0], [1], [0, 0, 1, 1], [], []>} : vector<8x32xf32>, vector<32x32xf32>, vector<8x32xf32> -> vector<8x32xf32>
    %c0_20 = arith.constant 0 : index
    %c0_21 = arith.constant 0 : index
    %18 = vector.load %arg9[%c0_20, %c0_21] : memref<1x32xf32, #tpu.memory_space<vmem>>, vector<1x32xf32>
    %19 = vector.broadcast %18 : vector<1x32xf32> to vector<8x32xf32>
    %20 = arith.addf %17, %19 : vector<8x32xf32>
    %cst_22 = arith.constant 0.353553385 : f32
    %21 = vector.broadcast %cst_22 : f32 to vector<8x32xf32>
    %22 = arith.mulf %10, %21 : vector<8x32xf32>
    %23 = vector.extract_strided_slice %22 {offsets = [0, 0], sizes = [8, 8], strides = [1, 1]} : vector<8x32xf32> to vector<8x8xf32>
    %24 = vector.extract_strided_slice %15 {offsets = [0, 0], sizes = [8, 8], strides = [1, 1]} : vector<8x32xf32> to vector<8x8xf32>
    %cst_23 = arith.constant dense<0.000000e+00> : vector<8x8xf32>
    %25 = tpu.matmul %23, %24, %cst_23 {dimension_numbers = #tpu.dot_dimension_numbers<[1], [1], [0], [0], [0, 0, 1, 0], [], []>} : vector<8x8xf32>, vector<8x8xf32>, vector<8x8xf32> -> vector<8x8xf32>
    %26 = arith.addf %25, %5 : vector<8x8xf32>
    %cst_24 = arith.constant dense<0xFF800000> : vector<8xf32>
    %27 = vector.multi_reduction <maximumf>, %26, %cst_24 [1] : vector<8x8xf32> to vector<8xf32>
    %28 = vector.shape_cast %27 : vector<8xf32> to vector<8x1xf32>
    %29 = vector.broadcast %28 : vector<8x1xf32> to vector<8x8xf32>
    %30 = arith.subf %26, %29 : vector<8x8xf32>
    %31 = math.exp %30 : vector<8x8xf32>
    %cst_25 = arith.constant dense<0.000000e+00> : vector<8xf32>
    %32 = vector.multi_reduction <add>, %31, %cst_25 [1] : vector<8x8xf32> to vector<8xf32>
    %33 = vector.shape_cast %32 : vector<8xf32> to vector<8x1xf32>
    %34 = vector.broadcast %33 : vector<8x1xf32> to vector<8x8xf32>
    %35 = arith.divf %31, %34 : vector<8x8xf32>
    %36 = vector.extract_strided_slice %20 {offsets = [0, 0], sizes = [8, 8], strides = [1, 1]} : vector<8x32xf32> to vector<8x8xf32>
    %cst_26 = arith.constant dense<0.000000e+00> : vector<8x8xf32>
    %37 = tpu.matmul %35, %36, %cst_26 {dimension_numbers = #tpu.dot_dimension_numbers<[1], [0], [0], [1], [0, 0, 1, 1], [], []>} : vector<8x8xf32>, vector<8x8xf32>, vector<8x8xf32> -> vector<8x8xf32>
    %c0_27 = arith.constant 0 : index
    %c0_28 = arith.constant 0 : index
    %38 = vector.load %arg17[%c0_27, %c0_28] : memref<8x32xf32, #tpu.memory_space<vmem>>, vector<8x8xf32>
    tpu.vector_store %arg17[%c0_27, %c0_28], %37 {strides = array<i32>} : memref<8x32xf32, #tpu.memory_space<vmem>>, vector<8x8xf32>,
    %39 = vector.extract_strided_slice %22 {offsets = [0, 8], sizes = [8, 8], strides = [1, 1]} : vector<8x32xf32> to vector<8x8xf32>
    %40 = vector.extract_strided_slice %15 {offsets = [0, 8], sizes = [8, 8], strides = [1, 1]} : vector<8x32xf32> to vector<8x8xf32>
    %cst_29 = arith.constant dense<0.000000e+00> : vector<8x8xf32>
    %41 = tpu.matmul %39, %40, %cst_29 {dimension_numbers = #tpu.dot_dimension_numbers<[1], [1], [0], [0], [0, 0, 1, 0], [], []>} : vector<8x8xf32>, vector<8x8xf32>, vector<8x8xf32> -> vector<8x8xf32>
    %42 = arith.addf %41, %5 : vector<8x8xf32>
    %cst_30 = arith.constant dense<0xFF800000> : vector<8xf32>
    %43 = vector.multi_reduction <maximumf>, %42, %cst_30 [1] : vector<8x8xf32> to vector<8xf32>
    %44 = vector.shape_cast %43 : vector<8xf32> to vector<8x1xf32>
    %45 = vector.broadcast %44 : vector<8x1xf32> to vector<8x8xf32>
    %46 = arith.subf %42, %45 : vector<8x8xf32>
    %47 = math.exp %46 : vector<8x8xf32>
    %cst_31 = arith.constant dense<0.000000e+00> : vector<8xf32>
    %48 = vector.multi_reduction <add>, %47, %cst_31 [1] : vector<8x8xf32> to vector<8xf32>
    %49 = vector.shape_cast %48 : vector<8xf32> to vector<8x1xf32>
    %50 = vector.broadcast %49 : vector<8x1xf32> to vector<8x8xf32>
    %51 = arith.divf %47, %50 : vector<8x8xf32>
    %52 = vector.extract_strided_slice %20 {offsets = [0, 8], sizes = [8, 8], strides = [1, 1]} : vector<8x32xf32> to vector<8x8xf32>
    %cst_32 = arith.constant dense<0.000000e+00> : vector<8x8xf32>
    %53 = tpu.matmul %51, %52, %cst_32 {dimension_numbers = #tpu.dot_dimension_numbers<[1], [0], [0], [1], [0, 0, 1, 1], [], []>} : vector<8x8xf32>, vector<8x8xf32>, vector<8x8xf32> -> vector<8x8xf32>
    %c0_33 = arith.constant 0 : index
    %c8 = arith.constant 8 : index
    %54 = vector.load %arg17[%c0_33, %c8] : memref<8x32xf32, #tpu.memory_space<vmem>>, vector<8x8xf32>
    tpu.vector_store %arg17[%c0_33, %c8], %53 {strides = array<i32>} : memref<8x32xf32, #tpu.memory_space<vmem>>, vector<8x8xf32>,
    %55 = vector.extract_strided_slice %22 {offsets = [0, 16], sizes = [8, 8], strides = [1, 1]} : vector<8x32xf32> to vector<8x8xf32>
    %56 = vector.extract_strided_slice %15 {offsets = [0, 16], sizes = [8, 8], strides = [1, 1]} : vector<8x32xf32> to vector<8x8xf32>
    %cst_34 = arith.constant dense<0.000000e+00> : vector<8x8xf32>
    %57 = tpu.matmul %55, %56, %cst_34 {dimension_numbers = #tpu.dot_dimension_numbers<[1], [1], [0], [0], [0, 0, 1, 0], [], []>} : vector<8x8xf32>, vector<8x8xf32>, vector<8x8xf32> -> vector<8x8xf32>
    %58 = arith.addf %57, %5 : vector<8x8xf32>
    %cst_35 = arith.constant dense<0xFF800000> : vector<8xf32>
    %59 = vector.multi_reduction <maximumf>, %58, %cst_35 [1] : vector<8x8xf32> to vector<8xf32>
    %60 = vector.shape_cast %59 : vector<8xf32> to vector<8x1xf32>
    %61 = vector.broadcast %60 : vector<8x1xf32> to vector<8x8xf32>
    %62 = arith.subf %58, %61 : vector<8x8xf32>
    %63 = math.exp %62 : vector<8x8xf32>
    %cst_36 = arith.constant dense<0.000000e+00> : vector<8xf32>
    %64 = vector.multi_reduction <add>, %63, %cst_36 [1] : vector<8x8xf32> to vector<8xf32>
    %65 = vector.shape_cast %64 : vector<8xf32> to vector<8x1xf32>
    %66 = vector.broadcast %65 : vector<8x1xf32> to vector<8x8xf32>
    %67 = arith.divf %63, %66 : vector<8x8xf32>
    %68 = vector.extract_strided_slice %20 {offsets = [0, 16], sizes = [8, 8], strides = [1, 1]} : vector<8x32xf32> to vector<8x8xf32>
    %cst_37 = arith.constant dense<0.000000e+00> : vector<8x8xf32>
    %69 = tpu.matmul %67, %68, %cst_37 {dimension_numbers = #tpu.dot_dimension_numbers<[1], [0], [0], [1], [0, 0, 1, 1], [], []>} : vector<8x8xf32>, vector<8x8xf32>, vector<8x8xf32> -> vector<8x8xf32>
    %c0_38 = arith.constant 0 : index
    %c16 = arith.constant 16 : index
    %70 = vector.load %arg17[%c0_38, %c16] : memref<8x32xf32, #tpu.memory_space<vmem>>, vector<8x8xf32>
    tpu.vector_store %arg17[%c0_38, %c16], %69 {strides = array<i32>} : memref<8x32xf32, #tpu.memory_space<vmem>>, vector<8x8xf32>,
    %71 = vector.extract_strided_slice %22 {offsets = [0, 24], sizes = [8, 8], strides = [1, 1]} : vector<8x32xf32> to vector<8x8xf32>
    %72 = vector.extract_strided_slice %15 {offsets = [0, 24], sizes = [8, 8], strides = [1, 1]} : vector<8x32xf32> to vector<8x8xf32>
    %cst_39 = arith.constant dense<0.000000e+00> : vector<8x8xf32>
    %73 = tpu.matmul %71, %72, %cst_39 {dimension_numbers = #tpu.dot_dimension_numbers<[1], [1], [0], [0], [0, 0, 1, 0], [], []>} : vector<8x8xf32>, vector<8x8xf32>, vector<8x8xf32> -> vector<8x8xf32>
    %74 = arith.addf %73, %5 : vector<8x8xf32>
    %cst_40 = arith.constant dense<0xFF800000> : vector<8xf32>
    %75 = vector.multi_reduction <maximumf>, %74, %cst_40 [1] : vector<8x8xf32> to vector<8xf32>
    %76 = vector.shape_cast %75 : vector<8xf32> to vector<8x1xf32>
    %77 = vector.broadcast %76 : vector<8x1xf32> to vector<8x8xf32>
    %78 = arith.subf %74, %77 : vector<8x8xf32>
    %79 = math.exp %78 : vector<8x8xf32>
    %cst_41 = arith.constant dense<0.000000e+00> : vector<8xf32>
    %80 = vector.multi_reduction <add>, %79, %cst_41 [1] : vector<8x8xf32> to vector<8xf32>
    %81 = vector.shape_cast %80 : vector<8xf32> to vector<8x1xf32>
    %82 = vector.broadcast %81 : vector<8x1xf32> to vector<8x8xf32>
    %83 = arith.divf %79, %82 : vector<8x8xf32>
    %84 = vector.extract_strided_slice %20 {offsets = [0, 24], sizes = [8, 8], strides = [1, 1]} : vector<8x32xf32> to vector<8x8xf32>
    %cst_42 = arith.constant dense<0.000000e+00> : vector<8x8xf32>
    %85 = tpu.matmul %83, %84, %cst_42 {dimension_numbers = #tpu.dot_dimension_numbers<[1], [0], [0], [1], [0, 0, 1, 1], [], []>} : vector<8x8xf32>, vector<8x8xf32>, vector<8x8xf32> -> vector<8x8xf32>
    %c0_43 = arith.constant 0 : index
    %c24 = arith.constant 24 : index
    %86 = vector.load %arg17[%c0_43, %c24] : memref<8x32xf32, #tpu.memory_space<vmem>>, vector<8x8xf32>
    tpu.vector_store %arg17[%c0_43, %c24], %85 {strides = array<i32>} : memref<8x32xf32, #tpu.memory_space<vmem>>, vector<8x8xf32>,
    %c0_44 = arith.constant 0 : index
    %c0_45 = arith.constant 0 : index
    %87 = vector.load %arg17[%c0_44, %c0_45] : memref<8x32xf32, #tpu.memory_space<vmem>>, vector<8x32xf32>
    %c0_46 = arith.constant 0 : index
    %c0_47 = arith.constant 0 : index
    %88 = vector.load %arg10[%c0_46, %c0_47] : memref<32x32xf32, #tpu.memory_space<vmem>>, vector<32x32xf32>
    %cst_48 = arith.constant dense<0.000000e+00> : vector<8x32xf32>
    %89 = tpu.matmul %87, %88, %cst_48 {dimension_numbers = #tpu.dot_dimension_numbers<[1], [0], [0], [1], [0, 0, 1, 1], [], []>} : vector<8x32xf32>, vector<32x32xf32>, vector<8x32xf32> -> vector<8x32xf32>
    %c0_49 = arith.constant 0 : index
    %c0_50 = arith.constant 0 : index
    %90 = vector.load %arg11[%c0_49, %c0_50] : memref<1x32xf32, #tpu.memory_space<vmem>>, vector<1x32xf32>
    %91 = vector.broadcast %90 : vector<1x32xf32> to vector<8x32xf32>
    %92 = arith.addf %89, %91 : vector<8x32xf32>
    %93 = arith.addf %92, %1 : vector<8x32xf32>
    %c0_51 = arith.constant 0 : index
    %c0_52 = arith.constant 0 : index
    %94 = vector.load %arg12[%c0_51, %c0_52] : memref<1x32xf32, #tpu.memory_space<vmem>>, vector<1x32xf32>
    %c0_53 = arith.constant 0 : index
    %c0_54 = arith.constant 0 : index
    %95 = vector.load %arg13[%c0_53, %c0_54] : memref<1x32xf32, #tpu.memory_space<vmem>>, vector<1x32xf32>
    %cst_55 = arith.constant dense<0.000000e+00> : vector<8xf32>
    %96 = vector.multi_reduction <add>, %93, %cst_55 [1] : vector<8x32xf32> to vector<8xf32>
    %97 = vector.shape_cast %96 : vector<8xf32> to vector<8x1xf32>
    %cst_56 = arith.constant 3.125000e-02 : f32
    %98 = vector.broadcast %cst_56 : f32 to vector<8x1xf32>
    %99 = arith.mulf %97, %98 : vector<8x1xf32>
    %100 = vector.broadcast %99 : vector<8x1xf32> to vector<8x32xf32>
    %101 = arith.subf %93, %100 : vector<8x32xf32>
    %102 = arith.mulf %101, %101 : vector<8x32xf32>
    %cst_57 = arith.constant dense<0.000000e+00> : vector<8xf32>
    %103 = vector.multi_reduction <add>, %102, %cst_57 [1] : vector<8x32xf32> to vector<8xf32>
    %104 = vector.shape_cast %103 : vector<8xf32> to vector<8x1xf32>
    %cst_58 = arith.constant 3.125000e-02 : f32
    %105 = vector.broadcast %cst_58 : f32 to vector<8x1xf32>
    %106 = arith.mulf %104, %105 : vector<8x1xf32>
    %cst_59 = arith.constant 9.99999974E-6 : f32
    %107 = vector.broadcast %cst_59 : f32 to vector<8x1xf32>
    %108 = arith.addf %106, %107 : vector<8x1xf32>
    %109 = math.rsqrt %108 : vector<8x1xf32>
    %110 = vector.broadcast %109 : vector<8x1xf32> to vector<8x32xf32>
    %111 = arith.mulf %101, %110 : vector<8x32xf32>
    %112 = vector.broadcast %94 : vector<1x32xf32> to vector<8x32xf32>
    %113 = arith.mulf %111, %112 : vector<8x32xf32>
    %114 = vector.broadcast %95 : vector<1x32xf32> to vector<8x32xf32>
    %115 = arith.addf %113, %114 : vector<8x32xf32>
    %116 = arith.addf %1, %115 : vector<8x32xf32>
    %c0_60 = arith.constant 0 : index
    %c0_61 = arith.constant 0 : index
    %117 = vector.load %arg14[%c0_60, %c0_61] : memref<1x32xf32, #tpu.memory_space<vmem>>, vector<1x32xf32>
    %c0_62 = arith.constant 0 : index
    %c0_63 = arith.constant 0 : index
    %118 = vector.load %arg15[%c0_62, %c0_63] : memref<1x32xf32, #tpu.memory_space<vmem>>, vector<1x32xf32>
    %cst_64 = arith.constant dense<0.000000e+00> : vector<8xf32>
    %119 = vector.multi_reduction <add>, %116, %cst_64 [1] : vector<8x32xf32> to vector<8xf32>
    %120 = vector.shape_cast %119 : vector<8xf32> to vector<8x1xf32>
    %cst_65 = arith.constant 3.125000e-02 : f32
    %121 = vector.broadcast %cst_65 : f32 to vector<8x1xf32>
    %122 = arith.mulf %120, %121 : vector<8x1xf32>
    %123 = vector.broadcast %122 : vector<8x1xf32> to vector<8x32xf32>
    %124 = arith.subf %116, %123 : vector<8x32xf32>
    %125 = arith.mulf %124, %124 : vector<8x32xf32>
    %cst_66 = arith.constant dense<0.000000e+00> : vector<8xf32>
    %126 = vector.multi_reduction <add>, %125, %cst_66 [1] : vector<8x32xf32> to vector<8xf32>
    %127 = vector.shape_cast %126 : vector<8xf32> to vector<8x1xf32>
    %cst_67 = arith.constant 3.125000e-02 : f32
    %128 = vector.broadcast %cst_67 : f32 to vector<8x1xf32>
    %129 = arith.mulf %127, %128 : vector<8x1xf32>
    %cst_68 = arith.constant 9.99999974E-6 : f32
    %130 = vector.broadcast %cst_68 : f32 to vector<8x1xf32>
    %131 = arith.addf %129, %130 : vector<8x1xf32>
    %132 = math.rsqrt %131 : vector<8x1xf32>
    %133 = vector.broadcast %132 : vector<8x1xf32> to vector<8x32xf32>
    %134 = arith.mulf %124, %133 : vector<8x32xf32>
    %135 = vector.broadcast %117 : vector<1x32xf32> to vector<8x32xf32>
    %136 = arith.mulf %134, %135 : vector<8x32xf32>
    %137 = vector.broadcast %118 : vector<1x32xf32> to vector<8x32xf32>
    %138 = arith.addf %136, %137 : vector<8x32xf32>
    %c0_69 = arith.constant 0 : index
    %c0_70 = arith.constant 0 : index
    %c0_71 = arith.constant 0 : index
    %139 = vector.load %arg16[%c0_69, %c0_70, %c0_71] : memref<1x8x32xf32, #tpu.memory_space<vmem>>, vector<1x8x32xf32>
    %140 = vector.shape_cast %139 : vector<1x8x32xf32> to vector<8x32xf32>
    %141 = vector.shape_cast %138 : vector<8x32xf32> to vector<1x8x32xf32>
    tpu.vector_store %arg16[%c0_69, %c0_70, %c0_71], %141 {strides = array<i32>} : memref<1x8x32xf32, #tpu.memory_space<vmem>>, vector<1x8x32xf32>,
    return
  }
  func.func @transform_0(%arg0: i32) -> (i32, i32, i32) {
    %c0_i32 = arith.constant 0 : i32
    %c0_i32_0 = arith.constant 0 : i32
    %c0_i32_1 = arith.constant 0 : i32
    return %arg0, %c0_i32, %c0_i32_0 : i32, i32, i32
  }
  func.func @transform_1(%arg0: i32) -> (i32, i32, i32) {
    %c0_i32 = arith.constant 0 : i32
    %c0_i32_0 = arith.constant 0 : i32
    %c0_i32_1 = arith.constant 0 : i32
    return %arg0, %c0_i32, %c0_i32_0 : i32, i32, i32
  }
  func.func @transform_2(%arg0: i32) -> (i32, i32, i32) {
    %c0_i32 = arith.constant 0 : i32
    %c0_i32_0 = arith.constant 0 : i32
    %c0_i32_1 = arith.constant 0 : i32
    return %arg0, %c0_i32, %c0_i32_0 : i32, i32, i32
  }
  func.func @transform_3(%arg0: i32) -> (i32, i32) {
    %c0_i32 = arith.constant 0 : i32
    %c0_i32_0 = arith.constant 0 : i32
    %c0_i32_1 = arith.constant 0 : i32
    return %c0_i32, %c0_i32_0 : i32, i32
  }
  func.func @transform_4(%arg0: i32) -> (i32, i32) {
    %c0_i32 = arith.constant 0 : i32
    %c0_i32_0 = arith.constant 0 : i32
    %c0_i32_1 = arith.constant 0 : i32
    return %c0_i32, %c0_i32_0 : i32, i32
  }
  func.func @transform_5(%arg0: i32) -> (i32, i32) {
    %c0_i32 = arith.constant 0 : i32
    %c0_i32_0 = arith.constant 0 : i32
    %c0_i32_1 = arith.constant 0 : i32
    return %c0_i32, %c0_i32_0 : i32, i32
  }
  func.func @transform_6(%arg0: i32) -> (i32, i32) {
    %c0_i32 = arith.constant 0 : i32
    %c0_i32_0 = arith.constant 0 : i32
    %c0_i32_1 = arith.constant 0 : i32
    return %c0_i32, %c0_i32_0 : i32, i32
  }
  func.func @transform_7(%arg0: i32) -> (i32, i32) {
    %c0_i32 = arith.constant 0 : i32
    %c0_i32_0 = arith.constant 0 : i32
    %c0_i32_1 = arith.constant 0 : i32
    return %c0_i32, %c0_i32_0 : i32, i32
  }
  func.func @transform_8(%arg0: i32) -> (i32, i32) {
    %c0_i32 = arith.constant 0 : i32
    %c0_i32_0 = arith.constant 0 : i32
    %c0_i32_1 = arith.constant 0 : i32
    return %c0_i32, %c0_i32_0 : i32, i32
  }
  func.func @transform_9(%arg0: i32) -> (i32, i32) {
    %c0_i32 = arith.constant 0 : i32
    %c0_i32_0 = arith.constant 0 : i32
    %c0_i32_1 = arith.constant 0 : i32
    return %c0_i32, %c0_i32_0 : i32, i32
  }
  func.func @transform_10(%arg0: i32) -> (i32, i32) {
    %c0_i32 = arith.constant 0 : i32
    %c0_i32_0 = arith.constant 0 : i32
    %c0_i32_1 = arith.constant 0 : i32
    return %c0_i32, %c0_i32_0 : i32, i32
  }
  func.func @transform_11(%arg0: i32) -> (i32, i32) {
    %c0_i32 = arith.constant 0 : i32
    %c0_i32_0 = arith.constant 0 : i32
    %c0_i32_1 = arith.constant 0 : i32
    return %c0_i32, %c0_i32_0 : i32, i32
  }
  func.func @transform_12(%arg0: i32) -> (i32, i32) {
    %c0_i32 = arith.constant 0 : i32
    %c0_i32_0 = arith.constant 0 : i32
    %c0_i32_1 = arith.constant 0 : i32
    return %c0_i32, %c0_i32_0 : i32, i32
  }
  func.func @transform_13(%arg0: i32) -> (i32, i32) {
    %c0_i32 = arith.constant 0 : i32
    %c0_i32_0 = arith.constant 0 : i32
    %c0_i32_1 = arith.constant 0 : i32
    return %c0_i32, %c0_i32_0 : i32, i32
  }
  func.func @transform_14(%arg0: i32) -> (i32, i32) {
    %c0_i32 = arith.constant 0 : i32
    %c0_i32_0 = arith.constant 0 : i32
    %c0_i32_1 = arith.constant 0 : i32
    return %c0_i32, %c0_i32_0 : i32, i32
  }
  func.func @transform_15(%arg0: i32) -> (i32, i32, i32) {
    %c0_i32 = arith.constant 0 : i32
    %c0_i32_0 = arith.constant 0 : i32
    %c0_i32_1 = arith.constant 0 : i32
    return %arg0, %c0_i32, %c0_i32_0 : i32, i32, i32
  }
}

module attributes {stable_mosaic.version = 11 : i64} {
  func.func @_mha_kernel(%arg0: i32, %arg1: memref<1x8x32xf32, #tpu.memory_space<vmem>>, %arg2: memref<1x12x32xf32, #tpu.memory_space<vmem>>, %arg3: memref<1x8x12xf32, #tpu.memory_space<vmem>>, %arg4: memref<32x32xf32, #tpu.memory_space<vmem>>, %arg5: memref<1x32xf32, #tpu.memory_space<vmem>>, %arg6: memref<32x32xf32, #tpu.memory_space<vmem>>, %arg7: memref<1x32xf32, #tpu.memory_space<vmem>>, %arg8: memref<32x32xf32, #tpu.memory_space<vmem>>, %arg9: memref<1x32xf32, #tpu.memory_space<vmem>>, %arg10: memref<32x32xf32, #tpu.memory_space<vmem>>, %arg11: memref<1x32xf32, #tpu.memory_space<vmem>>, %arg12: memref<1x32xf32, #tpu.memory_space<vmem>>, %arg13: memref<1x32xf32, #tpu.memory_space<vmem>>, %arg14: memref<1x32xf32, #tpu.memory_space<vmem>>, %arg15: memref<1x32xf32, #tpu.memory_space<vmem>>, %arg16: memref<1x8x32xf32, #tpu.memory_space<vmem>>, %arg17: memref<8x32xf32, #tpu.memory_space<vmem>>) attributes {dimension_semantics = [#tpu.dimension_semantics<parallel>], iteration_bounds = array<i64: 2>, scalar_prefetch = 0 : i64, scratch_operands = 1 : i64, tpu.core_type = #tpu.core_type<tc>, window_params = [{transform_indices = @transform_0, window_bounds = array<i64: 1, 8, 32>}, {transform_indices = @transform_1, window_bounds = array<i64: 1, 12, 32>}, {transform_indices = @transform_2, window_bounds = array<i64: 1, 8, 12>}, {pipeline_mode = #tpu.pipeline_mode<synchronous>, transform_indices = @transform_3, window_bounds = array<i64: 32, 32>}, {pipeline_mode = #tpu.pipeline_mode<synchronous>, transform_indices = @transform_4, window_bounds = array<i64: 1, 32>}, {pipeline_mode = #tpu.pipeline_mode<synchronous>, transform_indices = @transform_5, window_bounds = array<i64: 32, 32>}, {pipeline_mode = #tpu.pipeline_mode<synchronous>, transform_indices = @transform_6, window_bounds = array<i64: 1, 32>}, {pipeline_mode = #tpu.pipeline_mode<synchronous>, transform_indices = @transform_7, window_bounds = array<i64: 32, 32>}, {pipeline_mode = #tpu.pipeline_mode<synchronous>, transform_indices = @transform_8, window_bounds = array<i64: 1, 32>}, {pipeline_mode = #tpu.pipeline_mode<synchronous>, transform_indices = @transform_9, window_bounds = array<i64: 32, 32>}, {pipeline_mode = #tpu.pipeline_mode<synchronous>, transform_indices = @transform_10, window_bounds = array<i64: 1, 32>}, {pipeline_mode = #tpu.pipeline_mode<synchronous>, transform_indices = @transform_11, window_bounds = array<i64: 1, 32>}, {pipeline_mode = #tpu.pipeline_mode<synchronous>, transform_indices = @transform_12, window_bounds = array<i64: 1, 32>}, {pipeline_mode = #tpu.pipeline_mode<synchronous>, transform_indices = @transform_13, window_bounds = array<i64: 1, 32>}, {pipeline_mode = #tpu.pipeline_mode<synchronous>, transform_indices = @transform_14, window_bounds = array<i64: 1, 32>}, {transform_indices = @transform_15, window_bounds = array<i64: 1, 8, 32>}]} {
    %c0 = arith.constant 0 : index
    %c0_0 = arith.constant 0 : index
    %c0_1 = arith.constant 0 : index
    %0 = vector.load %arg1[%c0, %c0_0, %c0_1] : memref<1x8x32xf32, #tpu.memory_space<vmem>>, vector<1x8x32xf32>
    %1 = vector.shape_cast %0 : vector<1x8x32xf32> to vector<8x32xf32>
    %c0_2 = arith.constant 0 : index
    %c0_3 = arith.constant 0 : index
    %c0_4 = arith.constant 0 : index
    %2 = vector.load %arg2[%c0_2, %c0_3, %c0_4] : memref<1x12x32xf32, #tpu.memory_space<vmem>>, vector<1x12x32xf32>
    %3 = vector.shape_cast %2 : vector<1x12x32xf32> to vector<12x32xf32>
    %c0_5 = arith.constant 0 : index
    %c0_6 = arith.constant 0 : index
    %c0_7 = arith.constant 0 : index
    %4 = vector.load %arg3[%c0_5, %c0_6, %c0_7] : memref<1x8x12xf32, #tpu.memory_space<vmem>>, vector<1x8x12xf32>
    %5 = vector.shape_cast %4 : vector<1x8x12xf32> to vector<8x12xf32>
    %c0_8 = arith.constant 0 : index
    %c0_9 = arith.constant 0 : index
    %6 = vector.load %arg4[%c0_8, %c0_9] : memref<32x32xf32, #tpu.memory_space<vmem>>, vector<32x32xf32>
    %cst = arith.constant dense<0.000000e+00> : vector<8x32xf32>
    %7 = tpu.matmul %1, %6, %cst {dimension_numbers = #tpu.dot_dimension_numbers<[1], [0], [0], [1], [0, 0, 1, 1], [], []>} : vector<8x32xf32>, vector<32x32xf32>, vector<8x32xf32> -> vector<8x32xf32>
    %c0_10 = arith.constant 0 : index
    %c0_11 = arith.constant 0 : index
    %8 = vector.load %arg5[%c0_10, %c0_11] : memref<1x32xf32, #tpu.memory_space<vmem>>, vector<1x32xf32>
    %9 = vector.broadcast %8 : vector<1x32xf32> to vector<8x32xf32>
    %10 = arith.addf %7, %9 : vector<8x32xf32>
    %c0_12 = arith.constant 0 : index
    %c0_13 = arith.constant 0 : index
    %11 = vector.load %arg6[%c0_12, %c0_13] : memref<32x32xf32, #tpu.memory_space<vmem>>, vector<32x32xf32>
    %cst_14 = arith.constant dense<0.000000e+00> : vector<12x32xf32>
    %12 = tpu.matmul %3, %11, %cst_14 {dimension_numbers = #tpu.dot_dimension_numbers<[1], [0], [0], [1], [0, 0, 1, 1], [], []>} : vector<12x32xf32>, vector<32x32xf32>, vector<12x32xf32> -> vector<12x32xf32>
    %c0_15 = arith.constant 0 : index
    %c0_16 = arith.constant 0 : index
    %13 = vector.load %arg7[%c0_15, %c0_16] : memref<1x32xf32, #tpu.memory_space<vmem>>, vector<1x32xf32>
    %14 = vector.broadcast %13 : vector<1x32xf32> to vector<12x32xf32>
    %15 = arith.addf %12, %14 : vector<12x32xf32>
    %c0_17 = arith.constant 0 : index
    %c0_18 = arith.constant 0 : index
    %16 = vector.load %arg8[%c0_17, %c0_18] : memref<32x32xf32, #tpu.memory_space<vmem>>, vector<32x32xf32>
    %cst_19 = arith.constant dense<0.000000e+00> : vector<12x32xf32>
    %17 = tpu.matmul %3, %16, %cst_19 {dimension_numbers = #tpu.dot_dimension_numbers<[1], [0], [0], [1], [0, 0, 1, 1], [], []>} : vector<12x32xf32>, vector<32x32xf32>, vector<12x32xf32> -> vector<12x32xf32>
    %c0_20 = arith.constant 0 : index
    %c0_21 = arith.constant 0 : index
    %18 = vector.load %arg9[%c0_20, %c0_21] : memref<1x32xf32, #tpu.memory_space<vmem>>, vector<1x32xf32>
    %19 = vector.broadcast %18 : vector<1x32xf32> to vector<12x32xf32>
    %20 = arith.addf %17, %19 : vector<12x32xf32>
    %cst_22 = arith.constant 0.353553385 : f32
    %21 = vector.broadcast %cst_22 : f32 to vector<8x32xf32>
    %22 = arith.mulf %10, %21 : vector<8x32xf32>
    %23 = vector.extract_strided_slice %22 {offsets = [0, 0], sizes = [8, 8], strides = [1, 1]} : vector<8x32xf32> to vector<8x8xf32>
    %24 = vector.extract_strided_slice %15 {offsets = [0, 0], sizes = [12, 8], strides = [1, 1]} : vector<12x32xf32> to vector<12x8xf32>
    %cst_23 = arith.constant dense<0.000000e+00> : vector<8x12xf32>
    %25 = tpu.matmul %23, %24, %cst_23 {dimension_numbers = #tpu.dot_dimension_numbers<[1], [1], [0], [0], [0, 0, 1, 0], [], []>} : vector<8x8xf32>, vector<12x8xf32>, vector<8x12xf32> -> vector<8x12xf32>
    %26 = arith.addf %25, %5 : vector<8x12xf32>
    %cst_24 = arith.constant dense<0xFF800000> : vector<8xf32>
    %27 = vector.multi_reduction <maximumf>, %26, %cst_24 [1] : vector<8x12xf32> to vector<8xf32>
    %28 = vector.shape_cast %27 : vector<8xf32> to vector<8x1xf32>
    %29 = vector.broadcast %28 : vector<8x1xf32> to vector<8x12xf32>
    %30 = arith.subf %26, %29 : vector<8x12xf32>
    %31 = math.exp %30 : vector<8x12xf32>
    %cst_25 = arith.constant dense<0.000000e+00> : vector<8xf32>
    %32 = vector.multi_reduction <add>, %31, %cst_25 [1] : vector<8x12xf32> to vector<8xf32>
    %33 = vector.shape_cast %32 : vector<8xf32> to vector<8x1xf32>
    %34 = vector.broadcast %33 : vector<8x1xf32> to vector<8x12xf32>
    %35 = arith.divf %31, %34 : vector<8x12xf32>
    %36 = vector.extract_strided_slice %20 {offsets = [0, 0], sizes = [12, 8], strides = [1, 1]} : vector<12x32xf32> to vector<12x8xf32>
    %cst_26 = arith.constant dense<0.000000e+00> : vector<8x8xf32>
    %37 = tpu.matmul %35, %36, %cst_26 {dimension_numbers = #tpu.dot_dimension_numbers<[1], [0], [0], [1], [0, 0, 1, 1], [], []>} : vector<8x12xf32>, vector<12x8xf32>, vector<8x8xf32> -> vector<8x8xf32>
    %c0_27 = arith.constant 0 : index
    %c0_28 = arith.constant 0 : index
    %38 = vector.load %arg17[%c0_27, %c0_28] : memref<8x32xf32, #tpu.memory_space<vmem>>, vector<8x8xf32>
    tpu.vector_store %arg17[%c0_27, %c0_28], %37 {strides = array<i32>} : memref<8x32xf32, #tpu.memory_space<vmem>>, vector<8x8xf32>,
    %39 = vector.extract_strided_slice %22 {offsets = [0, 8], sizes = [8, 8], strides = [1, 1]} : vector<8x32xf32> to vector<8x8xf32>
    %40 = vector.extract_strided_slice %15 {offsets = [0, 8], sizes = [12, 8], strides = [1, 1]} : vector<12x32xf32> to vector<12x8xf32>
    %cst_29 = arith.constant dense<0.000000e+00> : vector<8x12xf32>
    %41 = tpu.matmul %39, %40, %cst_29 {dimension_numbers = #tpu.dot_dimension_numbers<[1], [1], [0], [0], [0, 0, 1, 0], [], []>} : vector<8x8xf32>, vector<12x8xf32>, vector<8x12xf32> -> vector<8x12xf32>
    %42 = arith.addf %41, %5 : vector<8x12xf32>
    %cst_30 = arith.constant dense<0xFF800000> : vector<8xf32>
    %43 = vector.multi_reduction <maximumf>, %42, %cst_30 [1] : vector<8x12xf32> to vector<8xf32>
    %44 = vector.shape_cast %43 : vector<8xf32> to vector<8x1xf32>
    %45 = vector.broadcast %44 : vector<8x1xf32> to vector<8x12xf32>
    %46 = arith.subf %42, %45 : vector<8x12xf32>
    %47 = math.exp %46 : vector<8x12xf32>
    %cst_31 = arith.constant dense<0.000000e+00> : vector<8xf32>
    %48 = vector.multi_reduction <add>, %47, %cst_31 [1] : vector<8x12xf32> to vector<8xf32>
    %49 = vector.shape_cast %48 : vector<8xf32> to vector<8x1xf32>
    %50 = vector.broadcast %49 : vector<8x1xf32> to vector<8x12xf32>
    %51 = arith.divf %47, %50 : vector<8x12xf32>
    %52 = vector.extract_strided_slice %20 {offsets = [0, 8], sizes = [12, 8], strides = [1, 1]} : vector<12x32xf32> to vector<12x8xf32>
    %cst_32 = arith.constant dense<0.000000e+00> : vector<8x8xf32>
    %53 = tpu.matmul %51, %52, %cst_32 {dimension_numbers = #tpu.dot_dimension_numbers<[1], [0], [0], [1], [0, 0, 1, 1], [], []>} : vector<8x12xf32>, vector<12x8xf32>, vector<8x8xf32> -> vector<8x8xf32>
    %c0_33 = arith.constant 0 : index
    %c8 = arith.constant 8 : index
    %54 = vector.load %arg17[%c0_33, %c8] : memref<8x32xf32, #tpu.memory_space<vmem>>, vector<8x8xf32>
    tpu.vector_store %arg17[%c0_33, %c8], %53 {strides = array<i32>} : memref<8x32xf32, #tpu.memory_space<vmem>>, vector<8x8xf32>,
    %55 = vector.extract_strided_slice %22 {offsets = [0, 16], sizes = [8, 8], strides = [1, 1]} : vector<8x32xf32> to vector<8x8xf32>
    %56 = vector.extract_strided_slice %15 {offsets = [0, 16], sizes = [12, 8], strides = [1, 1]} : vector<12x32xf32> to vector<12x8xf32>
    %cst_34 = arith.constant dense<0.000000e+00> : vector<8x12xf32>
    %57 = tpu.matmul %55, %56, %cst_34 {dimension_numbers = #tpu.dot_dimension_numbers<[1], [1], [0], [0], [0, 0, 1, 0], [], []>} : vector<8x8xf32>, vector<12x8xf32>, vector<8x12xf32> -> vector<8x12xf32>
    %58 = arith.addf %57, %5 : vector<8x12xf32>
    %cst_35 = arith.constant dense<0xFF800000> : vector<8xf32>
    %59 = vector.multi_reduction <maximumf>, %58, %cst_35 [1] : vector<8x12xf32> to vector<8xf32>
    %60 = vector.shape_cast %59 : vector<8xf32> to vector<8x1xf32>
    %61 = vector.broadcast %60 : vector<8x1xf32> to vector<8x12xf32>
    %62 = arith.subf %58, %61 : vector<8x12xf32>
    %63 = math.exp %62 : vector<8x12xf32>
    %cst_36 = arith.constant dense<0.000000e+00> : vector<8xf32>
    %64 = vector.multi_reduction <add>, %63, %cst_36 [1] : vector<8x12xf32> to vector<8xf32>
    %65 = vector.shape_cast %64 : vector<8xf32> to vector<8x1xf32>
    %66 = vector.broadcast %65 : vector<8x1xf32> to vector<8x12xf32>
    %67 = arith.divf %63, %66 : vector<8x12xf32>
    %68 = vector.extract_strided_slice %20 {offsets = [0, 16], sizes = [12, 8], strides = [1, 1]} : vector<12x32xf32> to vector<12x8xf32>
    %cst_37 = arith.constant dense<0.000000e+00> : vector<8x8xf32>
    %69 = tpu.matmul %67, %68, %cst_37 {dimension_numbers = #tpu.dot_dimension_numbers<[1], [0], [0], [1], [0, 0, 1, 1], [], []>} : vector<8x12xf32>, vector<12x8xf32>, vector<8x8xf32> -> vector<8x8xf32>
    %c0_38 = arith.constant 0 : index
    %c16 = arith.constant 16 : index
    %70 = vector.load %arg17[%c0_38, %c16] : memref<8x32xf32, #tpu.memory_space<vmem>>, vector<8x8xf32>
    tpu.vector_store %arg17[%c0_38, %c16], %69 {strides = array<i32>} : memref<8x32xf32, #tpu.memory_space<vmem>>, vector<8x8xf32>,
    %71 = vector.extract_strided_slice %22 {offsets = [0, 24], sizes = [8, 8], strides = [1, 1]} : vector<8x32xf32> to vector<8x8xf32>
    %72 = vector.extract_strided_slice %15 {offsets = [0, 24], sizes = [12, 8], strides = [1, 1]} : vector<12x32xf32> to vector<12x8xf32>
    %cst_39 = arith.constant dense<0.000000e+00> : vector<8x12xf32>
    %73 = tpu.matmul %71, %72, %cst_39 {dimension_numbers = #tpu.dot_dimension_numbers<[1], [1], [0], [0], [0, 0, 1, 0], [], []>} : vector<8x8xf32>, vector<12x8xf32>, vector<8x12xf32> -> vector<8x12xf32>
    %74 = arith.addf %73, %5 : vector<8x12xf32>
    %cst_40 = arith.constant dense<0xFF800000> : vector<8xf32>
    %75 = vector.multi_reduction <maximumf>, %74, %cst_40 [1] : vector<8x12xf32> to vector<8xf32>
    %76 = vector.shape_cast %75 : vector<8xf32> to vector<8x1xf32>
    %77 = vector.broadcast %76 : vector<8x1xf32> to vector<8x12xf32>
    %78 = arith.subf %74, %77 : vector<8x12xf32>
    %79 = math.exp %78 : vector<8x12xf32>
    %cst_41 = arith.constant dense<0.000000e+00> : vector<8xf32>
    %80 = vector.multi_reduction <add>, %79, %cst_41 [1] : vector<8x12xf32> to vector<8xf32>
    %81 = vector.shape_cast %80 : vector<8xf32> to vector<8x1xf32>
    %82 = vector.broadcast %81 : vector<8x1xf32> to vector<8x12xf32>
    %83 = arith.divf %79, %82 : vector<8x12xf32>
    %84 = vector.extract_strided_slice %20 {offsets = [0, 24], sizes = [12, 8], strides = [1, 1]} : vector<12x32xf32> to vector<12x8xf32>
    %cst_42 = arith.constant dense<0.000000e+00> : vector<8x8xf32>
    %85 = tpu.matmul %83, %84, %cst_42 {dimension_numbers = #tpu.dot_dimension_numbers<[1], [0], [0], [1], [0, 0, 1, 1], [], []>} : vector<8x12xf32>, vector<12x8xf32>, vector<8x8xf32> -> vector<8x8xf32>
    %c0_43 = arith.constant 0 : index
    %c24 = arith.constant 24 : index
    %86 = vector.load %arg17[%c0_43, %c24] : memref<8x32xf32, #tpu.memory_space<vmem>>, vector<8x8xf32>
    tpu.vector_store %arg17[%c0_43, %c24], %85 {strides = array<i32>} : memref<8x32xf32, #tpu.memory_space<vmem>>, vector<8x8xf32>,
    %c0_44 = arith.constant 0 : index
    %c0_45 = arith.constant 0 : index
    %87 = vector.load %arg17[%c0_44, %c0_45] : memref<8x32xf32, #tpu.memory_space<vmem>>, vector<8x32xf32>
    %c0_46 = arith.constant 0 : index
    %c0_47 = arith.constant 0 : index
    %88 = vector.load %arg10[%c0_46, %c0_47] : memref<32x32xf32, #tpu.memory_space<vmem>>, vector<32x32xf32>
    %cst_48 = arith.constant dense<0.000000e+00> : vector<8x32xf32>
    %89 = tpu.matmul %87, %88, %cst_48 {dimension_numbers = #tpu.dot_dimension_numbers<[1], [0], [0], [1], [0, 0, 1, 1], [], []>} : vector<8x32xf32>, vector<32x32xf32>, vector<8x32xf32> -> vector<8x32xf32>
    %c0_49 = arith.constant 0 : index
    %c0_50 = arith.constant 0 : index
    %90 = vector.load %arg11[%c0_49, %c0_50] : memref<1x32xf32, #tpu.memory_space<vmem>>, vector<1x32xf32>
    %91 = vector.broadcast %90 : vector<1x32xf32> to vector<8x32xf32>
    %92 = arith.addf %89, %91 : vector<8x32xf32>
    %93 = arith.addf %92, %1 : vector<8x32xf32>
    %c0_51 = arith.constant 0 : index
    %c0_52 = arith.constant 0 : index
    %94 = vector.load %arg12[%c0_51, %c0_52] : memref<1x32xf32, #tpu.memory_space<vmem>>, vector<1x32xf32>
    %c0_53 = arith.constant 0 : index
    %c0_54 = arith.constant 0 : index
    %95 = vector.load %arg13[%c0_53, %c0_54] : memref<1x32xf32, #tpu.memory_space<vmem>>, vector<1x32xf32>
    %cst_55 = arith.constant dense<0.000000e+00> : vector<8xf32>
    %96 = vector.multi_reduction <add>, %93, %cst_55 [1] : vector<8x32xf32> to vector<8xf32>
    %97 = vector.shape_cast %96 : vector<8xf32> to vector<8x1xf32>
    %cst_56 = arith.constant 3.125000e-02 : f32
    %98 = vector.broadcast %cst_56 : f32 to vector<8x1xf32>
    %99 = arith.mulf %97, %98 : vector<8x1xf32>
    %100 = vector.broadcast %99 : vector<8x1xf32> to vector<8x32xf32>
    %101 = arith.subf %93, %100 : vector<8x32xf32>
    %102 = arith.mulf %101, %101 : vector<8x32xf32>
    %cst_57 = arith.constant dense<0.000000e+00> : vector<8xf32>
    %103 = vector.multi_reduction <add>, %102, %cst_57 [1] : vector<8x32xf32> to vector<8xf32>
    %104 = vector.shape_cast %103 : vector<8xf32> to vector<8x1xf32>
    %cst_58 = arith.constant 3.125000e-02 : f32
    %105 = vector.broadcast %cst_58 : f32 to vector<8x1xf32>
    %106 = arith.mulf %104, %105 : vector<8x1xf32>
    %cst_59 = arith.constant 9.99999974E-6 : f32
    %107 = vector.broadcast %cst_59 : f32 to vector<8x1xf32>
    %108 = arith.addf %106, %107 : vector<8x1xf32>
    %109 = math.rsqrt %108 : vector<8x1xf32>
    %110 = vector.broadcast %109 : vector<8x1xf32> to vector<8x32xf32>
    %111 = arith.mulf %101, %110 : vector<8x32xf32>
    %112 = vector.broadcast %94 : vector<1x32xf32> to vector<8x32xf32>
    %113 = arith.mulf %111, %112 : vector<8x32xf32>
    %114 = vector.broadcast %95 : vector<1x32xf32> to vector<8x32xf32>
    %115 = arith.addf %113, %114 : vector<8x32xf32>
    %116 = arith.addf %1, %115 : vector<8x32xf32>
    %c0_60 = arith.constant 0 : index
    %c0_61 = arith.constant 0 : index
    %117 = vector.load %arg14[%c0_60, %c0_61] : memref<1x32xf32, #tpu.memory_space<vmem>>, vector<1x32xf32>
    %c0_62 = arith.constant 0 : index
    %c0_63 = arith.constant 0 : index
    %118 = vector.load %arg15[%c0_62, %c0_63] : memref<1x32xf32, #tpu.memory_space<vmem>>, vector<1x32xf32>
    %cst_64 = arith.constant dense<0.000000e+00> : vector<8xf32>
    %119 = vector.multi_reduction <add>, %116, %cst_64 [1] : vector<8x32xf32> to vector<8xf32>
    %120 = vector.shape_cast %119 : vector<8xf32> to vector<8x1xf32>
    %cst_65 = arith.constant 3.125000e-02 : f32
    %121 = vector.broadcast %cst_65 : f32 to vector<8x1xf32>
    %122 = arith.mulf %120, %121 : vector<8x1xf32>
    %123 = vector.broadcast %122 : vector<8x1xf32> to vector<8x32xf32>
    %124 = arith.subf %116, %123 : vector<8x32xf32>
    %125 = arith.mulf %124, %124 : vector<8x32xf32>
    %cst_66 = arith.constant dense<0.000000e+00> : vector<8xf32>
    %126 = vector.multi_reduction <add>, %125, %cst_66 [1] : vector<8x32xf32> to vector<8xf32>
    %127 = vector.shape_cast %126 : vector<8xf32> to vector<8x1xf32>
    %cst_67 = arith.constant 3.125000e-02 : f32
    %128 = vector.broadcast %cst_67 : f32 to vector<8x1xf32>
    %129 = arith.mulf %127, %128 : vector<8x1xf32>
    %cst_68 = arith.constant 9.99999974E-6 : f32
    %130 = vector.broadcast %cst_68 : f32 to vector<8x1xf32>
    %131 = arith.addf %129, %130 : vector<8x1xf32>
    %132 = math.rsqrt %131 : vector<8x1xf32>
    %133 = vector.broadcast %132 : vector<8x1xf32> to vector<8x32xf32>
    %134 = arith.mulf %124, %133 : vector<8x32xf32>
    %135 = vector.broadcast %117 : vector<1x32xf32> to vector<8x32xf32>
    %136 = arith.mulf %134, %135 : vector<8x32xf32>
    %137 = vector.broadcast %118 : vector<1x32xf32> to vector<8x32xf32>
    %138 = arith.addf %136, %137 : vector<8x32xf32>
    %c0_69 = arith.constant 0 : index
    %c0_70 = arith.constant 0 : index
    %c0_71 = arith.constant 0 : index
    %139 = vector.load %arg16[%c0_69, %c0_70, %c0_71] : memref<1x8x32xf32, #tpu.memory_space<vmem>>, vector<1x8x32xf32>
    %140 = vector.shape_cast %139 : vector<1x8x32xf32> to vector<8x32xf32>
    %141 = vector.shape_cast %138 : vector<8x32xf32> to vector<1x8x32xf32>
    tpu.vector_store %arg16[%c0_69, %c0_70, %c0_71], %141 {strides = array<i32>} : memref<1x8x32xf32, #tpu.memory_space<vmem>>, vector<1x8x32xf32>,
    return
  }
  func.func @transform_0(%arg0: i32) -> (i32, i32, i32) {
    %c0_i32 = arith.constant 0 : i32
    %c0_i32_0 = arith.constant 0 : i32
    %c0_i32_1 = arith.constant 0 : i32
    return %arg0, %c0_i32, %c0_i32_0 : i32, i32, i32
  }
  func.func @transform_1(%arg0: i32) -> (i32, i32, i32) {
    %c0_i32 = arith.constant 0 : i32
    %c0_i32_0 = arith.constant 0 : i32
    %c0_i32_1 = arith.constant 0 : i32
    return %arg0, %c0_i32, %c0_i32_0 : i32, i32, i32
  }
  func.func @transform_2(%arg0: i32) -> (i32, i32, i32) {
    %c0_i32 = arith.constant 0 : i32
    %c0_i32_0 = arith.constant 0 : i32
    %c0_i32_1 = arith.constant 0 : i32
    return %arg0, %c0_i32, %c0_i32_0 : i32, i32, i32
  }
  func.func @transform_3(%arg0: i32) -> (i32, i32) {
    %c0_i32 = arith.constant 0 : i32
    %c0_i32_0 = arith.constant 0 : i32
    %c0_i32_1 = arith.constant 0 : i32
    return %c0_i32, %c0_i32_0 : i32, i32
  }
  func.func @transform_4(%arg0: i32) -> (i32, i32) {
    %c0_i32 = arith.constant 0 : i32
    %c0_i32_0 = arith.constant 0 : i32
    %c0_i32_1 = arith.constant 0 : i32
    return %c0_i32, %c0_i32_0 : i32, i32
  }
  func.func @transform_5(%arg0: i32) -> (i32, i32) {
    %c0_i32 = arith.constant 0 : i32
    %c0_i32_0 = arith.constant 0 : i32
    %c0_i32_1 = arith.constant 0 : i32
    return %c0_i32, %c0_i32_0 : i32, i32
  }
  func.func @transform_6(%arg0: i32) -> (i32, i32) {
    %c0_i32 = arith.constant 0 : i32
    %c0_i32_0 = arith.constant 0 : i32
    %c0_i32_1 = arith.constant 0 : i32
    return %c0_i32, %c0_i32_0 : i32, i32
  }
  func.func @transform_7(%arg0: i32) -> (i32, i32) {
    %c0_i32 = arith.constant 0 : i32
    %c0_i32_0 = arith.constant 0 : i32
    %c0_i32_1 = arith.constant 0 : i32
    return %c0_i32, %c0_i32_0 : i32, i32
  }
  func.func @transform_8(%arg0: i32) -> (i32, i32) {
    %c0_i32 = arith.constant 0 : i32
    %c0_i32_0 = arith.constant 0 : i32
    %c0_i32_1 = arith.constant 0 : i32
    return %c0_i32, %c0_i32_0 : i32, i32
  }
  func.func @transform_9(%arg0: i32) -> (i32, i32) {
    %c0_i32 = arith.constant 0 : i32
    %c0_i32_0 = arith.constant 0 : i32
    %c0_i32_1 = arith.constant 0 : i32
    return %c0_i32, %c0_i32_0 : i32, i32
  }
  func.func @transform_10(%arg0: i32) -> (i32, i32) {
    %c0_i32 = arith.constant 0 : i32
    %c0_i32_0 = arith.constant 0 : i32
    %c0_i32_1 = arith.constant 0 : i32
    return %c0_i32, %c0_i32_0 : i32, i32
  }
  func.func @transform_11(%arg0: i32) -> (i32, i32) {
    %c0_i32 = arith.constant 0 : i32
    %c0_i32_0 = arith.constant 0 : i32
    %c0_i32_1 = arith.constant 0 : i32
    return %c0_i32, %c0_i32_0 : i32, i32
  }
  func.func @transform_12(%arg0: i32) -> (i32, i32) {
    %c0_i32 = arith.constant 0 : i32
    %c0_i32_0 = arith.constant 0 : i32
    %c0_i32_1 = arith.constant 0 : i32
    return %c0_i32, %c0_i32_0 : i32, i32
  }
  func.func @transform_13(%arg0: i32) -> (i32, i32) {
    %c0_i32 = arith.constant 0 : i32
    %c0_i32_0 = arith.constant 0 : i32
    %c0_i32_1 = arith.constant 0 : i32
    return %c0_i32, %c0_i32_0 : i32, i32
  }
  func.func @transform_14(%arg0: i32) -> (i32, i32) {
    %c0_i32 = arith.constant 0 : i32
    %c0_i32_0 = arith.constant 0 : i32
    %c0_i32_1 = arith.constant 0 : i32
    return %c0_i32, %c0_i32_0 : i32, i32
  }
  func.func @transform_15(%arg0: i32) -> (i32, i32, i32) {
    %c0_i32 = arith.constant 0 : i32
    %c0_i32_0 = arith.constant 0 : i32
    %c0_i32_1 = arith.constant 0 : i32
    return %arg0, %c0_i32, %c0_i32_0 : i32, i32, i32
  }
}

module attributes {stable_mosaic.version = 11 : i64} {
  func.func @_ffn_kernel(%arg0: i32, %arg1: i32, %arg2: memref<16x32xf32, #tpu.memory_space<vmem>>, %arg3: memref<32x64xf32, #tpu.memory_space<vmem>>, %arg4: memref<1x64xf32, #tpu.memory_space<vmem>>, %arg5: memref<64x32xf32, #tpu.memory_space<vmem>>, %arg6: memref<1x32xf32, #tpu.memory_space<vmem>>, %arg7: memref<1x32xf32, #tpu.memory_space<vmem>>, %arg8: memref<1x32xf32, #tpu.memory_space<vmem>>, %arg9: memref<1x32xf32, #tpu.memory_space<vmem>>, %arg10: memref<1x32xf32, #tpu.memory_space<vmem>>, %arg11: memref<16x32xf32, #tpu.memory_space<vmem>>, %arg12: memref<16x32xf32, #tpu.memory_space<vmem>>) attributes {dimension_semantics = [#tpu.dimension_semantics<parallel>, #tpu.dimension_semantics<arbitrary>], iteration_bounds = array<i64: 1, 1>, scalar_prefetch = 0 : i64, scratch_operands = 1 : i64, tpu.core_type = #tpu.core_type<tc>, window_params = [{transform_indices = @transform_0, window_bounds = array<i64: 16, 32>}, {transform_indices = @transform_1, window_bounds = array<i64: 32, 64>}, {transform_indices = @transform_2, window_bounds = array<i64: 1, 64>}, {transform_indices = @transform_3, window_bounds = array<i64: 64, 32>}, {pipeline_mode = #tpu.pipeline_mode<synchronous>, transform_indices = @transform_4, window_bounds = array<i64: 1, 32>}, {pipeline_mode = #tpu.pipeline_mode<synchronous>, transform_indices = @transform_5, window_bounds = array<i64: 1, 32>}, {pipeline_mode = #tpu.pipeline_mode<synchronous>, transform_indices = @transform_6, window_bounds = array<i64: 1, 32>}, {pipeline_mode = #tpu.pipeline_mode<synchronous>, transform_indices = @transform_7, window_bounds = array<i64: 1, 32>}, {pipeline_mode = #tpu.pipeline_mode<synchronous>, transform_indices = @transform_8, window_bounds = array<i64: 1, 32>}, {transform_indices = @transform_9, window_bounds = array<i64: 16, 32>}]} {
    %c0_i32 = arith.constant 0 : i32
    %0 = arith.cmpi eq, %arg1, %c0_i32 : i32
    %1 = arith.extui %0 : i1 to i32
    %c0_i32_0 = arith.constant 0 : i32
    %2 = arith.cmpi ne, %1, %c0_i32_0 : i32
    scf.if %2 {
      %cst_18 = arith.constant 0.000000e+00 : f32
      %25 = vector.broadcast %cst_18 : f32 to vector<16x32xf32>
      %c0_19 = arith.constant 0 : index
      %c0_20 = arith.constant 0 : index
      %26 = vector.load %arg12[%c0_19, %c0_20] : memref<16x32xf32, #tpu.memory_space<vmem>>, vector<16x32xf32>
      tpu.vector_store %arg12[%c0_19, %c0_20], %25 {strides = array<i32>} : memref<16x32xf32, #tpu.memory_space<vmem>>, vector<16x32xf32>,
    } else {
    }
    %c0 = arith.constant 0 : index
    %c0_1 = arith.constant 0 : index
    %3 = vector.load %arg2[%c0, %c0_1] : memref<16x32xf32, #tpu.memory_space<vmem>>, vector<16x32xf32>
    %c0_2 = arith.constant 0 : index
    %c0_3 = arith.constant 0 : index
    %4 = vector.load %arg3[%c0_2, %c0_3] : memref<32x64xf32, #tpu.memory_space<vmem>>, vector<32x64xf32>
    %cst = arith.constant dense<0.000000e+00> : vector<16x64xf32>
    %5 = tpu.matmul %3, %4, %cst {dimension_numbers = #tpu.dot_dimension_numbers<[1], [0], [0], [1], [0, 0, 1, 1], [], []>} : vector<16x32xf32>, vector<32x64xf32>, vector<16x64xf32> -> vector<16x64xf32>
    %c0_4 = arith.constant 0 : index
    %c0_5 = arith.constant 0 : index
    %6 = vector.load %arg4[%c0_4, %c0_5] : memref<1x64xf32, #tpu.memory_space<vmem>>, vector<1x64xf32>
    %7 = vector.broadcast %6 : vector<1x64xf32> to vector<16x64xf32>
    %8 = arith.addf %5, %7 : vector<16x64xf32>
    %cst_6 = arith.constant 5.000000e-01 : f32
    %9 = vector.broadcast %cst_6 : f32 to vector<16x64xf32>
    %10 = arith.mulf %9, %8 : vector<16x64xf32>
    %cst_7 = arith.constant 0.707106769 : f32
    %11 = vector.broadcast %cst_7 : f32 to vector<16x64xf32>
    %12 = arith.mulf %8, %11 : vector<16x64xf32>
    %13 = math.erf %12 : vector<16x64xf32>
    %cst_8 = arith.constant 1.000000e+00 : f32
    %14 = vector.broadcast %cst_8 : f32 to vector<16x64xf32>
    %15 = arith.addf %14, %13 : vector<16x64xf32>
    %16 = arith.mulf %10, %15 : vector<16x64xf32>
    %c0_9 = arith.constant 0 : index
    %c0_10 = arith.constant 0 : index
    %17 = vector.load %arg12[%c0_9, %c0_10] : memref<16x32xf32, #tpu.memory_space<vmem>>, vector<16x32xf32>
    %c0_11 = arith.constant 0 : index
    %c0_12 = arith.constant 0 : index
    %18 = vector.load %arg5[%c0_11, %c0_12] : memref<64x32xf32, #tpu.memory_space<vmem>>, vector<64x32xf32>
    %cst_13 = arith.constant dense<0.000000e+00> : vector<16x32xf32>
    %19 = tpu.matmul %16, %18, %cst_13 {dimension_numbers = #tpu.dot_dimension_numbers<[1], [0], [0], [1], [0, 0, 1, 1], [], []>} : vector<16x64xf32>, vector<64x32xf32>, vector<16x32xf32> -> vector<16x32xf32>
    %20 = arith.addf %17, %19 : vector<16x32xf32>
    %c0_14 = arith.constant 0 : index
    %c0_15 = arith.constant 0 : index
    %21 = vector.load %arg12[%c0_14, %c0_15] : memref<16x32xf32, #tpu.memory_space<vmem>>, vector<16x32xf32>
    tpu.vector_store %arg12[%c0_14, %c0_15], %20 {strides = array<i32>} : memref<16x32xf32, #tpu.memory_space<vmem>>, vector<16x32xf32>,
    %c0_i32_16 = arith.constant 0 : i32
    %22 = arith.cmpi eq, %arg1, %c0_i32_16 : i32
    %23 = arith.extui %22 : i1 to i32
    %c0_i32_17 = arith.constant 0 : i32
    %24 = arith.cmpi ne, %23, %c0_i32_17 : i32
    scf.if %24 {
      %c0_18 = arith.constant 0 : index
      %c0_19 = arith.constant 0 : index
      %25 = vector.load %arg2[%c0_18, %c0_19] : memref<16x32xf32, #tpu.memory_space<vmem>>, vector<16x32xf32>
      %c0_20 = arith.constant 0 : index
      %c0_21 = arith.constant 0 : index
      %26 = vector.load %arg12[%c0_20, %c0_21] : memref<16x32xf32, #tpu.memory_space<vmem>>, vector<16x32xf32>
      %c0_22 = arith.constant 0 : index
      %c0_23 = arith.constant 0 : index
      %27 = vector.load %arg6[%c0_22, %c0_23] : memref<1x32xf32, #tpu.memory_space<vmem>>, vector<1x32xf32>
      %28 = vector.broadcast %27 : vector<1x32xf32> to vector<16x32xf32>
      %29 = arith.addf %26, %28 : vector<16x32xf32>
      %30 = arith.addf %29, %25 : vector<16x32xf32>
      %c0_24 = arith.constant 0 : index
      %c0_25 = arith.constant 0 : index
      %31 = vector.load %arg7[%c0_24, %c0_25] : memref<1x32xf32, #tpu.memory_space<vmem>>, vector<1x32xf32>
      %c0_26 = arith.constant 0 : index
      %c0_27 = arith.constant 0 : index
      %32 = vector.load %arg8[%c0_26, %c0_27] : memref<1x32xf32, #tpu.memory_space<vmem>>, vector<1x32xf32>
      %cst_28 = arith.constant dense<0.000000e+00> : vector<16xf32>
      %33 = vector.multi_reduction <add>, %30, %cst_28 [1] : vector<16x32xf32> to vector<16xf32>
      %34 = vector.shape_cast %33 : vector<16xf32> to vector<16x1xf32>
      %cst_29 = arith.constant 3.125000e-02 : f32
      %35 = vector.broadcast %cst_29 : f32 to vector<16x1xf32>
      %36 = arith.mulf %34, %35 : vector<16x1xf32>
      %37 = vector.broadcast %36 : vector<16x1xf32> to vector<16x32xf32>
      %38 = arith.subf %30, %37 : vector<16x32xf32>
      %39 = arith.mulf %38, %38 : vector<16x32xf32>
      %cst_30 = arith.constant dense<0.000000e+00> : vector<16xf32>
      %40 = vector.multi_reduction <add>, %39, %cst_30 [1] : vector<16x32xf32> to vector<16xf32>
      %41 = vector.shape_cast %40 : vector<16xf32> to vector<16x1xf32>
      %cst_31 = arith.constant 3.125000e-02 : f32
      %42 = vector.broadcast %cst_31 : f32 to vector<16x1xf32>
      %43 = arith.mulf %41, %42 : vector<16x1xf32>
      %cst_32 = arith.constant 9.99999974E-6 : f32
      %44 = vector.broadcast %cst_32 : f32 to vector<16x1xf32>
      %45 = arith.addf %43, %44 : vector<16x1xf32>
      %46 = math.rsqrt %45 : vector<16x1xf32>
      %47 = vector.broadcast %46 : vector<16x1xf32> to vector<16x32xf32>
      %48 = arith.mulf %38, %47 : vector<16x32xf32>
      %49 = vector.broadcast %31 : vector<1x32xf32> to vector<16x32xf32>
      %50 = arith.mulf %48, %49 : vector<16x32xf32>
      %51 = vector.broadcast %32 : vector<1x32xf32> to vector<16x32xf32>
      %52 = arith.addf %50, %51 : vector<16x32xf32>
      %53 = arith.addf %25, %52 : vector<16x32xf32>
      %c0_33 = arith.constant 0 : index
      %c0_34 = arith.constant 0 : index
      %54 = vector.load %arg9[%c0_33, %c0_34] : memref<1x32xf32, #tpu.memory_space<vmem>>, vector<1x32xf32>
      %c0_35 = arith.constant 0 : index
      %c0_36 = arith.constant 0 : index
      %55 = vector.load %arg10[%c0_35, %c0_36] : memref<1x32xf32, #tpu.memory_space<vmem>>, vector<1x32xf32>
      %cst_37 = arith.constant dense<0.000000e+00> : vector<16xf32>
      %56 = vector.multi_reduction <add>, %53, %cst_37 [1] : vector<16x32xf32> to vector<16xf32>
      %57 = vector.shape_cast %56 : vector<16xf32> to vector<16x1xf32>
      %cst_38 = arith.constant 3.125000e-02 : f32
      %58 = vector.broadcast %cst_38 : f32 to vector<16x1xf32>
      %59 = arith.mulf %57, %58 : vector<16x1xf32>
      %60 = vector.broadcast %59 : vector<16x1xf32> to vector<16x32xf32>
      %61 = arith.subf %53, %60 : vector<16x32xf32>
      %62 = arith.mulf %61, %61 : vector<16x32xf32>
      %cst_39 = arith.constant dense<0.000000e+00> : vector<16xf32>
      %63 = vector.multi_reduction <add>, %62, %cst_39 [1] : vector<16x32xf32> to vector<16xf32>
      %64 = vector.shape_cast %63 : vector<16xf32> to vector<16x1xf32>
      %cst_40 = arith.constant 3.125000e-02 : f32
      %65 = vector.broadcast %cst_40 : f32 to vector<16x1xf32>
      %66 = arith.mulf %64, %65 : vector<16x1xf32>
      %cst_41 = arith.constant 9.99999974E-6 : f32
      %67 = vector.broadcast %cst_41 : f32 to vector<16x1xf32>
      %68 = arith.addf %66, %67 : vector<16x1xf32>
      %69 = math.rsqrt %68 : vector<16x1xf32>
      %70 = vector.broadcast %69 : vector<16x1xf32> to vector<16x32xf32>
      %71 = arith.mulf %61, %70 : vector<16x32xf32>
      %72 = vector.broadcast %54 : vector<1x32xf32> to vector<16x32xf32>
      %73 = arith.mulf %71, %72 : vector<16x32xf32>
      %74 = vector.broadcast %55 : vector<1x32xf32> to vector<16x32xf32>
      %75 = arith.addf %73, %74 : vector<16x32xf32>
      %c0_42 = arith.constant 0 : index
      %c0_43 = arith.constant 0 : index
      %76 = vector.load %arg11[%c0_42, %c0_43] : memref<16x32xf32, #tpu.memory_space<vmem>>, vector<16x32xf32>
      tpu.vector_store %arg11[%c0_42, %c0_43], %75 {strides = array<i32>} : memref<16x32xf32, #tpu.memory_space<vmem>>, vector<16x32xf32>,
    } else {
    }
    return
  }
  func.func @transform_0(%arg0: i32, %arg1: i32) -> (i32, i32) {
    %c0_i32 = arith.constant 0 : i32
    %c0_i32_0 = arith.constant 0 : i32
    return %arg0, %c0_i32 : i32, i32
  }
  func.func @transform_1(%arg0: i32, %arg1: i32) -> (i32, i32) {
    %c0_i32 = arith.constant 0 : i32
    %c0_i32_0 = arith.constant 0 : i32
    return %c0_i32, %arg1 : i32, i32
  }
  func.func @transform_2(%arg0: i32, %arg1: i32) -> (i32, i32) {
    %c0_i32 = arith.constant 0 : i32
    %c0_i32_0 = arith.constant 0 : i32
    return %c0_i32, %arg1 : i32, i32
  }
  func.func @transform_3(%arg0: i32, %arg1: i32) -> (i32, i32) {
    %c0_i32 = arith.constant 0 : i32
    %c0_i32_0 = arith.constant 0 : i32
    return %arg1, %c0_i32 : i32, i32
  }
  func.func @transform_4(%arg0: i32, %arg1: i32) -> (i32, i32) {
    %c0_i32 = arith.constant 0 : i32
    %c0_i32_0 = arith.constant 0 : i32
    %c0_i32_1 = arith.constant 0 : i32
    return %c0_i32, %c0_i32_0 : i32, i32
  }
  func.func @transform_5(%arg0: i32, %arg1: i32) -> (i32, i32) {
    %c0_i32 = arith.constant 0 : i32
    %c0_i32_0 = arith.constant 0 : i32
    %c0_i32_1 = arith.constant 0 : i32
    return %c0_i32, %c0_i32_0 : i32, i32
  }
  func.func @transform_6(%arg0: i32, %arg1: i32) -> (i32, i32) {
    %c0_i32 = arith.constant 0 : i32
    %c0_i32_0 = arith.constant 0 : i32
    %c0_i32_1 = arith.constant 0 : i32
    return %c0_i32, %c0_i32_0 : i32, i32
  }
  func.func @transform_7(%arg0: i32, %arg1: i32) -> (i32, i32) {
    %c0_i32 = arith.constant 0 : i32
    %c0_i32_0 = arith.constant 0 : i32
    %c0_i32_1 = arith.constant 0 : i32
    return %c0_i32, %c0_i32_0 : i32, i32
  }
  func.func @transform_8(%arg0: i32, %arg1: i32) -> (i32, i32) {
    %c0_i32 = arith.constant 0 : i32
    %c0_i32_0 = arith.constant 0 : i32
    %c0_i32_1 = arith.constant 0 : i32
    return %c0_i32, %c0_i32_0 : i32, i32
  }
  func.func @transform_9(%arg0: i32, %arg1: i32) -> (i32, i32) {
    %c0_i32 = arith.constant 0 : i32
    %c0_i32_0 = arith.constant 0 : i32
    return %arg0, %c0_i32 : i32, i32
  }
}

module attributes {stable_mosaic.version = 11 : i64} {
  func.func @_ffn_kernel(%arg0: i32, %arg1: i32, %arg2: memref<16x32xf32, #tpu.memory_space<vmem>>, %arg3: memref<32x64xf32, #tpu.memory_space<vmem>>, %arg4: memref<1x64xf32, #tpu.memory_space<vmem>>, %arg5: memref<64x32xf32, #tpu.memory_space<vmem>>, %arg6: memref<1x32xf32, #tpu.memory_space<vmem>>, %arg7: memref<1x32xf32, #tpu.memory_space<vmem>>, %arg8: memref<1x32xf32, #tpu.memory_space<vmem>>, %arg9: memref<1x32xf32, #tpu.memory_space<vmem>>, %arg10: memref<1x32xf32, #tpu.memory_space<vmem>>, %arg11: memref<16x32xf32, #tpu.memory_space<vmem>>, %arg12: memref<16x32xf32, #tpu.memory_space<vmem>>) attributes {dimension_semantics = [#tpu.dimension_semantics<parallel>, #tpu.dimension_semantics<arbitrary>], iteration_bounds = array<i64: 1, 1>, scalar_prefetch = 0 : i64, scratch_operands = 1 : i64, tpu.core_type = #tpu.core_type<tc>, window_params = [{transform_indices = @transform_0, window_bounds = array<i64: 16, 32>}, {transform_indices = @transform_1, window_bounds = array<i64: 32, 64>}, {transform_indices = @transform_2, window_bounds = array<i64: 1, 64>}, {transform_indices = @transform_3, window_bounds = array<i64: 64, 32>}, {pipeline_mode = #tpu.pipeline_mode<synchronous>, transform_indices = @transform_4, window_bounds = array<i64: 1, 32>}, {pipeline_mode = #tpu.pipeline_mode<synchronous>, transform_indices = @transform_5, window_bounds = array<i64: 1, 32>}, {pipeline_mode = #tpu.pipeline_mode<synchronous>, transform_indices = @transform_6, window_bounds = array<i64: 1, 32>}, {pipeline_mode = #tpu.pipeline_mode<synchronous>, transform_indices = @transform_7, window_bounds = array<i64: 1, 32>}, {pipeline_mode = #tpu.pipeline_mode<synchronous>, transform_indices = @transform_8, window_bounds = array<i64: 1, 32>}, {transform_indices = @transform_9, window_bounds = array<i64: 16, 32>}]} {
    %c0_i32 = arith.constant 0 : i32
    %0 = arith.cmpi eq, %arg1, %c0_i32 : i32
    %1 = arith.extui %0 : i1 to i32
    %c0_i32_0 = arith.constant 0 : i32
    %2 = arith.cmpi ne, %1, %c0_i32_0 : i32
    scf.if %2 {
      %cst_18 = arith.constant 0.000000e+00 : f32
      %25 = vector.broadcast %cst_18 : f32 to vector<16x32xf32>
      %c0_19 = arith.constant 0 : index
      %c0_20 = arith.constant 0 : index
      %26 = vector.load %arg12[%c0_19, %c0_20] : memref<16x32xf32, #tpu.memory_space<vmem>>, vector<16x32xf32>
      tpu.vector_store %arg12[%c0_19, %c0_20], %25 {strides = array<i32>} : memref<16x32xf32, #tpu.memory_space<vmem>>, vector<16x32xf32>,
    } else {
    }
    %c0 = arith.constant 0 : index
    %c0_1 = arith.constant 0 : index
    %3 = vector.load %arg2[%c0, %c0_1] : memref<16x32xf32, #tpu.memory_space<vmem>>, vector<16x32xf32>
    %c0_2 = arith.constant 0 : index
    %c0_3 = arith.constant 0 : index
    %4 = vector.load %arg3[%c0_2, %c0_3] : memref<32x64xf32, #tpu.memory_space<vmem>>, vector<32x64xf32>
    %cst = arith.constant dense<0.000000e+00> : vector<16x64xf32>
    %5 = tpu.matmul %3, %4, %cst {dimension_numbers = #tpu.dot_dimension_numbers<[1], [0], [0], [1], [0, 0, 1, 1], [], []>} : vector<16x32xf32>, vector<32x64xf32>, vector<16x64xf32> -> vector<16x64xf32>
    %c0_4 = arith.constant 0 : index
    %c0_5 = arith.constant 0 : index
    %6 = vector.load %arg4[%c0_4, %c0_5] : memref<1x64xf32, #tpu.memory_space<vmem>>, vector<1x64xf32>
    %7 = vector.broadcast %6 : vector<1x64xf32> to vector<16x64xf32>
    %8 = arith.addf %5, %7 : vector<16x64xf32>
    %cst_6 = arith.constant 5.000000e-01 : f32
    %9 = vector.broadcast %cst_6 : f32 to vector<16x64xf32>
    %10 = arith.mulf %9, %8 : vector<16x64xf32>
    %cst_7 = arith.constant 0.707106769 : f32
    %11 = vector.broadcast %cst_7 : f32 to vector<16x64xf32>
    %12 = arith.mulf %8, %11 : vector<16x64xf32>
    %13 = math.erf %12 : vector<16x64xf32>
    %cst_8 = arith.constant 1.000000e+00 : f32
    %14 = vector.broadcast %cst_8 : f32 to vector<16x64xf32>
    %15 = arith.addf %14, %13 : vector<16x64xf32>
    %16 = arith.mulf %10, %15 : vector<16x64xf32>
    %c0_9 = arith.constant 0 : index
    %c0_10 = arith.constant 0 : index
    %17 = vector.load %arg12[%c0_9, %c0_10] : memref<16x32xf32, #tpu.memory_space<vmem>>, vector<16x32xf32>
    %c0_11 = arith.constant 0 : index
    %c0_12 = arith.constant 0 : index
    %18 = vector.load %arg5[%c0_11, %c0_12] : memref<64x32xf32, #tpu.memory_space<vmem>>, vector<64x32xf32>
    %cst_13 = arith.constant dense<0.000000e+00> : vector<16x32xf32>
    %19 = tpu.matmul %16, %18, %cst_13 {dimension_numbers = #tpu.dot_dimension_numbers<[1], [0], [0], [1], [0, 0, 1, 1], [], []>} : vector<16x64xf32>, vector<64x32xf32>, vector<16x32xf32> -> vector<16x32xf32>
    %20 = arith.addf %17, %19 : vector<16x32xf32>
    %c0_14 = arith.constant 0 : index
    %c0_15 = arith.constant 0 : index
    %21 = vector.load %arg12[%c0_14, %c0_15] : memref<16x32xf32, #tpu.memory_space<vmem>>, vector<16x32xf32>
    tpu.vector_store %arg12[%c0_14, %c0_15], %20 {strides = array<i32>} : memref<16x32xf32, #tpu.memory_space<vmem>>, vector<16x32xf32>,
    %c0_i32_16 = arith.constant 0 : i32
    %22 = arith.cmpi eq, %arg1, %c0_i32_16 : i32
    %23 = arith.extui %22 : i1 to i32
    %c0_i32_17 = arith.constant 0 : i32
    %24 = arith.cmpi ne, %23, %c0_i32_17 : i32
    scf.if %24 {
      %c0_18 = arith.constant 0 : index
      %c0_19 = arith.constant 0 : index
      %25 = vector.load %arg2[%c0_18, %c0_19] : memref<16x32xf32, #tpu.memory_space<vmem>>, vector<16x32xf32>
      %c0_20 = arith.constant 0 : index
      %c0_21 = arith.constant 0 : index
      %26 = vector.load %arg12[%c0_20, %c0_21] : memref<16x32xf32, #tpu.memory_space<vmem>>, vector<16x32xf32>
      %c0_22 = arith.constant 0 : index
      %c0_23 = arith.constant 0 : index
      %27 = vector.load %arg6[%c0_22, %c0_23] : memref<1x32xf32, #tpu.memory_space<vmem>>, vector<1x32xf32>
      %28 = vector.broadcast %27 : vector<1x32xf32> to vector<16x32xf32>
      %29 = arith.addf %26, %28 : vector<16x32xf32>
      %30 = arith.addf %29, %25 : vector<16x32xf32>
      %c0_24 = arith.constant 0 : index
      %c0_25 = arith.constant 0 : index
      %31 = vector.load %arg7[%c0_24, %c0_25] : memref<1x32xf32, #tpu.memory_space<vmem>>, vector<1x32xf32>
      %c0_26 = arith.constant 0 : index
      %c0_27 = arith.constant 0 : index
      %32 = vector.load %arg8[%c0_26, %c0_27] : memref<1x32xf32, #tpu.memory_space<vmem>>, vector<1x32xf32>
      %cst_28 = arith.constant dense<0.000000e+00> : vector<16xf32>
      %33 = vector.multi_reduction <add>, %30, %cst_28 [1] : vector<16x32xf32> to vector<16xf32>
      %34 = vector.shape_cast %33 : vector<16xf32> to vector<16x1xf32>
      %cst_29 = arith.constant 3.125000e-02 : f32
      %35 = vector.broadcast %cst_29 : f32 to vector<16x1xf32>
      %36 = arith.mulf %34, %35 : vector<16x1xf32>
      %37 = vector.broadcast %36 : vector<16x1xf32> to vector<16x32xf32>
      %38 = arith.subf %30, %37 : vector<16x32xf32>
      %39 = arith.mulf %38, %38 : vector<16x32xf32>
      %cst_30 = arith.constant dense<0.000000e+00> : vector<16xf32>
      %40 = vector.multi_reduction <add>, %39, %cst_30 [1] : vector<16x32xf32> to vector<16xf32>
      %41 = vector.shape_cast %40 : vector<16xf32> to vector<16x1xf32>
      %cst_31 = arith.constant 3.125000e-02 : f32
      %42 = vector.broadcast %cst_31 : f32 to vector<16x1xf32>
      %43 = arith.mulf %41, %42 : vector<16x1xf32>
      %cst_32 = arith.constant 9.99999974E-6 : f32
      %44 = vector.broadcast %cst_32 : f32 to vector<16x1xf32>
      %45 = arith.addf %43, %44 : vector<16x1xf32>
      %46 = math.rsqrt %45 : vector<16x1xf32>
      %47 = vector.broadcast %46 : vector<16x1xf32> to vector<16x32xf32>
      %48 = arith.mulf %38, %47 : vector<16x32xf32>
      %49 = vector.broadcast %31 : vector<1x32xf32> to vector<16x32xf32>
      %50 = arith.mulf %48, %49 : vector<16x32xf32>
      %51 = vector.broadcast %32 : vector<1x32xf32> to vector<16x32xf32>
      %52 = arith.addf %50, %51 : vector<16x32xf32>
      %53 = arith.addf %25, %52 : vector<16x32xf32>
      %c0_33 = arith.constant 0 : index
      %c0_34 = arith.constant 0 : index
      %54 = vector.load %arg9[%c0_33, %c0_34] : memref<1x32xf32, #tpu.memory_space<vmem>>, vector<1x32xf32>
      %c0_35 = arith.constant 0 : index
      %c0_36 = arith.constant 0 : index
      %55 = vector.load %arg10[%c0_35, %c0_36] : memref<1x32xf32, #tpu.memory_space<vmem>>, vector<1x32xf32>
      %cst_37 = arith.constant dense<0.000000e+00> : vector<16xf32>
      %56 = vector.multi_reduction <add>, %53, %cst_37 [1] : vector<16x32xf32> to vector<16xf32>
      %57 = vector.shape_cast %56 : vector<16xf32> to vector<16x1xf32>
      %cst_38 = arith.constant 3.125000e-02 : f32
      %58 = vector.broadcast %cst_38 : f32 to vector<16x1xf32>
      %59 = arith.mulf %57, %58 : vector<16x1xf32>
      %60 = vector.broadcast %59 : vector<16x1xf32> to vector<16x32xf32>
      %61 = arith.subf %53, %60 : vector<16x32xf32>
      %62 = arith.mulf %61, %61 : vector<16x32xf32>
      %cst_39 = arith.constant dense<0.000000e+00> : vector<16xf32>
      %63 = vector.multi_reduction <add>, %62, %cst_39 [1] : vector<16x32xf32> to vector<16xf32>
      %64 = vector.shape_cast %63 : vector<16xf32> to vector<16x1xf32>
      %cst_40 = arith.constant 3.125000e-02 : f32
      %65 = vector.broadcast %cst_40 : f32 to vector<16x1xf32>
      %66 = arith.mulf %64, %65 : vector<16x1xf32>
      %cst_41 = arith.constant 9.99999974E-6 : f32
      %67 = vector.broadcast %cst_41 : f32 to vector<16x1xf32>
      %68 = arith.addf %66, %67 : vector<16x1xf32>
      %69 = math.rsqrt %68 : vector<16x1xf32>
      %70 = vector.broadcast %69 : vector<16x1xf32> to vector<16x32xf32>
      %71 = arith.mulf %61, %70 : vector<16x32xf32>
      %72 = vector.broadcast %54 : vector<1x32xf32> to vector<16x32xf32>
      %73 = arith.mulf %71, %72 : vector<16x32xf32>
      %74 = vector.broadcast %55 : vector<1x32xf32> to vector<16x32xf32>
      %75 = arith.addf %73, %74 : vector<16x32xf32>
      %c0_42 = arith.constant 0 : index
      %c0_43 = arith.constant 0 : index
      %76 = vector.load %arg11[%c0_42, %c0_43] : memref<16x32xf32, #tpu.memory_space<vmem>>, vector<16x32xf32>
      tpu.vector_store %arg11[%c0_42, %c0_43], %75 {strides = array<i32>} : memref<16x32xf32, #tpu.memory_space<vmem>>, vector<16x32xf32>,
    } else {
    }
    return
  }
  func.func @transform_0(%arg0: i32, %arg1: i32) -> (i32, i32) {
    %c0_i32 = arith.constant 0 : i32
    %c0_i32_0 = arith.constant 0 : i32
    return %arg0, %c0_i32 : i32, i32
  }
  func.func @transform_1(%arg0: i32, %arg1: i32) -> (i32, i32) {
    %c0_i32 = arith.constant 0 : i32
    %c0_i32_0 = arith.constant 0 : i32
    return %c0_i32, %arg1 : i32, i32
  }
  func.func @transform_2(%arg0: i32, %arg1: i32) -> (i32, i32) {
    %c0_i32 = arith.constant 0 : i32
    %c0_i32_0 = arith.constant 0 : i32
    return %c0_i32, %arg1 : i32, i32
  }
  func.func @transform_3(%arg0: i32, %arg1: i32) -> (i32, i32) {
    %c0_i32 = arith.constant 0 : i32
    %c0_i32_0 = arith.constant 0 : i32
    return %arg1, %c0_i32 : i32, i32
  }
  func.func @transform_4(%arg0: i32, %arg1: i32) -> (i32, i32) {
    %c0_i32 = arith.constant 0 : i32
    %c0_i32_0 = arith.constant 0 : i32
    %c0_i32_1 = arith.constant 0 : i32
    return %c0_i32, %c0_i32_0 : i32, i32
  }
  func.func @transform_5(%arg0: i32, %arg1: i32) -> (i32, i32) {
    %c0_i32 = arith.constant 0 : i32
    %c0_i32_0 = arith.constant 0 : i32
    %c0_i32_1 = arith.constant 0 : i32
    return %c0_i32, %c0_i32_0 : i32, i32
  }
  func.func @transform_6(%arg0: i32, %arg1: i32) -> (i32, i32) {
    %c0_i32 = arith.constant 0 : i32
    %c0_i32_0 = arith.constant 0 : i32
    %c0_i32_1 = arith.constant 0 : i32
    return %c0_i32, %c0_i32_0 : i32, i32
  }
  func.func @transform_7(%arg0: i32, %arg1: i32) -> (i32, i32) {
    %c0_i32 = arith.constant 0 : i32
    %c0_i32_0 = arith.constant 0 : i32
    %c0_i32_1 = arith.constant 0 : i32
    return %c0_i32, %c0_i32_0 : i32, i32
  }
  func.func @transform_8(%arg0: i32, %arg1: i32) -> (i32, i32) {
    %c0_i32 = arith.constant 0 : i32
    %c0_i32_0 = arith.constant 0 : i32
    %c0_i32_1 = arith.constant 0 : i32
    return %c0_i32, %c0_i32_0 : i32, i32
  }
  func.func @transform_9(%arg0: i32, %arg1: i32) -> (i32, i32) {
    %c0_i32 = arith.constant 0 : i32
    %c0_i32_0 = arith.constant 0 : i32
    return %arg0, %c0_i32 : i32, i32
  }
}

module attributes {stable_mosaic.version = 11 : i64} {
  func.func @_embed_kernel(%arg0: i32, %arg1: memref<1x8x1xf32, #tpu.memory_space<vmem>>, %arg2: memref<1x32xf32, #tpu.memory_space<vmem>>, %arg3: memref<1x32xf32, #tpu.memory_space<vmem>>, %arg4: memref<8x32xf32, #tpu.memory_space<vmem>>, %arg5: memref<1x8x32xf32, #tpu.memory_space<vmem>>) attributes {dimension_semantics = [#tpu.dimension_semantics<parallel>], iteration_bounds = array<i64: 2>, scalar_prefetch = 0 : i64, scratch_operands = 0 : i64, tpu.core_type = #tpu.core_type<tc>, window_params = [{transform_indices = @transform_0, window_bounds = array<i64: 1, 8, 1>}, {pipeline_mode = #tpu.pipeline_mode<synchronous>, transform_indices = @transform_1, window_bounds = array<i64: 1, 32>}, {pipeline_mode = #tpu.pipeline_mode<synchronous>, transform_indices = @transform_2, window_bounds = array<i64: 1, 32>}, {pipeline_mode = #tpu.pipeline_mode<synchronous>, transform_indices = @transform_3, window_bounds = array<i64: 8, 32>}, {transform_indices = @transform_4, window_bounds = array<i64: 1, 8, 32>}]} {
    %c0 = arith.constant 0 : index
    %c0_0 = arith.constant 0 : index
    %c0_1 = arith.constant 0 : index
    %0 = vector.load %arg1[%c0, %c0_0, %c0_1] : memref<1x8x1xf32, #tpu.memory_space<vmem>>, vector<1x8x1xf32>
    %1 = vector.shape_cast %0 : vector<1x8x1xf32> to vector<8x1xf32>
    %c0_2 = arith.constant 0 : index
    %c0_3 = arith.constant 0 : index
    %2 = vector.load %arg2[%c0_2, %c0_3] : memref<1x32xf32, #tpu.memory_space<vmem>>, vector<1x32xf32>
    %3 = vector.broadcast %1 : vector<8x1xf32> to vector<8x32xf32>
    %4 = vector.broadcast %2 : vector<1x32xf32> to vector<8x32xf32>
    %5 = arith.mulf %3, %4 : vector<8x32xf32>
    %c0_4 = arith.constant 0 : index
    %c0_5 = arith.constant 0 : index
    %6 = vector.load %arg3[%c0_4, %c0_5] : memref<1x32xf32, #tpu.memory_space<vmem>>, vector<1x32xf32>
    %7 = vector.broadcast %6 : vector<1x32xf32> to vector<8x32xf32>
    %8 = arith.addf %5, %7 : vector<8x32xf32>
    %c0_6 = arith.constant 0 : index
    %c0_7 = arith.constant 0 : index
    %9 = vector.load %arg4[%c0_6, %c0_7] : memref<8x32xf32, #tpu.memory_space<vmem>>, vector<8x32xf32>
    %10 = arith.addf %8, %9 : vector<8x32xf32>
    %c0_8 = arith.constant 0 : index
    %c0_9 = arith.constant 0 : index
    %c0_10 = arith.constant 0 : index
    %11 = vector.load %arg5[%c0_8, %c0_9, %c0_10] : memref<1x8x32xf32, #tpu.memory_space<vmem>>, vector<1x8x32xf32>
    %12 = vector.shape_cast %11 : vector<1x8x32xf32> to vector<8x32xf32>
    %13 = vector.shape_cast %10 : vector<8x32xf32> to vector<1x8x32xf32>
    tpu.vector_store %arg5[%c0_8, %c0_9, %c0_10], %13 {strides = array<i32>} : memref<1x8x32xf32, #tpu.memory_space<vmem>>, vector<1x8x32xf32>,
    return
  }
  func.func @transform_0(%arg0: i32) -> (i32, i32, i32) {
    %c0_i32 = arith.constant 0 : i32
    %c0_i32_0 = arith.constant 0 : i32
    %c0_i32_1 = arith.constant 0 : i32
    return %arg0, %c0_i32, %c0_i32_0 : i32, i32, i32
  }
  func.func @transform_1(%arg0: i32) -> (i32, i32) {
    %c0_i32 = arith.constant 0 : i32
    %c0_i32_0 = arith.constant 0 : i32
    %c0_i32_1 = arith.constant 0 : i32
    return %c0_i32, %c0_i32_0 : i32, i32
  }
  func.func @transform_2(%arg0: i32) -> (i32, i32) {
    %c0_i32 = arith.constant 0 : i32
    %c0_i32_0 = arith.constant 0 : i32
    %c0_i32_1 = arith.constant 0 : i32
    return %c0_i32, %c0_i32_0 : i32, i32
  }
  func.func @transform_3(%arg0: i32) -> (i32, i32) {
    %c0_i32 = arith.constant 0 : i32
    %c0_i32_0 = arith.constant 0 : i32
    %c0_i32_1 = arith.constant 0 : i32
    return %c0_i32, %c0_i32_0 : i32, i32
  }
  func.func @transform_4(%arg0: i32) -> (i32, i32, i32) {
    %c0_i32 = arith.constant 0 : i32
    %c0_i32_0 = arith.constant 0 : i32
    %c0_i32_1 = arith.constant 0 : i32
    return %arg0, %c0_i32, %c0_i32_0 : i32, i32, i32
  }
}

module attributes {stable_mosaic.version = 11 : i64} {
  func.func @_mha_kernel(%arg0: i32, %arg1: memref<1x8x32xf32, #tpu.memory_space<vmem>>, %arg2: memref<1x8x32xf32, #tpu.memory_space<vmem>>, %arg3: memref<1x8x8xf32, #tpu.memory_space<vmem>>, %arg4: memref<32x32xf32, #tpu.memory_space<vmem>>, %arg5: memref<1x32xf32, #tpu.memory_space<vmem>>, %arg6: memref<32x32xf32, #tpu.memory_space<vmem>>, %arg7: memref<1x32xf32, #tpu.memory_space<vmem>>, %arg8: memref<32x32xf32, #tpu.memory_space<vmem>>, %arg9: memref<1x32xf32, #tpu.memory_space<vmem>>, %arg10: memref<32x32xf32, #tpu.memory_space<vmem>>, %arg11: memref<1x32xf32, #tpu.memory_space<vmem>>, %arg12: memref<1x32xf32, #tpu.memory_space<vmem>>, %arg13: memref<1x32xf32, #tpu.memory_space<vmem>>, %arg14: memref<1x32xf32, #tpu.memory_space<vmem>>, %arg15: memref<1x32xf32, #tpu.memory_space<vmem>>, %arg16: memref<1x8x32xf32, #tpu.memory_space<vmem>>, %arg17: memref<8x32xf32, #tpu.memory_space<vmem>>) attributes {dimension_semantics = [#tpu.dimension_semantics<parallel>], iteration_bounds = array<i64: 2>, scalar_prefetch = 0 : i64, scratch_operands = 1 : i64, tpu.core_type = #tpu.core_type<tc>, window_params = [{transform_indices = @transform_0, window_bounds = array<i64: 1, 8, 32>}, {transform_indices = @transform_1, window_bounds = array<i64: 1, 8, 32>}, {transform_indices = @transform_2, window_bounds = array<i64: 1, 8, 8>}, {pipeline_mode = #tpu.pipeline_mode<synchronous>, transform_indices = @transform_3, window_bounds = array<i64: 32, 32>}, {pipeline_mode = #tpu.pipeline_mode<synchronous>, transform_indices = @transform_4, window_bounds = array<i64: 1, 32>}, {pipeline_mode = #tpu.pipeline_mode<synchronous>, transform_indices = @transform_5, window_bounds = array<i64: 32, 32>}, {pipeline_mode = #tpu.pipeline_mode<synchronous>, transform_indices = @transform_6, window_bounds = array<i64: 1, 32>}, {pipeline_mode = #tpu.pipeline_mode<synchronous>, transform_indices = @transform_7, window_bounds = array<i64: 32, 32>}, {pipeline_mode = #tpu.pipeline_mode<synchronous>, transform_indices = @transform_8, window_bounds = array<i64: 1, 32>}, {pipeline_mode = #tpu.pipeline_mode<synchronous>, transform_indices = @transform_9, window_bounds = array<i64: 32, 32>}, {pipeline_mode = #tpu.pipeline_mode<synchronous>, transform_indices = @transform_10, window_bounds = array<i64: 1, 32>}, {pipeline_mode = #tpu.pipeline_mode<synchronous>, transform_indices = @transform_11, window_bounds = array<i64: 1, 32>}, {pipeline_mode = #tpu.pipeline_mode<synchronous>, transform_indices = @transform_12, window_bounds = array<i64: 1, 32>}, {pipeline_mode = #tpu.pipeline_mode<synchronous>, transform_indices = @transform_13, window_bounds = array<i64: 1, 32>}, {pipeline_mode = #tpu.pipeline_mode<synchronous>, transform_indices = @transform_14, window_bounds = array<i64: 1, 32>}, {transform_indices = @transform_15, window_bounds = array<i64: 1, 8, 32>}]} {
    %c0 = arith.constant 0 : index
    %c0_0 = arith.constant 0 : index
    %c0_1 = arith.constant 0 : index
    %0 = vector.load %arg1[%c0, %c0_0, %c0_1] : memref<1x8x32xf32, #tpu.memory_space<vmem>>, vector<1x8x32xf32>
    %1 = vector.shape_cast %0 : vector<1x8x32xf32> to vector<8x32xf32>
    %c0_2 = arith.constant 0 : index
    %c0_3 = arith.constant 0 : index
    %c0_4 = arith.constant 0 : index
    %2 = vector.load %arg2[%c0_2, %c0_3, %c0_4] : memref<1x8x32xf32, #tpu.memory_space<vmem>>, vector<1x8x32xf32>
    %3 = vector.shape_cast %2 : vector<1x8x32xf32> to vector<8x32xf32>
    %c0_5 = arith.constant 0 : index
    %c0_6 = arith.constant 0 : index
    %c0_7 = arith.constant 0 : index
    %4 = vector.load %arg3[%c0_5, %c0_6, %c0_7] : memref<1x8x8xf32, #tpu.memory_space<vmem>>, vector<1x8x8xf32>
    %5 = vector.shape_cast %4 : vector<1x8x8xf32> to vector<8x8xf32>
    %c0_8 = arith.constant 0 : index
    %c0_9 = arith.constant 0 : index
    %6 = vector.load %arg4[%c0_8, %c0_9] : memref<32x32xf32, #tpu.memory_space<vmem>>, vector<32x32xf32>
    %cst = arith.constant dense<0.000000e+00> : vector<8x32xf32>
    %7 = tpu.matmul %1, %6, %cst {dimension_numbers = #tpu.dot_dimension_numbers<[1], [0], [0], [1], [0, 0, 1, 1], [], []>} : vector<8x32xf32>, vector<32x32xf32>, vector<8x32xf32> -> vector<8x32xf32>
    %c0_10 = arith.constant 0 : index
    %c0_11 = arith.constant 0 : index
    %8 = vector.load %arg5[%c0_10, %c0_11] : memref<1x32xf32, #tpu.memory_space<vmem>>, vector<1x32xf32>
    %9 = vector.broadcast %8 : vector<1x32xf32> to vector<8x32xf32>
    %10 = arith.addf %7, %9 : vector<8x32xf32>
    %c0_12 = arith.constant 0 : index
    %c0_13 = arith.constant 0 : index
    %11 = vector.load %arg6[%c0_12, %c0_13] : memref<32x32xf32, #tpu.memory_space<vmem>>, vector<32x32xf32>
    %cst_14 = arith.constant dense<0.000000e+00> : vector<8x32xf32>
    %12 = tpu.matmul %3, %11, %cst_14 {dimension_numbers = #tpu.dot_dimension_numbers<[1], [0], [0], [1], [0, 0, 1, 1], [], []>} : vector<8x32xf32>, vector<32x32xf32>, vector<8x32xf32> -> vector<8x32xf32>
    %c0_15 = arith.constant 0 : index
    %c0_16 = arith.constant 0 : index
    %13 = vector.load %arg7[%c0_15, %c0_16] : memref<1x32xf32, #tpu.memory_space<vmem>>, vector<1x32xf32>
    %14 = vector.broadcast %13 : vector<1x32xf32> to vector<8x32xf32>
    %15 = arith.addf %12, %14 : vector<8x32xf32>
    %c0_17 = arith.constant 0 : index
    %c0_18 = arith.constant 0 : index
    %16 = vector.load %arg8[%c0_17, %c0_18] : memref<32x32xf32, #tpu.memory_space<vmem>>, vector<32x32xf32>
    %cst_19 = arith.constant dense<0.000000e+00> : vector<8x32xf32>
    %17 = tpu.matmul %3, %16, %cst_19 {dimension_numbers = #tpu.dot_dimension_numbers<[1], [0], [0], [1], [0, 0, 1, 1], [], []>} : vector<8x32xf32>, vector<32x32xf32>, vector<8x32xf32> -> vector<8x32xf32>
    %c0_20 = arith.constant 0 : index
    %c0_21 = arith.constant 0 : index
    %18 = vector.load %arg9[%c0_20, %c0_21] : memref<1x32xf32, #tpu.memory_space<vmem>>, vector<1x32xf32>
    %19 = vector.broadcast %18 : vector<1x32xf32> to vector<8x32xf32>
    %20 = arith.addf %17, %19 : vector<8x32xf32>
    %cst_22 = arith.constant 0.353553385 : f32
    %21 = vector.broadcast %cst_22 : f32 to vector<8x32xf32>
    %22 = arith.mulf %10, %21 : vector<8x32xf32>
    %23 = vector.extract_strided_slice %22 {offsets = [0, 0], sizes = [8, 8], strides = [1, 1]} : vector<8x32xf32> to vector<8x8xf32>
    %24 = vector.extract_strided_slice %15 {offsets = [0, 0], sizes = [8, 8], strides = [1, 1]} : vector<8x32xf32> to vector<8x8xf32>
    %cst_23 = arith.constant dense<0.000000e+00> : vector<8x8xf32>
    %25 = tpu.matmul %23, %24, %cst_23 {dimension_numbers = #tpu.dot_dimension_numbers<[1], [1], [0], [0], [0, 0, 1, 0], [], []>} : vector<8x8xf32>, vector<8x8xf32>, vector<8x8xf32> -> vector<8x8xf32>
    %26 = arith.addf %25, %5 : vector<8x8xf32>
    %cst_24 = arith.constant dense<0xFF800000> : vector<8xf32>
    %27 = vector.multi_reduction <maximumf>, %26, %cst_24 [1] : vector<8x8xf32> to vector<8xf32>
    %28 = vector.shape_cast %27 : vector<8xf32> to vector<8x1xf32>
    %29 = vector.broadcast %28 : vector<8x1xf32> to vector<8x8xf32>
    %30 = arith.subf %26, %29 : vector<8x8xf32>
    %31 = math.exp %30 : vector<8x8xf32>
    %cst_25 = arith.constant dense<0.000000e+00> : vector<8xf32>
    %32 = vector.multi_reduction <add>, %31, %cst_25 [1] : vector<8x8xf32> to vector<8xf32>
    %33 = vector.shape_cast %32 : vector<8xf32> to vector<8x1xf32>
    %34 = vector.broadcast %33 : vector<8x1xf32> to vector<8x8xf32>
    %35 = arith.divf %31, %34 : vector<8x8xf32>
    %36 = vector.extract_strided_slice %20 {offsets = [0, 0], sizes = [8, 8], strides = [1, 1]} : vector<8x32xf32> to vector<8x8xf32>
    %cst_26 = arith.constant dense<0.000000e+00> : vector<8x8xf32>
    %37 = tpu.matmul %35, %36, %cst_26 {dimension_numbers = #tpu.dot_dimension_numbers<[1], [0], [0], [1], [0, 0, 1, 1], [], []>} : vector<8x8xf32>, vector<8x8xf32>, vector<8x8xf32> -> vector<8x8xf32>
    %c0_27 = arith.constant 0 : index
    %c0_28 = arith.constant 0 : index
    %38 = vector.load %arg17[%c0_27, %c0_28] : memref<8x32xf32, #tpu.memory_space<vmem>>, vector<8x8xf32>
    tpu.vector_store %arg17[%c0_27, %c0_28], %37 {strides = array<i32>} : memref<8x32xf32, #tpu.memory_space<vmem>>, vector<8x8xf32>,
    %39 = vector.extract_strided_slice %22 {offsets = [0, 8], sizes = [8, 8], strides = [1, 1]} : vector<8x32xf32> to vector<8x8xf32>
    %40 = vector.extract_strided_slice %15 {offsets = [0, 8], sizes = [8, 8], strides = [1, 1]} : vector<8x32xf32> to vector<8x8xf32>
    %cst_29 = arith.constant dense<0.000000e+00> : vector<8x8xf32>
    %41 = tpu.matmul %39, %40, %cst_29 {dimension_numbers = #tpu.dot_dimension_numbers<[1], [1], [0], [0], [0, 0, 1, 0], [], []>} : vector<8x8xf32>, vector<8x8xf32>, vector<8x8xf32> -> vector<8x8xf32>
    %42 = arith.addf %41, %5 : vector<8x8xf32>
    %cst_30 = arith.constant dense<0xFF800000> : vector<8xf32>
    %43 = vector.multi_reduction <maximumf>, %42, %cst_30 [1] : vector<8x8xf32> to vector<8xf32>
    %44 = vector.shape_cast %43 : vector<8xf32> to vector<8x1xf32>
    %45 = vector.broadcast %44 : vector<8x1xf32> to vector<8x8xf32>
    %46 = arith.subf %42, %45 : vector<8x8xf32>
    %47 = math.exp %46 : vector<8x8xf32>
    %cst_31 = arith.constant dense<0.000000e+00> : vector<8xf32>
    %48 = vector.multi_reduction <add>, %47, %cst_31 [1] : vector<8x8xf32> to vector<8xf32>
    %49 = vector.shape_cast %48 : vector<8xf32> to vector<8x1xf32>
    %50 = vector.broadcast %49 : vector<8x1xf32> to vector<8x8xf32>
    %51 = arith.divf %47, %50 : vector<8x8xf32>
    %52 = vector.extract_strided_slice %20 {offsets = [0, 8], sizes = [8, 8], strides = [1, 1]} : vector<8x32xf32> to vector<8x8xf32>
    %cst_32 = arith.constant dense<0.000000e+00> : vector<8x8xf32>
    %53 = tpu.matmul %51, %52, %cst_32 {dimension_numbers = #tpu.dot_dimension_numbers<[1], [0], [0], [1], [0, 0, 1, 1], [], []>} : vector<8x8xf32>, vector<8x8xf32>, vector<8x8xf32> -> vector<8x8xf32>
    %c0_33 = arith.constant 0 : index
    %c8 = arith.constant 8 : index
    %54 = vector.load %arg17[%c0_33, %c8] : memref<8x32xf32, #tpu.memory_space<vmem>>, vector<8x8xf32>
    tpu.vector_store %arg17[%c0_33, %c8], %53 {strides = array<i32>} : memref<8x32xf32, #tpu.memory_space<vmem>>, vector<8x8xf32>,
    %55 = vector.extract_strided_slice %22 {offsets = [0, 16], sizes = [8, 8], strides = [1, 1]} : vector<8x32xf32> to vector<8x8xf32>
    %56 = vector.extract_strided_slice %15 {offsets = [0, 16], sizes = [8, 8], strides = [1, 1]} : vector<8x32xf32> to vector<8x8xf32>
    %cst_34 = arith.constant dense<0.000000e+00> : vector<8x8xf32>
    %57 = tpu.matmul %55, %56, %cst_34 {dimension_numbers = #tpu.dot_dimension_numbers<[1], [1], [0], [0], [0, 0, 1, 0], [], []>} : vector<8x8xf32>, vector<8x8xf32>, vector<8x8xf32> -> vector<8x8xf32>
    %58 = arith.addf %57, %5 : vector<8x8xf32>
    %cst_35 = arith.constant dense<0xFF800000> : vector<8xf32>
    %59 = vector.multi_reduction <maximumf>, %58, %cst_35 [1] : vector<8x8xf32> to vector<8xf32>
    %60 = vector.shape_cast %59 : vector<8xf32> to vector<8x1xf32>
    %61 = vector.broadcast %60 : vector<8x1xf32> to vector<8x8xf32>
    %62 = arith.subf %58, %61 : vector<8x8xf32>
    %63 = math.exp %62 : vector<8x8xf32>
    %cst_36 = arith.constant dense<0.000000e+00> : vector<8xf32>
    %64 = vector.multi_reduction <add>, %63, %cst_36 [1] : vector<8x8xf32> to vector<8xf32>
    %65 = vector.shape_cast %64 : vector<8xf32> to vector<8x1xf32>
    %66 = vector.broadcast %65 : vector<8x1xf32> to vector<8x8xf32>
    %67 = arith.divf %63, %66 : vector<8x8xf32>
    %68 = vector.extract_strided_slice %20 {offsets = [0, 16], sizes = [8, 8], strides = [1, 1]} : vector<8x32xf32> to vector<8x8xf32>
    %cst_37 = arith.constant dense<0.000000e+00> : vector<8x8xf32>
    %69 = tpu.matmul %67, %68, %cst_37 {dimension_numbers = #tpu.dot_dimension_numbers<[1], [0], [0], [1], [0, 0, 1, 1], [], []>} : vector<8x8xf32>, vector<8x8xf32>, vector<8x8xf32> -> vector<8x8xf32>
    %c0_38 = arith.constant 0 : index
    %c16 = arith.constant 16 : index
    %70 = vector.load %arg17[%c0_38, %c16] : memref<8x32xf32, #tpu.memory_space<vmem>>, vector<8x8xf32>
    tpu.vector_store %arg17[%c0_38, %c16], %69 {strides = array<i32>} : memref<8x32xf32, #tpu.memory_space<vmem>>, vector<8x8xf32>,
    %71 = vector.extract_strided_slice %22 {offsets = [0, 24], sizes = [8, 8], strides = [1, 1]} : vector<8x32xf32> to vector<8x8xf32>
    %72 = vector.extract_strided_slice %15 {offsets = [0, 24], sizes = [8, 8], strides = [1, 1]} : vector<8x32xf32> to vector<8x8xf32>
    %cst_39 = arith.constant dense<0.000000e+00> : vector<8x8xf32>
    %73 = tpu.matmul %71, %72, %cst_39 {dimension_numbers = #tpu.dot_dimension_numbers<[1], [1], [0], [0], [0, 0, 1, 0], [], []>} : vector<8x8xf32>, vector<8x8xf32>, vector<8x8xf32> -> vector<8x8xf32>
    %74 = arith.addf %73, %5 : vector<8x8xf32>
    %cst_40 = arith.constant dense<0xFF800000> : vector<8xf32>
    %75 = vector.multi_reduction <maximumf>, %74, %cst_40 [1] : vector<8x8xf32> to vector<8xf32>
    %76 = vector.shape_cast %75 : vector<8xf32> to vector<8x1xf32>
    %77 = vector.broadcast %76 : vector<8x1xf32> to vector<8x8xf32>
    %78 = arith.subf %74, %77 : vector<8x8xf32>
    %79 = math.exp %78 : vector<8x8xf32>
    %cst_41 = arith.constant dense<0.000000e+00> : vector<8xf32>
    %80 = vector.multi_reduction <add>, %79, %cst_41 [1] : vector<8x8xf32> to vector<8xf32>
    %81 = vector.shape_cast %80 : vector<8xf32> to vector<8x1xf32>
    %82 = vector.broadcast %81 : vector<8x1xf32> to vector<8x8xf32>
    %83 = arith.divf %79, %82 : vector<8x8xf32>
    %84 = vector.extract_strided_slice %20 {offsets = [0, 24], sizes = [8, 8], strides = [1, 1]} : vector<8x32xf32> to vector<8x8xf32>
    %cst_42 = arith.constant dense<0.000000e+00> : vector<8x8xf32>
    %85 = tpu.matmul %83, %84, %cst_42 {dimension_numbers = #tpu.dot_dimension_numbers<[1], [0], [0], [1], [0, 0, 1, 1], [], []>} : vector<8x8xf32>, vector<8x8xf32>, vector<8x8xf32> -> vector<8x8xf32>
    %c0_43 = arith.constant 0 : index
    %c24 = arith.constant 24 : index
    %86 = vector.load %arg17[%c0_43, %c24] : memref<8x32xf32, #tpu.memory_space<vmem>>, vector<8x8xf32>
    tpu.vector_store %arg17[%c0_43, %c24], %85 {strides = array<i32>} : memref<8x32xf32, #tpu.memory_space<vmem>>, vector<8x8xf32>,
    %c0_44 = arith.constant 0 : index
    %c0_45 = arith.constant 0 : index
    %87 = vector.load %arg17[%c0_44, %c0_45] : memref<8x32xf32, #tpu.memory_space<vmem>>, vector<8x32xf32>
    %c0_46 = arith.constant 0 : index
    %c0_47 = arith.constant 0 : index
    %88 = vector.load %arg10[%c0_46, %c0_47] : memref<32x32xf32, #tpu.memory_space<vmem>>, vector<32x32xf32>
    %cst_48 = arith.constant dense<0.000000e+00> : vector<8x32xf32>
    %89 = tpu.matmul %87, %88, %cst_48 {dimension_numbers = #tpu.dot_dimension_numbers<[1], [0], [0], [1], [0, 0, 1, 1], [], []>} : vector<8x32xf32>, vector<32x32xf32>, vector<8x32xf32> -> vector<8x32xf32>
    %c0_49 = arith.constant 0 : index
    %c0_50 = arith.constant 0 : index
    %90 = vector.load %arg11[%c0_49, %c0_50] : memref<1x32xf32, #tpu.memory_space<vmem>>, vector<1x32xf32>
    %91 = vector.broadcast %90 : vector<1x32xf32> to vector<8x32xf32>
    %92 = arith.addf %89, %91 : vector<8x32xf32>
    %93 = arith.addf %92, %1 : vector<8x32xf32>
    %c0_51 = arith.constant 0 : index
    %c0_52 = arith.constant 0 : index
    %94 = vector.load %arg12[%c0_51, %c0_52] : memref<1x32xf32, #tpu.memory_space<vmem>>, vector<1x32xf32>
    %c0_53 = arith.constant 0 : index
    %c0_54 = arith.constant 0 : index
    %95 = vector.load %arg13[%c0_53, %c0_54] : memref<1x32xf32, #tpu.memory_space<vmem>>, vector<1x32xf32>
    %cst_55 = arith.constant dense<0.000000e+00> : vector<8xf32>
    %96 = vector.multi_reduction <add>, %93, %cst_55 [1] : vector<8x32xf32> to vector<8xf32>
    %97 = vector.shape_cast %96 : vector<8xf32> to vector<8x1xf32>
    %cst_56 = arith.constant 3.125000e-02 : f32
    %98 = vector.broadcast %cst_56 : f32 to vector<8x1xf32>
    %99 = arith.mulf %97, %98 : vector<8x1xf32>
    %100 = vector.broadcast %99 : vector<8x1xf32> to vector<8x32xf32>
    %101 = arith.subf %93, %100 : vector<8x32xf32>
    %102 = arith.mulf %101, %101 : vector<8x32xf32>
    %cst_57 = arith.constant dense<0.000000e+00> : vector<8xf32>
    %103 = vector.multi_reduction <add>, %102, %cst_57 [1] : vector<8x32xf32> to vector<8xf32>
    %104 = vector.shape_cast %103 : vector<8xf32> to vector<8x1xf32>
    %cst_58 = arith.constant 3.125000e-02 : f32
    %105 = vector.broadcast %cst_58 : f32 to vector<8x1xf32>
    %106 = arith.mulf %104, %105 : vector<8x1xf32>
    %cst_59 = arith.constant 9.99999974E-6 : f32
    %107 = vector.broadcast %cst_59 : f32 to vector<8x1xf32>
    %108 = arith.addf %106, %107 : vector<8x1xf32>
    %109 = math.rsqrt %108 : vector<8x1xf32>
    %110 = vector.broadcast %109 : vector<8x1xf32> to vector<8x32xf32>
    %111 = arith.mulf %101, %110 : vector<8x32xf32>
    %112 = vector.broadcast %94 : vector<1x32xf32> to vector<8x32xf32>
    %113 = arith.mulf %111, %112 : vector<8x32xf32>
    %114 = vector.broadcast %95 : vector<1x32xf32> to vector<8x32xf32>
    %115 = arith.addf %113, %114 : vector<8x32xf32>
    %116 = arith.addf %1, %115 : vector<8x32xf32>
    %c0_60 = arith.constant 0 : index
    %c0_61 = arith.constant 0 : index
    %117 = vector.load %arg14[%c0_60, %c0_61] : memref<1x32xf32, #tpu.memory_space<vmem>>, vector<1x32xf32>
    %c0_62 = arith.constant 0 : index
    %c0_63 = arith.constant 0 : index
    %118 = vector.load %arg15[%c0_62, %c0_63] : memref<1x32xf32, #tpu.memory_space<vmem>>, vector<1x32xf32>
    %cst_64 = arith.constant dense<0.000000e+00> : vector<8xf32>
    %119 = vector.multi_reduction <add>, %116, %cst_64 [1] : vector<8x32xf32> to vector<8xf32>
    %120 = vector.shape_cast %119 : vector<8xf32> to vector<8x1xf32>
    %cst_65 = arith.constant 3.125000e-02 : f32
    %121 = vector.broadcast %cst_65 : f32 to vector<8x1xf32>
    %122 = arith.mulf %120, %121 : vector<8x1xf32>
    %123 = vector.broadcast %122 : vector<8x1xf32> to vector<8x32xf32>
    %124 = arith.subf %116, %123 : vector<8x32xf32>
    %125 = arith.mulf %124, %124 : vector<8x32xf32>
    %cst_66 = arith.constant dense<0.000000e+00> : vector<8xf32>
    %126 = vector.multi_reduction <add>, %125, %cst_66 [1] : vector<8x32xf32> to vector<8xf32>
    %127 = vector.shape_cast %126 : vector<8xf32> to vector<8x1xf32>
    %cst_67 = arith.constant 3.125000e-02 : f32
    %128 = vector.broadcast %cst_67 : f32 to vector<8x1xf32>
    %129 = arith.mulf %127, %128 : vector<8x1xf32>
    %cst_68 = arith.constant 9.99999974E-6 : f32
    %130 = vector.broadcast %cst_68 : f32 to vector<8x1xf32>
    %131 = arith.addf %129, %130 : vector<8x1xf32>
    %132 = math.rsqrt %131 : vector<8x1xf32>
    %133 = vector.broadcast %132 : vector<8x1xf32> to vector<8x32xf32>
    %134 = arith.mulf %124, %133 : vector<8x32xf32>
    %135 = vector.broadcast %117 : vector<1x32xf32> to vector<8x32xf32>
    %136 = arith.mulf %134, %135 : vector<8x32xf32>
    %137 = vector.broadcast %118 : vector<1x32xf32> to vector<8x32xf32>
    %138 = arith.addf %136, %137 : vector<8x32xf32>
    %c0_69 = arith.constant 0 : index
    %c0_70 = arith.constant 0 : index
    %c0_71 = arith.constant 0 : index
    %139 = vector.load %arg16[%c0_69, %c0_70, %c0_71] : memref<1x8x32xf32, #tpu.memory_space<vmem>>, vector<1x8x32xf32>
    %140 = vector.shape_cast %139 : vector<1x8x32xf32> to vector<8x32xf32>
    %141 = vector.shape_cast %138 : vector<8x32xf32> to vector<1x8x32xf32>
    tpu.vector_store %arg16[%c0_69, %c0_70, %c0_71], %141 {strides = array<i32>} : memref<1x8x32xf32, #tpu.memory_space<vmem>>, vector<1x8x32xf32>,
    return
  }
  func.func @transform_0(%arg0: i32) -> (i32, i32, i32) {
    %c0_i32 = arith.constant 0 : i32
    %c0_i32_0 = arith.constant 0 : i32
    %c0_i32_1 = arith.constant 0 : i32
    return %arg0, %c0_i32, %c0_i32_0 : i32, i32, i32
  }
  func.func @transform_1(%arg0: i32) -> (i32, i32, i32) {
    %c0_i32 = arith.constant 0 : i32
    %c0_i32_0 = arith.constant 0 : i32
    %c0_i32_1 = arith.constant 0 : i32
    return %arg0, %c0_i32, %c0_i32_0 : i32, i32, i32
  }
  func.func @transform_2(%arg0: i32) -> (i32, i32, i32) {
    %c0_i32 = arith.constant 0 : i32
    %c0_i32_0 = arith.constant 0 : i32
    %c0_i32_1 = arith.constant 0 : i32
    return %arg0, %c0_i32, %c0_i32_0 : i32, i32, i32
  }
  func.func @transform_3(%arg0: i32) -> (i32, i32) {
    %c0_i32 = arith.constant 0 : i32
    %c0_i32_0 = arith.constant 0 : i32
    %c0_i32_1 = arith.constant 0 : i32
    return %c0_i32, %c0_i32_0 : i32, i32
  }
  func.func @transform_4(%arg0: i32) -> (i32, i32) {
    %c0_i32 = arith.constant 0 : i32
    %c0_i32_0 = arith.constant 0 : i32
    %c0_i32_1 = arith.constant 0 : i32
    return %c0_i32, %c0_i32_0 : i32, i32
  }
  func.func @transform_5(%arg0: i32) -> (i32, i32) {
    %c0_i32 = arith.constant 0 : i32
    %c0_i32_0 = arith.constant 0 : i32
    %c0_i32_1 = arith.constant 0 : i32
    return %c0_i32, %c0_i32_0 : i32, i32
  }
  func.func @transform_6(%arg0: i32) -> (i32, i32) {
    %c0_i32 = arith.constant 0 : i32
    %c0_i32_0 = arith.constant 0 : i32
    %c0_i32_1 = arith.constant 0 : i32
    return %c0_i32, %c0_i32_0 : i32, i32
  }
  func.func @transform_7(%arg0: i32) -> (i32, i32) {
    %c0_i32 = arith.constant 0 : i32
    %c0_i32_0 = arith.constant 0 : i32
    %c0_i32_1 = arith.constant 0 : i32
    return %c0_i32, %c0_i32_0 : i32, i32
  }
  func.func @transform_8(%arg0: i32) -> (i32, i32) {
    %c0_i32 = arith.constant 0 : i32
    %c0_i32_0 = arith.constant 0 : i32
    %c0_i32_1 = arith.constant 0 : i32
    return %c0_i32, %c0_i32_0 : i32, i32
  }
  func.func @transform_9(%arg0: i32) -> (i32, i32) {
    %c0_i32 = arith.constant 0 : i32
    %c0_i32_0 = arith.constant 0 : i32
    %c0_i32_1 = arith.constant 0 : i32
    return %c0_i32, %c0_i32_0 : i32, i32
  }
  func.func @transform_10(%arg0: i32) -> (i32, i32) {
    %c0_i32 = arith.constant 0 : i32
    %c0_i32_0 = arith.constant 0 : i32
    %c0_i32_1 = arith.constant 0 : i32
    return %c0_i32, %c0_i32_0 : i32, i32
  }
  func.func @transform_11(%arg0: i32) -> (i32, i32) {
    %c0_i32 = arith.constant 0 : i32
    %c0_i32_0 = arith.constant 0 : i32
    %c0_i32_1 = arith.constant 0 : i32
    return %c0_i32, %c0_i32_0 : i32, i32
  }
  func.func @transform_12(%arg0: i32) -> (i32, i32) {
    %c0_i32 = arith.constant 0 : i32
    %c0_i32_0 = arith.constant 0 : i32
    %c0_i32_1 = arith.constant 0 : i32
    return %c0_i32, %c0_i32_0 : i32, i32
  }
  func.func @transform_13(%arg0: i32) -> (i32, i32) {
    %c0_i32 = arith.constant 0 : i32
    %c0_i32_0 = arith.constant 0 : i32
    %c0_i32_1 = arith.constant 0 : i32
    return %c0_i32, %c0_i32_0 : i32, i32
  }
  func.func @transform_14(%arg0: i32) -> (i32, i32) {
    %c0_i32 = arith.constant 0 : i32
    %c0_i32_0 = arith.constant 0 : i32
    %c0_i32_1 = arith.constant 0 : i32
    return %c0_i32, %c0_i32_0 : i32, i32
  }
  func.func @transform_15(%arg0: i32) -> (i32, i32, i32) {
    %c0_i32 = arith.constant 0 : i32
    %c0_i32_0 = arith.constant 0 : i32
    %c0_i32_1 = arith.constant 0 : i32
    return %arg0, %c0_i32, %c0_i32_0 : i32, i32, i32
  }
}

module attributes {stable_mosaic.version = 11 : i64} {
  func.func @_mha_kernel(%arg0: i32, %arg1: memref<1x8x32xf32, #tpu.memory_space<vmem>>, %arg2: memref<1x12x32xf32, #tpu.memory_space<vmem>>, %arg3: memref<1x8x12xf32, #tpu.memory_space<vmem>>, %arg4: memref<32x32xf32, #tpu.memory_space<vmem>>, %arg5: memref<1x32xf32, #tpu.memory_space<vmem>>, %arg6: memref<32x32xf32, #tpu.memory_space<vmem>>, %arg7: memref<1x32xf32, #tpu.memory_space<vmem>>, %arg8: memref<32x32xf32, #tpu.memory_space<vmem>>, %arg9: memref<1x32xf32, #tpu.memory_space<vmem>>, %arg10: memref<32x32xf32, #tpu.memory_space<vmem>>, %arg11: memref<1x32xf32, #tpu.memory_space<vmem>>, %arg12: memref<1x32xf32, #tpu.memory_space<vmem>>, %arg13: memref<1x32xf32, #tpu.memory_space<vmem>>, %arg14: memref<1x32xf32, #tpu.memory_space<vmem>>, %arg15: memref<1x32xf32, #tpu.memory_space<vmem>>, %arg16: memref<1x8x32xf32, #tpu.memory_space<vmem>>, %arg17: memref<8x32xf32, #tpu.memory_space<vmem>>) attributes {dimension_semantics = [#tpu.dimension_semantics<parallel>], iteration_bounds = array<i64: 2>, scalar_prefetch = 0 : i64, scratch_operands = 1 : i64, tpu.core_type = #tpu.core_type<tc>, window_params = [{transform_indices = @transform_0, window_bounds = array<i64: 1, 8, 32>}, {transform_indices = @transform_1, window_bounds = array<i64: 1, 12, 32>}, {transform_indices = @transform_2, window_bounds = array<i64: 1, 8, 12>}, {pipeline_mode = #tpu.pipeline_mode<synchronous>, transform_indices = @transform_3, window_bounds = array<i64: 32, 32>}, {pipeline_mode = #tpu.pipeline_mode<synchronous>, transform_indices = @transform_4, window_bounds = array<i64: 1, 32>}, {pipeline_mode = #tpu.pipeline_mode<synchronous>, transform_indices = @transform_5, window_bounds = array<i64: 32, 32>}, {pipeline_mode = #tpu.pipeline_mode<synchronous>, transform_indices = @transform_6, window_bounds = array<i64: 1, 32>}, {pipeline_mode = #tpu.pipeline_mode<synchronous>, transform_indices = @transform_7, window_bounds = array<i64: 32, 32>}, {pipeline_mode = #tpu.pipeline_mode<synchronous>, transform_indices = @transform_8, window_bounds = array<i64: 1, 32>}, {pipeline_mode = #tpu.pipeline_mode<synchronous>, transform_indices = @transform_9, window_bounds = array<i64: 32, 32>}, {pipeline_mode = #tpu.pipeline_mode<synchronous>, transform_indices = @transform_10, window_bounds = array<i64: 1, 32>}, {pipeline_mode = #tpu.pipeline_mode<synchronous>, transform_indices = @transform_11, window_bounds = array<i64: 1, 32>}, {pipeline_mode = #tpu.pipeline_mode<synchronous>, transform_indices = @transform_12, window_bounds = array<i64: 1, 32>}, {pipeline_mode = #tpu.pipeline_mode<synchronous>, transform_indices = @transform_13, window_bounds = array<i64: 1, 32>}, {pipeline_mode = #tpu.pipeline_mode<synchronous>, transform_indices = @transform_14, window_bounds = array<i64: 1, 32>}, {transform_indices = @transform_15, window_bounds = array<i64: 1, 8, 32>}]} {
    %c0 = arith.constant 0 : index
    %c0_0 = arith.constant 0 : index
    %c0_1 = arith.constant 0 : index
    %0 = vector.load %arg1[%c0, %c0_0, %c0_1] : memref<1x8x32xf32, #tpu.memory_space<vmem>>, vector<1x8x32xf32>
    %1 = vector.shape_cast %0 : vector<1x8x32xf32> to vector<8x32xf32>
    %c0_2 = arith.constant 0 : index
    %c0_3 = arith.constant 0 : index
    %c0_4 = arith.constant 0 : index
    %2 = vector.load %arg2[%c0_2, %c0_3, %c0_4] : memref<1x12x32xf32, #tpu.memory_space<vmem>>, vector<1x12x32xf32>
    %3 = vector.shape_cast %2 : vector<1x12x32xf32> to vector<12x32xf32>
    %c0_5 = arith.constant 0 : index
    %c0_6 = arith.constant 0 : index
    %c0_7 = arith.constant 0 : index
    %4 = vector.load %arg3[%c0_5, %c0_6, %c0_7] : memref<1x8x12xf32, #tpu.memory_space<vmem>>, vector<1x8x12xf32>
    %5 = vector.shape_cast %4 : vector<1x8x12xf32> to vector<8x12xf32>
    %c0_8 = arith.constant 0 : index
    %c0_9 = arith.constant 0 : index
    %6 = vector.load %arg4[%c0_8, %c0_9] : memref<32x32xf32, #tpu.memory_space<vmem>>, vector<32x32xf32>
    %cst = arith.constant dense<0.000000e+00> : vector<8x32xf32>
    %7 = tpu.matmul %1, %6, %cst {dimension_numbers = #tpu.dot_dimension_numbers<[1], [0], [0], [1], [0, 0, 1, 1], [], []>} : vector<8x32xf32>, vector<32x32xf32>, vector<8x32xf32> -> vector<8x32xf32>
    %c0_10 = arith.constant 0 : index
    %c0_11 = arith.constant 0 : index
    %8 = vector.load %arg5[%c0_10, %c0_11] : memref<1x32xf32, #tpu.memory_space<vmem>>, vector<1x32xf32>
    %9 = vector.broadcast %8 : vector<1x32xf32> to vector<8x32xf32>
    %10 = arith.addf %7, %9 : vector<8x32xf32>
    %c0_12 = arith.constant 0 : index
    %c0_13 = arith.constant 0 : index
    %11 = vector.load %arg6[%c0_12, %c0_13] : memref<32x32xf32, #tpu.memory_space<vmem>>, vector<32x32xf32>
    %cst_14 = arith.constant dense<0.000000e+00> : vector<12x32xf32>
    %12 = tpu.matmul %3, %11, %cst_14 {dimension_numbers = #tpu.dot_dimension_numbers<[1], [0], [0], [1], [0, 0, 1, 1], [], []>} : vector<12x32xf32>, vector<32x32xf32>, vector<12x32xf32> -> vector<12x32xf32>
    %c0_15 = arith.constant 0 : index
    %c0_16 = arith.constant 0 : index
    %13 = vector.load %arg7[%c0_15, %c0_16] : memref<1x32xf32, #tpu.memory_space<vmem>>, vector<1x32xf32>
    %14 = vector.broadcast %13 : vector<1x32xf32> to vector<12x32xf32>
    %15 = arith.addf %12, %14 : vector<12x32xf32>
    %c0_17 = arith.constant 0 : index
    %c0_18 = arith.constant 0 : index
    %16 = vector.load %arg8[%c0_17, %c0_18] : memref<32x32xf32, #tpu.memory_space<vmem>>, vector<32x32xf32>
    %cst_19 = arith.constant dense<0.000000e+00> : vector<12x32xf32>
    %17 = tpu.matmul %3, %16, %cst_19 {dimension_numbers = #tpu.dot_dimension_numbers<[1], [0], [0], [1], [0, 0, 1, 1], [], []>} : vector<12x32xf32>, vector<32x32xf32>, vector<12x32xf32> -> vector<12x32xf32>
    %c0_20 = arith.constant 0 : index
    %c0_21 = arith.constant 0 : index
    %18 = vector.load %arg9[%c0_20, %c0_21] : memref<1x32xf32, #tpu.memory_space<vmem>>, vector<1x32xf32>
    %19 = vector.broadcast %18 : vector<1x32xf32> to vector<12x32xf32>
    %20 = arith.addf %17, %19 : vector<12x32xf32>
    %cst_22 = arith.constant 0.353553385 : f32
    %21 = vector.broadcast %cst_22 : f32 to vector<8x32xf32>
    %22 = arith.mulf %10, %21 : vector<8x32xf32>
    %23 = vector.extract_strided_slice %22 {offsets = [0, 0], sizes = [8, 8], strides = [1, 1]} : vector<8x32xf32> to vector<8x8xf32>
    %24 = vector.extract_strided_slice %15 {offsets = [0, 0], sizes = [12, 8], strides = [1, 1]} : vector<12x32xf32> to vector<12x8xf32>
    %cst_23 = arith.constant dense<0.000000e+00> : vector<8x12xf32>
    %25 = tpu.matmul %23, %24, %cst_23 {dimension_numbers = #tpu.dot_dimension_numbers<[1], [1], [0], [0], [0, 0, 1, 0], [], []>} : vector<8x8xf32>, vector<12x8xf32>, vector<8x12xf32> -> vector<8x12xf32>
    %26 = arith.addf %25, %5 : vector<8x12xf32>
    %cst_24 = arith.constant dense<0xFF800000> : vector<8xf32>
    %27 = vector.multi_reduction <maximumf>, %26, %cst_24 [1] : vector<8x12xf32> to vector<8xf32>
    %28 = vector.shape_cast %27 : vector<8xf32> to vector<8x1xf32>
    %29 = vector.broadcast %28 : vector<8x1xf32> to vector<8x12xf32>
    %30 = arith.subf %26, %29 : vector<8x12xf32>
    %31 = math.exp %30 : vector<8x12xf32>
    %cst_25 = arith.constant dense<0.000000e+00> : vector<8xf32>
    %32 = vector.multi_reduction <add>, %31, %cst_25 [1] : vector<8x12xf32> to vector<8xf32>
    %33 = vector.shape_cast %32 : vector<8xf32> to vector<8x1xf32>
    %34 = vector.broadcast %33 : vector<8x1xf32> to vector<8x12xf32>
    %35 = arith.divf %31, %34 : vector<8x12xf32>
    %36 = vector.extract_strided_slice %20 {offsets = [0, 0], sizes = [12, 8], strides = [1, 1]} : vector<12x32xf32> to vector<12x8xf32>
    %cst_26 = arith.constant dense<0.000000e+00> : vector<8x8xf32>
    %37 = tpu.matmul %35, %36, %cst_26 {dimension_numbers = #tpu.dot_dimension_numbers<[1], [0], [0], [1], [0, 0, 1, 1], [], []>} : vector<8x12xf32>, vector<12x8xf32>, vector<8x8xf32> -> vector<8x8xf32>
    %c0_27 = arith.constant 0 : index
    %c0_28 = arith.constant 0 : index
    %38 = vector.load %arg17[%c0_27, %c0_28] : memref<8x32xf32, #tpu.memory_space<vmem>>, vector<8x8xf32>
    tpu.vector_store %arg17[%c0_27, %c0_28], %37 {strides = array<i32>} : memref<8x32xf32, #tpu.memory_space<vmem>>, vector<8x8xf32>,
    %39 = vector.extract_strided_slice %22 {offsets = [0, 8], sizes = [8, 8], strides = [1, 1]} : vector<8x32xf32> to vector<8x8xf32>
    %40 = vector.extract_strided_slice %15 {offsets = [0, 8], sizes = [12, 8], strides = [1, 1]} : vector<12x32xf32> to vector<12x8xf32>
    %cst_29 = arith.constant dense<0.000000e+00> : vector<8x12xf32>
    %41 = tpu.matmul %39, %40, %cst_29 {dimension_numbers = #tpu.dot_dimension_numbers<[1], [1], [0], [0], [0, 0, 1, 0], [], []>} : vector<8x8xf32>, vector<12x8xf32>, vector<8x12xf32> -> vector<8x12xf32>
    %42 = arith.addf %41, %5 : vector<8x12xf32>
    %cst_30 = arith.constant dense<0xFF800000> : vector<8xf32>
    %43 = vector.multi_reduction <maximumf>, %42, %cst_30 [1] : vector<8x12xf32> to vector<8xf32>
    %44 = vector.shape_cast %43 : vector<8xf32> to vector<8x1xf32>
    %45 = vector.broadcast %44 : vector<8x1xf32> to vector<8x12xf32>
    %46 = arith.subf %42, %45 : vector<8x12xf32>
    %47 = math.exp %46 : vector<8x12xf32>
    %cst_31 = arith.constant dense<0.000000e+00> : vector<8xf32>
    %48 = vector.multi_reduction <add>, %47, %cst_31 [1] : vector<8x12xf32> to vector<8xf32>
    %49 = vector.shape_cast %48 : vector<8xf32> to vector<8x1xf32>
    %50 = vector.broadcast %49 : vector<8x1xf32> to vector<8x12xf32>
    %51 = arith.divf %47, %50 : vector<8x12xf32>
    %52 = vector.extract_strided_slice %20 {offsets = [0, 8], sizes = [12, 8], strides = [1, 1]} : vector<12x32xf32> to vector<12x8xf32>
    %cst_32 = arith.constant dense<0.000000e+00> : vector<8x8xf32>
    %53 = tpu.matmul %51, %52, %cst_32 {dimension_numbers = #tpu.dot_dimension_numbers<[1], [0], [0], [1], [0, 0, 1, 1], [], []>} : vector<8x12xf32>, vector<12x8xf32>, vector<8x8xf32> -> vector<8x8xf32>
    %c0_33 = arith.constant 0 : index
    %c8 = arith.constant 8 : index
    %54 = vector.load %arg17[%c0_33, %c8] : memref<8x32xf32, #tpu.memory_space<vmem>>, vector<8x8xf32>
    tpu.vector_store %arg17[%c0_33, %c8], %53 {strides = array<i32>} : memref<8x32xf32, #tpu.memory_space<vmem>>, vector<8x8xf32>,
    %55 = vector.extract_strided_slice %22 {offsets = [0, 16], sizes = [8, 8], strides = [1, 1]} : vector<8x32xf32> to vector<8x8xf32>
    %56 = vector.extract_strided_slice %15 {offsets = [0, 16], sizes = [12, 8], strides = [1, 1]} : vector<12x32xf32> to vector<12x8xf32>
    %cst_34 = arith.constant dense<0.000000e+00> : vector<8x12xf32>
    %57 = tpu.matmul %55, %56, %cst_34 {dimension_numbers = #tpu.dot_dimension_numbers<[1], [1], [0], [0], [0, 0, 1, 0], [], []>} : vector<8x8xf32>, vector<12x8xf32>, vector<8x12xf32> -> vector<8x12xf32>
    %58 = arith.addf %57, %5 : vector<8x12xf32>
    %cst_35 = arith.constant dense<0xFF800000> : vector<8xf32>
    %59 = vector.multi_reduction <maximumf>, %58, %cst_35 [1] : vector<8x12xf32> to vector<8xf32>
    %60 = vector.shape_cast %59 : vector<8xf32> to vector<8x1xf32>
    %61 = vector.broadcast %60 : vector<8x1xf32> to vector<8x12xf32>
    %62 = arith.subf %58, %61 : vector<8x12xf32>
    %63 = math.exp %62 : vector<8x12xf32>
    %cst_36 = arith.constant dense<0.000000e+00> : vector<8xf32>
    %64 = vector.multi_reduction <add>, %63, %cst_36 [1] : vector<8x12xf32> to vector<8xf32>
    %65 = vector.shape_cast %64 : vector<8xf32> to vector<8x1xf32>
    %66 = vector.broadcast %65 : vector<8x1xf32> to vector<8x12xf32>
    %67 = arith.divf %63, %66 : vector<8x12xf32>
    %68 = vector.extract_strided_slice %20 {offsets = [0, 16], sizes = [12, 8], strides = [1, 1]} : vector<12x32xf32> to vector<12x8xf32>
    %cst_37 = arith.constant dense<0.000000e+00> : vector<8x8xf32>
    %69 = tpu.matmul %67, %68, %cst_37 {dimension_numbers = #tpu.dot_dimension_numbers<[1], [0], [0], [1], [0, 0, 1, 1], [], []>} : vector<8x12xf32>, vector<12x8xf32>, vector<8x8xf32> -> vector<8x8xf32>
    %c0_38 = arith.constant 0 : index
    %c16 = arith.constant 16 : index
    %70 = vector.load %arg17[%c0_38, %c16] : memref<8x32xf32, #tpu.memory_space<vmem>>, vector<8x8xf32>
    tpu.vector_store %arg17[%c0_38, %c16], %69 {strides = array<i32>} : memref<8x32xf32, #tpu.memory_space<vmem>>, vector<8x8xf32>,
    %71 = vector.extract_strided_slice %22 {offsets = [0, 24], sizes = [8, 8], strides = [1, 1]} : vector<8x32xf32> to vector<8x8xf32>
    %72 = vector.extract_strided_slice %15 {offsets = [0, 24], sizes = [12, 8], strides = [1, 1]} : vector<12x32xf32> to vector<12x8xf32>
    %cst_39 = arith.constant dense<0.000000e+00> : vector<8x12xf32>
    %73 = tpu.matmul %71, %72, %cst_39 {dimension_numbers = #tpu.dot_dimension_numbers<[1], [1], [0], [0], [0, 0, 1, 0], [], []>} : vector<8x8xf32>, vector<12x8xf32>, vector<8x12xf32> -> vector<8x12xf32>
    %74 = arith.addf %73, %5 : vector<8x12xf32>
    %cst_40 = arith.constant dense<0xFF800000> : vector<8xf32>
    %75 = vector.multi_reduction <maximumf>, %74, %cst_40 [1] : vector<8x12xf32> to vector<8xf32>
    %76 = vector.shape_cast %75 : vector<8xf32> to vector<8x1xf32>
    %77 = vector.broadcast %76 : vector<8x1xf32> to vector<8x12xf32>
    %78 = arith.subf %74, %77 : vector<8x12xf32>
    %79 = math.exp %78 : vector<8x12xf32>
    %cst_41 = arith.constant dense<0.000000e+00> : vector<8xf32>
    %80 = vector.multi_reduction <add>, %79, %cst_41 [1] : vector<8x12xf32> to vector<8xf32>
    %81 = vector.shape_cast %80 : vector<8xf32> to vector<8x1xf32>
    %82 = vector.broadcast %81 : vector<8x1xf32> to vector<8x12xf32>
    %83 = arith.divf %79, %82 : vector<8x12xf32>
    %84 = vector.extract_strided_slice %20 {offsets = [0, 24], sizes = [12, 8], strides = [1, 1]} : vector<12x32xf32> to vector<12x8xf32>
    %cst_42 = arith.constant dense<0.000000e+00> : vector<8x8xf32>
    %85 = tpu.matmul %83, %84, %cst_42 {dimension_numbers = #tpu.dot_dimension_numbers<[1], [0], [0], [1], [0, 0, 1, 1], [], []>} : vector<8x12xf32>, vector<12x8xf32>, vector<8x8xf32> -> vector<8x8xf32>
    %c0_43 = arith.constant 0 : index
    %c24 = arith.constant 24 : index
    %86 = vector.load %arg17[%c0_43, %c24] : memref<8x32xf32, #tpu.memory_space<vmem>>, vector<8x8xf32>
    tpu.vector_store %arg17[%c0_43, %c24], %85 {strides = array<i32>} : memref<8x32xf32, #tpu.memory_space<vmem>>, vector<8x8xf32>,
    %c0_44 = arith.constant 0 : index
    %c0_45 = arith.constant 0 : index
    %87 = vector.load %arg17[%c0_44, %c0_45] : memref<8x32xf32, #tpu.memory_space<vmem>>, vector<8x32xf32>
    %c0_46 = arith.constant 0 : index
    %c0_47 = arith.constant 0 : index
    %88 = vector.load %arg10[%c0_46, %c0_47] : memref<32x32xf32, #tpu.memory_space<vmem>>, vector<32x32xf32>
    %cst_48 = arith.constant dense<0.000000e+00> : vector<8x32xf32>
    %89 = tpu.matmul %87, %88, %cst_48 {dimension_numbers = #tpu.dot_dimension_numbers<[1], [0], [0], [1], [0, 0, 1, 1], [], []>} : vector<8x32xf32>, vector<32x32xf32>, vector<8x32xf32> -> vector<8x32xf32>
    %c0_49 = arith.constant 0 : index
    %c0_50 = arith.constant 0 : index
    %90 = vector.load %arg11[%c0_49, %c0_50] : memref<1x32xf32, #tpu.memory_space<vmem>>, vector<1x32xf32>
    %91 = vector.broadcast %90 : vector<1x32xf32> to vector<8x32xf32>
    %92 = arith.addf %89, %91 : vector<8x32xf32>
    %93 = arith.addf %92, %1 : vector<8x32xf32>
    %c0_51 = arith.constant 0 : index
    %c0_52 = arith.constant 0 : index
    %94 = vector.load %arg12[%c0_51, %c0_52] : memref<1x32xf32, #tpu.memory_space<vmem>>, vector<1x32xf32>
    %c0_53 = arith.constant 0 : index
    %c0_54 = arith.constant 0 : index
    %95 = vector.load %arg13[%c0_53, %c0_54] : memref<1x32xf32, #tpu.memory_space<vmem>>, vector<1x32xf32>
    %cst_55 = arith.constant dense<0.000000e+00> : vector<8xf32>
    %96 = vector.multi_reduction <add>, %93, %cst_55 [1] : vector<8x32xf32> to vector<8xf32>
    %97 = vector.shape_cast %96 : vector<8xf32> to vector<8x1xf32>
    %cst_56 = arith.constant 3.125000e-02 : f32
    %98 = vector.broadcast %cst_56 : f32 to vector<8x1xf32>
    %99 = arith.mulf %97, %98 : vector<8x1xf32>
    %100 = vector.broadcast %99 : vector<8x1xf32> to vector<8x32xf32>
    %101 = arith.subf %93, %100 : vector<8x32xf32>
    %102 = arith.mulf %101, %101 : vector<8x32xf32>
    %cst_57 = arith.constant dense<0.000000e+00> : vector<8xf32>
    %103 = vector.multi_reduction <add>, %102, %cst_57 [1] : vector<8x32xf32> to vector<8xf32>
    %104 = vector.shape_cast %103 : vector<8xf32> to vector<8x1xf32>
    %cst_58 = arith.constant 3.125000e-02 : f32
    %105 = vector.broadcast %cst_58 : f32 to vector<8x1xf32>
    %106 = arith.mulf %104, %105 : vector<8x1xf32>
    %cst_59 = arith.constant 9.99999974E-6 : f32
    %107 = vector.broadcast %cst_59 : f32 to vector<8x1xf32>
    %108 = arith.addf %106, %107 : vector<8x1xf32>
    %109 = math.rsqrt %108 : vector<8x1xf32>
    %110 = vector.broadcast %109 : vector<8x1xf32> to vector<8x32xf32>
    %111 = arith.mulf %101, %110 : vector<8x32xf32>
    %112 = vector.broadcast %94 : vector<1x32xf32> to vector<8x32xf32>
    %113 = arith.mulf %111, %112 : vector<8x32xf32>
    %114 = vector.broadcast %95 : vector<1x32xf32> to vector<8x32xf32>
    %115 = arith.addf %113, %114 : vector<8x32xf32>
    %116 = arith.addf %1, %115 : vector<8x32xf32>
    %c0_60 = arith.constant 0 : index
    %c0_61 = arith.constant 0 : index
    %117 = vector.load %arg14[%c0_60, %c0_61] : memref<1x32xf32, #tpu.memory_space<vmem>>, vector<1x32xf32>
    %c0_62 = arith.constant 0 : index
    %c0_63 = arith.constant 0 : index
    %118 = vector.load %arg15[%c0_62, %c0_63] : memref<1x32xf32, #tpu.memory_space<vmem>>, vector<1x32xf32>
    %cst_64 = arith.constant dense<0.000000e+00> : vector<8xf32>
    %119 = vector.multi_reduction <add>, %116, %cst_64 [1] : vector<8x32xf32> to vector<8xf32>
    %120 = vector.shape_cast %119 : vector<8xf32> to vector<8x1xf32>
    %cst_65 = arith.constant 3.125000e-02 : f32
    %121 = vector.broadcast %cst_65 : f32 to vector<8x1xf32>
    %122 = arith.mulf %120, %121 : vector<8x1xf32>
    %123 = vector.broadcast %122 : vector<8x1xf32> to vector<8x32xf32>
    %124 = arith.subf %116, %123 : vector<8x32xf32>
    %125 = arith.mulf %124, %124 : vector<8x32xf32>
    %cst_66 = arith.constant dense<0.000000e+00> : vector<8xf32>
    %126 = vector.multi_reduction <add>, %125, %cst_66 [1] : vector<8x32xf32> to vector<8xf32>
    %127 = vector.shape_cast %126 : vector<8xf32> to vector<8x1xf32>
    %cst_67 = arith.constant 3.125000e-02 : f32
    %128 = vector.broadcast %cst_67 : f32 to vector<8x1xf32>
    %129 = arith.mulf %127, %128 : vector<8x1xf32>
    %cst_68 = arith.constant 9.99999974E-6 : f32
    %130 = vector.broadcast %cst_68 : f32 to vector<8x1xf32>
    %131 = arith.addf %129, %130 : vector<8x1xf32>
    %132 = math.rsqrt %131 : vector<8x1xf32>
    %133 = vector.broadcast %132 : vector<8x1xf32> to vector<8x32xf32>
    %134 = arith.mulf %124, %133 : vector<8x32xf32>
    %135 = vector.broadcast %117 : vector<1x32xf32> to vector<8x32xf32>
    %136 = arith.mulf %134, %135 : vector<8x32xf32>
    %137 = vector.broadcast %118 : vector<1x32xf32> to vector<8x32xf32>
    %138 = arith.addf %136, %137 : vector<8x32xf32>
    %c0_69 = arith.constant 0 : index
    %c0_70 = arith.constant 0 : index
    %c0_71 = arith.constant 0 : index
    %139 = vector.load %arg16[%c0_69, %c0_70, %c0_71] : memref<1x8x32xf32, #tpu.memory_space<vmem>>, vector<1x8x32xf32>
    %140 = vector.shape_cast %139 : vector<1x8x32xf32> to vector<8x32xf32>
    %141 = vector.shape_cast %138 : vector<8x32xf32> to vector<1x8x32xf32>
    tpu.vector_store %arg16[%c0_69, %c0_70, %c0_71], %141 {strides = array<i32>} : memref<1x8x32xf32, #tpu.memory_space<vmem>>, vector<1x8x32xf32>,
    return
  }
  func.func @transform_0(%arg0: i32) -> (i32, i32, i32) {
    %c0_i32 = arith.constant 0 : i32
    %c0_i32_0 = arith.constant 0 : i32
    %c0_i32_1 = arith.constant 0 : i32
    return %arg0, %c0_i32, %c0_i32_0 : i32, i32, i32
  }
  func.func @transform_1(%arg0: i32) -> (i32, i32, i32) {
    %c0_i32 = arith.constant 0 : i32
    %c0_i32_0 = arith.constant 0 : i32
    %c0_i32_1 = arith.constant 0 : i32
    return %arg0, %c0_i32, %c0_i32_0 : i32, i32, i32
  }
  func.func @transform_2(%arg0: i32) -> (i32, i32, i32) {
    %c0_i32 = arith.constant 0 : i32
    %c0_i32_0 = arith.constant 0 : i32
    %c0_i32_1 = arith.constant 0 : i32
    return %arg0, %c0_i32, %c0_i32_0 : i32, i32, i32
  }
  func.func @transform_3(%arg0: i32) -> (i32, i32) {
    %c0_i32 = arith.constant 0 : i32
    %c0_i32_0 = arith.constant 0 : i32
    %c0_i32_1 = arith.constant 0 : i32
    return %c0_i32, %c0_i32_0 : i32, i32
  }
  func.func @transform_4(%arg0: i32) -> (i32, i32) {
    %c0_i32 = arith.constant 0 : i32
    %c0_i32_0 = arith.constant 0 : i32
    %c0_i32_1 = arith.constant 0 : i32
    return %c0_i32, %c0_i32_0 : i32, i32
  }
  func.func @transform_5(%arg0: i32) -> (i32, i32) {
    %c0_i32 = arith.constant 0 : i32
    %c0_i32_0 = arith.constant 0 : i32
    %c0_i32_1 = arith.constant 0 : i32
    return %c0_i32, %c0_i32_0 : i32, i32
  }
  func.func @transform_6(%arg0: i32) -> (i32, i32) {
    %c0_i32 = arith.constant 0 : i32
    %c0_i32_0 = arith.constant 0 : i32
    %c0_i32_1 = arith.constant 0 : i32
    return %c0_i32, %c0_i32_0 : i32, i32
  }
  func.func @transform_7(%arg0: i32) -> (i32, i32) {
    %c0_i32 = arith.constant 0 : i32
    %c0_i32_0 = arith.constant 0 : i32
    %c0_i32_1 = arith.constant 0 : i32
    return %c0_i32, %c0_i32_0 : i32, i32
  }
  func.func @transform_8(%arg0: i32) -> (i32, i32) {
    %c0_i32 = arith.constant 0 : i32
    %c0_i32_0 = arith.constant 0 : i32
    %c0_i32_1 = arith.constant 0 : i32
    return %c0_i32, %c0_i32_0 : i32, i32
  }
  func.func @transform_9(%arg0: i32) -> (i32, i32) {
    %c0_i32 = arith.constant 0 : i32
    %c0_i32_0 = arith.constant 0 : i32
    %c0_i32_1 = arith.constant 0 : i32
    return %c0_i32, %c0_i32_0 : i32, i32
  }
  func.func @transform_10(%arg0: i32) -> (i32, i32) {
    %c0_i32 = arith.constant 0 : i32
    %c0_i32_0 = arith.constant 0 : i32
    %c0_i32_1 = arith.constant 0 : i32
    return %c0_i32, %c0_i32_0 : i32, i32
  }
  func.func @transform_11(%arg0: i32) -> (i32, i32) {
    %c0_i32 = arith.constant 0 : i32
    %c0_i32_0 = arith.constant 0 : i32
    %c0_i32_1 = arith.constant 0 : i32
    return %c0_i32, %c0_i32_0 : i32, i32
  }
  func.func @transform_12(%arg0: i32) -> (i32, i32) {
    %c0_i32 = arith.constant 0 : i32
    %c0_i32_0 = arith.constant 0 : i32
    %c0_i32_1 = arith.constant 0 : i32
    return %c0_i32, %c0_i32_0 : i32, i32
  }
  func.func @transform_13(%arg0: i32) -> (i32, i32) {
    %c0_i32 = arith.constant 0 : i32
    %c0_i32_0 = arith.constant 0 : i32
    %c0_i32_1 = arith.constant 0 : i32
    return %c0_i32, %c0_i32_0 : i32, i32
  }
  func.func @transform_14(%arg0: i32) -> (i32, i32) {
    %c0_i32 = arith.constant 0 : i32
    %c0_i32_0 = arith.constant 0 : i32
    %c0_i32_1 = arith.constant 0 : i32
    return %c0_i32, %c0_i32_0 : i32, i32
  }
  func.func @transform_15(%arg0: i32) -> (i32, i32, i32) {
    %c0_i32 = arith.constant 0 : i32
    %c0_i32_0 = arith.constant 0 : i32
    %c0_i32_1 = arith.constant 0 : i32
    return %arg0, %c0_i32, %c0_i32_0 : i32, i32, i32
  }
}

module attributes {stable_mosaic.version = 11 : i64} {
  func.func @_ffn_kernel(%arg0: i32, %arg1: i32, %arg2: memref<16x32xf32, #tpu.memory_space<vmem>>, %arg3: memref<32x64xf32, #tpu.memory_space<vmem>>, %arg4: memref<1x64xf32, #tpu.memory_space<vmem>>, %arg5: memref<64x32xf32, #tpu.memory_space<vmem>>, %arg6: memref<1x32xf32, #tpu.memory_space<vmem>>, %arg7: memref<1x32xf32, #tpu.memory_space<vmem>>, %arg8: memref<1x32xf32, #tpu.memory_space<vmem>>, %arg9: memref<1x32xf32, #tpu.memory_space<vmem>>, %arg10: memref<1x32xf32, #tpu.memory_space<vmem>>, %arg11: memref<16x32xf32, #tpu.memory_space<vmem>>, %arg12: memref<16x32xf32, #tpu.memory_space<vmem>>) attributes {dimension_semantics = [#tpu.dimension_semantics<parallel>, #tpu.dimension_semantics<arbitrary>], iteration_bounds = array<i64: 1, 1>, scalar_prefetch = 0 : i64, scratch_operands = 1 : i64, tpu.core_type = #tpu.core_type<tc>, window_params = [{transform_indices = @transform_0, window_bounds = array<i64: 16, 32>}, {transform_indices = @transform_1, window_bounds = array<i64: 32, 64>}, {transform_indices = @transform_2, window_bounds = array<i64: 1, 64>}, {transform_indices = @transform_3, window_bounds = array<i64: 64, 32>}, {pipeline_mode = #tpu.pipeline_mode<synchronous>, transform_indices = @transform_4, window_bounds = array<i64: 1, 32>}, {pipeline_mode = #tpu.pipeline_mode<synchronous>, transform_indices = @transform_5, window_bounds = array<i64: 1, 32>}, {pipeline_mode = #tpu.pipeline_mode<synchronous>, transform_indices = @transform_6, window_bounds = array<i64: 1, 32>}, {pipeline_mode = #tpu.pipeline_mode<synchronous>, transform_indices = @transform_7, window_bounds = array<i64: 1, 32>}, {pipeline_mode = #tpu.pipeline_mode<synchronous>, transform_indices = @transform_8, window_bounds = array<i64: 1, 32>}, {transform_indices = @transform_9, window_bounds = array<i64: 16, 32>}]} {
    %c0_i32 = arith.constant 0 : i32
    %0 = arith.cmpi eq, %arg1, %c0_i32 : i32
    %1 = arith.extui %0 : i1 to i32
    %c0_i32_0 = arith.constant 0 : i32
    %2 = arith.cmpi ne, %1, %c0_i32_0 : i32
    scf.if %2 {
      %cst_18 = arith.constant 0.000000e+00 : f32
      %25 = vector.broadcast %cst_18 : f32 to vector<16x32xf32>
      %c0_19 = arith.constant 0 : index
      %c0_20 = arith.constant 0 : index
      %26 = vector.load %arg12[%c0_19, %c0_20] : memref<16x32xf32, #tpu.memory_space<vmem>>, vector<16x32xf32>
      tpu.vector_store %arg12[%c0_19, %c0_20], %25 {strides = array<i32>} : memref<16x32xf32, #tpu.memory_space<vmem>>, vector<16x32xf32>,
    } else {
    }
    %c0 = arith.constant 0 : index
    %c0_1 = arith.constant 0 : index
    %3 = vector.load %arg2[%c0, %c0_1] : memref<16x32xf32, #tpu.memory_space<vmem>>, vector<16x32xf32>
    %c0_2 = arith.constant 0 : index
    %c0_3 = arith.constant 0 : index
    %4 = vector.load %arg3[%c0_2, %c0_3] : memref<32x64xf32, #tpu.memory_space<vmem>>, vector<32x64xf32>
    %cst = arith.constant dense<0.000000e+00> : vector<16x64xf32>
    %5 = tpu.matmul %3, %4, %cst {dimension_numbers = #tpu.dot_dimension_numbers<[1], [0], [0], [1], [0, 0, 1, 1], [], []>} : vector<16x32xf32>, vector<32x64xf32>, vector<16x64xf32> -> vector<16x64xf32>
    %c0_4 = arith.constant 0 : index
    %c0_5 = arith.constant 0 : index
    %6 = vector.load %arg4[%c0_4, %c0_5] : memref<1x64xf32, #tpu.memory_space<vmem>>, vector<1x64xf32>
    %7 = vector.broadcast %6 : vector<1x64xf32> to vector<16x64xf32>
    %8 = arith.addf %5, %7 : vector<16x64xf32>
    %cst_6 = arith.constant 5.000000e-01 : f32
    %9 = vector.broadcast %cst_6 : f32 to vector<16x64xf32>
    %10 = arith.mulf %9, %8 : vector<16x64xf32>
    %cst_7 = arith.constant 0.707106769 : f32
    %11 = vector.broadcast %cst_7 : f32 to vector<16x64xf32>
    %12 = arith.mulf %8, %11 : vector<16x64xf32>
    %13 = math.erf %12 : vector<16x64xf32>
    %cst_8 = arith.constant 1.000000e+00 : f32
    %14 = vector.broadcast %cst_8 : f32 to vector<16x64xf32>
    %15 = arith.addf %14, %13 : vector<16x64xf32>
    %16 = arith.mulf %10, %15 : vector<16x64xf32>
    %c0_9 = arith.constant 0 : index
    %c0_10 = arith.constant 0 : index
    %17 = vector.load %arg12[%c0_9, %c0_10] : memref<16x32xf32, #tpu.memory_space<vmem>>, vector<16x32xf32>
    %c0_11 = arith.constant 0 : index
    %c0_12 = arith.constant 0 : index
    %18 = vector.load %arg5[%c0_11, %c0_12] : memref<64x32xf32, #tpu.memory_space<vmem>>, vector<64x32xf32>
    %cst_13 = arith.constant dense<0.000000e+00> : vector<16x32xf32>
    %19 = tpu.matmul %16, %18, %cst_13 {dimension_numbers = #tpu.dot_dimension_numbers<[1], [0], [0], [1], [0, 0, 1, 1], [], []>} : vector<16x64xf32>, vector<64x32xf32>, vector<16x32xf32> -> vector<16x32xf32>
    %20 = arith.addf %17, %19 : vector<16x32xf32>
    %c0_14 = arith.constant 0 : index
    %c0_15 = arith.constant 0 : index
    %21 = vector.load %arg12[%c0_14, %c0_15] : memref<16x32xf32, #tpu.memory_space<vmem>>, vector<16x32xf32>
    tpu.vector_store %arg12[%c0_14, %c0_15], %20 {strides = array<i32>} : memref<16x32xf32, #tpu.memory_space<vmem>>, vector<16x32xf32>,
    %c0_i32_16 = arith.constant 0 : i32
    %22 = arith.cmpi eq, %arg1, %c0_i32_16 : i32
    %23 = arith.extui %22 : i1 to i32
    %c0_i32_17 = arith.constant 0 : i32
    %24 = arith.cmpi ne, %23, %c0_i32_17 : i32
    scf.if %24 {
      %c0_18 = arith.constant 0 : index
      %c0_19 = arith.constant 0 : index
      %25 = vector.load %arg2[%c0_18, %c0_19] : memref<16x32xf32, #tpu.memory_space<vmem>>, vector<16x32xf32>
      %c0_20 = arith.constant 0 : index
      %c0_21 = arith.constant 0 : index
      %26 = vector.load %arg12[%c0_20, %c0_21] : memref<16x32xf32, #tpu.memory_space<vmem>>, vector<16x32xf32>
      %c0_22 = arith.constant 0 : index
      %c0_23 = arith.constant 0 : index
      %27 = vector.load %arg6[%c0_22, %c0_23] : memref<1x32xf32, #tpu.memory_space<vmem>>, vector<1x32xf32>
      %28 = vector.broadcast %27 : vector<1x32xf32> to vector<16x32xf32>
      %29 = arith.addf %26, %28 : vector<16x32xf32>
      %30 = arith.addf %29, %25 : vector<16x32xf32>
      %c0_24 = arith.constant 0 : index
      %c0_25 = arith.constant 0 : index
      %31 = vector.load %arg7[%c0_24, %c0_25] : memref<1x32xf32, #tpu.memory_space<vmem>>, vector<1x32xf32>
      %c0_26 = arith.constant 0 : index
      %c0_27 = arith.constant 0 : index
      %32 = vector.load %arg8[%c0_26, %c0_27] : memref<1x32xf32, #tpu.memory_space<vmem>>, vector<1x32xf32>
      %cst_28 = arith.constant dense<0.000000e+00> : vector<16xf32>
      %33 = vector.multi_reduction <add>, %30, %cst_28 [1] : vector<16x32xf32> to vector<16xf32>
      %34 = vector.shape_cast %33 : vector<16xf32> to vector<16x1xf32>
      %cst_29 = arith.constant 3.125000e-02 : f32
      %35 = vector.broadcast %cst_29 : f32 to vector<16x1xf32>
      %36 = arith.mulf %34, %35 : vector<16x1xf32>
      %37 = vector.broadcast %36 : vector<16x1xf32> to vector<16x32xf32>
      %38 = arith.subf %30, %37 : vector<16x32xf32>
      %39 = arith.mulf %38, %38 : vector<16x32xf32>
      %cst_30 = arith.constant dense<0.000000e+00> : vector<16xf32>
      %40 = vector.multi_reduction <add>, %39, %cst_30 [1] : vector<16x32xf32> to vector<16xf32>
      %41 = vector.shape_cast %40 : vector<16xf32> to vector<16x1xf32>
      %cst_31 = arith.constant 3.125000e-02 : f32
      %42 = vector.broadcast %cst_31 : f32 to vector<16x1xf32>
      %43 = arith.mulf %41, %42 : vector<16x1xf32>
      %cst_32 = arith.constant 9.99999974E-6 : f32
      %44 = vector.broadcast %cst_32 : f32 to vector<16x1xf32>
      %45 = arith.addf %43, %44 : vector<16x1xf32>
      %46 = math.rsqrt %45 : vector<16x1xf32>
      %47 = vector.broadcast %46 : vector<16x1xf32> to vector<16x32xf32>
      %48 = arith.mulf %38, %47 : vector<16x32xf32>
      %49 = vector.broadcast %31 : vector<1x32xf32> to vector<16x32xf32>
      %50 = arith.mulf %48, %49 : vector<16x32xf32>
      %51 = vector.broadcast %32 : vector<1x32xf32> to vector<16x32xf32>
      %52 = arith.addf %50, %51 : vector<16x32xf32>
      %53 = arith.addf %25, %52 : vector<16x32xf32>
      %c0_33 = arith.constant 0 : index
      %c0_34 = arith.constant 0 : index
      %54 = vector.load %arg9[%c0_33, %c0_34] : memref<1x32xf32, #tpu.memory_space<vmem>>, vector<1x32xf32>
      %c0_35 = arith.constant 0 : index
      %c0_36 = arith.constant 0 : index
      %55 = vector.load %arg10[%c0_35, %c0_36] : memref<1x32xf32, #tpu.memory_space<vmem>>, vector<1x32xf32>
      %cst_37 = arith.constant dense<0.000000e+00> : vector<16xf32>
      %56 = vector.multi_reduction <add>, %53, %cst_37 [1] : vector<16x32xf32> to vector<16xf32>
      %57 = vector.shape_cast %56 : vector<16xf32> to vector<16x1xf32>
      %cst_38 = arith.constant 3.125000e-02 : f32
      %58 = vector.broadcast %cst_38 : f32 to vector<16x1xf32>
      %59 = arith.mulf %57, %58 : vector<16x1xf32>
      %60 = vector.broadcast %59 : vector<16x1xf32> to vector<16x32xf32>
      %61 = arith.subf %53, %60 : vector<16x32xf32>
      %62 = arith.mulf %61, %61 : vector<16x32xf32>
      %cst_39 = arith.constant dense<0.000000e+00> : vector<16xf32>
      %63 = vector.multi_reduction <add>, %62, %cst_39 [1] : vector<16x32xf32> to vector<16xf32>
      %64 = vector.shape_cast %63 : vector<16xf32> to vector<16x1xf32>
      %cst_40 = arith.constant 3.125000e-02 : f32
      %65 = vector.broadcast %cst_40 : f32 to vector<16x1xf32>
      %66 = arith.mulf %64, %65 : vector<16x1xf32>
      %cst_41 = arith.constant 9.99999974E-6 : f32
      %67 = vector.broadcast %cst_41 : f32 to vector<16x1xf32>
      %68 = arith.addf %66, %67 : vector<16x1xf32>
      %69 = math.rsqrt %68 : vector<16x1xf32>
      %70 = vector.broadcast %69 : vector<16x1xf32> to vector<16x32xf32>
      %71 = arith.mulf %61, %70 : vector<16x32xf32>
      %72 = vector.broadcast %54 : vector<1x32xf32> to vector<16x32xf32>
      %73 = arith.mulf %71, %72 : vector<16x32xf32>
      %74 = vector.broadcast %55 : vector<1x32xf32> to vector<16x32xf32>
      %75 = arith.addf %73, %74 : vector<16x32xf32>
      %c0_42 = arith.constant 0 : index
      %c0_43 = arith.constant 0 : index
      %76 = vector.load %arg11[%c0_42, %c0_43] : memref<16x32xf32, #tpu.memory_space<vmem>>, vector<16x32xf32>
      tpu.vector_store %arg11[%c0_42, %c0_43], %75 {strides = array<i32>} : memref<16x32xf32, #tpu.memory_space<vmem>>, vector<16x32xf32>,
    } else {
    }
    return
  }
  func.func @transform_0(%arg0: i32, %arg1: i32) -> (i32, i32) {
    %c0_i32 = arith.constant 0 : i32
    %c0_i32_0 = arith.constant 0 : i32
    return %arg0, %c0_i32 : i32, i32
  }
  func.func @transform_1(%arg0: i32, %arg1: i32) -> (i32, i32) {
    %c0_i32 = arith.constant 0 : i32
    %c0_i32_0 = arith.constant 0 : i32
    return %c0_i32, %arg1 : i32, i32
  }
  func.func @transform_2(%arg0: i32, %arg1: i32) -> (i32, i32) {
    %c0_i32 = arith.constant 0 : i32
    %c0_i32_0 = arith.constant 0 : i32
    return %c0_i32, %arg1 : i32, i32
  }
  func.func @transform_3(%arg0: i32, %arg1: i32) -> (i32, i32) {
    %c0_i32 = arith.constant 0 : i32
    %c0_i32_0 = arith.constant 0 : i32
    return %arg1, %c0_i32 : i32, i32
  }
  func.func @transform_4(%arg0: i32, %arg1: i32) -> (i32, i32) {
    %c0_i32 = arith.constant 0 : i32
    %c0_i32_0 = arith.constant 0 : i32
    %c0_i32_1 = arith.constant 0 : i32
    return %c0_i32, %c0_i32_0 : i32, i32
  }
  func.func @transform_5(%arg0: i32, %arg1: i32) -> (i32, i32) {
    %c0_i32 = arith.constant 0 : i32
    %c0_i32_0 = arith.constant 0 : i32
    %c0_i32_1 = arith.constant 0 : i32
    return %c0_i32, %c0_i32_0 : i32, i32
  }
  func.func @transform_6(%arg0: i32, %arg1: i32) -> (i32, i32) {
    %c0_i32 = arith.constant 0 : i32
    %c0_i32_0 = arith.constant 0 : i32
    %c0_i32_1 = arith.constant 0 : i32
    return %c0_i32, %c0_i32_0 : i32, i32
  }
  func.func @transform_7(%arg0: i32, %arg1: i32) -> (i32, i32) {
    %c0_i32 = arith.constant 0 : i32
    %c0_i32_0 = arith.constant 0 : i32
    %c0_i32_1 = arith.constant 0 : i32
    return %c0_i32, %c0_i32_0 : i32, i32
  }
  func.func @transform_8(%arg0: i32, %arg1: i32) -> (i32, i32) {
    %c0_i32 = arith.constant 0 : i32
    %c0_i32_0 = arith.constant 0 : i32
    %c0_i32_1 = arith.constant 0 : i32
    return %c0_i32, %c0_i32_0 : i32, i32
  }
  func.func @transform_9(%arg0: i32, %arg1: i32) -> (i32, i32) {
    %c0_i32 = arith.constant 0 : i32
    %c0_i32_0 = arith.constant 0 : i32
    return %arg0, %c0_i32 : i32, i32
  }
}

module attributes {stable_mosaic.version = 11 : i64} {
  func.func @_ffn_kernel(%arg0: i32, %arg1: i32, %arg2: memref<16x32xf32, #tpu.memory_space<vmem>>, %arg3: memref<32x64xf32, #tpu.memory_space<vmem>>, %arg4: memref<1x64xf32, #tpu.memory_space<vmem>>, %arg5: memref<64x32xf32, #tpu.memory_space<vmem>>, %arg6: memref<1x32xf32, #tpu.memory_space<vmem>>, %arg7: memref<1x32xf32, #tpu.memory_space<vmem>>, %arg8: memref<1x32xf32, #tpu.memory_space<vmem>>, %arg9: memref<1x32xf32, #tpu.memory_space<vmem>>, %arg10: memref<1x32xf32, #tpu.memory_space<vmem>>, %arg11: memref<16x32xf32, #tpu.memory_space<vmem>>, %arg12: memref<16x32xf32, #tpu.memory_space<vmem>>) attributes {dimension_semantics = [#tpu.dimension_semantics<parallel>, #tpu.dimension_semantics<arbitrary>], iteration_bounds = array<i64: 1, 1>, scalar_prefetch = 0 : i64, scratch_operands = 1 : i64, tpu.core_type = #tpu.core_type<tc>, window_params = [{transform_indices = @transform_0, window_bounds = array<i64: 16, 32>}, {transform_indices = @transform_1, window_bounds = array<i64: 32, 64>}, {transform_indices = @transform_2, window_bounds = array<i64: 1, 64>}, {transform_indices = @transform_3, window_bounds = array<i64: 64, 32>}, {pipeline_mode = #tpu.pipeline_mode<synchronous>, transform_indices = @transform_4, window_bounds = array<i64: 1, 32>}, {pipeline_mode = #tpu.pipeline_mode<synchronous>, transform_indices = @transform_5, window_bounds = array<i64: 1, 32>}, {pipeline_mode = #tpu.pipeline_mode<synchronous>, transform_indices = @transform_6, window_bounds = array<i64: 1, 32>}, {pipeline_mode = #tpu.pipeline_mode<synchronous>, transform_indices = @transform_7, window_bounds = array<i64: 1, 32>}, {pipeline_mode = #tpu.pipeline_mode<synchronous>, transform_indices = @transform_8, window_bounds = array<i64: 1, 32>}, {transform_indices = @transform_9, window_bounds = array<i64: 16, 32>}]} {
    %c0_i32 = arith.constant 0 : i32
    %0 = arith.cmpi eq, %arg1, %c0_i32 : i32
    %1 = arith.extui %0 : i1 to i32
    %c0_i32_0 = arith.constant 0 : i32
    %2 = arith.cmpi ne, %1, %c0_i32_0 : i32
    scf.if %2 {
      %cst_18 = arith.constant 0.000000e+00 : f32
      %25 = vector.broadcast %cst_18 : f32 to vector<16x32xf32>
      %c0_19 = arith.constant 0 : index
      %c0_20 = arith.constant 0 : index
      %26 = vector.load %arg12[%c0_19, %c0_20] : memref<16x32xf32, #tpu.memory_space<vmem>>, vector<16x32xf32>
      tpu.vector_store %arg12[%c0_19, %c0_20], %25 {strides = array<i32>} : memref<16x32xf32, #tpu.memory_space<vmem>>, vector<16x32xf32>,
    } else {
    }
    %c0 = arith.constant 0 : index
    %c0_1 = arith.constant 0 : index
    %3 = vector.load %arg2[%c0, %c0_1] : memref<16x32xf32, #tpu.memory_space<vmem>>, vector<16x32xf32>
    %c0_2 = arith.constant 0 : index
    %c0_3 = arith.constant 0 : index
    %4 = vector.load %arg3[%c0_2, %c0_3] : memref<32x64xf32, #tpu.memory_space<vmem>>, vector<32x64xf32>
    %cst = arith.constant dense<0.000000e+00> : vector<16x64xf32>
    %5 = tpu.matmul %3, %4, %cst {dimension_numbers = #tpu.dot_dimension_numbers<[1], [0], [0], [1], [0, 0, 1, 1], [], []>} : vector<16x32xf32>, vector<32x64xf32>, vector<16x64xf32> -> vector<16x64xf32>
    %c0_4 = arith.constant 0 : index
    %c0_5 = arith.constant 0 : index
    %6 = vector.load %arg4[%c0_4, %c0_5] : memref<1x64xf32, #tpu.memory_space<vmem>>, vector<1x64xf32>
    %7 = vector.broadcast %6 : vector<1x64xf32> to vector<16x64xf32>
    %8 = arith.addf %5, %7 : vector<16x64xf32>
    %cst_6 = arith.constant 5.000000e-01 : f32
    %9 = vector.broadcast %cst_6 : f32 to vector<16x64xf32>
    %10 = arith.mulf %9, %8 : vector<16x64xf32>
    %cst_7 = arith.constant 0.707106769 : f32
    %11 = vector.broadcast %cst_7 : f32 to vector<16x64xf32>
    %12 = arith.mulf %8, %11 : vector<16x64xf32>
    %13 = math.erf %12 : vector<16x64xf32>
    %cst_8 = arith.constant 1.000000e+00 : f32
    %14 = vector.broadcast %cst_8 : f32 to vector<16x64xf32>
    %15 = arith.addf %14, %13 : vector<16x64xf32>
    %16 = arith.mulf %10, %15 : vector<16x64xf32>
    %c0_9 = arith.constant 0 : index
    %c0_10 = arith.constant 0 : index
    %17 = vector.load %arg12[%c0_9, %c0_10] : memref<16x32xf32, #tpu.memory_space<vmem>>, vector<16x32xf32>
    %c0_11 = arith.constant 0 : index
    %c0_12 = arith.constant 0 : index
    %18 = vector.load %arg5[%c0_11, %c0_12] : memref<64x32xf32, #tpu.memory_space<vmem>>, vector<64x32xf32>
    %cst_13 = arith.constant dense<0.000000e+00> : vector<16x32xf32>
    %19 = tpu.matmul %16, %18, %cst_13 {dimension_numbers = #tpu.dot_dimension_numbers<[1], [0], [0], [1], [0, 0, 1, 1], [], []>} : vector<16x64xf32>, vector<64x32xf32>, vector<16x32xf32> -> vector<16x32xf32>
    %20 = arith.addf %17, %19 : vector<16x32xf32>
    %c0_14 = arith.constant 0 : index
    %c0_15 = arith.constant 0 : index
    %21 = vector.load %arg12[%c0_14, %c0_15] : memref<16x32xf32, #tpu.memory_space<vmem>>, vector<16x32xf32>
    tpu.vector_store %arg12[%c0_14, %c0_15], %20 {strides = array<i32>} : memref<16x32xf32, #tpu.memory_space<vmem>>, vector<16x32xf32>,
    %c0_i32_16 = arith.constant 0 : i32
    %22 = arith.cmpi eq, %arg1, %c0_i32_16 : i32
    %23 = arith.extui %22 : i1 to i32
    %c0_i32_17 = arith.constant 0 : i32
    %24 = arith.cmpi ne, %23, %c0_i32_17 : i32
    scf.if %24 {
      %c0_18 = arith.constant 0 : index
      %c0_19 = arith.constant 0 : index
      %25 = vector.load %arg2[%c0_18, %c0_19] : memref<16x32xf32, #tpu.memory_space<vmem>>, vector<16x32xf32>
      %c0_20 = arith.constant 0 : index
      %c0_21 = arith.constant 0 : index
      %26 = vector.load %arg12[%c0_20, %c0_21] : memref<16x32xf32, #tpu.memory_space<vmem>>, vector<16x32xf32>
      %c0_22 = arith.constant 0 : index
      %c0_23 = arith.constant 0 : index
      %27 = vector.load %arg6[%c0_22, %c0_23] : memref<1x32xf32, #tpu.memory_space<vmem>>, vector<1x32xf32>
      %28 = vector.broadcast %27 : vector<1x32xf32> to vector<16x32xf32>
      %29 = arith.addf %26, %28 : vector<16x32xf32>
      %30 = arith.addf %29, %25 : vector<16x32xf32>
      %c0_24 = arith.constant 0 : index
      %c0_25 = arith.constant 0 : index
      %31 = vector.load %arg7[%c0_24, %c0_25] : memref<1x32xf32, #tpu.memory_space<vmem>>, vector<1x32xf32>
      %c0_26 = arith.constant 0 : index
      %c0_27 = arith.constant 0 : index
      %32 = vector.load %arg8[%c0_26, %c0_27] : memref<1x32xf32, #tpu.memory_space<vmem>>, vector<1x32xf32>
      %cst_28 = arith.constant dense<0.000000e+00> : vector<16xf32>
      %33 = vector.multi_reduction <add>, %30, %cst_28 [1] : vector<16x32xf32> to vector<16xf32>
      %34 = vector.shape_cast %33 : vector<16xf32> to vector<16x1xf32>
      %cst_29 = arith.constant 3.125000e-02 : f32
      %35 = vector.broadcast %cst_29 : f32 to vector<16x1xf32>
      %36 = arith.mulf %34, %35 : vector<16x1xf32>
      %37 = vector.broadcast %36 : vector<16x1xf32> to vector<16x32xf32>
      %38 = arith.subf %30, %37 : vector<16x32xf32>
      %39 = arith.mulf %38, %38 : vector<16x32xf32>
      %cst_30 = arith.constant dense<0.000000e+00> : vector<16xf32>
      %40 = vector.multi_reduction <add>, %39, %cst_30 [1] : vector<16x32xf32> to vector<16xf32>
      %41 = vector.shape_cast %40 : vector<16xf32> to vector<16x1xf32>
      %cst_31 = arith.constant 3.125000e-02 : f32
      %42 = vector.broadcast %cst_31 : f32 to vector<16x1xf32>
      %43 = arith.mulf %41, %42 : vector<16x1xf32>
      %cst_32 = arith.constant 9.99999974E-6 : f32
      %44 = vector.broadcast %cst_32 : f32 to vector<16x1xf32>
      %45 = arith.addf %43, %44 : vector<16x1xf32>
      %46 = math.rsqrt %45 : vector<16x1xf32>
      %47 = vector.broadcast %46 : vector<16x1xf32> to vector<16x32xf32>
      %48 = arith.mulf %38, %47 : vector<16x32xf32>
      %49 = vector.broadcast %31 : vector<1x32xf32> to vector<16x32xf32>
      %50 = arith.mulf %48, %49 : vector<16x32xf32>
      %51 = vector.broadcast %32 : vector<1x32xf32> to vector<16x32xf32>
      %52 = arith.addf %50, %51 : vector<16x32xf32>
      %53 = arith.addf %25, %52 : vector<16x32xf32>
      %c0_33 = arith.constant 0 : index
      %c0_34 = arith.constant 0 : index
      %54 = vector.load %arg9[%c0_33, %c0_34] : memref<1x32xf32, #tpu.memory_space<vmem>>, vector<1x32xf32>
      %c0_35 = arith.constant 0 : index
      %c0_36 = arith.constant 0 : index
      %55 = vector.load %arg10[%c0_35, %c0_36] : memref<1x32xf32, #tpu.memory_space<vmem>>, vector<1x32xf32>
      %cst_37 = arith.constant dense<0.000000e+00> : vector<16xf32>
      %56 = vector.multi_reduction <add>, %53, %cst_37 [1] : vector<16x32xf32> to vector<16xf32>
      %57 = vector.shape_cast %56 : vector<16xf32> to vector<16x1xf32>
      %cst_38 = arith.constant 3.125000e-02 : f32
      %58 = vector.broadcast %cst_38 : f32 to vector<16x1xf32>
      %59 = arith.mulf %57, %58 : vector<16x1xf32>
      %60 = vector.broadcast %59 : vector<16x1xf32> to vector<16x32xf32>
      %61 = arith.subf %53, %60 : vector<16x32xf32>
      %62 = arith.mulf %61, %61 : vector<16x32xf32>
      %cst_39 = arith.constant dense<0.000000e+00> : vector<16xf32>
      %63 = vector.multi_reduction <add>, %62, %cst_39 [1] : vector<16x32xf32> to vector<16xf32>
      %64 = vector.shape_cast %63 : vector<16xf32> to vector<16x1xf32>
      %cst_40 = arith.constant 3.125000e-02 : f32
      %65 = vector.broadcast %cst_40 : f32 to vector<16x1xf32>
      %66 = arith.mulf %64, %65 : vector<16x1xf32>
      %cst_41 = arith.constant 9.99999974E-6 : f32
      %67 = vector.broadcast %cst_41 : f32 to vector<16x1xf32>
      %68 = arith.addf %66, %67 : vector<16x1xf32>
      %69 = math.rsqrt %68 : vector<16x1xf32>
      %70 = vector.broadcast %69 : vector<16x1xf32> to vector<16x32xf32>
      %71 = arith.mulf %61, %70 : vector<16x32xf32>
      %72 = vector.broadcast %54 : vector<1x32xf32> to vector<16x32xf32>
      %73 = arith.mulf %71, %72 : vector<16x32xf32>
      %74 = vector.broadcast %55 : vector<1x32xf32> to vector<16x32xf32>
      %75 = arith.addf %73, %74 : vector<16x32xf32>
      %c0_42 = arith.constant 0 : index
      %c0_43 = arith.constant 0 : index
      %76 = vector.load %arg11[%c0_42, %c0_43] : memref<16x32xf32, #tpu.memory_space<vmem>>, vector<16x32xf32>
      tpu.vector_store %arg11[%c0_42, %c0_43], %75 {strides = array<i32>} : memref<16x32xf32, #tpu.memory_space<vmem>>, vector<16x32xf32>,
    } else {
    }
    return
  }
  func.func @transform_0(%arg0: i32, %arg1: i32) -> (i32, i32) {
    %c0_i32 = arith.constant 0 : i32
    %c0_i32_0 = arith.constant 0 : i32
    return %arg0, %c0_i32 : i32, i32
  }
  func.func @transform_1(%arg0: i32, %arg1: i32) -> (i32, i32) {
    %c0_i32 = arith.constant 0 : i32
    %c0_i32_0 = arith.constant 0 : i32
    return %c0_i32, %arg1 : i32, i32
  }
  func.func @transform_2(%arg0: i32, %arg1: i32) -> (i32, i32) {
    %c0_i32 = arith.constant 0 : i32
    %c0_i32_0 = arith.constant 0 : i32
    return %c0_i32, %arg1 : i32, i32
  }
  func.func @transform_3(%arg0: i32, %arg1: i32) -> (i32, i32) {
    %c0_i32 = arith.constant 0 : i32
    %c0_i32_0 = arith.constant 0 : i32
    return %arg1, %c0_i32 : i32, i32
  }
  func.func @transform_4(%arg0: i32, %arg1: i32) -> (i32, i32) {
    %c0_i32 = arith.constant 0 : i32
    %c0_i32_0 = arith.constant 0 : i32
    %c0_i32_1 = arith.constant 0 : i32
    return %c0_i32, %c0_i32_0 : i32, i32
  }
  func.func @transform_5(%arg0: i32, %arg1: i32) -> (i32, i32) {
    %c0_i32 = arith.constant 0 : i32
    %c0_i32_0 = arith.constant 0 : i32
    %c0_i32_1 = arith.constant 0 : i32
    return %c0_i32, %c0_i32_0 : i32, i32
  }
  func.func @transform_6(%arg0: i32, %arg1: i32) -> (i32, i32) {
    %c0_i32 = arith.constant 0 : i32
    %c0_i32_0 = arith.constant 0 : i32
    %c0_i32_1 = arith.constant 0 : i32
    return %c0_i32, %c0_i32_0 : i32, i32
  }
  func.func @transform_7(%arg0: i32, %arg1: i32) -> (i32, i32) {
    %c0_i32 = arith.constant 0 : i32
    %c0_i32_0 = arith.constant 0 : i32
    %c0_i32_1 = arith.constant 0 : i32
    return %c0_i32, %c0_i32_0 : i32, i32
  }
  func.func @transform_8(%arg0: i32, %arg1: i32) -> (i32, i32) {
    %c0_i32 = arith.constant 0 : i32
    %c0_i32_0 = arith.constant 0 : i32
    %c0_i32_1 = arith.constant 0 : i32
    return %c0_i32, %c0_i32_0 : i32, i32
  }
  func.func @transform_9(%arg0: i32, %arg1: i32) -> (i32, i32) {
    %c0_i32 = arith.constant 0 : i32
    %c0_i32_0 = arith.constant 0 : i32
    return %arg0, %c0_i32 : i32, i32
  }
}

</mosaic_0001>

<bundles_post_ra>
// kernel: decoder_forward.7
= control target key start
LH: loop header
LB: loop body
LE: loop exit
PB: predicated region body
PF: predicated region fallthrough
CT: control target
= control target key end

     0   :  { %s327_s15 = smov 0   ;;  %s347_s0 = inlined_call_operand.vmem [shape: f32[2,8,1], index: 0, kind: input, shape index: {}]   ;;  %s348_s1 = inlined_call_operand.vmem [shape: f32[1,32], index: 1, kind: input, shape index: {}]   ;;  %s349_s2 = inlined_call_operand.vmem [shape: f32[1,32], index: 2, kind: input, shape index: {}]   ;;  %s350_s3 = inlined_call_operand.vmem [shape: f32[8,32], index: 3, kind: input, shape index: {}]   ;;  %s351_s4 = inlined_call_operand.vmem [shape: f32[2,8,32], index: 4, kind: output, shape index: {}]  }
   0x1 LB: > { %s272_s16 = sadd.s32 4294967295, %s299_s15   ;;  %p276_p0 = scmp.ge.s32.totalorder %s299_s15, 1  ;;  %s299_s15 = sphi %s327_s15, %s14_s15  }
   0x2   : > { %p161_p1 = scmp.lt.s32.totalorder %s299_s15, 3 }
   0x4   : > { %p162_p2 = pnand %p276_p0, %p161_p1 }
   0x5   : > { %p185_p3 = scmp.lt.s32.totalorder (!%p162_p2), %s272_s16, 1  ;;  %v301_v0 = vmov (!%p162_p2), 0   ;;  %v279_v2 = vld [vmem:[%s348_s1] ss:$0 sm:$0xff] (!%p162_p2)  ;;  %vm217_vm0 = vcmask (!%p162_p2), 261120  }
   0x6   : > { %165 = sbr.rel (%p162_p2) target bundleno = 152 (0x98), region = 36  ;;  %292 = vset.pattern.permute.xlu0 (!%p162_p2), %v301_v0  ;;  %v280_v3 = vld [vmem:[%s349_s2] ss:$0 sm:$0xff] (!%p162_p2) }
   0x7   : > { %v215_v6 = vld [vmem:[%s350_s3] sm:$0xff] (!%p162_p2) }
   0xd   : > { %s353_s16 = smov (!%p185_p3, %s272_s16), 1 }
   0xe   : > { %s277_s17 = sshll.u32 %s353_s16, 3 }
   0xf   : > { %s188_s20 = scalar_lea.vmem %s347_s0, %s277_s17  ;;  %s192_s29 = scalar_lea.vmem %s351_s4, %s277_s17 }
  0x10   : > { %v193_v1 = vld [vmem:[%s188_s20] sm:$0xff] }
  0x11   : > { %197 = vperm.xlu0 %292, %v193_v1  }
  0x90   : > { %v198_v4 = vpop.permute.xlu0 %197 }
  0x91   : > { %v206_v5 = vmul.f32 %v279_v2, %v198_v4 }
  0x93   : > { %v214_v7 = vadd.f32 %v280_v3, %v206_v5 }
  0x95   : > { %v216_v8 = vadd.f32 %v215_v6, %v214_v7 }
  0x97   : > { %218 = vst.msk [vmem:[%s192_s29] sm:$0xff] %vm217_vm0, %v216_v8 }
  0x98 PF: > { %s14_s15 = sadd.s32 1, %s299_s15  }
  0x99   : > { %p11_p4 = scmp.ge.s32.totalorder %s14_s15, 4  }
  0x9b   :  { %13 = sbr.rel (!%p11_p4) target bundleno = 1 (0x1), region = 66 }

// kernel: decoder_forward.10
= control target key start
LH: loop header
LB: loop body
LE: loop exit
PB: predicated region body
PF: predicated region fallthrough
CT: control target
= control target key end

     0   :  { %vm36_vm0 = vcmask 261120   ;;  %v447_v20 = vmov 0.0   ;;  %vm154_vm1 = vcmask 523264   ;;  %s590_s1 = inlined_call_operand.vmem [shape: f32[32,64], index: 1, kind: input, shape index: {}]   ;;  %s591_s0 = inlined_call_operand.vmem [shape: f32[16,32], index: 0, kind: input, shape index: {}]   ;;  %s592_s3 = inlined_call_operand.vmem [shape: f32[64,32], index: 3, kind: input, shape index: {}]   ;;  %s593_s2 = inlined_call_operand.vmem [shape: f32[1,64], index: 2, kind: input, shape index: {}]   ;;  %s594_s4 = inlined_call_operand.vmem [shape: f32[1,32], index: 4, kind: input, shape index: {}]   ;;  %s595_s5 = inlined_call_operand.vmem [shape: f32[1,32], index: 5, kind: input, shape index: {}]   ;;  %s596_s6 = inlined_call_operand.vmem [shape: f32[1,32], index: 6, kind: input, shape index: {}]   ;;  %s597_s7 = inlined_call_operand.vmem [shape: f32[1,32], index: 7, kind: input, shape index: {}]   ;;  %s598_s8 = inlined_call_operand.vmem [shape: f32[1,32], index: 8, kind: input, shape index: {}]   ;;  %s599_s9 = inlined_call_operand.vmem [shape: f32[16,32], index: 9, kind: output, shape index: {}]  }
   0x1   :  { %v41_v0 = vld [vmem:[%s590_s1] sm:$0xff]  ;;  %v42_v1 = vld [vmem:[%s590_s1 + $0x8] sm:$0xff]  ;;  %v43_v2 = vld [vmem:[%s590_s1 + $0x10] sm:$0xff]  ;;  %38 = vst.msk [vmem:[#allocation2 + $0x8] sm:$0xff] %vm36_vm0, %v447_v20 }
   0x2   :  { %v410_v3 = vpack.c.bf16 %v42_v1, %v41_v0  ;;  %v44_v4 = vld [vmem:[%s590_s1 + $0x18] sm:$0xff]  ;;  %v513_v5 = vld [vmem:[%s591_s0] sm:$0xff]  ;;  %v520_v7 = vld [vmem:[%s591_s0 + $0x8] sm:$0xff]  ;;  %37 = vst.msk [vmem:[#allocation2] sm:$0xff] %vm36_vm0, %v447_v20 }
   0x3   :  { %v414_v6 = vpack.c.bf16 %v44_v4, %v43_v2  ;;  %388 = vmatprep.mubr.msk.f32.mxu0 %vm36_vm0, %v513_v5  ;;  %v146_v8 = vld [vmem:[%s592_s3] sm:$0xff]  ;;  %v147_v9 = vld [vmem:[%s592_s3 + $0x8] sm:$0xff]  ;;  %v148_v11 = vld [vmem:[%s592_s3 + $0x10] sm:$0xff] }
   0x4   :  { %411 = vmatprep.subr.bf16.mxu0 %v410_v3  ;;  %v418_v10 = vpack.c.bf16 %v147_v9, %v146_v8  ;;  %v149_v12 = vld [vmem:[%s592_s3 + $0x18] sm:$0xff]  ;;  %v150_v14 = vld [vmem:[%s592_s3 + $0x20] sm:$0xff]  ;;  %v151_v15 = vld [vmem:[%s592_s3 + $0x28] sm:$0xff] }
   0x5   :  { %413 = vmatpush3.bf16.msra.mxu0 %v410_v3  ;;  %v422_v13 = vpack.c.bf16 %v149_v12, %v148_v11  ;;  %v426_v16 = vpack.c.bf16 %v151_v15, %v150_v14  ;;  %v152_v17 = vld [vmem:[%s592_s3 + $0x30] sm:$0xff]  ;;  %v153_v18 = vld [vmem:[%s592_s3 + $0x38] sm:$0xff]  ;;  %v354_v21 = vld [vmem:[%s593_s2] ss:$0 sm:$0xff] }
   0x6   :  { %415 = vmatprep.subr.bf16.mxu0 %v414_v6  ;;  %419 = vmatprep.subr.bf16.mxu1 %v418_v10  ;;  %v430_v19 = vpack.c.bf16 %v153_v18, %v152_v17  ;;  %v359_v42 = vld [vmem:[%s594_s4] ss:$0 sm:$0xff] }
   0x7   :  { %421 = vmatpush3.bf16.msra.mxu1 %v418_v10  ;;  %v360_v4 = vld [vmem:[%s595_s5] ss:$0 sm:$0xff] }
   0x8   :  { %423 = vmatprep.subr.bf16.mxu1 %v422_v13  ;;  %v145_v36 = vld [vmem:[#allocation2 + $0x8] sm:$0xff]  ;;  %v361_v8 = vld [vmem:[%s596_s6] ss:$0 sm:$0xff] }
   0x9   :  { %417 = vmatpush3.bf16.msra.mxu0 %v414_v6  ;;  %v144_v37 = vld [vmem:[#allocation2] sm:$0xff] }
   0xb   :  { %425 = vmatpush3.bf16.msra.mxu1 %v422_v13 }
   0xc   :  { %389 = vmatmul.mubr.msk.f32.vlgmr.msra.gmra.mrb[0].mxu0 %vm36_vm0, %v520_v7  ;;  %427 = vmatprep.subr.bf16.mxu1 %v426_v16 }
   0xf   :  { %429 = vmatpush3.bf16.msra.mxu1 %v426_v16 }
  0x10   :  { %431 = vmatprep.subr.bf16.mxu1 %v430_v19 }
  0x13   :  { %433 = vmatpush3.bf16.msra.mxu1 %v430_v19 }
  0xdf   :  { %v390_v22 = vpop.f32.mrb[0].mxu0 }
  0xe0   :  { %v131_v23 = vadd.f32 %v390_v22, %v354_v21  ;;  %v125_v24 = vpop.f32.mrb[1].mxu0 }
  0xe1   :  { %v126_v25 = vadd.f32 %v354_v21, %v125_v24 }
  0xe2   :  { %v137_v26 = vmul.f32 0.70710677, %v131_v23  ;;  %v135_v33 = vmul.f32 0.5, %v131_v23 }
  0xe3   :  { %v136_v27 = vmul.f32 0.70710677, %v126_v25  ;;  %v134_v31 = vmul.f32 0.5, %v126_v25 }
  0xe4   :  { %435 = verf.f32 %v137_v26 }
  0xe5   :  { %437 = verf.f32 %v136_v27 }
  0xee   :  { %v436_v28 = vpop.eup %435 }
  0xef   :  { %v438_v29 = vpop.eup %437  ;;  %v141_v30 = vadd.f32 1.0, %v436_v28 }
  0xf0   :  { %v140_v32 = vadd.f32 1.0, %v438_v29 }
  0xf1   :  { %v143_v35 = vmul.f32 %v141_v30, %v135_v33 }
  0xf2   :  { %v142_v34 = vmul.f32 %v140_v32, %v134_v31 }
  0xf4   :  { %407 = vmatprep.mubr.msk.f32.mxu1 %vm154_vm1, %v142_v34  ;;  %v362_v34 = vld [vmem:[%s597_s7] ss:$0 sm:$0xff] }
  0xf5   :  { %408 = vmatmul.mubr.msk.f32.vlgmr.msra.gmra.mrb[0].mxu1 %vm154_vm1, %v143_v35 }
 0x1c8   :  { %v409_v38 = vpop.f32.mrb[0].mxu1 }
 0x1c9   :  { %v237_v39 = vadd.f32 %v409_v38, %v145_v36  ;;  %v227_v40 = vpop.f32.mrb[1].mxu1  ;;  %v363_v36 = vld [vmem:[%s598_s8] ss:$0 sm:$0xff] }
 0x1ca   :  { %v236_v41 = vadd.f32 %v227_v40, %v144_v37 }
 0x1cb   :  { %239 = vst.msk [vmem:[#allocation2 + $0x8] sm:$0xff] %vm36_vm0, %v237_v39 }
 0x1cc   :  { %238 = vst.msk [vmem:[#allocation2] sm:$0xff] %vm36_vm0, %v236_v41 }
 0x1d2   :  { %v246_v43 = vld [vmem:[#allocation2 + $0x8] sm:$0xff] }
 0x1d3   :  { %v245_v44 = vld [vmem:[#allocation2] sm:$0xff]  ;;  %v255_v46 = vadd.f32 %v359_v42, %v246_v43 }
 0x1d4   :  { %v254_v45 = vadd.f32 %v359_v42, %v245_v44 }
 0x1d5   :  { %v257_v49 = vadd.f32 %v255_v46, %v520_v7 }
 0x1d6   :  { %v256_v47 = vadd.f32 %v254_v45, %v513_v5 }
 0x1d7   :  { %v263_v50 = vsel %vm36_vm0, %v257_v49, 0.0 }
 0x1d8   :  { %v260_v48 = vsel %vm36_vm0, %v256_v47, 0.0 }
 0x1d9   :  { %261 = vadd.xlane.f32.xlu0 %v260_v48 }
 0x1dd   :  { %264 = vadd.xlane.f32.xlu0 %v263_v50 }
 0x266   :  { %v262_v51 = vpop.xlane.xlu0 %261 }
 0x267   :  { %v266_v52 = vmul.f32 0.03125, %v262_v51 }
 0x269   :  { %v268_v53 = vsub.f32 %v256_v47, %v266_v52 }
 0x26a   :  { %v265_v54 = vpop.xlane.xlu0 %264 }
 0x26b   :  { %v267_v55 = vmul.f32 0.03125, %v265_v54  ;;  %v270_v56 = vmul.f32 %v268_v53, %v268_v53 }
 0x26d   :  { %v269_v57 = vsub.f32 %v257_v49, %v267_v55  ;;  %v272_v58 = vsel %vm36_vm0, %v270_v56, 0.0 }
 0x26e   :  { %273 = vadd.xlane.f32.xlu1 %v272_v58 }
 0x26f   :  { %v271_v59 = vmul.f32 %v269_v57, %v269_v57 }
 0x271   :  { %v275_v60 = vsel %vm36_vm0, %v271_v59, 0.0 }
 0x272   :  { %276 = vadd.xlane.f32.xlu1 %v275_v60 }
 0x2fb   :  { %v274_v61 = vpop.xlane.xlu1 %273 }
 0x2fc   :  { %v278_v62 = vmul.f32 0.03125, %v274_v61 }
 0x2fe   :  { %v280_v63 = vadd.f32 1e-05, %v278_v62 }
 0x2ff   :  { %v277_v0 = vpop.xlane.xlu1 %276 }
 0x300   :  { %439 = vrsqrt.f32 %v280_v63  ;;  %v279_v1 = vmul.f32 0.03125, %v277_v0 }
 0x302   :  { %v281_v2 = vadd.f32 1e-05, %v279_v1 }
 0x304   :  { %441 = vrsqrt.f32 %v281_v2 }
 0x30a   :  { %v440_v3 = vpop.eup %439 }
 0x30b   :  { %v284_v6 = vmul.f32 %v440_v3, %v268_v53 }
 0x30d   :  { %v292_v9 = vmul.f32 %v360_v4, %v284_v6 }
 0x30e   :  { %v442_v10 = vpop.eup %441 }
 0x30f   :  { %v300_v11 = vadd.f32 %v361_v8, %v292_v9  ;;  %v285_v12 = vmul.f32 %v442_v10, %v269_v57 }
 0x311   :  { %v302_v13 = vadd.f32 %v300_v11, %v513_v5  ;;  %v293_v14 = vmul.f32 %v360_v4, %v285_v12 }
 0x313   :  { %v306_v15 = vsel %vm36_vm0, %v302_v13, 0.0  ;;  %v301_v16 = vadd.f32 %v361_v8, %v293_v14 }
 0x314   :  { %307 = vadd.xlane.f32.xlu0 %v306_v15 }
 0x315   :  { %v303_v17 = vadd.f32 %v301_v16, %v520_v7 }
 0x317   :  { %v309_v18 = vsel %vm36_vm0, %v303_v17, 0.0 }
 0x318   :  { %310 = vadd.xlane.f32.xlu1 %v309_v18 }
 0x3a1   :  { %v308_v19 = vpop.xlane.xlu0 %307 }
 0x3a2   :  { %v312_v20 = vmul.f32 0.03125, %v308_v19 }
 0x3a4   :  { %v314_v21 = vsub.f32 %v302_v13, %v312_v20 }
 0x3a5   :  { %v311_v22 = vpop.xlane.xlu1 %310 }
 0x3a6   :  { %v313_v23 = vmul.f32 0.03125, %v311_v22  ;;  %v316_v24 = vmul.f32 %v314_v21, %v314_v21 }
 0x3a8   :  { %v315_v25 = vsub.f32 %v303_v17, %v313_v23  ;;  %v318_v26 = vsel %vm36_vm0, %v316_v24, 0.0 }
 0x3a9   :  { %319 = vadd.xlane.f32.xlu0 %v318_v26 }
 0x3aa   :  { %v317_v5 = vmul.f32 %v315_v25, %v315_v25 }
 0x3ac   :  { %v321_v27 = vsel %vm36_vm0, %v317_v5, 0.0 }
 0x3ad   :  { %322 = vadd.xlane.f32.xlu1 %v321_v27 }
 0x436   :  { %v320_v28 = vpop.xlane.xlu0 %319 }
 0x437   :  { %v324_v29 = vmul.f32 0.03125, %v320_v28 }
 0x439   :  { %v326_v7 = vadd.f32 1e-05, %v324_v29 }
 0x43a   :  { %v323_v30 = vpop.xlane.xlu1 %322 }
 0x43b   :  { %443 = vrsqrt.f32 %v326_v7  ;;  %v325_v31 = vmul.f32 0.03125, %v323_v30 }
 0x43d   :  { %v327_v32 = vadd.f32 1e-05, %v325_v31 }
 0x43f   :  { %445 = vrsqrt.f32 %v327_v32 }
 0x445   :  { %v444_v33 = vpop.eup %443 }
 0x446   :  { %v330_v35 = vmul.f32 %v444_v33, %v314_v21 }
 0x448   :  { %v338_v37 = vmul.f32 %v362_v34, %v330_v35 }
 0x449   :  { %v446_v38 = vpop.eup %445 }
 0x44a   :  { %v346_v39 = vadd.f32 %v363_v36, %v338_v37  ;;  %v331_v40 = vmul.f32 %v446_v38, %v315_v25 }
 0x44c   :  { %348 = vst.msk [vmem:[%s599_s9] sm:$0xff] %vm36_vm0, %v346_v39  ;;  %v339_v41 = vmul.f32 %v362_v34, %v331_v40 }
 0x44e   :  { %v347_v42 = vadd.f32 %v363_v36, %v339_v41 }
 0x450   :  { %349 = vst.msk [vmem:[%s599_s9 + $0x8] sm:$0xff] %vm36_vm0, %v347_v42 }

// kernel: decoder_forward.8
= control target key start
LH: loop header
LB: loop body
LE: loop exit
PB: predicated region body
PF: predicated region fallthrough
CT: control target
= control target key end

     0   :  { %s1990_s18 = smov 0   ;;  %s2181_s0 = inlined_call_operand.vmem [shape: f32[2,8,32], index: 0, kind: input, shape index: {}, may-alias: {0,1}]   ;;  %s2182_s1 = inlined_call_operand.vmem [shape: f32[2,8,32], index: 1, kind: input, shape index: {}, may-alias: {0,1}]   ;;  %s2183_s2 = inlined_call_operand.vmem [shape: f32[2,8,8], index: 2, kind: input, shape index: {}]   ;;  %s2184_s3 = inlined_call_operand.vmem [shape: f32[32,32], index: 3, kind: input, shape index: {}]   ;;  %s2185_s4 = inlined_call_operand.vmem [shape: f32[1,32], index: 4, kind: input, shape index: {}]   ;;  %s2186_s5 = inlined_call_operand.vmem [shape: f32[32,32], index: 5, kind: input, shape index: {}]   ;;  %s2187_s6 = inlined_call_operand.vmem [shape: f32[1,32], index: 6, kind: input, shape index: {}]   ;;  %s2188_s7 = inlined_call_operand.vmem [shape: f32[32,32], index: 7, kind: input, shape index: {}]   ;;  %s2189_s8 = inlined_call_operand.vmem [shape: f32[1,32], index: 8, kind: input, shape index: {}]   ;;  %s2190_s9 = inlined_call_operand.vmem [shape: f32[32,32], index: 9, kind: input, shape index: {}]   ;;  %s2191_s10 = inlined_call_operand.vmem [shape: f32[1,32], index: 10, kind: input, shape index: {}]   ;;  %s2192_s11 = inlined_call_operand.vmem [shape: f32[1,32], index: 11, kind: input, shape index: {}]   ;;  %s2193_s12 = inlined_call_operand.vmem [shape: f32[1,32], index: 12, kind: input, shape index: {}]   ;;  %s2194_s13 = inlined_call_operand.vmem [shape: f32[1,32], index: 13, kind: input, shape index: {}]   ;;  %s2195_s14 = inlined_call_operand.vmem [shape: f32[1,32], index: 14, kind: input, shape index: {}]   ;;  %s2196_s15 = inlined_call_operand.vmem [shape: f32[2,8,32], index: 15, kind: output, shape index: {}]  }
   0x1 LB: > { %s1677_s19 = sadd.s32 4294967295, %s1899_s18   ;;  %p1681_p0 = scmp.ge.s32.totalorder %s1899_s18, 1  ;;  %s1899_s18 = sphi %s1990_s18, %s25_s18  }
   0x2   : > { %p454_p1 = scmp.lt.s32.totalorder %s1899_s18, 3 }
   0x4   : > { %p455_p2 = pnand %p1681_p0, %p454_p1 }
   0x5   : > { %v612_v0 = vld [vmem:[%s2186_s5] sm:$0xff] (!%p455_p2)  ;;  %v613_v1 = vld [vmem:[%s2186_s5 + $0x8] sm:$0xff] (!%p455_p2)  ;;  %v1901_v3 = vmov (!%p455_p2), 0.0|0.0   ;;  %v614_v6 = vld [vmem:[%s2186_s5 + $0x10] sm:$0xff] (!%p455_p2)  ;;  %p508_p3 = scmp.lt.s32.totalorder (!%p455_p2), %s1677_s19, 1  ;;  %vm1902_vm0 = vmmov (!%p455_p2), 0  }
   0x6   : > { %458 = sbr.rel (%p455_p2) target bundleno = 2539 (0x9eb), region = 80  ;;  %v527_v2 = vld [vmem:[%s2184_s3] sm:$0xff] (!%p455_p2)  ;;  %1838 = vmatprep.subr.bf16.mxu1 (!%p455_p2), %v1901_v3  ;;  %1832 = vmatprep.subr.bf16.mxu0 (!%p455_p2), %v1901_v3  ;;  %v1839_v4 = vpack.c.bf16 (!%p455_p2), %v613_v1, %v612_v0  ;;  %v528_v5 = vld [vmem:[%s2184_s3 + $0x8] sm:$0xff] (!%p455_p2)  ;;  %v615_v7 = vld [vmem:[%s2186_s5 + $0x18] sm:$0xff] (!%p455_p2)  ;;  %v1903_v11 = vmov (!%p455_p2), 0.0   ;;  %vm538_vm1 = vcmask (!%p455_p2), 261120  }
   0x7   : > { %v1833_v8 = vpack.c.bf16 (!%p455_p2), %v528_v5, %v527_v2  ;;  %v529_v9 = vld [vmem:[%s2184_s3 + $0x10] sm:$0xff] (!%p455_p2)  ;;  %v530_v10 = vld [vmem:[%s2184_s3 + $0x18] sm:$0xff] (!%p455_p2)  ;;  %1767 = vmatprep.mubr.msk.f32.mxu1 (!%p455_p2), %vm1902_vm0, %v1903_v11  ;;  %1756 = vmatprep.mubr.msk.f32.mxu0 (!%p455_p2), %vm1902_vm0, %v1903_v11  ;;  %v1842_v12 = vpack.c.bf16 (!%p455_p2), %v615_v7, %v614_v6  ;;  %v1688_v16 = vld [vmem:[%s2187_s6] ss:$0 sm:$0xff] (!%p455_p2)  ;;  %vm778_vm2 = vcmask (!%p455_p2), 64512   ;;  %s1904_s20 = smov (!%p455_p2), 120  }
   0x8   : > { %1840 = vmatpush3.bf16.msra.mxu1 (!%p455_p2), %v1839_v4  ;;  %v1836_v13 = vpack.c.bf16 (!%p455_p2), %v530_v10, %v529_v9  ;;  %v1686_v17 = vld [vmem:[%s2185_s4] ss:$0 sm:$0xff] (!%p455_p2)  ;;  %s1905_s21 = smov (!%p455_p2), 112   ;;  %s1906_s22 = smov (!%p455_p2), 104   ;;  %v697_v26 = vld [vmem:[%s2188_s7 + $0x8] sm:$0xff] (!%p455_p2)  ;;  %v698_v27 = vld [vmem:[%s2188_s7 + $0x10] sm:$0xff] (!%p455_p2) }
   0x9   : > { %1834 = vmatpush3.bf16.msra.mxu0 (!%p455_p2), %v1833_v8  ;;  %1841 = vmatprep.subr.bf16.mxu1 (!%p455_p2), %v1901_v3  ;;  %v696_v25 = vld [vmem:[%s2188_s7] sm:$0xff] (!%p455_p2)  ;;  %v699_v29 = vld [vmem:[%s2188_s7 + $0x18] sm:$0xff] (!%p455_p2)  ;;  %s1907_s16 = smov (!%p455_p2), 8   ;;  %s1908_s17 = smov (!%p455_p2), 16   ;;  %vm1110_vm3 = vcmask (!%p455_p2), 130112   ;;  %vm1281_vm4 = vcmask (!%p455_p2), 195712  }
   0xa   : > { %1835 = vmatprep.subr.bf16.mxu0 (!%p455_p2), %v1901_v3  ;;  %v1845_v28 = vpack.c.bf16 (!%p455_p2), %v697_v26, %v696_v25  ;;  %v1848_v30 = vpack.c.bf16 (!%p455_p2), %v699_v29, %v698_v27  ;;  %v1690_v41 = vld [vmem:[%s2189_s8] ss:$0 sm:$0xff] (!%p455_p2)  ;;  %vm1452_vm5 = vcmask (!%p455_p2), 261312  }
   0xc   : > { %1843 = vmatpush3.bf16.msra.mxu1 (!%p455_p2), %v1842_v12 }
   0xd   : > { %s2198_s19 = smov (!%p508_p3, %s1677_s19), 1  ;;  %1837 = vmatpush3.bf16.msra.mxu0 %v1836_v13  ;;  %1781 = vmatprep.subr.mxu1 %v1903_v11 }
   0xe   : > { %s2030_s23 = sshll.u32 %s2198_s19, 3  ;;  %1844 = vmatprep.subr.bf16.mxu0 %v1901_v3 }
   0xf   : > { %s515_s26 = scalar_lea.vmem %s2182_s1, %s2030_s23  ;;  %s511_s29 = scalar_lea.vmem %s2181_s0, %s2030_s23 }
  0x10   : > { %v525_v14 = vld [vmem:[%s515_s26] sm:$0xff]  ;;  %s519_s24 = scalar_lea.vmem %s2183_s2, %s2030_s23 }
  0x11   : > { %v2040_v15 = vld [vmem:[%s511_s29] sm:$0xff]  ;;  %1768 = vmatmul.mubr.msk.f32.vlgmr.msra.gmra.mrb[0].mxu1 %vm538_vm1, %v525_v14 }
  0x12   : > { %1757 = vmatmul.mubr.msk.f32.vlgmr.msra.gmra.mrb[0].mxu0 %vm538_vm1, %v2040_v15  ;;  %1783 = vmatprep.mubr.msk.f32.mxu1 %vm1902_vm0, %v1903_v11  ;;  %v526_v31 = vld [vmem:[%s519_s24] sm:$0xff]  ;;  %s1909_s24 = smov 24  }
  0x13   : > { %1778 = vmatprep.mubr.msk.f32.mxu0 %vm1902_vm0, %v1903_v11  ;;  %1846 = vmatpush3.bf16.msra.mxu0 %v1845_v28 }
  0x14   : > { %1847 = vmatprep.subr.bf16.mxu0 %v1901_v3 }
  0x17   : > { %1849 = vmatpush3.bf16.msra.mxu0 %v1848_v30 }
  0x18   : > { %1801 = vmatprep.subr.mxu0 %v1903_v11 }
  0x1a   : > { %1779 = vmatmul.mubr.msk.f32.vlgmr.msra.gmra.mrb[2].mxu0 %vm538_vm1, %v525_v14 }
  0x1b   : > { %1803 = vmatprep.mubr.msk.f32.mxu0 %vm1902_vm0, %v1903_v11 }
  0xe4   : > { %v692_v18 = vpop.f32.mrb[0].mxu1 }
  0xe5   : > { %v693_v19 = vadd.f32 %v1688_v16, %v692_v18  ;;  %v608_v20 = vpop.f32.mrb[0].mxu0  ;;  %v1769_v21 = vpop.f32.mrb[1].mxu1 }
  0xe6   : > { %v609_v22 = vadd.f32 %v1686_v17, %v608_v20  ;;  %v1758_v23 = vpop.f32.mrb[1].mxu0 }
  0xe7   : > { %942 = vrot.lane.b32.xlu1 %v693_v19, %s1904_s20  ;;  %1782 = vmatpush3.xpose.msk.msra.mxu1 %vm778_vm2, %v693_v19 }
  0xe8   : > { %v777_v24 = vmul.f32 0.35355338, %v609_v22  ;;  %1786 = vmatprep.subr.mxu1 %v1903_v11 }
  0xea   : > { %1784 = vmatmul.mubr.msk.f32.vlgmr.msra.gmra.mrb[2].mxu1 %vm778_vm2, %v777_v24 }
  0xeb   : > { %940 = vrot.lane.b32.xlu1 %v777_v24, %s1904_s20  ;;  %1788 = vmatprep.mubr.msk.f32.mxu1 %vm1902_vm0, %v1903_v11 }
  0xed   : > { %v773_v42 = vpop.f32.mrb[2].mxu0 }
  0xee   : > { %v2093_v43 = vadd.f32 %v1690_v41, %v773_v42  ;;  %v1780_v44 = vpop.f32.mrb[3].mxu0 }
  0xef   : > { %1112 = vrot.lane.b32.xlu1 %v777_v24, %s1905_s21 }
  0xf0   : > { %1787 = vmatpush3.msra.mxu1 %v2093_v43 }
  0xf1   : > { %1791 = vmatprep.subr.mxu1 %v1903_v11 }
  0xf3   : > { %1285 = vrot.lane.b32.xlu1 %v693_v19, %s1906_s22 }
  0xf7   : > { %1283 = vrot.lane.b32.xlu1 %v777_v24, %s1906_s22 }
 0x159   : > { %v943_v45 = vpop.permute.xlu1 %942 }
 0x15d   : > { %v941_v46 = vpop.permute.xlu1 %940 }
 0x161   : > { %v1113_v47 = vpop.permute.xlu1 %1112 }
 0x165   : > { %v1286_v50 = vpop.permute.xlu1 %1285 }
 0x169   : > { %v1284_v52 = vpop.permute.xlu1 %1283 }
 0x1bd   : > { %v851_v32 = vpop.f32.mrb[2].mxu1 }
 0x1be   : > { %v852_v33 = vadd.f32 %v851_v32, %v526_v31  ;;  %v1785_v34 = vpop.f32.mrb[3].mxu1 }
 0x1bf   : > { %v1455_v34 = vld [vmem:[%s2190_s9] sm:$0xff] }
 0x1c0   : > { %v855_v35 = vsel %vm778_vm2, %v852_v33, -inf }
 0x1c1   : > { %856 = vmax.xlane.f32.xlu0 %v855_v35  ;;  %v1456_v35 = vld [vmem:[%s2190_s9 + $0x8] sm:$0xff] }
 0x24e   : > { %v857_v36 = vpop.xlane.xlu0 %856 }
 0x24f   : > { %v858_v37 = vsub.f32 %v852_v33, %v857_v36  ;;  %v1851_v36 = vpack.c.bf16 %v1456_v35, %v1455_v34 }
 0x251   : > { %v859_v38 = vmul.f32 1.442695, %v858_v37  ;;  %v1457_v37 = vld [vmem:[%s2190_s9 + $0x10] sm:$0xff] }
 0x253   : > { %1873 = vpow2.f32 %v859_v38 }
 0x25d   : > { %v1874_v39 = vpop.eup %1873 }
 0x25e   : > { %v861_v40 = vsel %vm778_vm2, %v1874_v39, 0.0 }
 0x25f   : > { %862 = vadd.xlane.f32.xlu0 %v861_v40 }
 0x275   : > { %1114 = vrot.lane.b32.xlu0 %v693_v19, %s1905_s21 }
 0x2ec   : > { %v863_v48 = vpop.xlane.xlu0 %862 }
 0x2ed   : > { %1875 = vrcp.f32 %v863_v48  ;;  %v1704_v48 = vld [vmem:[%s2191_s10] ss:$0 sm:$0xff] }
 0x2f0   : > { %v1115_v49 = vpop.permute.xlu0 %1114 }
 0x2f1   : > { %1802 = vmatpush3.xpose.msk.msra.mxu0 %vm778_vm2, %v1115_v49 }
 0x2f2   : > { %1811 = vmatprep.subr.mxu0 %v1903_v11 }
 0x2f4   : > { %1804 = vmatmul.mubr.msk.f32.vlgmr.msra.gmra.mrb[4].mxu0 %vm778_vm2, %v1113_v47 }
 0x2f5   : > { %1812 = vmatpush3.xpose.msk.msra.mxu0 %vm778_vm2, %v1286_v50  ;;  %1813 = vmatprep.mubr.msk.f32.mxu0 %vm1902_vm0, %v1903_v11 }
 0x2f6   : > { %1850 = vmatprep.subr.bf16.mxu0 %v1901_v3 }
 0x2f7   : > { %v1876_v51 = vpop.eup %1875 }
 0x2f8   : > { %v865_v53 = vmul.f32 %v1876_v51, %v1874_v39  ;;  %1814 = vmatmul.mubr.msk.f32.vlgmr.msra.gmra.mrb[6].mxu0 %vm778_vm2, %v1284_v52 }
 0x2f9   : > { %1829 = vmatprep.mubr.msk.f32.mxu0 %vm1902_vm0, %v1903_v11  ;;  %1852 = vmatpush3.bf16.msra.mxu0 %v1851_v36 }
 0x2fa   : > { %1789 = vmatmul.mubr.msk.f32.vlgmr.msra.gmra.mrb[4].mxu1 %vm778_vm2, %v865_v53  ;;  %1853 = vmatprep.subr.bf16.mxu0 %v1901_v3 }
 0x2fb   : > { %1792 = vmatpush3.xpose.msk.msra.mxu1 %vm778_vm2, %v943_v45  ;;  %1793 = vmatprep.mubr.msk.f32.mxu1 %vm1902_vm0, %v1903_v11 }
 0x2fc   : > { %1796 = vmatprep.subr.mxu1 %v1903_v11 }
 0x2fe   : > { %1794 = vmatmul.mubr.msk.f32.vlgmr.msra.gmra.mrb[6].mxu1 %vm778_vm2, %v941_v46 }
 0x2ff   : > { %1798 = vmatprep.mubr.msk.f32.mxu1 %vm1902_vm0, %v1903_v11 }
 0x3c7   : > { %v1186_v54 = vpop.f32.mrb[4].mxu0 }
 0x3c8   : > { %v1187_v55 = vadd.f32 %v1186_v54, %v526_v31  ;;  %v1805_v56 = vpop.f32.mrb[5].mxu0 }
 0x3ca   : > { %v1190_v57 = vsel %vm778_vm2, %v1187_v55, -inf }
 0x3cb   : > { %1191 = vmax.xlane.f32.xlu0 %v1190_v57  ;;  %v1357_v58 = vpop.f32.mrb[6].mxu0 }
 0x3cc   : > { %v1815_v59 = vpop.f32.mrb[7].mxu0  ;;  %v1358_v1 = vadd.f32 %v1357_v58, %v526_v31 }
 0x3cd   : > { %v935_v60 = vpop.f32.mrb[4].mxu1 }
 0x3ce   : > { %939 = vst.msk [vmem:[#allocation2] sm:$0xff] %vm778_vm2, %v935_v60  ;;  %v1790_v61 = vpop.f32.mrb[5].mxu1  ;;  %v1361_v4 = vsel %vm778_vm2, %v1358_v1, -inf }
 0x3d1   : > { %v1014_v62 = vpop.f32.mrb[6].mxu1 }
 0x3d2   : > { %v1015_v63 = vadd.f32 %v1014_v62, %v526_v31  ;;  %v1795_v0 = vpop.f32.mrb[7].mxu1 }
 0x3d4   : > { %v1018_v2 = vsel %vm778_vm2, %v1015_v63, -inf }
 0x3d5   : > { %1019 = vmax.xlane.f32.xlu1 %v1018_v2 }
 0x3d9   : > { %1362 = vmax.xlane.f32.xlu1 %v1361_v4 }
 0x458   : > { %v1192_v5 = vpop.xlane.xlu0 %1191 }
 0x459   : > { %v1193_v6 = vsub.f32 %v1187_v55, %v1192_v5 }
 0x45b   : > { %v1194_v7 = vmul.f32 1.442695, %v1193_v6 }
 0x45d   : > { %1877 = vpow2.f32 %v1194_v7 }
 0x462   : > { %v1020_v8 = vpop.xlane.xlu1 %1019 }
 0x463   : > { %v1021_v18 = vsub.f32 %v1015_v63, %v1020_v8  ;;  %v1706_v63 = vld [vmem:[%s2192_s11] ss:$0 sm:$0xff] }
 0x465   : > { %v1022_v19 = vmul.f32 1.442695, %v1021_v18 }
 0x466   : > { %v1363_v9 = vpop.xlane.xlu1 %1362 }
 0x467   : > { %v1878_v10 = vpop.eup %1877  ;;  %v1364_v12 = vsub.f32 %v1358_v1, %v1363_v9  ;;  %v1707_v1 = vld [vmem:[%s2193_s12] ss:$0 sm:$0xff] }
 0x468   : > { %v1196_v13 = vsel %vm778_vm2, %v1878_v10, 0.0 }
 0x469   : > { %v1365_v14 = vmul.f32 1.442695, %v1364_v12  ;;  %1197 = vadd.xlane.f32.xlu0 %v1196_v13 }
 0x46b   : > { %1879 = vpow2.f32 %v1365_v14 }
 0x46c   : > { %1881 = vpow2.f32 %v1022_v19  ;;  %v1709_v19 = vld [vmem:[%s2195_s14] ss:$0 sm:$0xff] }
 0x475   : > { %v1880_v16 = vpop.eup %1879 }
 0x476   : > { %v1367_v17 = vsel %vm778_vm2, %v1880_v16, 0.0  ;;  %v1882_v20 = vpop.eup %1881 }
 0x477   : > { %1368 = vadd.xlane.f32.xlu1 %v1367_v17  ;;  %v1024_v21 = vsel %vm778_vm2, %v1882_v20, 0.0 }
 0x47f   : > { %1030 = vrot.lane.b32.xlu0 %v2093_v43, %s1904_s20 }
 0x488   : > { %1201 = vrot.lane.b32.xlu1 %v2093_v43, %s1905_s21 }
 0x4ac   : > { %1025 = vadd.xlane.f32.xlu1 %v1024_v21 }
 0x4bd   : > { %1372 = vrot.lane.b32.xlu1 %v2093_v43, %s1906_s22 }
 0x4f6   : > { %v1198_v22 = vpop.xlane.xlu0 %1197 }
 0x4fa   : > { %v1031_v23 = vpop.permute.xlu0 %1030 }
 0x4fb   : > { %1797 = vmatpush3.msra.mxu1 %v1031_v23 }
 0x4fc   : > { %1806 = vmatprep.subr.mxu1 %v1903_v11 }
 0x504   : > { %v1369_v24 = vpop.xlane.xlu1 %1368 }
 0x508   : > { %v1202_v25 = vpop.permute.xlu1 %1201 }
 0x539   : > { %v1026_v26 = vpop.xlane.xlu1 %1025 }
 0x53a   : > { %1883 = vrcp.f32 %v1026_v26 }
 0x53b   : > { %1885 = vrcp.f32 %v1198_v22 }
 0x53c   : > { %1887 = vrcp.f32 %v1369_v24 }
 0x53d   : > { %v1373_v32 = vpop.permute.xlu1 %1372 }
 0x544   : > { %v1884_v27 = vpop.eup %1883 }
 0x545   : > { %v1028_v28 = vmul.f32 %v1884_v27, %v1882_v20  ;;  %v1886_v29 = vpop.eup %1885 }
 0x546   : > { %v1200_v30 = vmul.f32 %v1886_v29, %v1878_v10  ;;  %v1888_v31 = vpop.eup %1887 }
 0x547   : > { %1799 = vmatmul.mubr.msk.f32.vlgmr.msra.gmra.mrb[8].mxu1 %vm778_vm2, %v1028_v28  ;;  %v1371_v33 = vmul.f32 %v1888_v31, %v1880_v16 }
 0x548   : > { %1807 = vmatpush3.msra.mxu1 %v1202_v25  ;;  %1808 = vmatprep.mubr.msk.f32.mxu1 %vm1902_vm0, %v1903_v11 }
 0x549   : > { %1816 = vmatprep.subr.mxu1 %v1903_v11 }
 0x54b   : > { %1809 = vmatmul.mubr.msk.f32.vlgmr.msra.gmra.mrb[10].mxu1 %vm778_vm2, %v1200_v30 }
 0x54c   : > { %1817 = vmatpush3.msra.mxu1 %v1373_v32  ;;  %1818 = vmatprep.mubr.msk.f32.mxu1 %vm1902_vm0, %v1903_v11  ;;  %v1458_v11 = vld [vmem:[%s2190_s9 + $0x18] sm:$0xff] }
 0x54d   : > { %v1854_v38 = vpack.c.bf16 %v1458_v11, %v1457_v37 }
 0x54f   : > { %1819 = vmatmul.mubr.msk.f32.vlgmr.msra.gmra.mrb[12].mxu1 %vm778_vm2, %v1371_v33  ;;  %1855 = vmatpush3.bf16.msra.mxu0 %v1854_v38 }
 0x61a   : > { %v1102_v39 = vpop.f32.mrb[8].mxu1 }
 0x61b   : > { %1107 = vrot.lane.b32.xlu0 %v1102_v39, %s1907_s16  ;;  %v1800_v40 = vpop.f32.mrb[9].mxu1 }
 0x61e   : > { %v1273_v41 = vpop.f32.mrb[10].mxu1 }
 0x61f   : > { %1278 = vrot.lane.b32.xlu1 %v1273_v41, %s1908_s17  ;;  %v1810_v42 = vpop.f32.mrb[11].mxu1 }
 0x622   : > { %v1444_v43 = vpop.f32.mrb[12].mxu1 }
 0x623   : > { %1449 = vrot.lane.b32.xlu0 %v1444_v43, %s1909_s24  ;;  %v1820_v44 = vpop.f32.mrb[13].mxu1  ;;  %s523_s24 = scalar_lea.vmem %s2196_s15, %s2030_s23 }
 0x68d   : > { %v1108_v45 = vpop.permute.xlu0 %1107 }
 0x68e   : > { %1111 = vst.msk [vmem:[#allocation2] sm:$0xff] %vm1110_vm3, %v1108_v45 }
 0x691   : > { %v1279_v46 = vpop.permute.xlu1 %1278 }
 0x692   : > { %1282 = vst.msk [vmem:[#allocation2] sm:$0xff] %vm1281_vm4, %v1279_v46 }
 0x695   : > { %v1450_v3 = vpop.permute.xlu0 %1449 }
 0x696   : > { %1453 = vst.msk [vmem:[#allocation2] sm:$0xff] %vm1452_vm5, %v1450_v3 }
 0x69d   : > { %v1454_v47 = vld [vmem:[#allocation2] sm:$0xff] }
 0x69e   : > { %1830 = vmatmul.mubr.msk.f32.vlgmr.msra.gmra.mrb[8].mxu0 %vm538_vm1, %v1454_v47 }
 0x771   : > { %v1535_v49 = vpop.f32.mrb[8].mxu0 }
 0x772   : > { %v1536_v50 = vadd.f32 %v1704_v48, %v1535_v49  ;;  %v1831_v51 = vpop.f32.mrb[9].mxu0 }
 0x774   : > { %v1539_v52 = vadd.f32 %v1536_v50, %v2040_v15 }
 0x776   : > { %v1542_v53 = vsel %vm538_vm1, %v1539_v52, 0.0 }
 0x777   : > { %1543 = vadd.xlane.f32.xlu1 %v1542_v53 }
 0x804   : > { %v1544_v54 = vpop.xlane.xlu1 %1543 }
 0x805   : > { %v1545_v55 = vmul.f32 0.03125, %v1544_v54 }
 0x807   : > { %v1546_v56 = vsub.f32 %v1539_v52, %v1545_v55 }
 0x809   : > { %v1547_v57 = vmul.f32 %v1546_v56, %v1546_v56 }
 0x80b   : > { %v1548_v58 = vsel %vm538_vm1, %v1547_v57, 0.0 }
 0x80c   : > { %1549 = vadd.xlane.f32.xlu0 %v1548_v58 }
 0x899   : > { %v1550_v59 = vpop.xlane.xlu0 %1549 }
 0x89a   : > { %v1551_v60 = vmul.f32 0.03125, %v1550_v59 }
 0x89c   : > { %v1552_v61 = vadd.f32 1e-05, %v1551_v60 }
 0x89e   : > { %1889 = vrsqrt.f32 %v1552_v61 }
 0x8a8   : > { %v1890_v62 = vpop.eup %1889 }
 0x8a9   : > { %v1554_v0 = vmul.f32 %v1890_v62, %v1546_v56 }
 0x8ab   : > { %v1561_v2 = vmul.f32 %v1706_v63, %v1554_v0 }
 0x8ad   : > { %v1568_v4 = vadd.f32 %v1707_v1, %v1561_v2 }
 0x8af   : > { %v1569_v5 = vadd.f32 %v1568_v4, %v2040_v15  ;;  %v1708_v15 = vld [vmem:[%s2194_s13] ss:$0 sm:$0xff] }
 0x8b1   : > { %v1572_v6 = vsel %vm538_vm1, %v1569_v5, 0.0 }
 0x8b2   : > { %1573 = vadd.xlane.f32.xlu0 %v1572_v6 }
 0x93f   : > { %v1574_v7 = vpop.xlane.xlu0 %1573 }
 0x940   : > { %v1575_v8 = vmul.f32 0.03125, %v1574_v7 }
 0x942   : > { %v1576_v9 = vsub.f32 %v1569_v5, %v1575_v8 }
 0x944   : > { %v1577_v10 = vmul.f32 %v1576_v9, %v1576_v9 }
 0x946   : > { %v1578_v12 = vsel %vm538_vm1, %v1577_v10, 0.0 }
 0x947   : > { %1579 = vadd.xlane.f32.xlu1 %v1578_v12 }
 0x9d4   : > { %v1580_v13 = vpop.xlane.xlu1 %1579 }
 0x9d5   : > { %v1581_v14 = vmul.f32 0.03125, %v1580_v13 }
 0x9d7   : > { %v1582_v16 = vadd.f32 1e-05, %v1581_v14 }
 0x9d9   : > { %1891 = vrsqrt.f32 %v1582_v16 }
 0x9e3   : > { %v1892_v17 = vpop.eup %1891 }
 0x9e4   : > { %v1584_v18 = vmul.f32 %v1892_v17, %v1576_v9 }
 0x9e6   : > { %v1591_v20 = vmul.f32 %v1708_v15, %v1584_v18 }
 0x9e8   : > { %v1598_v21 = vadd.f32 %v1709_v19, %v1591_v20 }
 0x9ea   : > { %1599 = vst.msk [vmem:[%s523_s24] sm:$0xff] %vm538_vm1, %v1598_v21 }
 0x9eb PF: > { %s25_s18 = sadd.s32 1, %s1899_s18  }
 0x9ec   : > { %p22_p4 = scmp.ge.s32.totalorder %s25_s18, 4  }
 0x9ee   :  { %24 = sbr.rel (!%p22_p4) target bundleno = 1 (0x1), region = 116 }

// kernel: decoder_forward.13
= control target key start
LH: loop header
LB: loop body
LE: loop exit
PB: predicated region body
PF: predicated region fallthrough
CT: control target
= control target key end

     0   :  { %vm37_vm0 = vcmask 261120   ;;  %s639_s0 = inlined_call_operand.vmem [shape: f32[16,32], index: 0, kind: input, shape index: {}]   ;;  %s640_s1 = inlined_call_operand.vmem [shape: f32[32,64], index: 1, kind: input, shape index: {}]   ;;  %s641_s2 = inlined_call_operand.vmem [shape: f32[1,64], index: 2, kind: input, shape index: {}]   ;;  %s642_s3 = inlined_call_operand.vmem [shape: f32[64,32], index: 3, kind: input, shape index: {}]   ;;  %s643_s4 = inlined_call_operand.vmem [shape: f32[1,32], index: 4, kind: input, shape index: {}]   ;;  %s644_s5 = inlined_call_operand.vmem [shape: f32[1,32], index: 5, kind: input, shape index: {}]   ;;  %s645_s6 = inlined_call_operand.vmem [shape: f32[1,32], index: 6, kind: input, shape index: {}]   ;;  %s646_s7 = inlined_call_operand.vmem [shape: f32[1,32], index: 7, kind: input, shape index: {}]   ;;  %s647_s8 = inlined_call_operand.vmem [shape: f32[1,32], index: 8, kind: input, shape index: {}]   ;;  %s648_s9 = inlined_call_operand.hbm [shape: f32[16,32], index: 9, kind: output, shape index: {}]  }
   0x1   :  { %v42_v0 = vld [vmem:[%s640_s1] sm:$0xff]  ;;  %v43_v1 = vld [vmem:[%s640_s1 + $0x8] sm:$0xff]  ;;  %v44_v2 = vld [vmem:[%s640_s1 + $0x10] sm:$0xff] }
   0x2   :  { %v423_v3 = vpack.c.bf16 %v43_v1, %v42_v0  ;;  %v45_v4 = vld [vmem:[%s640_s1 + $0x18] sm:$0xff]  ;;  %v556_v5 = vld [vmem:[%s639_s0] sm:$0xff] }
   0x3   :  { %v427_v6 = vpack.c.bf16 %v45_v4, %v44_v2  ;;  %401 = vmatprep.mubr.msk.f32.mxu0 %vm37_vm0, %v556_v5 }
   0x4   :  { %14 = vsyncpa [#allocation4], 0  ;;  %424 = vmatprep.subr.bf16.mxu0 %v423_v3  ;;  %v563_v7 = vld [vmem:[%s639_s0 + $0x8] sm:$0xff]  ;;  %v147_v8 = vld [vmem:[%s642_s3] sm:$0xff]  ;;  %v487_v20 = vmov 0.0   ;;  %vm155_vm1 = vcmask 523264  }
   0x5   :  { %426 = vmatpush3.bf16.msra.mxu0 %v423_v3  ;;  %v148_v9 = vld [vmem:[%s642_s3 + $0x8] sm:$0xff]  ;;  %v149_v11 = vld [vmem:[%s642_s3 + $0x10] sm:$0xff]  ;;  %v150_v12 = vld [vmem:[%s642_s3 + $0x18] sm:$0xff]  ;;  %39 = vst.msk [vmem:[#allocation2 + $0x8] sm:$0xff] %vm37_vm0, %v487_v20  ;;  %s488_s1 = smov [#allocation3]  }
   0x6   :  { %428 = vmatprep.subr.bf16.mxu0 %v427_v6  ;;  %v431_v10 = vpack.c.bf16 %v148_v9, %v147_v8  ;;  %v435_v13 = vpack.c.bf16 %v150_v12, %v149_v11  ;;  %v151_v14 = vld [vmem:[%s642_s3 + $0x20] sm:$0xff]  ;;  %v152_v15 = vld [vmem:[%s642_s3 + $0x28] sm:$0xff]  ;;  %v153_v17 = vld [vmem:[%s642_s3 + $0x30] sm:$0xff]  ;;  %38 = vst.msk [vmem:[#allocation2] sm:$0xff] %vm37_vm0, %v487_v20  ;;  %s356_s21 = sshll.u32 %s488_s1, 4  ;;  %s357_s21 = int_to_ptr.vmem [resolvable:$true] %s356_s21 }
   0x7   :  { %v439_v16 = vpack.c.bf16 %v152_v15, %v151_v14  ;;  %v154_v18 = vld [vmem:[%s642_s3 + $0x38] sm:$0xff]  ;;  %v367_v21 = vld [vmem:[%s641_s2] ss:$0 sm:$0xff]  ;;  %s463_s22 = scalar_lea.vmem %s357_s21, 256  ;;  %p468_p1 = scmp.lt.s32.totalorder %s357_s21, %s357_s21 }
   0x8   :  { %432 = vmatprep.subr.bf16.mxu1 %v431_v10  ;;  %v443_v19 = vpack.c.bf16 %v154_v18, %v153_v17  ;;  %v372_v42 = vld [vmem:[%s643_s4] ss:$0 sm:$0xff]  ;;  %p464_p0 = scmp.ne.s32.totalorder %s357_s21, %s463_s22  ;;  %p469_p2 = scmp.lt.s32.totalorder %s463_s22, %s463_s22 }
   0x9   :  { %430 = vmatpush3.bf16.msra.mxu0 %v427_v6  ;;  %434 = vmatpush3.bf16.msra.mxu1 %v431_v10  ;;  %v373_v4 = vld [vmem:[%s644_s5] ss:$0 sm:$0xff] }
   0xa   :  { %436 = vmatprep.subr.bf16.mxu1 %v435_v13  ;;  %v374_v8 = vld [vmem:[%s645_s6] ss:$0 sm:$0xff]  ;;  %p470_p3 = por %p469_p2, %p468_p1 }
   0xc   :  { %402 = vmatmul.mubr.msk.f32.vlgmr.msra.gmra.mrb[0].mxu0 %vm37_vm0, %v563_v7  ;;  %v146_v36 = vld [vmem:[#allocation2 + $0x8] sm:$0xff]  ;;  %p471_p4 = pnand %p470_p3, %p464_p0 }
   0xd   :  { %438 = vmatpush3.bf16.msra.mxu1 %v435_v13  ;;  %v145_v37 = vld [vmem:[#allocation2] sm:$0xff] }
   0xe   :  { %440 = vmatprep.subr.bf16.mxu1 %v439_v16 }
  0x11   :  { %442 = vmatpush3.bf16.msra.mxu1 %v439_v16 }
  0x12   :  { %444 = vmatprep.subr.bf16.mxu1 %v443_v19 }
  0x15   :  { %446 = vmatpush3.bf16.msra.mxu1 %v443_v19 }
  0xdf   :  { %v403_v22 = vpop.f32.mrb[0].mxu0 }
  0xe0   :  { %v132_v23 = vadd.f32 %v403_v22, %v367_v21  ;;  %v126_v24 = vpop.f32.mrb[1].mxu0 }
  0xe1   :  { %v127_v25 = vadd.f32 %v367_v21, %v126_v24 }
  0xe2   :  { %v138_v26 = vmul.f32 0.70710677, %v132_v23  ;;  %v136_v33 = vmul.f32 0.5, %v132_v23 }
  0xe3   :  { %v137_v27 = vmul.f32 0.70710677, %v127_v25  ;;  %v135_v31 = vmul.f32 0.5, %v127_v25 }
  0xe4   :  { %451 = verf.f32 %v138_v26 }
  0xe5   :  { %453 = verf.f32 %v137_v27 }
  0xee   :  { %v452_v28 = vpop.eup %451 }
  0xef   :  { %v454_v29 = vpop.eup %453  ;;  %v142_v30 = vadd.f32 1.0, %v452_v28 }
  0xf0   :  { %v141_v32 = vadd.f32 1.0, %v454_v29 }
  0xf1   :  { %v144_v35 = vmul.f32 %v142_v30, %v136_v33 }
  0xf2   :  { %v143_v34 = vmul.f32 %v141_v32, %v135_v31 }
  0xf4   :  { %420 = vmatprep.mubr.msk.f32.mxu1 %vm155_vm1, %v143_v34  ;;  %v375_v34 = vld [vmem:[%s646_s7] ss:$0 sm:$0xff] }
  0xf5   :  { %421 = vmatmul.mubr.msk.f32.vlgmr.msra.gmra.mrb[0].mxu1 %vm155_vm1, %v144_v35 }
 0x1c8   :  { %v422_v38 = vpop.f32.mrb[0].mxu1 }
 0x1c9   :  { %v238_v39 = vadd.f32 %v422_v38, %v146_v36  ;;  %v228_v40 = vpop.f32.mrb[1].mxu1  ;;  %v376_v36 = vld [vmem:[%s647_s8] ss:$0 sm:$0xff] }
 0x1ca   :  { %v237_v41 = vadd.f32 %v228_v40, %v145_v37 }
 0x1cb   :  { %240 = vst.msk [vmem:[#allocation2 + $0x8] sm:$0xff] %vm37_vm0, %v238_v39 }
 0x1cc   :  { %239 = vst.msk [vmem:[#allocation2] sm:$0xff] %vm37_vm0, %v237_v41 }
 0x1d2   :  { %v247_v43 = vld [vmem:[#allocation2 + $0x8] sm:$0xff] }
 0x1d3   :  { %v246_v44 = vld [vmem:[#allocation2] sm:$0xff]  ;;  %v256_v46 = vadd.f32 %v372_v42, %v247_v43 }
 0x1d4   :  { %v255_v45 = vadd.f32 %v372_v42, %v246_v44 }
 0x1d5   :  { %v258_v49 = vadd.f32 %v256_v46, %v563_v7 }
 0x1d6   :  { %v257_v47 = vadd.f32 %v255_v45, %v556_v5 }
 0x1d7   :  { %v264_v50 = vsel %vm37_vm0, %v258_v49, 0.0 }
 0x1d8   :  { %v261_v48 = vsel %vm37_vm0, %v257_v47, 0.0 }
 0x1d9   :  { %262 = vadd.xlane.f32.xlu0 %v261_v48 }
 0x1dd   :  { %265 = vadd.xlane.f32.xlu0 %v264_v50 }
 0x266   :  { %v263_v51 = vpop.xlane.xlu0 %262 }
 0x267   :  { %v267_v52 = vmul.f32 0.03125, %v263_v51 }
 0x269   :  { %v269_v53 = vsub.f32 %v257_v47, %v267_v52 }
 0x26a   :  { %v266_v54 = vpop.xlane.xlu0 %265 }
 0x26b   :  { %v268_v55 = vmul.f32 0.03125, %v266_v54  ;;  %v271_v56 = vmul.f32 %v269_v53, %v269_v53 }
 0x26d   :  { %v270_v57 = vsub.f32 %v258_v49, %v268_v55  ;;  %v273_v58 = vsel %vm37_vm0, %v271_v56, 0.0 }
 0x26e   :  { %274 = vadd.xlane.f32.xlu1 %v273_v58 }
 0x26f   :  { %v272_v59 = vmul.f32 %v270_v57, %v270_v57 }
 0x271   :  { %v276_v60 = vsel %vm37_vm0, %v272_v59, 0.0 }
 0x272   :  { %277 = vadd.xlane.f32.xlu1 %v276_v60 }
 0x2fb   :  { %v275_v61 = vpop.xlane.xlu1 %274 }
 0x2fc   :  { %v279_v62 = vmul.f32 0.03125, %v275_v61 }
 0x2fe   :  { %v281_v63 = vadd.f32 1e-05, %v279_v62 }
 0x2ff   :  { %v278_v0 = vpop.xlane.xlu1 %277 }
 0x300   :  { %455 = vrsqrt.f32 %v281_v63  ;;  %v280_v1 = vmul.f32 0.03125, %v278_v0 }
 0x302   :  { %v282_v2 = vadd.f32 1e-05, %v280_v1 }
 0x304   :  { %457 = vrsqrt.f32 %v282_v2 }
 0x30a   :  { %v456_v3 = vpop.eup %455 }
 0x30b   :  { %v285_v6 = vmul.f32 %v456_v3, %v269_v53 }
 0x30d   :  { %v293_v9 = vmul.f32 %v373_v4, %v285_v6 }
 0x30e   :  { %v458_v10 = vpop.eup %457 }
 0x30f   :  { %v301_v11 = vadd.f32 %v374_v8, %v293_v9  ;;  %v286_v12 = vmul.f32 %v458_v10, %v270_v57 }
 0x311   :  { %v303_v13 = vadd.f32 %v301_v11, %v556_v5  ;;  %v294_v14 = vmul.f32 %v373_v4, %v286_v12 }
 0x313   :  { %v307_v15 = vsel %vm37_vm0, %v303_v13, 0.0  ;;  %v302_v16 = vadd.f32 %v374_v8, %v294_v14 }
 0x314   :  { %308 = vadd.xlane.f32.xlu0 %v307_v15 }
 0x315   :  { %v304_v17 = vadd.f32 %v302_v16, %v563_v7 }
 0x317   :  { %v310_v18 = vsel %vm37_vm0, %v304_v17, 0.0 }
 0x318   :  { %311 = vadd.xlane.f32.xlu1 %v310_v18 }
 0x3a1   :  { %v309_v19 = vpop.xlane.xlu0 %308 }
 0x3a2   :  { %v313_v20 = vmul.f32 0.03125, %v309_v19 }
 0x3a4   :  { %v315_v21 = vsub.f32 %v303_v13, %v313_v20 }
 0x3a5   :  { %v312_v22 = vpop.xlane.xlu1 %311 }
 0x3a6   :  { %v314_v23 = vmul.f32 0.03125, %v312_v22  ;;  %v317_v24 = vmul.f32 %v315_v21, %v315_v21 }
 0x3a8   :  { %v316_v25 = vsub.f32 %v304_v17, %v314_v23  ;;  %v319_v26 = vsel %vm37_vm0, %v317_v24, 0.0 }
 0x3a9   :  { %320 = vadd.xlane.f32.xlu0 %v319_v26 }
 0x3aa   :  { %v318_v5 = vmul.f32 %v316_v25, %v316_v25 }
 0x3ac   :  { %v322_v27 = vsel %vm37_vm0, %v318_v5, 0.0 }
 0x3ad   :  { %323 = vadd.xlane.f32.xlu1 %v322_v27 }
 0x436   :  { %v321_v28 = vpop.xlane.xlu0 %320 }
 0x437   :  { %v325_v29 = vmul.f32 0.03125, %v321_v28 }
 0x439   :  { %v327_v7 = vadd.f32 1e-05, %v325_v29 }
 0x43a   :  { %v324_v30 = vpop.xlane.xlu1 %323 }
 0x43b   :  { %459 = vrsqrt.f32 %v327_v7  ;;  %v326_v31 = vmul.f32 0.03125, %v324_v30 }
 0x43d   :  { %v328_v32 = vadd.f32 1e-05, %v326_v31 }
 0x43f   :  { %461 = vrsqrt.f32 %v328_v32 }
 0x445   :  { %v460_v33 = vpop.eup %459 }
 0x446   :  { %v331_v35 = vmul.f32 %v460_v33, %v315_v21 }
 0x448   :  { %v339_v37 = vmul.f32 %v375_v34, %v331_v35 }
 0x449   :  { %v462_v38 = vpop.eup %461 }
 0x44a   :  { %v332_v39 = vmul.f32 %v462_v38, %v316_v25  ;;  %v347_v40 = vadd.f32 %v376_v36, %v339_v37 }
 0x44c   :  { %v340_v41 = vmul.f32 %v375_v34, %v332_v39  ;;  %349 = vst.msk [vmem:[#allocation3] sm:$0xff] %vm37_vm0, %v347_v40 }
 0x44e   :  { %v348_v42 = vadd.f32 %v376_v36, %v340_v41 }
 0x450   :  { %350 = vst.msk [vmem:[#allocation3 + $0x8] sm:$0xff] %vm37_vm0, %v348_v42 }
 0x451   :  { %474 = shalt.err (!%p471_p4)
}
 0x452   :  { %s475_s23 = scalar_lea.hbm %s648_s9, 256 }
 0x453   :  { %p476_p5 = scmp.ne.s32.totalorder %s648_s9, %s475_s23  ;;  %p479_p6 = scmp.lt.u32.totalorder %s475_s23, %s648_s9 }
 0x455   :  { %p481_p7 = pnand %p479_p6, %p476_p5 }
 0x457   :  { %484 = shalt.err (!%p481_p7)
}
 0x458   :  { %s489_s27 = smov 128   ;;  %s490_s28 = smov 8  }
 0x459   :  { %362 = dma.vmem_to_hbm [thread:$0]  %s357_s21, 256, %s648_s9, [#allocation4], %s489_s27, %s489_s27, %s490_s28  }
 0x45a   :  { %485 = dma.done.wait [#allocation4], 256  }
 0x45b   :  { %486 = vsyncadd [#allocation4], 4294967040 }
 0x45c   :  { %366 = vsyncpa [#allocation4], 1 }

// kernel: decoder_forward.9
= control target key start
LH: loop header
LB: loop body
LE: loop exit
PB: predicated region body
PF: predicated region fallthrough
CT: control target
= control target key end

     0   :  { %s2145_s18 = smov 0   ;;  %s2364_s0 = inlined_call_operand.vmem [shape: f32[2,8,32], index: 0, kind: input, shape index: {}]   ;;  %s2365_s1 = inlined_call_operand.vmem [shape: f32[2,12,32], index: 1, kind: input, shape index: {}]   ;;  %s2366_s2 = inlined_call_operand.vmem [shape: f32[2,8,12], index: 2, kind: input, shape index: {}]   ;;  %s2367_s3 = inlined_call_operand.vmem [shape: f32[32,32], index: 3, kind: input, shape index: {}]   ;;  %s2368_s4 = inlined_call_operand.vmem [shape: f32[1,32], index: 4, kind: input, shape index: {}]   ;;  %s2369_s5 = inlined_call_operand.vmem [shape: f32[32,32], index: 5, kind: input, shape index: {}]   ;;  %s2370_s6 = inlined_call_operand.vmem [shape: f32[1,32], index: 6, kind: input, shape index: {}]   ;;  %s2371_s7 = inlined_call_operand.vmem [shape: f32[32,32], index: 7, kind: input, shape index: {}]   ;;  %s2372_s8 = inlined_call_operand.vmem [shape: f32[1,32], index: 8, kind: input, shape index: {}]   ;;  %s2373_s9 = inlined_call_operand.vmem [shape: f32[32,32], index: 9, kind: input, shape index: {}]   ;;  %s2374_s10 = inlined_call_operand.vmem [shape: f32[1,32], index: 10, kind: input, shape index: {}]   ;;  %s2375_s11 = inlined_call_operand.vmem [shape: f32[1,32], index: 11, kind: input, shape index: {}]   ;;  %s2376_s12 = inlined_call_operand.vmem [shape: f32[1,32], index: 12, kind: input, shape index: {}]   ;;  %s2377_s13 = inlined_call_operand.vmem [shape: f32[1,32], index: 13, kind: input, shape index: {}]   ;;  %s2378_s14 = inlined_call_operand.vmem [shape: f32[1,32], index: 14, kind: input, shape index: {}]   ;;  %s2379_s15 = inlined_call_operand.vmem [shape: f32[2,8,32], index: 15, kind: output, shape index: {}]  }
   0x1 LB: > { %s1726_s19 = sadd.s32 4294967295, %s2053_s18   ;;  %p1730_p0 = scmp.ge.s32.totalorder %s2053_s18, 1  ;;  %s2053_s18 = sphi %s2145_s18, %s25_s18  }
   0x2   : > { %p455_p1 = scmp.lt.s32.totalorder %s2053_s18, 3 }
   0x4   : > { %p456_p2 = pnand %p1730_p0, %p455_p1 }
   0x5   : > { %v616_v0 = vld [vmem:[%s2369_s5] sm:$0xff] (!%p456_p2)  ;;  %v617_v1 = vld [vmem:[%s2369_s5 + $0x8] sm:$0xff] (!%p456_p2)  ;;  %v618_v2 = vld [vmem:[%s2369_s5 + $0x10] sm:$0xff] (!%p456_p2)  ;;  %p510_p3 = scmp.lt.s32.totalorder (!%p456_p2), %s1726_s19, 1  ;;  %v2055_v5 = vmov (!%p456_p2), 0.0|0.0   ;;  %vm2056_vm0 = vmmov (!%p456_p2), 0  }
   0x6   : > { %459 = sbr.rel (%p456_p2) target bundleno = 3558 (0xde6), region = 80  ;;  %v1925_v3 = vpack.c.bf16 (!%p456_p2), %v617_v1, %v616_v0  ;;  %v619_v4 = vld [vmem:[%s2369_s5 + $0x18] sm:$0xff] (!%p456_p2)  ;;  %1919 = vmatprep.subr.bf16.mxu0 (!%p456_p2), %v2055_v5  ;;  %v531_v6 = vld [vmem:[%s2367_s3] sm:$0xff] (!%p456_p2)  ;;  %v532_v7 = vld [vmem:[%s2367_s3 + $0x8] sm:$0xff] (!%p456_p2)  ;;  %v2057_v12 = vmov (!%p456_p2), 0.0   ;;  %vm542_vm1 = vcmask (!%p456_p2), 261120  }
   0x7   : > { %v1929_v8 = vpack.c.bf16 (!%p456_p2), %v619_v4, %v618_v2  ;;  %v1920_v9 = vpack.c.bf16 (!%p456_p2), %v532_v7, %v531_v6  ;;  %v533_v10 = vld [vmem:[%s2367_s3 + $0x10] sm:$0xff] (!%p456_p2)  ;;  %v534_v11 = vld [vmem:[%s2367_s3 + $0x18] sm:$0xff] (!%p456_p2)  ;;  %1827 = vmatprep.mubr.msk.f32.mxu0 (!%p456_p2), %vm2056_vm0, %v2057_v12  ;;  %v1738_v17 = vld [vmem:[%s2370_s6] ss:$0 sm:$0xff] (!%p456_p2)  ;;  %vm795_vm2 = vcmask (!%p456_p2), 64512   ;;  %s2058_s21 = smov (!%p456_p2), 120  }
   0x8   : > { %1926 = vmatprep.subr.bf16.mxu1 (!%p456_p2), %v1925_v3  ;;  %v1923_v13 = vpack.c.bf16 (!%p456_p2), %v534_v11, %v533_v10  ;;  %v1736_v18 = vld [vmem:[%s2368_s4] ss:$0 sm:$0xff] (!%p456_p2)  ;;  %vm2208_vm3 = vmpackc.low (!%p456_p2), %vm795_vm2, %vm795_vm2  ;;  %v709_v31 = vld [vmem:[%s2371_s7 + $0x8] sm:$0xff] (!%p456_p2)  ;;  %vm875_vm4 = vcmask (!%p456_p2), 97280   ;;  %vm890_vm5 = vcmask (!%p456_p2), 1043456   ;;  %vm2059_vm6 = vmmov (!%p456_p2), 1  }
   0x9   : > { %1928 = vmatpush3.bf16.msra.mxu1 (!%p456_p2), %v1925_v3  ;;  %1921 = vmatpush3.bf16.msra.mxu0 (!%p456_p2), %v1920_v9  ;;  %v708_v30 = vld [vmem:[%s2371_s7] sm:$0xff] (!%p456_p2)  ;;  %v710_v32 = vld [vmem:[%s2371_s7 + $0x10] sm:$0xff] (!%p456_p2)  ;;  %v711_v34 = vld [vmem:[%s2371_s7 + $0x18] sm:$0xff] (!%p456_p2)  ;;  %s2062_s25 = smov (!%p456_p2), 8   ;;  %s2063_s26 = smov (!%p456_p2), 16   ;;  %vm1143_vm8 = vcmask (!%p456_p2), 130112  }
   0xa   : > { %1930 = vmatprep.subr.bf16.mxu1 (!%p456_p2), %v1929_v8  ;;  %1922 = vmatprep.subr.bf16.mxu0 (!%p456_p2), %v2055_v5  ;;  %v1933_v33 = vpack.c.bf16 (!%p456_p2), %v709_v31, %v708_v30  ;;  %v1937_v35 = vpack.c.bf16 (!%p456_p2), %v711_v34, %v710_v32  ;;  %v1741_v48 = vld [vmem:[%s2372_s8] ss:$0 sm:$0xff] (!%p456_p2)  ;;  %vm2255_vm7 = vmpackc.low (!%p456_p2), %vm890_vm5, %vm2059_vm6  ;;  %vm1322_vm9 = vcmask (!%p456_p2), 195712   ;;  %s2064_s22 = smov (!%p456_p2), 24   ;;  %vm1501_vm10 = vcmask (!%p456_p2), 261312  }
   0xb   : > { %v1504_v52 = vld [vmem:[%s2373_s9] sm:$0xff] (!%p456_p2) }
   0xd   : > { %s2385_s19 = smov (!%p510_p3, %s1726_s19), 1  ;;  %1932 = vmatpush3.bf16.msra.mxu1 %v1929_v8  ;;  %1924 = vmatpush3.bf16.msra.mxu0 %v1923_v13 }
   0xe   : > { %s2180_s23 = sshll.u32 %s2385_s19, 3  ;;  %s1772_s24 = sshll.u32 %s2385_s19, 4  ;;  %1941 = vmatprep.subr.bf16.mxu1 %v2055_v5  ;;  %1934 = vmatprep.subr.bf16.mxu0 %v1933_v33 }
   0xf   : > { %s518_s27 = scalar_lea.vmem %s2365_s1, %s1772_s24  ;;  %s513_s30 = scalar_lea.vmem %s2364_s0, %s2180_s23 }
  0x10   : > { %v528_v14 = vld [vmem:[%s518_s27] sm:$0xff]  ;;  %v529_v15 = vld [vmem:[%s518_s27 + $0x8] sm:$0xf]  ;;  %s522_s17 = scalar_lea.vmem %s2366_s2, %s2180_s23  ;;  %s2060_s24 = smov 112  }
  0x11   : > { %1838 = vmatprep.mubr.msk.f32.mxu1 %vm542_vm1, %v528_v14  ;;  %v2191_v16 = vld [vmem:[%s513_s30] sm:$0xff] }
  0x12   : > { %1839 = vmatmul.mubr.msk.f32.vlgmr.msra.gmra.mrb[0].mxu1 %vm542_vm1, %v529_v15  ;;  %1828 = vmatmul.mubr.msk.f32.vlgmr.msra.gmra.mrb[0].mxu0 %vm542_vm1, %v2191_v16  ;;  %v2247_v36 = vld [vmem:[%s522_s17] sm:$0xff] }
  0x13   : > { %1856 = vmatprep.mubr.msk.f32.mxu1 %vm2056_vm0, %v2057_v12  ;;  %1849 = vmatprep.mubr.msk.f32.mxu0 %vm542_vm1, %v528_v14 }
  0x14   : > { %1936 = vmatpush3.bf16.msra.mxu0 %v1933_v33 }
  0x15   : > { %1938 = vmatprep.subr.bf16.mxu0 %v1937_v35 }
  0x18   : > { %1940 = vmatpush3.bf16.msra.mxu0 %v1937_v35 }
  0x19   : > { %1953 = vmatprep.subr.bf16.mxu0 %v2055_v5 }
  0x1b   : > { %1850 = vmatmul.mubr.msk.f32.vlgmr.msra.gmra.mrb[2].mxu0 %vm542_vm1, %v529_v15 }
  0x1c   : > { %1877 = vmatprep.mubr.msk.f32.mxu0 %vm2056_vm0, %v2057_v12 }
  0xe5   : > { %v1840_v19 = vpop.f32.mrb[0].mxu1  ;;  %v612_v20 = vpop.f32.mrb[0].mxu0 }
  0xe6   : > { %v705_v21 = vadd.f32 %v1840_v19, %v1738_v17  ;;  %v699_v22 = vpop.f32.mrb[1].mxu1  ;;  %v1829_v23 = vpop.f32.mrb[1].mxu0  ;;  %v613_v25 = vadd.f32 %v1736_v18, %v612_v20 }
  0xe7   : > { %v700_v24 = vadd.f32 %v1738_v17, %v699_v22 }
  0xe8   : > { %v2218_v29 = vmul.f32 0.35355338, %v613_v25 }
  0xe9   : > { %v1942_v27 = vpack.c.bf16 %v705_v21, %v700_v24  ;;  %v2212_v28 = vpack.i.bf16 %v705_v21, %v700_v24 }
  0xeb   : > { %1998 = vrot.lane.b32.xlu1 %v2212_v28, %s2058_s21  ;;  %1944 = vmatpush3.bf16.xpose.msk.msra.mxu1 %vm2208_vm3, %v1942_v27 }
  0xec   : > { %1945 = vmatprep.subr.bf16.mxu1 %v2055_v5 }
  0xee   : > { %v1851_v41 = vpop.f32.mrb[2].mxu0 }
  0xef   : > { %965 = vrot.lane.b32.xlu1 %v2218_v29, %s2058_s21  ;;  %v785_v42 = vpop.f32.mrb[3].mxu0  ;;  %v791_v49 = vadd.f32 %v1851_v41, %v1741_v48 }
  0xf0   : > { %v786_v50 = vadd.f32 %v1741_v48, %v785_v42 }
  0xf2   : > { %1857 = vmatmul.mubr.msk.f32.vlgmr.msra.gmra.mrb[2].mxu1 %vm795_vm2, %v2218_v29  ;;  %v1946_v51 = vpack.c.bf16 %v791_v49, %v786_v50  ;;  %v2274_v3 = vpack.i.bf16 %v791_v49, %v786_v50 }
  0xf3   : > { %1863 = vmatprep.mubr.msk.f32.mxu1 %vm2056_vm0, %v2057_v12 }
  0xf4   : > { %1948 = vmatpush3.bf16.msk.msra.mxu1 %vm2255_vm7, %v1946_v51 }
  0xf5   : > { %1949 = vmatprep.subr.bf16.mxu1 %v2055_v5 }
 0x15d   : > { %v1999_v54 = vpop.permute.xlu1 %1998 }
 0x15e   : > { %v2001_v55 = vunpack.i.h.bf16 %v1999_v54  ;;  %v2000_v56 = vunpack.i.l.bf16 %v1999_v54 }
 0x160   : > { %v1950_v59 = vpack.c.bf16 %v2001_v55, %v2000_v56 }
 0x161   : > { %v966_v60 = vpop.permute.xlu1 %965 }
 0x1c5   : > { %v871_v37 = vpop.f32.mrb[2].mxu1 }
 0x1c6   : > { %v872_v38 = vadd.f32 %v871_v37, %v2247_v36  ;;  %v1858_v39 = vpop.f32.mrb[3].mxu1 }
 0x1c8   : > { %v876_v40 = vsel %vm875_vm4, %v872_v38, -inf }
 0x1c9   : > { %877 = vmax.xlane.f32.xlu0 %v876_v40 }
 0x256   : > { %v878_v43 = vpop.xlane.xlu0 %877 }
 0x257   : > { %v879_v44 = vsub.f32 %v872_v38, %v878_v43 }
 0x259   : > { %v880_v45 = vmul.f32 1.442695, %v879_v44 }
 0x25b   : > { %2027 = vpow2.f32 %v880_v45 }
 0x265   : > { %v2028_v46 = vpop.eup %2027 }
 0x266   : > { %v882_v47 = vsel %vm875_vm4, %v2028_v46, 0.0 }
 0x267   : > { %883 = vadd.xlane.f32.xlu0 %v882_v47 }
 0x2f4   : > { %v884_v53 = vpop.xlane.xlu0 %883 }
 0x2f5   : > { %2029 = vrcp.f32 %v884_v53 }
 0x2ff   : > { %v2030_v57 = vpop.eup %2029 }
 0x300   : > { %v886_v58 = vmul.f32 %v2030_v57, %v2028_v46 }
 0x302   : > { %1864 = vmatmul.mubr.msk.f32.vlgmr.msra.gmra.mrb[4].mxu1 %vm875_vm4, %v886_v58 }
 0x303   : > { %1952 = vmatpush3.bf16.xpose.msk.msra.mxu1 %vm2208_vm3, %v1950_v59  ;;  %1870 = vmatprep.mubr.msk.f32.mxu1 %vm2056_vm0, %v2057_v12 }
 0x304   : > { %1961 = vmatprep.subr.bf16.mxu1 %v2055_v5 }
 0x30a   : > { %1871 = vmatmul.mubr.msk.f32.vlgmr.msra.gmra.mrb[6].mxu1 %vm795_vm2, %v966_v60 }
 0x30b   : > { %1891 = vmatprep.mubr.msk.f32.mxu1 %vm2056_vm0, %v2057_v12 }
 0x3d5   : > { %v960_v61 = vpop.f32.mrb[4].mxu1 }
 0x3d6   : > { %964 = vst.msk [vmem:[#allocation2] sm:$0xff] %vm795_vm2, %v960_v61  ;;  %v1865_v62 = vpop.f32.mrb[5].mxu1 }
 0x3dd   : > { %v1043_v63 = vpop.f32.mrb[6].mxu1 }
 0x3de   : > { %v1044_v0 = vadd.f32 %v1043_v63, %v2247_v36  ;;  %v1872_v1 = vpop.f32.mrb[7].mxu1 }
 0x3e0   : > { %v1047_v2 = vsel %vm875_vm4, %v1044_v0, -inf }
 0x3e1   : > { %1048 = vmax.xlane.f32.xlu0 %v1047_v2 }
 0x3f7   : > { %2003 = vrot.lane.b32.xlu0 %v2274_v3, %s2058_s21  ;;  %s2061_s21 = smov 104  }
 0x3fb   : > { %2008 = vrot.lane.b32.xlu0 %v2212_v28, %s2060_s24 }
 0x3ff   : > { %1145 = vrot.lane.b32.xlu0 %v2218_v29, %s2060_s24 }
 0x46e   : > { %v1049_v4 = vpop.xlane.xlu0 %1048 }
 0x46f   : > { %v1050_v6 = vsub.f32 %v1044_v0, %v1049_v4  ;;  %v1505_v4 = vld [vmem:[%s2373_s9 + $0x8] sm:$0xff] }
 0x471   : > { %v1051_v7 = vmul.f32 1.442695, %v1050_v6  ;;  %v1974_v6 = vpack.c.bf16 %v1505_v4, %v1504_v52 }
 0x472   : > { %v2004_v8 = vpop.permute.xlu0 %2003 }
 0x473   : > { %2031 = vpow2.f32 %v1051_v7  ;;  %v2006_v9 = vunpack.i.h.bf16 %v2004_v8  ;;  %v2005_v10 = vunpack.i.l.bf16 %v2004_v8  ;;  %v1506_v7 = vld [vmem:[%s2373_s9 + $0x10] sm:$0xff]  ;;  %v1507_v8 = vld [vmem:[%s2373_s9 + $0x18] sm:$0xff] }
 0x475   : > { %v1954_v11 = vpack.c.bf16 %v2006_v9, %v2005_v10  ;;  %v1977_v9 = vpack.c.bf16 %v1507_v8, %v1506_v7 }
 0x476   : > { %v2009_v20 = vpop.permute.xlu0 %2008 }
 0x477   : > { %1956 = vmatpush3.bf16.msk.msra.mxu0 %vm2255_vm7, %v1954_v11  ;;  %v2011_v22 = vunpack.i.h.bf16 %v2009_v20  ;;  %v2010_v23 = vunpack.i.l.bf16 %v2009_v20 }
 0x478   : > { %1957 = vmatprep.subr.bf16.mxu0 %v2055_v5 }
 0x479   : > { %v1958_v27 = vpack.c.bf16 %v2011_v22, %v2010_v23 }
 0x47d   : > { %v2032_v13 = vpop.eup %2031 }
 0x47e   : > { %v1053_v14 = vsel %vm875_vm4, %v2032_v13, 0.0 }
 0x47f   : > { %1054 = vadd.xlane.f32.xlu1 %v1053_v14  ;;  %v1764_v14 = vld [vmem:[%s2374_s10] ss:$0 sm:$0xff] }
 0x490   : > { %2013 = vrot.lane.b32.xlu1 %v2274_v3, %s2060_s24 }
 0x494   : > { %2018 = vrot.lane.b32.xlu1 %v2212_v28, %s2061_s21  ;;  %v1146_v28 = vpop.permute.xlu0 %1145 }
 0x50c   : > { %v1055_v15 = vpop.xlane.xlu1 %1054 }
 0x50d   : > { %2033 = vrcp.f32 %v1055_v15 }
 0x510   : > { %v2014_v17 = vpop.permute.xlu1 %2013 }
 0x511   : > { %v2016_v18 = vunpack.i.h.bf16 %v2014_v17  ;;  %v2015_v19 = vunpack.i.l.bf16 %v2014_v17 }
 0x513   : > { %v1962_v21 = vpack.c.bf16 %v2016_v18, %v2015_v19 }
 0x514   : > { %v2019_v42 = vpop.permute.xlu1 %2018 }
 0x515   : > { %1964 = vmatpush3.bf16.msk.msra.mxu1 %vm2255_vm7, %v1962_v21  ;;  %v2021_v44 = vunpack.i.h.bf16 %v2019_v42  ;;  %v2020_v45 = vunpack.i.l.bf16 %v2019_v42 }
 0x516   : > { %1965 = vmatprep.subr.bf16.mxu1 %v2055_v5 }
 0x517   : > { %v2034_v24 = vpop.eup %2033  ;;  %v1966_v48 = vpack.c.bf16 %v2021_v44, %v2020_v45 }
 0x518   : > { %v1057_v25 = vmul.f32 %v2034_v24, %v2032_v13 }
 0x51a   : > { %1878 = vmatmul.mubr.msk.f32.vlgmr.msra.gmra.mrb[4].mxu0 %vm875_vm4, %v1057_v25 }
 0x51b   : > { %1960 = vmatpush3.bf16.xpose.msk.msra.mxu0 %vm2208_vm3, %v1958_v27  ;;  %1884 = vmatprep.mubr.msk.f32.mxu0 %vm2056_vm0, %v2057_v12 }
 0x51c   : > { %1969 = vmatprep.subr.bf16.mxu0 %v2055_v5 }
 0x522   : > { %1885 = vmatmul.mubr.msk.f32.vlgmr.msra.gmra.mrb[6].mxu0 %vm795_vm2, %v1146_v28 }
 0x523   : > { %1905 = vmatprep.mubr.msk.f32.mxu0 %vm2056_vm0, %v2057_v12 }
 0x5ed   : > { %v1135_v30 = vpop.f32.mrb[4].mxu0 }
 0x5ee   : > { %v1879_v31 = vpop.f32.mrb[5].mxu0 }
 0x5ef   : > { %v1766_v31 = vld [vmem:[%s2375_s11] ss:$0 sm:$0xff] }
 0x5f5   : > { %v1223_v32 = vpop.f32.mrb[6].mxu0 }
 0x5f6   : > { %v1224_v33 = vadd.f32 %v1223_v32, %v2247_v36  ;;  %v1886_v34 = vpop.f32.mrb[7].mxu0 }
 0x5f8   : > { %v1227_v35 = vsel %vm875_vm4, %v1224_v33, -inf }
 0x5f9   : > { %1228 = vmax.xlane.f32.xlu0 %v1227_v35 }
 0x686   : > { %v1229_v37 = vpop.xlane.xlu0 %1228 }
 0x687   : > { %v1230_v38 = vsub.f32 %v1224_v33, %v1229_v37  ;;  %v1767_v33 = vld [vmem:[%s2376_s12] ss:$0 sm:$0xff] }
 0x689   : > { %v1231_v39 = vmul.f32 1.442695, %v1230_v38 }
 0x68b   : > { %2035 = vpow2.f32 %v1231_v39 }
 0x695   : > { %v2036_v40 = vpop.eup %2035 }
 0x696   : > { %v1233_v41 = vsel %vm875_vm4, %v2036_v40, 0.0 }
 0x697   : > { %1234 = vadd.xlane.f32.xlu1 %v1233_v41 }
 0x6a8   : > { %1324 = vrot.lane.b32.xlu1 %v2218_v29, %s2061_s21 }
 0x724   : > { %v1235_v43 = vpop.xlane.xlu1 %1234 }
 0x725   : > { %2037 = vrcp.f32 %v1235_v43 }
 0x728   : > { %v1325_v49 = vpop.permute.xlu1 %1324 }
 0x72f   : > { %v2038_v46 = vpop.eup %2037 }
 0x730   : > { %v1237_v47 = vmul.f32 %v2038_v46, %v2036_v40 }
 0x732   : > { %1892 = vmatmul.mubr.msk.f32.vlgmr.msra.gmra.mrb[8].mxu1 %vm875_vm4, %v1237_v47 }
 0x733   : > { %1968 = vmatpush3.bf16.xpose.msk.msra.mxu1 %vm2208_vm3, %v1966_v48  ;;  %1898 = vmatprep.mubr.msk.f32.mxu1 %vm2056_vm0, %v2057_v12 }
 0x73a   : > { %1899 = vmatmul.mubr.msk.f32.vlgmr.msra.gmra.mrb[10].mxu1 %vm795_vm2, %v1325_v49  ;;  %v1769_v49 = vld [vmem:[%s2378_s14] ss:$0 sm:$0xff] }
 0x805   : > { %v1314_v29 = vpop.f32.mrb[8].mxu1 }
 0x806   : > { %v1893_v50 = vpop.f32.mrb[9].mxu1 }
 0x80d   : > { %v1402_v51 = vpop.f32.mrb[10].mxu1 }
 0x80e   : > { %v1403_v53 = vadd.f32 %v1402_v51, %v2247_v36  ;;  %v1900_v54 = vpop.f32.mrb[11].mxu1 }
 0x810   : > { %v1406_v55 = vsel %vm875_vm4, %v1403_v53, -inf }
 0x811   : > { %1407 = vmax.xlane.f32.xlu0 %v1406_v55 }
 0x827   : > { %2023 = vrot.lane.b32.xlu0 %v2274_v3, %s2061_s21 }
 0x82b   : > { %1140 = vrot.lane.b32.xlu0 %v1135_v30, %s2062_s25 }
 0x82f   : > { %1319 = vrot.lane.b32.xlu0 %v1314_v29, %s2063_s26 }
 0x89e   : > { %v1408_v26 = vpop.xlane.xlu0 %1407 }
 0x89f   : > { %v1409_v56 = vsub.f32 %v1403_v53, %v1408_v26 }
 0x8a1   : > { %v1410_v57 = vmul.f32 1.442695, %v1409_v56 }
 0x8a2   : > { %v2024_v58 = vpop.permute.xlu0 %2023 }
 0x8a3   : > { %2039 = vpow2.f32 %v1410_v57  ;;  %v2026_v59 = vunpack.i.h.bf16 %v2024_v58  ;;  %v2025_v60 = vunpack.i.l.bf16 %v2024_v58 }
 0x8a5   : > { %v1970_v36 = vpack.c.bf16 %v2026_v59, %v2025_v60 }
 0x8a6   : > { %v1141_v61 = vpop.permute.xlu0 %1140 }
 0x8a7   : > { %1144 = vst.msk [vmem:[#allocation2] sm:$0xff] %vm1143_vm8, %v1141_v61  ;;  %1972 = vmatpush3.bf16.msk.msra.mxu0 %vm2255_vm7, %v1970_v36 }
 0x8a8   : > { %1973 = vmatprep.subr.bf16.mxu0 %v2055_v5 }
 0x8aa   : > { %v1320_v62 = vpop.permute.xlu0 %1319 }
 0x8ab   : > { %1323 = vst.msk [vmem:[#allocation2] sm:$0xff] %vm1322_vm9, %v1320_v62 }
 0x8ad   : > { %v2040_v63 = vpop.eup %2039 }
 0x8ae   : > { %v1412_v0 = vsel %vm875_vm4, %v2040_v63, 0.0 }
 0x8af   : > { %1413 = vadd.xlane.f32.xlu1 %v1412_v0 }
 0x93c   : > { %v1414_v1 = vpop.xlane.xlu1 %1413 }
 0x93d   : > { %2041 = vrcp.f32 %v1414_v1 }
 0x947   : > { %v2042_v2 = vpop.eup %2041 }
 0x948   : > { %v1416_v3 = vmul.f32 %v2042_v2, %v2040_v63 }
 0x94a   : > { %1906 = vmatmul.mubr.msk.f32.vlgmr.msra.gmra.mrb[8].mxu0 %vm875_vm4, %v1416_v3 }
 0x94b   : > { %1916 = vmatprep.mubr.msk.f32.mxu0 %vm2056_vm0, %v2057_v12  ;;  %1975 = vmatpush3.bf16.msra.mxu0 %v1974_v6 }
 0x94c   : > { %1976 = vmatprep.subr.bf16.mxu0 %v2055_v5 }
 0x94f   : > { %1978 = vmatpush3.bf16.msra.mxu0 %v1977_v9 }
 0xa1d   : > { %v1493_v12 = vpop.f32.mrb[8].mxu0 }
 0xa1e   : > { %1498 = vrot.lane.b32.xlu0 %v1493_v12, %s2064_s22  ;;  %v1907_v10 = vpop.f32.mrb[9].mxu0  ;;  %s526_s22 = scalar_lea.vmem %s2379_s15, %s2180_s23 }
 0xa90   : > { %v1499_v11 = vpop.permute.xlu0 %1498 }
 0xa91   : > { %1502 = vst.msk [vmem:[#allocation2] sm:$0xff] %vm1501_vm10, %v1499_v11 }
 0xa98   : > { %v1503_v13 = vld [vmem:[#allocation2] sm:$0xff] }
 0xa99   : > { %1917 = vmatmul.mubr.msk.f32.vlgmr.msra.gmra.mrb[10].mxu0 %vm542_vm1, %v1503_v13 }
 0xb6c   : > { %v1584_v15 = vpop.f32.mrb[10].mxu0 }
 0xb6d   : > { %v1585_v17 = vadd.f32 %v1764_v14, %v1584_v15  ;;  %v1918_v18 = vpop.f32.mrb[11].mxu0 }
 0xb6f   : > { %v1588_v5 = vadd.f32 %v1585_v17, %v2191_v16 }
 0xb71   : > { %v1591_v19 = vsel %vm542_vm1, %v1588_v5, 0.0 }
 0xb72   : > { %1592 = vadd.xlane.f32.xlu1 %v1591_v19 }
 0xbff   : > { %v1593_v20 = vpop.xlane.xlu1 %1592 }
 0xc00   : > { %v1594_v21 = vmul.f32 0.03125, %v1593_v20 }
 0xc02   : > { %v1595_v22 = vsub.f32 %v1588_v5, %v1594_v21 }
 0xc04   : > { %v1596_v23 = vmul.f32 %v1595_v22, %v1595_v22 }
 0xc06   : > { %v1597_v24 = vsel %vm542_vm1, %v1596_v23, 0.0 }
 0xc07   : > { %1598 = vadd.xlane.f32.xlu0 %v1597_v24 }
 0xc94   : > { %v1599_v25 = vpop.xlane.xlu0 %1598 }
 0xc95   : > { %v1600_v27 = vmul.f32 0.03125, %v1599_v25 }
 0xc97   : > { %v1601_v28 = vadd.f32 1e-05, %v1600_v27 }
 0xc99   : > { %2043 = vrsqrt.f32 %v1601_v28 }
 0xca3   : > { %v2044_v30 = vpop.eup %2043 }
 0xca4   : > { %v1603_v32 = vmul.f32 %v2044_v30, %v1595_v22 }
 0xca6   : > { %v1610_v34 = vmul.f32 %v1766_v31, %v1603_v32 }
 0xca8   : > { %v1617_v35 = vadd.f32 %v1767_v33, %v1610_v34 }
 0xcaa   : > { %v1618_v37 = vadd.f32 %v1617_v35, %v2191_v16  ;;  %v1768_v16 = vld [vmem:[%s2377_s13] ss:$0 sm:$0xff] }
 0xcac   : > { %v1621_v38 = vsel %vm542_vm1, %v1618_v37, 0.0 }
 0xcad   : > { %1622 = vadd.xlane.f32.xlu1 %v1621_v38 }
 0xd3a   : > { %v1623_v39 = vpop.xlane.xlu1 %1622 }
 0xd3b   : > { %v1624_v40 = vmul.f32 0.03125, %v1623_v39 }
 0xd3d   : > { %v1625_v41 = vsub.f32 %v1618_v37, %v1624_v40 }
 0xd3f   : > { %v1626_v42 = vmul.f32 %v1625_v41, %v1625_v41 }
 0xd41   : > { %v1627_v43 = vsel %vm542_vm1, %v1626_v42, 0.0 }
 0xd42   : > { %1628 = vadd.xlane.f32.xlu1 %v1627_v43 }
 0xdcf   : > { %v1629_v44 = vpop.xlane.xlu1 %1628 }
 0xdd0   : > { %v1630_v45 = vmul.f32 0.03125, %v1629_v44 }
 0xdd2   : > { %v1631_v46 = vadd.f32 1e-05, %v1630_v45 }
 0xdd4   : > { %2045 = vrsqrt.f32 %v1631_v46 }
 0xdde   : > { %v2046_v47 = vpop.eup %2045 }
 0xddf   : > { %v1633_v48 = vmul.f32 %v2046_v47, %v1625_v41 }
 0xde1   : > { %v1640_v29 = vmul.f32 %v1768_v16, %v1633_v48 }
 0xde3   : > { %v1647_v50 = vadd.f32 %v1769_v49, %v1640_v29 }
 0xde5   : > { %1648 = vst.msk [vmem:[%s526_s22] sm:$0xff] %vm542_vm1, %v1647_v50 }
 0xde6 PF: > { %s25_s18 = sadd.s32 1, %s2053_s18  }
 0xde7   : > { %p22_p4 = scmp.ge.s32.totalorder %s25_s18, 4  }
 0xde9   :  { %24 = sbr.rel (!%p22_p4) target bundleno = 1 (0x1), region = 116 }

// kernel: decoder_forward.7
= control target key start
LH: loop header
LB: loop body
LE: loop exit
PB: predicated region body
PF: predicated region fallthrough
CT: control target
= control target key end

     0   :  { %s327_s15 = smov 0   ;;  %s347_s0 = inlined_call_operand.vmem [shape: f32[2,8,1], index: 0, kind: input, shape index: {}]   ;;  %s348_s1 = inlined_call_operand.vmem [shape: f32[1,32], index: 1, kind: input, shape index: {}]   ;;  %s349_s2 = inlined_call_operand.vmem [shape: f32[1,32], index: 2, kind: input, shape index: {}]   ;;  %s350_s3 = inlined_call_operand.vmem [shape: f32[8,32], index: 3, kind: input, shape index: {}]   ;;  %s351_s4 = inlined_call_operand.vmem [shape: f32[2,8,32], index: 4, kind: output, shape index: {}]  }
   0x1 LB: > { %s272_s16 = sadd.s32 4294967295, %s299_s15   ;;  %p276_p0 = scmp.ge.s32.totalorder %s299_s15, 1  ;;  %s299_s15 = sphi %s327_s15, %s14_s15  }
   0x2   : > { %p161_p1 = scmp.lt.s32.totalorder %s299_s15, 3 }
   0x4   : > { %p162_p2 = pnand %p276_p0, %p161_p1 }
   0x5   : > { %p185_p3 = scmp.lt.s32.totalorder (!%p162_p2), %s272_s16, 1  ;;  %v301_v0 = vmov (!%p162_p2), 0   ;;  %v279_v2 = vld [vmem:[%s348_s1] ss:$0 sm:$0xff] (!%p162_p2)  ;;  %vm217_vm0 = vcmask (!%p162_p2), 261120  }
   0x6   : > { %165 = sbr.rel (%p162_p2) target bundleno = 152 (0x98), region = 36  ;;  %292 = vset.pattern.permute.xlu0 (!%p162_p2), %v301_v0  ;;  %v280_v3 = vld [vmem:[%s349_s2] ss:$0 sm:$0xff] (!%p162_p2) }
   0x7   : > { %v215_v6 = vld [vmem:[%s350_s3] sm:$0xff] (!%p162_p2) }
   0xd   : > { %s353_s16 = smov (!%p185_p3, %s272_s16), 1 }
   0xe   : > { %s277_s17 = sshll.u32 %s353_s16, 3 }
   0xf   : > { %s188_s20 = scalar_lea.vmem %s347_s0, %s277_s17  ;;  %s192_s29 = scalar_lea.vmem %s351_s4, %s277_s17 }
  0x10   : > { %v193_v1 = vld [vmem:[%s188_s20] sm:$0xff] }
  0x11   : > { %197 = vperm.xlu0 %292, %v193_v1  }
  0x90   : > { %v198_v4 = vpop.permute.xlu0 %197 }
  0x91   : > { %v206_v5 = vmul.f32 %v279_v2, %v198_v4 }
  0x93   : > { %v214_v7 = vadd.f32 %v280_v3, %v206_v5 }
  0x95   : > { %v216_v8 = vadd.f32 %v215_v6, %v214_v7 }
  0x97   : > { %218 = vst.msk [vmem:[%s192_s29] sm:$0xff] %vm217_vm0, %v216_v8 }
  0x98 PF: > { %s14_s15 = sadd.s32 1, %s299_s15  }
  0x99   : > { %p11_p4 = scmp.ge.s32.totalorder %s14_s15, 4  }
  0x9b   :  { %13 = sbr.rel (!%p11_p4) target bundleno = 1 (0x1), region = 66 }

// kernel: decoder_forward.10
= control target key start
LH: loop header
LB: loop body
LE: loop exit
PB: predicated region body
PF: predicated region fallthrough
CT: control target
= control target key end

     0   :  { %vm36_vm0 = vcmask 261120   ;;  %v447_v20 = vmov 0.0   ;;  %vm154_vm1 = vcmask 523264   ;;  %s590_s1 = inlined_call_operand.vmem [shape: f32[32,64], index: 1, kind: input, shape index: {}]   ;;  %s591_s0 = inlined_call_operand.vmem [shape: f32[16,32], index: 0, kind: input, shape index: {}]   ;;  %s592_s3 = inlined_call_operand.vmem [shape: f32[64,32], index: 3, kind: input, shape index: {}]   ;;  %s593_s2 = inlined_call_operand.vmem [shape: f32[1,64], index: 2, kind: input, shape index: {}]   ;;  %s594_s4 = inlined_call_operand.vmem [shape: f32[1,32], index: 4, kind: input, shape index: {}]   ;;  %s595_s5 = inlined_call_operand.vmem [shape: f32[1,32], index: 5, kind: input, shape index: {}]   ;;  %s596_s6 = inlined_call_operand.vmem [shape: f32[1,32], index: 6, kind: input, shape index: {}]   ;;  %s597_s7 = inlined_call_operand.vmem [shape: f32[1,32], index: 7, kind: input, shape index: {}]   ;;  %s598_s8 = inlined_call_operand.vmem [shape: f32[1,32], index: 8, kind: input, shape index: {}]   ;;  %s599_s9 = inlined_call_operand.vmem [shape: f32[16,32], index: 9, kind: output, shape index: {}]  }
   0x1   :  { %v41_v0 = vld [vmem:[%s590_s1] sm:$0xff]  ;;  %v42_v1 = vld [vmem:[%s590_s1 + $0x8] sm:$0xff]  ;;  %v43_v2 = vld [vmem:[%s590_s1 + $0x10] sm:$0xff]  ;;  %38 = vst.msk [vmem:[#allocation2 + $0x8] sm:$0xff] %vm36_vm0, %v447_v20 }
   0x2   :  { %v410_v3 = vpack.c.bf16 %v42_v1, %v41_v0  ;;  %v44_v4 = vld [vmem:[%s590_s1 + $0x18] sm:$0xff]  ;;  %v513_v5 = vld [vmem:[%s591_s0] sm:$0xff]  ;;  %v520_v7 = vld [vmem:[%s591_s0 + $0x8] sm:$0xff]  ;;  %37 = vst.msk [vmem:[#allocation2] sm:$0xff] %vm36_vm0, %v447_v20 }
   0x3   :  { %v414_v6 = vpack.c.bf16 %v44_v4, %v43_v2  ;;  %388 = vmatprep.mubr.msk.f32.mxu0 %vm36_vm0, %v513_v5  ;;  %v146_v8 = vld [vmem:[%s592_s3] sm:$0xff]  ;;  %v147_v9 = vld [vmem:[%s592_s3 + $0x8] sm:$0xff]  ;;  %v148_v11 = vld [vmem:[%s592_s3 + $0x10] sm:$0xff] }
   0x4   :  { %411 = vmatprep.subr.bf16.mxu0 %v410_v3  ;;  %v418_v10 = vpack.c.bf16 %v147_v9, %v146_v8  ;;  %v149_v12 = vld [vmem:[%s592_s3 + $0x18] sm:$0xff]  ;;  %v150_v14 = vld [vmem:[%s592_s3 + $0x20] sm:$0xff]  ;;  %v151_v15 = vld [vmem:[%s592_s3 + $0x28] sm:$0xff] }
   0x5   :  { %413 = vmatpush3.bf16.msra.mxu0 %v410_v3  ;;  %v422_v13 = vpack.c.bf16 %v149_v12, %v148_v11  ;;  %v426_v16 = vpack.c.bf16 %v151_v15, %v150_v14  ;;  %v152_v17 = vld [vmem:[%s592_s3 + $0x30] sm:$0xff]  ;;  %v153_v18 = vld [vmem:[%s592_s3 + $0x38] sm:$0xff]  ;;  %v354_v21 = vld [vmem:[%s593_s2] ss:$0 sm:$0xff] }
   0x6   :  { %415 = vmatprep.subr.bf16.mxu0 %v414_v6  ;;  %419 = vmatprep.subr.bf16.mxu1 %v418_v10  ;;  %v430_v19 = vpack.c.bf16 %v153_v18, %v152_v17  ;;  %v359_v42 = vld [vmem:[%s594_s4] ss:$0 sm:$0xff] }
   0x7   :  { %421 = vmatpush3.bf16.msra.mxu1 %v418_v10  ;;  %v360_v4 = vld [vmem:[%s595_s5] ss:$0 sm:$0xff] }
   0x8   :  { %423 = vmatprep.subr.bf16.mxu1 %v422_v13  ;;  %v145_v36 = vld [vmem:[#allocation2 + $0x8] sm:$0xff]  ;;  %v361_v8 = vld [vmem:[%s596_s6] ss:$0 sm:$0xff] }
   0x9   :  { %417 = vmatpush3.bf16.msra.mxu0 %v414_v6  ;;  %v144_v37 = vld [vmem:[#allocation2] sm:$0xff] }
   0xb   :  { %425 = vmatpush3.bf16.msra.mxu1 %v422_v13 }
   0xc   :  { %389 = vmatmul.mubr.msk.f32.vlgmr.msra.gmra.mrb[0].mxu0 %vm36_vm0, %v520_v7  ;;  %427 = vmatprep.subr.bf16.mxu1 %v426_v16 }
   0xf   :  { %429 = vmatpush3.bf16.msra.mxu1 %v426_v16 }
  0x10   :  { %431 = vmatprep.subr.bf16.mxu1 %v430_v19 }
  0x13   :  { %433 = vmatpush3.bf16.msra.mxu1 %v430_v19 }
  0xdf   :  { %v390_v22 = vpop.f32.mrb[0].mxu0 }
  0xe0   :  { %v131_v23 = vadd.f32 %v390_v22, %v354_v21  ;;  %v125_v24 = vpop.f32.mrb[1].mxu0 }
  0xe1   :  { %v126_v25 = vadd.f32 %v354_v21, %v125_v24 }
  0xe2   :  { %v137_v26 = vmul.f32 0.70710677, %v131_v23  ;;  %v135_v33 = vmul.f32 0.5, %v131_v23 }
  0xe3   :  { %v136_v27 = vmul.f32 0.70710677, %v126_v25  ;;  %v134_v31 = vmul.f32 0.5, %v126_v25 }
  0xe4   :  { %435 = verf.f32 %v137_v26 }
  0xe5   :  { %437 = verf.f32 %v136_v27 }
  0xee   :  { %v436_v28 = vpop.eup %435 }
  0xef   :  { %v438_v29 = vpop.eup %437  ;;  %v141_v30 = vadd.f32 1.0, %v436_v28 }
  0xf0   :  { %v140_v32 = vadd.f32 1.0, %v438_v29 }
  0xf1   :  { %v143_v35 = vmul.f32 %v141_v30, %v135_v33 }
  0xf2   :  { %v142_v34 = vmul.f32 %v140_v32, %v134_v31 }
  0xf4   :  { %407 = vmatprep.mubr.msk.f32.mxu1 %vm154_vm1, %v142_v34  ;;  %v362_v34 = vld [vmem:[%s597_s7] ss:$0 sm:$0xff] }
  0xf5   :  { %408 = vmatmul.mubr.msk.f32.vlgmr.msra.gmra.mrb[0].mxu1 %vm154_vm1, %v143_v35 }
 0x1c8   :  { %v409_v38 = vpop.f32.mrb[0].mxu1 }
 0x1c9   :  { %v237_v39 = vadd.f32 %v409_v38, %v145_v36  ;;  %v227_v40 = vpop.f32.mrb[1].mxu1  ;;  %v363_v36 = vld [vmem:[%s598_s8] ss:$0 sm:$0xff] }
 0x1ca   :  { %v236_v41 = vadd.f32 %v227_v40, %v144_v37 }
 0x1cb   :  { %239 = vst.msk [vmem:[#allocation2 + $0x8] sm:$0xff] %vm36_vm0, %v237_v39 }
 0x1cc   :  { %238 = vst.msk [vmem:[#allocation2] sm:$0xff] %vm36_vm0, %v236_v41 }
 0x1d2   :  { %v246_v43 = vld [vmem:[#allocation2 + $0x8] sm:$0xff] }
 0x1d3   :  { %v245_v44 = vld [vmem:[#allocation2] sm:$0xff]  ;;  %v255_v46 = vadd.f32 %v359_v42, %v246_v43 }
 0x1d4   :  { %v254_v45 = vadd.f32 %v359_v42, %v245_v44 }
 0x1d5   :  { %v257_v49 = vadd.f32 %v255_v46, %v520_v7 }
 0x1d6   :  { %v256_v47 = vadd.f32 %v254_v45, %v513_v5 }
 0x1d7   :  { %v263_v50 = vsel %vm36_vm0, %v257_v49, 0.0 }
 0x1d8   :  { %v260_v48 = vsel %vm36_vm0, %v256_v47, 0.0 }
 0x1d9   :  { %261 = vadd.xlane.f32.xlu0 %v260_v48 }
 0x1dd   :  { %264 = vadd.xlane.f32.xlu0 %v263_v50 }
 0x266   :  { %v262_v51 = vpop.xlane.xlu0 %261 }
 0x267   :  { %v266_v52 = vmul.f32 0.03125, %v262_v51 }
 0x269   :  { %v268_v53 = vsub.f32 %v256_v47, %v266_v52 }
 0x26a   :  { %v265_v54 = vpop.xlane.xlu0 %264 }
 0x26b   :  { %v267_v55 = vmul.f32 0.03125, %v265_v54  ;;  %v270_v56 = vmul.f32 %v268_v53, %v268_v53 }
 0x26d   :  { %v269_v57 = vsub.f32 %v257_v49, %v267_v55  ;;  %v272_v58 = vsel %vm36_vm0, %v270_v56, 0.0 }
 0x26e   :  { %273 = vadd.xlane.f32.xlu1 %v272_v58 }
 0x26f   :  { %v271_v59 = vmul.f32 %v269_v57, %v269_v57 }
 0x271   :  { %v275_v60 = vsel %vm36_vm0, %v271_v59, 0.0 }
 0x272   :  { %276 = vadd.xlane.f32.xlu1 %v275_v60 }
 0x2fb   :  { %v274_v61 = vpop.xlane.xlu1 %273 }
 0x2fc   :  { %v278_v62 = vmul.f32 0.03125, %v274_v61 }
 0x2fe   :  { %v280_v63 = vadd.f32 1e-05, %v278_v62 }
 0x2ff   :  { %v277_v0 = vpop.xlane.xlu1 %276 }
 0x300   :  { %439 = vrsqrt.f32 %v280_v63  ;;  %v279_v1 = vmul.f32 0.03125, %v277_v0 }
 0x302   :  { %v281_v2 = vadd.f32 1e-05, %v279_v1 }
 0x304   :  { %441 = vrsqrt.f32 %v281_v2 }
 0x30a   :  { %v440_v3 = vpop.eup %439 }
 0x30b   :  { %v284_v6 = vmul.f32 %v440_v3, %v268_v53 }
 0x30d   :  { %v292_v9 = vmul.f32 %v360_v4, %v284_v6 }
 0x30e   :  { %v442_v10 = vpop.eup %441 }
 0x30f   :  { %v300_v11 = vadd.f32 %v361_v8, %v292_v9  ;;  %v285_v12 = vmul.f32 %v442_v10, %v269_v57 }
 0x311   :  { %v302_v13 = vadd.f32 %v300_v11, %v513_v5  ;;  %v293_v14 = vmul.f32 %v360_v4, %v285_v12 }
 0x313   :  { %v306_v15 = vsel %vm36_vm0, %v302_v13, 0.0  ;;  %v301_v16 = vadd.f32 %v361_v8, %v293_v14 }
 0x314   :  { %307 = vadd.xlane.f32.xlu0 %v306_v15 }
 0x315   :  { %v303_v17 = vadd.f32 %v301_v16, %v520_v7 }
 0x317   :  { %v309_v18 = vsel %vm36_vm0, %v303_v17, 0.0 }
 0x318   :  { %310 = vadd.xlane.f32.xlu1 %v309_v18 }
 0x3a1   :  { %v308_v19 = vpop.xlane.xlu0 %307 }
 0x3a2   :  { %v312_v20 = vmul.f32 0.03125, %v308_v19 }
 0x3a4   :  { %v314_v21 = vsub.f32 %v302_v13, %v312_v20 }
 0x3a5   :  { %v311_v22 = vpop.xlane.xlu1 %310 }
 0x3a6   :  { %v313_v23 = vmul.f32 0.03125, %v311_v22  ;;  %v316_v24 = vmul.f32 %v314_v21, %v314_v21 }
 0x3a8   :  { %v315_v25 = vsub.f32 %v303_v17, %v313_v23  ;;  %v318_v26 = vsel %vm36_vm0, %v316_v24, 0.0 }
 0x3a9   :  { %319 = vadd.xlane.f32.xlu0 %v318_v26 }
 0x3aa   :  { %v317_v5 = vmul.f32 %v315_v25, %v315_v25 }
 0x3ac   :  { %v321_v27 = vsel %vm36_vm0, %v317_v5, 0.0 }
 0x3ad   :  { %322 = vadd.xlane.f32.xlu1 %v321_v27 }
 0x436   :  { %v320_v28 = vpop.xlane.xlu0 %319 }
 0x437   :  { %v324_v29 = vmul.f32 0.03125, %v320_v28 }
 0x439   :  { %v326_v7 = vadd.f32 1e-05, %v324_v29 }
 0x43a   :  { %v323_v30 = vpop.xlane.xlu1 %322 }
 0x43b   :  { %443 = vrsqrt.f32 %v326_v7  ;;  %v325_v31 = vmul.f32 0.03125, %v323_v30 }
 0x43d   :  { %v327_v32 = vadd.f32 1e-05, %v325_v31 }
 0x43f   :  { %445 = vrsqrt.f32 %v327_v32 }
 0x445   :  { %v444_v33 = vpop.eup %443 }
 0x446   :  { %v330_v35 = vmul.f32 %v444_v33, %v314_v21 }
 0x448   :  { %v338_v37 = vmul.f32 %v362_v34, %v330_v35 }
 0x449   :  { %v446_v38 = vpop.eup %445 }
 0x44a   :  { %v346_v39 = vadd.f32 %v363_v36, %v338_v37  ;;  %v331_v40 = vmul.f32 %v446_v38, %v315_v25 }
 0x44c   :  { %348 = vst.msk [vmem:[%s599_s9] sm:$0xff] %vm36_vm0, %v346_v39  ;;  %v339_v41 = vmul.f32 %v362_v34, %v331_v40 }
 0x44e   :  { %v347_v42 = vadd.f32 %v363_v36, %v339_v41 }
 0x450   :  { %349 = vst.msk [vmem:[%s599_s9 + $0x8] sm:$0xff] %vm36_vm0, %v347_v42 }

// kernel: decoder_forward.8
= control target key start
LH: loop header
LB: loop body
LE: loop exit
PB: predicated region body
PF: predicated region fallthrough
CT: control target
= control target key end

     0   :  { %s1990_s18 = smov 0   ;;  %s2181_s0 = inlined_call_operand.vmem [shape: f32[2,8,32], index: 0, kind: input, shape index: {}, may-alias: {0,1}]   ;;  %s2182_s1 = inlined_call_operand.vmem [shape: f32[2,8,32], index: 1, kind: input, shape index: {}, may-alias: {0,1}]   ;;  %s2183_s2 = inlined_call_operand.vmem [shape: f32[2,8,8], index: 2, kind: input, shape index: {}]   ;;  %s2184_s3 = inlined_call_operand.vmem [shape: f32[32,32], index: 3, kind: input, shape index: {}]   ;;  %s2185_s4 = inlined_call_operand.vmem [shape: f32[1,32], index: 4, kind: input, shape index: {}]   ;;  %s2186_s5 = inlined_call_operand.vmem [shape: f32[32,32], index: 5, kind: input, shape index: {}]   ;;  %s2187_s6 = inlined_call_operand.vmem [shape: f32[1,32], index: 6, kind: input, shape index: {}]   ;;  %s2188_s7 = inlined_call_operand.vmem [shape: f32[32,32], index: 7, kind: input, shape index: {}]   ;;  %s2189_s8 = inlined_call_operand.vmem [shape: f32[1,32], index: 8, kind: input, shape index: {}]   ;;  %s2190_s9 = inlined_call_operand.vmem [shape: f32[32,32], index: 9, kind: input, shape index: {}]   ;;  %s2191_s10 = inlined_call_operand.vmem [shape: f32[1,32], index: 10, kind: input, shape index: {}]   ;;  %s2192_s11 = inlined_call_operand.vmem [shape: f32[1,32], index: 11, kind: input, shape index: {}]   ;;  %s2193_s12 = inlined_call_operand.vmem [shape: f32[1,32], index: 12, kind: input, shape index: {}]   ;;  %s2194_s13 = inlined_call_operand.vmem [shape: f32[1,32], index: 13, kind: input, shape index: {}]   ;;  %s2195_s14 = inlined_call_operand.vmem [shape: f32[1,32], index: 14, kind: input, shape index: {}]   ;;  %s2196_s15 = inlined_call_operand.vmem [shape: f32[2,8,32], index: 15, kind: output, shape index: {}]  }
   0x1 LB: > { %s1677_s19 = sadd.s32 4294967295, %s1899_s18   ;;  %p1681_p0 = scmp.ge.s32.totalorder %s1899_s18, 1  ;;  %s1899_s18 = sphi %s1990_s18, %s25_s18  }
   0x2   : > { %p454_p1 = scmp.lt.s32.totalorder %s1899_s18, 3 }
   0x4   : > { %p455_p2 = pnand %p1681_p0, %p454_p1 }
   0x5   : > { %v612_v0 = vld [vmem:[%s2186_s5] sm:$0xff] (!%p455_p2)  ;;  %v613_v1 = vld [vmem:[%s2186_s5 + $0x8] sm:$0xff] (!%p455_p2)  ;;  %v1901_v3 = vmov (!%p455_p2), 0.0|0.0   ;;  %v614_v6 = vld [vmem:[%s2186_s5 + $0x10] sm:$0xff] (!%p455_p2)  ;;  %p508_p3 = scmp.lt.s32.totalorder (!%p455_p2), %s1677_s19, 1  ;;  %vm1902_vm0 = vmmov (!%p455_p2), 0  }
   0x6   : > { %458 = sbr.rel (%p455_p2) target bundleno = 2539 (0x9eb), region = 80  ;;  %v527_v2 = vld [vmem:[%s2184_s3] sm:$0xff] (!%p455_p2)  ;;  %1838 = vmatprep.subr.bf16.mxu1 (!%p455_p2), %v1901_v3  ;;  %1832 = vmatprep.subr.bf16.mxu0 (!%p455_p2), %v1901_v3  ;;  %v1839_v4 = vpack.c.bf16 (!%p455_p2), %v613_v1, %v612_v0  ;;  %v528_v5 = vld [vmem:[%s2184_s3 + $0x8] sm:$0xff] (!%p455_p2)  ;;  %v615_v7 = vld [vmem:[%s2186_s5 + $0x18] sm:$0xff] (!%p455_p2)  ;;  %v1903_v11 = vmov (!%p455_p2), 0.0   ;;  %vm538_vm1 = vcmask (!%p455_p2), 261120  }
   0x7   : > { %v1833_v8 = vpack.c.bf16 (!%p455_p2), %v528_v5, %v527_v2  ;;  %v529_v9 = vld [vmem:[%s2184_s3 + $0x10] sm:$0xff] (!%p455_p2)  ;;  %v530_v10 = vld [vmem:[%s2184_s3 + $0x18] sm:$0xff] (!%p455_p2)  ;;  %1767 = vmatprep.mubr.msk.f32.mxu1 (!%p455_p2), %vm1902_vm0, %v1903_v11  ;;  %1756 = vmatprep.mubr.msk.f32.mxu0 (!%p455_p2), %vm1902_vm0, %v1903_v11  ;;  %v1842_v12 = vpack.c.bf16 (!%p455_p2), %v615_v7, %v614_v6  ;;  %v1688_v16 = vld [vmem:[%s2187_s6] ss:$0 sm:$0xff] (!%p455_p2)  ;;  %vm778_vm2 = vcmask (!%p455_p2), 64512   ;;  %s1904_s20 = smov (!%p455_p2), 120  }
   0x8   : > { %1840 = vmatpush3.bf16.msra.mxu1 (!%p455_p2), %v1839_v4  ;;  %v1836_v13 = vpack.c.bf16 (!%p455_p2), %v530_v10, %v529_v9  ;;  %v1686_v17 = vld [vmem:[%s2185_s4] ss:$0 sm:$0xff] (!%p455_p2)  ;;  %s1905_s21 = smov (!%p455_p2), 112   ;;  %s1906_s22 = smov (!%p455_p2), 104   ;;  %v697_v26 = vld [vmem:[%s2188_s7 + $0x8] sm:$0xff] (!%p455_p2)  ;;  %v698_v27 = vld [vmem:[%s2188_s7 + $0x10] sm:$0xff] (!%p455_p2) }
   0x9   : > { %1834 = vmatpush3.bf16.msra.mxu0 (!%p455_p2), %v1833_v8  ;;  %1841 = vmatprep.subr.bf16.mxu1 (!%p455_p2), %v1901_v3  ;;  %v696_v25 = vld [vmem:[%s2188_s7] sm:$0xff] (!%p455_p2)  ;;  %v699_v29 = vld [vmem:[%s2188_s7 + $0x18] sm:$0xff] (!%p455_p2)  ;;  %s1907_s16 = smov (!%p455_p2), 8   ;;  %s1908_s17 = smov (!%p455_p2), 16   ;;  %vm1110_vm3 = vcmask (!%p455_p2), 130112   ;;  %vm1281_vm4 = vcmask (!%p455_p2), 195712  }
   0xa   : > { %1835 = vmatprep.subr.bf16.mxu0 (!%p455_p2), %v1901_v3  ;;  %v1845_v28 = vpack.c.bf16 (!%p455_p2), %v697_v26, %v696_v25  ;;  %v1848_v30 = vpack.c.bf16 (!%p455_p2), %v699_v29, %v698_v27  ;;  %v1690_v41 = vld [vmem:[%s2189_s8] ss:$0 sm:$0xff] (!%p455_p2)  ;;  %vm1452_vm5 = vcmask (!%p455_p2), 261312  }
   0xc   : > { %1843 = vmatpush3.bf16.msra.mxu1 (!%p455_p2), %v1842_v12 }
   0xd   : > { %s2198_s19 = smov (!%p508_p3, %s1677_s19), 1  ;;  %1837 = vmatpush3.bf16.msra.mxu0 %v1836_v13  ;;  %1781 = vmatprep.subr.mxu1 %v1903_v11 }
   0xe   : > { %s2030_s23 = sshll.u32 %s2198_s19, 3  ;;  %1844 = vmatprep.subr.bf16.mxu0 %v1901_v3 }
   0xf   : > { %s515_s26 = scalar_lea.vmem %s2182_s1, %s2030_s23  ;;  %s511_s29 = scalar_lea.vmem %s2181_s0, %s2030_s23 }
  0x10   : > { %v525_v14 = vld [vmem:[%s515_s26] sm:$0xff]  ;;  %s519_s24 = scalar_lea.vmem %s2183_s2, %s2030_s23 }
  0x11   : > { %v2040_v15 = vld [vmem:[%s511_s29] sm:$0xff]  ;;  %1768 = vmatmul.mubr.msk.f32.vlgmr.msra.gmra.mrb[0].mxu1 %vm538_vm1, %v525_v14 }
  0x12   : > { %1757 = vmatmul.mubr.msk.f32.vlgmr.msra.gmra.mrb[0].mxu0 %vm538_vm1, %v2040_v15  ;;  %1783 = vmatprep.mubr.msk.f32.mxu1 %vm1902_vm0, %v1903_v11  ;;  %v526_v31 = vld [vmem:[%s519_s24] sm:$0xff]  ;;  %s1909_s24 = smov 24  }
  0x13   : > { %1778 = vmatprep.mubr.msk.f32.mxu0 %vm1902_vm0, %v1903_v11  ;;  %1846 = vmatpush3.bf16.msra.mxu0 %v1845_v28 }
  0x14   : > { %1847 = vmatprep.subr.bf16.mxu0 %v1901_v3 }
  0x17   : > { %1849 = vmatpush3.bf16.msra.mxu0 %v1848_v30 }
  0x18   : > { %1801 = vmatprep.subr.mxu0 %v1903_v11 }
  0x1a   : > { %1779 = vmatmul.mubr.msk.f32.vlgmr.msra.gmra.mrb[2].mxu0 %vm538_vm1, %v525_v14 }
  0x1b   : > { %1803 = vmatprep.mubr.msk.f32.mxu0 %vm1902_vm0, %v1903_v11 }
  0xe4   : > { %v692_v18 = vpop.f32.mrb[0].mxu1 }
  0xe5   : > { %v693_v19 = vadd.f32 %v1688_v16, %v692_v18  ;;  %v608_v20 = vpop.f32.mrb[0].mxu0  ;;  %v1769_v21 = vpop.f32.mrb[1].mxu1 }
  0xe6   : > { %v609_v22 = vadd.f32 %v1686_v17, %v608_v20  ;;  %v1758_v23 = vpop.f32.mrb[1].mxu0 }
  0xe7   : > { %942 = vrot.lane.b32.xlu1 %v693_v19, %s1904_s20  ;;  %1782 = vmatpush3.xpose.msk.msra.mxu1 %vm778_vm2, %v693_v19 }
  0xe8   : > { %v777_v24 = vmul.f32 0.35355338, %v609_v22  ;;  %1786 = vmatprep.subr.mxu1 %v1903_v11 }
  0xea   : > { %1784 = vmatmul.mubr.msk.f32.vlgmr.msra.gmra.mrb[2].mxu1 %vm778_vm2, %v777_v24 }
  0xeb   : > { %940 = vrot.lane.b32.xlu1 %v777_v24, %s1904_s20  ;;  %1788 = vmatprep.mubr.msk.f32.mxu1 %vm1902_vm0, %v1903_v11 }
  0xed   : > { %v773_v42 = vpop.f32.mrb[2].mxu0 }
  0xee   : > { %v2093_v43 = vadd.f32 %v1690_v41, %v773_v42  ;;  %v1780_v44 = vpop.f32.mrb[3].mxu0 }
  0xef   : > { %1112 = vrot.lane.b32.xlu1 %v777_v24, %s1905_s21 }
  0xf0   : > { %1787 = vmatpush3.msra.mxu1 %v2093_v43 }
  0xf1   : > { %1791 = vmatprep.subr.mxu1 %v1903_v11 }
  0xf3   : > { %1285 = vrot.lane.b32.xlu1 %v693_v19, %s1906_s22 }
  0xf7   : > { %1283 = vrot.lane.b32.xlu1 %v777_v24, %s1906_s22 }
 0x159   : > { %v943_v45 = vpop.permute.xlu1 %942 }
 0x15d   : > { %v941_v46 = vpop.permute.xlu1 %940 }
 0x161   : > { %v1113_v47 = vpop.permute.xlu1 %1112 }
 0x165   : > { %v1286_v50 = vpop.permute.xlu1 %1285 }
 0x169   : > { %v1284_v52 = vpop.permute.xlu1 %1283 }
 0x1bd   : > { %v851_v32 = vpop.f32.mrb[2].mxu1 }
 0x1be   : > { %v852_v33 = vadd.f32 %v851_v32, %v526_v31  ;;  %v1785_v34 = vpop.f32.mrb[3].mxu1 }
 0x1bf   : > { %v1455_v34 = vld [vmem:[%s2190_s9] sm:$0xff] }
 0x1c0   : > { %v855_v35 = vsel %vm778_vm2, %v852_v33, -inf }
 0x1c1   : > { %856 = vmax.xlane.f32.xlu0 %v855_v35  ;;  %v1456_v35 = vld [vmem:[%s2190_s9 + $0x8] sm:$0xff] }
 0x24e   : > { %v857_v36 = vpop.xlane.xlu0 %856 }
 0x24f   : > { %v858_v37 = vsub.f32 %v852_v33, %v857_v36  ;;  %v1851_v36 = vpack.c.bf16 %v1456_v35, %v1455_v34 }
 0x251   : > { %v859_v38 = vmul.f32 1.442695, %v858_v37  ;;  %v1457_v37 = vld [vmem:[%s2190_s9 + $0x10] sm:$0xff] }
 0x253   : > { %1873 = vpow2.f32 %v859_v38 }
 0x25d   : > { %v1874_v39 = vpop.eup %1873 }
 0x25e   : > { %v861_v40 = vsel %vm778_vm2, %v1874_v39, 0.0 }
 0x25f   : > { %862 = vadd.xlane.f32.xlu0 %v861_v40 }
 0x275   : > { %1114 = vrot.lane.b32.xlu0 %v693_v19, %s1905_s21 }
 0x2ec   : > { %v863_v48 = vpop.xlane.xlu0 %862 }
 0x2ed   : > { %1875 = vrcp.f32 %v863_v48  ;;  %v1704_v48 = vld [vmem:[%s2191_s10] ss:$0 sm:$0xff] }
 0x2f0   : > { %v1115_v49 = vpop.permute.xlu0 %1114 }
 0x2f1   : > { %1802 = vmatpush3.xpose.msk.msra.mxu0 %vm778_vm2, %v1115_v49 }
 0x2f2   : > { %1811 = vmatprep.subr.mxu0 %v1903_v11 }
 0x2f4   : > { %1804 = vmatmul.mubr.msk.f32.vlgmr.msra.gmra.mrb[4].mxu0 %vm778_vm2, %v1113_v47 }
 0x2f5   : > { %1812 = vmatpush3.xpose.msk.msra.mxu0 %vm778_vm2, %v1286_v50  ;;  %1813 = vmatprep.mubr.msk.f32.mxu0 %vm1902_vm0, %v1903_v11 }
 0x2f6   : > { %1850 = vmatprep.subr.bf16.mxu0 %v1901_v3 }
 0x2f7   : > { %v1876_v51 = vpop.eup %1875 }
 0x2f8   : > { %v865_v53 = vmul.f32 %v1876_v51, %v1874_v39  ;;  %1814 = vmatmul.mubr.msk.f32.vlgmr.msra.gmra.mrb[6].mxu0 %vm778_vm2, %v1284_v52 }
 0x2f9   : > { %1829 = vmatprep.mubr.msk.f32.mxu0 %vm1902_vm0, %v1903_v11  ;;  %1852 = vmatpush3.bf16.msra.mxu0 %v1851_v36 }
 0x2fa   : > { %1789 = vmatmul.mubr.msk.f32.vlgmr.msra.gmra.mrb[4].mxu1 %vm778_vm2, %v865_v53  ;;  %1853 = vmatprep.subr.bf16.mxu0 %v1901_v3 }
 0x2fb   : > { %1792 = vmatpush3.xpose.msk.msra.mxu1 %vm778_vm2, %v943_v45  ;;  %1793 = vmatprep.mubr.msk.f32.mxu1 %vm1902_vm0, %v1903_v11 }
 0x2fc   : > { %1796 = vmatprep.subr.mxu1 %v1903_v11 }
 0x2fe   : > { %1794 = vmatmul.mubr.msk.f32.vlgmr.msra.gmra.mrb[6].mxu1 %vm778_vm2, %v941_v46 }
 0x2ff   : > { %1798 = vmatprep.mubr.msk.f32.mxu1 %vm1902_vm0, %v1903_v11 }
 0x3c7   : > { %v1186_v54 = vpop.f32.mrb[4].mxu0 }
 0x3c8   : > { %v1187_v55 = vadd.f32 %v1186_v54, %v526_v31  ;;  %v1805_v56 = vpop.f32.mrb[5].mxu0 }
 0x3ca   : > { %v1190_v57 = vsel %vm778_vm2, %v1187_v55, -inf }
 0x3cb   : > { %1191 = vmax.xlane.f32.xlu0 %v1190_v57  ;;  %v1357_v58 = vpop.f32.mrb[6].mxu0 }
 0x3cc   : > { %v1815_v59 = vpop.f32.mrb[7].mxu0  ;;  %v1358_v1 = vadd.f32 %v1357_v58, %v526_v31 }
 0x3cd   : > { %v935_v60 = vpop.f32.mrb[4].mxu1 }
 0x3ce   : > { %939 = vst.msk [vmem:[#allocation2] sm:$0xff] %vm778_vm2, %v935_v60  ;;  %v1790_v61 = vpop.f32.mrb[5].mxu1  ;;  %v1361_v4 = vsel %vm778_vm2, %v1358_v1, -inf }
 0x3d1   : > { %v1014_v62 = vpop.f32.mrb[6].mxu1 }
 0x3d2   : > { %v1015_v63 = vadd.f32 %v1014_v62, %v526_v31  ;;  %v1795_v0 = vpop.f32.mrb[7].mxu1 }
 0x3d4   : > { %v1018_v2 = vsel %vm778_vm2, %v1015_v63, -inf }
 0x3d5   : > { %1019 = vmax.xlane.f32.xlu1 %v1018_v2 }
 0x3d9   : > { %1362 = vmax.xlane.f32.xlu1 %v1361_v4 }
 0x458   : > { %v1192_v5 = vpop.xlane.xlu0 %1191 }
 0x459   : > { %v1193_v6 = vsub.f32 %v1187_v55, %v1192_v5 }
 0x45b   : > { %v1194_v7 = vmul.f32 1.442695, %v1193_v6 }
 0x45d   : > { %1877 = vpow2.f32 %v1194_v7 }
 0x462   : > { %v1020_v8 = vpop.xlane.xlu1 %1019 }
 0x463   : > { %v1021_v18 = vsub.f32 %v1015_v63, %v1020_v8  ;;  %v1706_v63 = vld [vmem:[%s2192_s11] ss:$0 sm:$0xff] }
 0x465   : > { %v1022_v19 = vmul.f32 1.442695, %v1021_v18 }
 0x466   : > { %v1363_v9 = vpop.xlane.xlu1 %1362 }
 0x467   : > { %v1878_v10 = vpop.eup %1877  ;;  %v1364_v12 = vsub.f32 %v1358_v1, %v1363_v9  ;;  %v1707_v1 = vld [vmem:[%s2193_s12] ss:$0 sm:$0xff] }
 0x468   : > { %v1196_v13 = vsel %vm778_vm2, %v1878_v10, 0.0 }
 0x469   : > { %v1365_v14 = vmul.f32 1.442695, %v1364_v12  ;;  %1197 = vadd.xlane.f32.xlu0 %v1196_v13 }
 0x46b   : > { %1879 = vpow2.f32 %v1365_v14 }
 0x46c   : > { %1881 = vpow2.f32 %v1022_v19  ;;  %v1709_v19 = vld [vmem:[%s2195_s14] ss:$0 sm:$0xff] }
 0x475   : > { %v1880_v16 = vpop.eup %1879 }
 0x476   : > { %v1367_v17 = vsel %vm778_vm2, %v1880_v16, 0.0  ;;  %v1882_v20 = vpop.eup %1881 }
 0x477   : > { %1368 = vadd.xlane.f32.xlu1 %v1367_v17  ;;  %v1024_v21 = vsel %vm778_vm2, %v1882_v20, 0.0 }
 0x47f   : > { %1030 = vrot.lane.b32.xlu0 %v2093_v43, %s1904_s20 }
 0x488   : > { %1201 = vrot.lane.b32.xlu1 %v2093_v43, %s1905_s21 }
 0x4ac   : > { %1025 = vadd.xlane.f32.xlu1 %v1024_v21 }
 0x4bd   : > { %1372 = vrot.lane.b32.xlu1 %v2093_v43, %s1906_s22 }
 0x4f6   : > { %v1198_v22 = vpop.xlane.xlu0 %1197 }
 0x4fa   : > { %v1031_v23 = vpop.permute.xlu0 %1030 }
 0x4fb   : > { %1797 = vmatpush3.msra.mxu1 %v1031_v23 }
 0x4fc   : > { %1806 = vmatprep.subr.mxu1 %v1903_v11 }
 0x504   : > { %v1369_v24 = vpop.xlane.xlu1 %1368 }
 0x508   : > { %v1202_v25 = vpop.permute.xlu1 %1201 }
 0x539   : > { %v1026_v26 = vpop.xlane.xlu1 %1025 }
 0x53a   : > { %1883 = vrcp.f32 %v1026_v26 }
 0x53b   : > { %1885 = vrcp.f32 %v1198_v22 }
 0x53c   : > { %1887 = vrcp.f32 %v1369_v24 }
 0x53d   : > { %v1373_v32 = vpop.permute.xlu1 %1372 }
 0x544   : > { %v1884_v27 = vpop.eup %1883 }
 0x545   : > { %v1028_v28 = vmul.f32 %v1884_v27, %v1882_v20  ;;  %v1886_v29 = vpop.eup %1885 }
 0x546   : > { %v1200_v30 = vmul.f32 %v1886_v29, %v1878_v10  ;;  %v1888_v31 = vpop.eup %1887 }
 0x547   : > { %1799 = vmatmul.mubr.msk.f32.vlgmr.msra.gmra.mrb[8].mxu1 %vm778_vm2, %v1028_v28  ;;  %v1371_v33 = vmul.f32 %v1888_v31, %v1880_v16 }
 0x548   : > { %1807 = vmatpush3.msra.mxu1 %v1202_v25  ;;  %1808 = vmatprep.mubr.msk.f32.mxu1 %vm1902_vm0, %v1903_v11 }
 0x549   : > { %1816 = vmatprep.subr.mxu1 %v1903_v11 }
 0x54b   : > { %1809 = vmatmul.mubr.msk.f32.vlgmr.msra.gmra.mrb[10].mxu1 %vm778_vm2, %v1200_v30 }
 0x54c   : > { %1817 = vmatpush3.msra.mxu1 %v1373_v32  ;;  %1818 = vmatprep.mubr.msk.f32.mxu1 %vm1902_vm0, %v1903_v11  ;;  %v1458_v11 = vld [vmem:[%s2190_s9 + $0x18] sm:$0xff] }
 0x54d   : > { %v1854_v38 = vpack.c.bf16 %v1458_v11, %v1457_v37 }
 0x54f   : > { %1819 = vmatmul.mubr.msk.f32.vlgmr.msra.gmra.mrb[12].mxu1 %vm778_vm2, %v1371_v33  ;;  %1855 = vmatpush3.bf16.msra.mxu0 %v1854_v38 }
 0x61a   : > { %v1102_v39 = vpop.f32.mrb[8].mxu1 }
 0x61b   : > { %1107 = vrot.lane.b32.xlu0 %v1102_v39, %s1907_s16  ;;  %v1800_v40 = vpop.f32.mrb[9].mxu1 }
 0x61e   : > { %v1273_v41 = vpop.f32.mrb[10].mxu1 }
 0x61f   : > { %1278 = vrot.lane.b32.xlu1 %v1273_v41, %s1908_s17  ;;  %v1810_v42 = vpop.f32.mrb[11].mxu1 }
 0x622   : > { %v1444_v43 = vpop.f32.mrb[12].mxu1 }
 0x623   : > { %1449 = vrot.lane.b32.xlu0 %v1444_v43, %s1909_s24  ;;  %v1820_v44 = vpop.f32.mrb[13].mxu1  ;;  %s523_s24 = scalar_lea.vmem %s2196_s15, %s2030_s23 }
 0x68d   : > { %v1108_v45 = vpop.permute.xlu0 %1107 }
 0x68e   : > { %1111 = vst.msk [vmem:[#allocation2] sm:$0xff] %vm1110_vm3, %v1108_v45 }
 0x691   : > { %v1279_v46 = vpop.permute.xlu1 %1278 }
 0x692   : > { %1282 = vst.msk [vmem:[#allocation2] sm:$0xff] %vm1281_vm4, %v1279_v46 }
 0x695   : > { %v1450_v3 = vpop.permute.xlu0 %1449 }
 0x696   : > { %1453 = vst.msk [vmem:[#allocation2] sm:$0xff] %vm1452_vm5, %v1450_v3 }
 0x69d   : > { %v1454_v47 = vld [vmem:[#allocation2] sm:$0xff] }
 0x69e   : > { %1830 = vmatmul.mubr.msk.f32.vlgmr.msra.gmra.mrb[8].mxu0 %vm538_vm1, %v1454_v47 }
 0x771   : > { %v1535_v49 = vpop.f32.mrb[8].mxu0 }
 0x772   : > { %v1536_v50 = vadd.f32 %v1704_v48, %v1535_v49  ;;  %v1831_v51 = vpop.f32.mrb[9].mxu0 }
 0x774   : > { %v1539_v52 = vadd.f32 %v1536_v50, %v2040_v15 }
 0x776   : > { %v1542_v53 = vsel %vm538_vm1, %v1539_v52, 0.0 }
 0x777   : > { %1543 = vadd.xlane.f32.xlu1 %v1542_v53 }
 0x804   : > { %v1544_v54 = vpop.xlane.xlu1 %1543 }
 0x805   : > { %v1545_v55 = vmul.f32 0.03125, %v1544_v54 }
 0x807   : > { %v1546_v56 = vsub.f32 %v1539_v52, %v1545_v55 }
 0x809   : > { %v1547_v57 = vmul.f32 %v1546_v56, %v1546_v56 }
 0x80b   : > { %v1548_v58 = vsel %vm538_vm1, %v1547_v57, 0.0 }
 0x80c   : > { %1549 = vadd.xlane.f32.xlu0 %v1548_v58 }
 0x899   : > { %v1550_v59 = vpop.xlane.xlu0 %1549 }
 0x89a   : > { %v1551_v60 = vmul.f32 0.03125, %v1550_v59 }
 0x89c   : > { %v1552_v61 = vadd.f32 1e-05, %v1551_v60 }
 0x89e   : > { %1889 = vrsqrt.f32 %v1552_v61 }
 0x8a8   : > { %v1890_v62 = vpop.eup %1889 }
 0x8a9   : > { %v1554_v0 = vmul.f32 %v1890_v62, %v1546_v56 }
 0x8ab   : > { %v1561_v2 = vmul.f32 %v1706_v63, %v1554_v0 }
 0x8ad   : > { %v1568_v4 = vadd.f32 %v1707_v1, %v1561_v2 }
 0x8af   : > { %v1569_v5 = vadd.f32 %v1568_v4, %v2040_v15  ;;  %v1708_v15 = vld [vmem:[%s2194_s13] ss:$0 sm:$0xff] }
 0x8b1   : > { %v1572_v6 = vsel %vm538_vm1, %v1569_v5, 0.0 }
 0x8b2   : > { %1573 = vadd.xlane.f32.xlu0 %v1572_v6 }
 0x93f   : > { %v1574_v7 = vpop.xlane.xlu0 %1573 }
 0x940   : > { %v1575_v8 = vmul.f32 0.03125, %v1574_v7 }
 0x942   : > { %v1576_v9 = vsub.f32 %v1569_v5, %v1575_v8 }
 0x944   : > { %v1577_v10 = vmul.f32 %v1576_v9, %v1576_v9 }
 0x946   : > { %v1578_v12 = vsel %vm538_vm1, %v1577_v10, 0.0 }
 0x947   : > { %1579 = vadd.xlane.f32.xlu1 %v1578_v12 }
 0x9d4   : > { %v1580_v13 = vpop.xlane.xlu1 %1579 }
 0x9d5   : > { %v1581_v14 = vmul.f32 0.03125, %v1580_v13 }
 0x9d7   : > { %v1582_v16 = vadd.f32 1e-05, %v1581_v14 }
 0x9d9   : > { %1891 = vrsqrt.f32 %v1582_v16 }
 0x9e3   : > { %v1892_v17 = vpop.eup %1891 }
 0x9e4   : > { %v1584_v18 = vmul.f32 %v1892_v17, %v1576_v9 }
 0x9e6   : > { %v1591_v20 = vmul.f32 %v1708_v15, %v1584_v18 }
 0x9e8   : > { %v1598_v21 = vadd.f32 %v1709_v19, %v1591_v20 }
 0x9ea   : > { %1599 = vst.msk [vmem:[%s523_s24] sm:$0xff] %vm538_vm1, %v1598_v21 }
 0x9eb PF: > { %s25_s18 = sadd.s32 1, %s1899_s18  }
 0x9ec   : > { %p22_p4 = scmp.ge.s32.totalorder %s25_s18, 4  }
 0x9ee   :  { %24 = sbr.rel (!%p22_p4) target bundleno = 1 (0x1), region = 116 }

// kernel: decoder_forward.9
= control target key start
LH: loop header
LB: loop body
LE: loop exit
PB: predicated region body
PF: predicated region fallthrough
CT: control target
= control target key end

     0   :  { %s2145_s18 = smov 0   ;;  %s2364_s0 = inlined_call_operand.vmem [shape: f32[2,8,32], index: 0, kind: input, shape index: {}]   ;;  %s2365_s1 = inlined_call_operand.vmem [shape: f32[2,12,32], index: 1, kind: input, shape index: {}]   ;;  %s2366_s2 = inlined_call_operand.vmem [shape: f32[2,8,12], index: 2, kind: input, shape index: {}]   ;;  %s2367_s3 = inlined_call_operand.vmem [shape: f32[32,32], index: 3, kind: input, shape index: {}]   ;;  %s2368_s4 = inlined_call_operand.vmem [shape: f32[1,32], index: 4, kind: input, shape index: {}]   ;;  %s2369_s5 = inlined_call_operand.vmem [shape: f32[32,32], index: 5, kind: input, shape index: {}]   ;;  %s2370_s6 = inlined_call_operand.vmem [shape: f32[1,32], index: 6, kind: input, shape index: {}]   ;;  %s2371_s7 = inlined_call_operand.vmem [shape: f32[32,32], index: 7, kind: input, shape index: {}]   ;;  %s2372_s8 = inlined_call_operand.vmem [shape: f32[1,32], index: 8, kind: input, shape index: {}]   ;;  %s2373_s9 = inlined_call_operand.vmem [shape: f32[32,32], index: 9, kind: input, shape index: {}]   ;;  %s2374_s10 = inlined_call_operand.vmem [shape: f32[1,32], index: 10, kind: input, shape index: {}]   ;;  %s2375_s11 = inlined_call_operand.vmem [shape: f32[1,32], index: 11, kind: input, shape index: {}]   ;;  %s2376_s12 = inlined_call_operand.vmem [shape: f32[1,32], index: 12, kind: input, shape index: {}]   ;;  %s2377_s13 = inlined_call_operand.vmem [shape: f32[1,32], index: 13, kind: input, shape index: {}]   ;;  %s2378_s14 = inlined_call_operand.vmem [shape: f32[1,32], index: 14, kind: input, shape index: {}]   ;;  %s2379_s15 = inlined_call_operand.vmem [shape: f32[2,8,32], index: 15, kind: output, shape index: {}]  }
   0x1 LB: > { %s1726_s19 = sadd.s32 4294967295, %s2053_s18   ;;  %p1730_p0 = scmp.ge.s32.totalorder %s2053_s18, 1  ;;  %s2053_s18 = sphi %s2145_s18, %s25_s18  }
   0x2   : > { %p455_p1 = scmp.lt.s32.totalorder %s2053_s18, 3 }
   0x4   : > { %p456_p2 = pnand %p1730_p0, %p455_p1 }
   0x5   : > { %v616_v0 = vld [vmem:[%s2369_s5] sm:$0xff] (!%p456_p2)  ;;  %v617_v1 = vld [vmem:[%s2369_s5 + $0x8] sm:$0xff] (!%p456_p2)  ;;  %v618_v2 = vld [vmem:[%s2369_s5 + $0x10] sm:$0xff] (!%p456_p2)  ;;  %p510_p3 = scmp.lt.s32.totalorder (!%p456_p2), %s1726_s19, 1  ;;  %v2055_v5 = vmov (!%p456_p2), 0.0|0.0   ;;  %vm2056_vm0 = vmmov (!%p456_p2), 0  }
   0x6   : > { %459 = sbr.rel (%p456_p2) target bundleno = 3558 (0xde6), region = 80  ;;  %v1925_v3 = vpack.c.bf16 (!%p456_p2), %v617_v1, %v616_v0  ;;  %v619_v4 = vld [vmem:[%s2369_s5 + $0x18] sm:$0xff] (!%p456_p2)  ;;  %1919 = vmatprep.subr.bf16.mxu0 (!%p456_p2), %v2055_v5  ;;  %v531_v6 = vld [vmem:[%s2367_s3] sm:$0xff] (!%p456_p2)  ;;  %v532_v7 = vld [vmem:[%s2367_s3 + $0x8] sm:$0xff] (!%p456_p2)  ;;  %v2057_v12 = vmov (!%p456_p2), 0.0   ;;  %vm542_vm1 = vcmask (!%p456_p2), 261120  }
   0x7   : > { %v1929_v8 = vpack.c.bf16 (!%p456_p2), %v619_v4, %v618_v2  ;;  %v1920_v9 = vpack.c.bf16 (!%p456_p2), %v532_v7, %v531_v6  ;;  %v533_v10 = vld [vmem:[%s2367_s3 + $0x10] sm:$0xff] (!%p456_p2)  ;;  %v534_v11 = vld [vmem:[%s2367_s3 + $0x18] sm:$0xff] (!%p456_p2)  ;;  %1827 = vmatprep.mubr.msk.f32.mxu0 (!%p456_p2), %vm2056_vm0, %v2057_v12  ;;  %v1738_v17 = vld [vmem:[%s2370_s6] ss:$0 sm:$0xff] (!%p456_p2)  ;;  %vm795_vm2 = vcmask (!%p456_p2), 64512   ;;  %s2058_s21 = smov (!%p456_p2), 120  }
   0x8   : > { %1926 = vmatprep.subr.bf16.mxu1 (!%p456_p2), %v1925_v3  ;;  %v1923_v13 = vpack.c.bf16 (!%p456_p2), %v534_v11, %v533_v10  ;;  %v1736_v18 = vld [vmem:[%s2368_s4] ss:$0 sm:$0xff] (!%p456_p2)  ;;  %vm2208_vm3 = vmpackc.low (!%p456_p2), %vm795_vm2, %vm795_vm2  ;;  %v709_v31 = vld [vmem:[%s2371_s7 + $0x8] sm:$0xff] (!%p456_p2)  ;;  %vm875_vm4 = vcmask (!%p456_p2), 97280   ;;  %vm890_vm5 = vcmask (!%p456_p2), 1043456   ;;  %vm2059_vm6 = vmmov (!%p456_p2), 1  }
   0x9   : > { %1928 = vmatpush3.bf16.msra.mxu1 (!%p456_p2), %v1925_v3  ;;  %1921 = vmatpush3.bf16.msra.mxu0 (!%p456_p2), %v1920_v9  ;;  %v708_v30 = vld [vmem:[%s2371_s7] sm:$0xff] (!%p456_p2)  ;;  %v710_v32 = vld [vmem:[%s2371_s7 + $0x10] sm:$0xff] (!%p456_p2)  ;;  %v711_v34 = vld [vmem:[%s2371_s7 + $0x18] sm:$0xff] (!%p456_p2)  ;;  %s2062_s25 = smov (!%p456_p2), 8   ;;  %s2063_s26 = smov (!%p456_p2), 16   ;;  %vm1143_vm8 = vcmask (!%p456_p2), 130112  }
   0xa   : > { %1930 = vmatprep.subr.bf16.mxu1 (!%p456_p2), %v1929_v8  ;;  %1922 = vmatprep.subr.bf16.mxu0 (!%p456_p2), %v2055_v5  ;;  %v1933_v33 = vpack.c.bf16 (!%p456_p2), %v709_v31, %v708_v30  ;;  %v1937_v35 = vpack.c.bf16 (!%p456_p2), %v711_v34, %v710_v32  ;;  %v1741_v48 = vld [vmem:[%s2372_s8] ss:$0 sm:$0xff] (!%p456_p2)  ;;  %vm2255_vm7 = vmpackc.low (!%p456_p2), %vm890_vm5, %vm2059_vm6  ;;  %vm1322_vm9 = vcmask (!%p456_p2), 195712   ;;  %s2064_s22 = smov (!%p456_p2), 24   ;;  %vm1501_vm10 = vcmask (!%p456_p2), 261312  }
   0xb   : > { %v1504_v52 = vld [vmem:[%s2373_s9] sm:$0xff] (!%p456_p2) }
   0xd   : > { %s2385_s19 = smov (!%p510_p3, %s1726_s19), 1  ;;  %1932 = vmatpush3.bf16.msra.mxu1 %v1929_v8  ;;  %1924 = vmatpush3.bf16.msra.mxu0 %v1923_v13 }
   0xe   : > { %s2180_s23 = sshll.u32 %s2385_s19, 3  ;;  %s1772_s24 = sshll.u32 %s2385_s19, 4  ;;  %1941 = vmatprep.subr.bf16.mxu1 %v2055_v5  ;;  %1934 = vmatprep.subr.bf16.mxu0 %v1933_v33 }
   0xf   : > { %s518_s27 = scalar_lea.vmem %s2365_s1, %s1772_s24  ;;  %s513_s30 = scalar_lea.vmem %s2364_s0, %s2180_s23 }
  0x10   : > { %v528_v14 = vld [vmem:[%s518_s27] sm:$0xff]  ;;  %v529_v15 = vld [vmem:[%s518_s27 + $0x8] sm:$0xf]  ;;  %s522_s17 = scalar_lea.vmem %s2366_s2, %s2180_s23  ;;  %s2060_s24 = smov 112  }
  0x11   : > { %1838 = vmatprep.mubr.msk.f32.mxu1 %vm542_vm1, %v528_v14  ;;  %v2191_v16 = vld [vmem:[%s513_s30] sm:$0xff] }
  0x12   : > { %1839 = vmatmul.mubr.msk.f32.vlgmr.msra.gmra.mrb[0].mxu1 %vm542_vm1, %v529_v15  ;;  %1828 = vmatmul.mubr.msk.f32.vlgmr.msra.gmra.mrb[0].mxu0 %vm542_vm1, %v2191_v16  ;;  %v2247_v36 = vld [vmem:[%s522_s17] sm:$0xff] }
  0x13   : > { %1856 = vmatprep.mubr.msk.f32.mxu1 %vm2056_vm0, %v2057_v12  ;;  %1849 = vmatprep.mubr.msk.f32.mxu0 %vm542_vm1, %v528_v14 }
  0x14   : > { %1936 = vmatpush3.bf16.msra.mxu0 %v1933_v33 }
  0x15   : > { %1938 = vmatprep.subr.bf16.mxu0 %v1937_v35 }
  0x18   : > { %1940 = vmatpush3.bf16.msra.mxu0 %v1937_v35 }
  0x19   : > { %1953 = vmatprep.subr.bf16.mxu0 %v2055_v5 }
  0x1b   : > { %1850 = vmatmul.mubr.msk.f32.vlgmr.msra.gmra.mrb[2].mxu0 %vm542_vm1, %v529_v15 }
  0x1c   : > { %1877 = vmatprep.mubr.msk.f32.mxu0 %vm2056_vm0, %v2057_v12 }
  0xe5   : > { %v1840_v19 = vpop.f32.mrb[0].mxu1  ;;  %v612_v20 = vpop.f32.mrb[0].mxu0 }
  0xe6   : > { %v705_v21 = vadd.f32 %v1840_v19, %v1738_v17  ;;  %v699_v22 = vpop.f32.mrb[1].mxu1  ;;  %v1829_v23 = vpop.f32.mrb[1].mxu0  ;;  %v613_v25 = vadd.f32 %v1736_v18, %v612_v20 }
  0xe7   : > { %v700_v24 = vadd.f32 %v1738_v17, %v699_v22 }
  0xe8   : > { %v2218_v29 = vmul.f32 0.35355338, %v613_v25 }
  0xe9   : > { %v1942_v27 = vpack.c.bf16 %v705_v21, %v700_v24  ;;  %v2212_v28 = vpack.i.bf16 %v705_v21, %v700_v24 }
  0xeb   : > { %1998 = vrot.lane.b32.xlu1 %v2212_v28, %s2058_s21  ;;  %1944 = vmatpush3.bf16.xpose.msk.msra.mxu1 %vm2208_vm3, %v1942_v27 }
  0xec   : > { %1945 = vmatprep.subr.bf16.mxu1 %v2055_v5 }
  0xee   : > { %v1851_v41 = vpop.f32.mrb[2].mxu0 }
  0xef   : > { %965 = vrot.lane.b32.xlu1 %v2218_v29, %s2058_s21  ;;  %v785_v42 = vpop.f32.mrb[3].mxu0  ;;  %v791_v49 = vadd.f32 %v1851_v41, %v1741_v48 }
  0xf0   : > { %v786_v50 = vadd.f32 %v1741_v48, %v785_v42 }
  0xf2   : > { %1857 = vmatmul.mubr.msk.f32.vlgmr.msra.gmra.mrb[2].mxu1 %vm795_vm2, %v2218_v29  ;;  %v1946_v51 = vpack.c.bf16 %v791_v49, %v786_v50  ;;  %v2274_v3 = vpack.i.bf16 %v791_v49, %v786_v50 }
  0xf3   : > { %1863 = vmatprep.mubr.msk.f32.mxu1 %vm2056_vm0, %v2057_v12 }
  0xf4   : > { %1948 = vmatpush3.bf16.msk.msra.mxu1 %vm2255_vm7, %v1946_v51 }
  0xf5   : > { %1949 = vmatprep.subr.bf16.mxu1 %v2055_v5 }
 0x15d   : > { %v1999_v54 = vpop.permute.xlu1 %1998 }
 0x15e   : > { %v2001_v55 = vunpack.i.h.bf16 %v1999_v54  ;;  %v2000_v56 = vunpack.i.l.bf16 %v1999_v54 }
 0x160   : > { %v1950_v59 = vpack.c.bf16 %v2001_v55, %v2000_v56 }
 0x161   : > { %v966_v60 = vpop.permute.xlu1 %965 }
 0x1c5   : > { %v871_v37 = vpop.f32.mrb[2].mxu1 }
 0x1c6   : > { %v872_v38 = vadd.f32 %v871_v37, %v2247_v36  ;;  %v1858_v39 = vpop.f32.mrb[3].mxu1 }
 0x1c8   : > { %v876_v40 = vsel %vm875_vm4, %v872_v38, -inf }
 0x1c9   : > { %877 = vmax.xlane.f32.xlu0 %v876_v40 }
 0x256   : > { %v878_v43 = vpop.xlane.xlu0 %877 }
 0x257   : > { %v879_v44 = vsub.f32 %v872_v38, %v878_v43 }
 0x259   : > { %v880_v45 = vmul.f32 1.442695, %v879_v44 }
 0x25b   : > { %2027 = vpow2.f32 %v880_v45 }
 0x265   : > { %v2028_v46 = vpop.eup %2027 }
 0x266   : > { %v882_v47 = vsel %vm875_vm4, %v2028_v46, 0.0 }
 0x267   : > { %883 = vadd.xlane.f32.xlu0 %v882_v47 }
 0x2f4   : > { %v884_v53 = vpop.xlane.xlu0 %883 }
 0x2f5   : > { %2029 = vrcp.f32 %v884_v53 }
 0x2ff   : > { %v2030_v57 = vpop.eup %2029 }
 0x300   : > { %v886_v58 = vmul.f32 %v2030_v57, %v2028_v46 }
 0x302   : > { %1864 = vmatmul.mubr.msk.f32.vlgmr.msra.gmra.mrb[4].mxu1 %vm875_vm4, %v886_v58 }
 0x303   : > { %1952 = vmatpush3.bf16.xpose.msk.msra.mxu1 %vm2208_vm3, %v1950_v59  ;;  %1870 = vmatprep.mubr.msk.f32.mxu1 %vm2056_vm0, %v2057_v12 }
 0x304   : > { %1961 = vmatprep.subr.bf16.mxu1 %v2055_v5 }
 0x30a   : > { %1871 = vmatmul.mubr.msk.f32.vlgmr.msra.gmra.mrb[6].mxu1 %vm795_vm2, %v966_v60 }
 0x30b   : > { %1891 = vmatprep.mubr.msk.f32.mxu1 %vm2056_vm0, %v2057_v12 }
 0x3d5   : > { %v960_v61 = vpop.f32.mrb[4].mxu1 }
 0x3d6   : > { %964 = vst.msk [vmem:[#allocation2] sm:$0xff] %vm795_vm2, %v960_v61  ;;  %v1865_v62 = vpop.f32.mrb[5].mxu1 }
 0x3dd   : > { %v1043_v63 = vpop.f32.mrb[6].mxu1 }
 0x3de   : > { %v1044_v0 = vadd.f32 %v1043_v63, %v2247_v36  ;;  %v1872_v1 = vpop.f32.mrb[7].mxu1 }
 0x3e0   : > { %v1047_v2 = vsel %vm875_vm4, %v1044_v0, -inf }
 0x3e1   : > { %1048 = vmax.xlane.f32.xlu0 %v1047_v2 }
 0x3f7   : > { %2003 = vrot.lane.b32.xlu0 %v2274_v3, %s2058_s21  ;;  %s2061_s21 = smov 104  }
 0x3fb   : > { %2008 = vrot.lane.b32.xlu0 %v2212_v28, %s2060_s24 }
 0x3ff   : > { %1145 = vrot.lane.b32.xlu0 %v2218_v29, %s2060_s24 }
 0x46e   : > { %v1049_v4 = vpop.xlane.xlu0 %1048 }
 0x46f   : > { %v1050_v6 = vsub.f32 %v1044_v0, %v1049_v4  ;;  %v1505_v4 = vld [vmem:[%s2373_s9 + $0x8] sm:$0xff] }
 0x471   : > { %v1051_v7 = vmul.f32 1.442695, %v1050_v6  ;;  %v1974_v6 = vpack.c.bf16 %v1505_v4, %v1504_v52 }
 0x472   : > { %v2004_v8 = vpop.permute.xlu0 %2003 }
 0x473   : > { %2031 = vpow2.f32 %v1051_v7  ;;  %v2006_v9 = vunpack.i.h.bf16 %v2004_v8  ;;  %v2005_v10 = vunpack.i.l.bf16 %v2004_v8  ;;  %v1506_v7 = vld [vmem:[%s2373_s9 + $0x10] sm:$0xff]  ;;  %v1507_v8 = vld [vmem:[%s2373_s9 + $0x18] sm:$0xff] }
 0x475   : > { %v1954_v11 = vpack.c.bf16 %v2006_v9, %v2005_v10  ;;  %v1977_v9 = vpack.c.bf16 %v1507_v8, %v1506_v7 }
 0x476   : > { %v2009_v20 = vpop.permute.xlu0 %2008 }
 0x477   : > { %1956 = vmatpush3.bf16.msk.msra.mxu0 %vm2255_vm7, %v1954_v11  ;;  %v2011_v22 = vunpack.i.h.bf16 %v2009_v20  ;;  %v2010_v23 = vunpack.i.l.bf16 %v2009_v20 }
 0x478   : > { %1957 = vmatprep.subr.bf16.mxu0 %v2055_v5 }
 0x479   : > { %v1958_v27 = vpack.c.bf16 %v2011_v22, %v2010_v23 }
 0x47d   : > { %v2032_v13 = vpop.eup %2031 }
 0x47e   : > { %v1053_v14 = vsel %vm875_vm4, %v2032_v13, 0.0 }
 0x47f   : > { %1054 = vadd.xlane.f32.xlu1 %v1053_v14  ;;  %v1764_v14 = vld [vmem:[%s2374_s10] ss:$0 sm:$0xff] }
 0x490   : > { %2013 = vrot.lane.b32.xlu1 %v2274_v3, %s2060_s24 }
 0x494   : > { %2018 = vrot.lane.b32.xlu1 %v2212_v28, %s2061_s21  ;;  %v1146_v28 = vpop.permute.xlu0 %1145 }
 0x50c   : > { %v1055_v15 = vpop.xlane.xlu1 %1054 }
 0x50d   : > { %2033 = vrcp.f32 %v1055_v15 }
 0x510   : > { %v2014_v17 = vpop.permute.xlu1 %2013 }
 0x511   : > { %v2016_v18 = vunpack.i.h.bf16 %v2014_v17  ;;  %v2015_v19 = vunpack.i.l.bf16 %v2014_v17 }
 0x513   : > { %v1962_v21 = vpack.c.bf16 %v2016_v18, %v2015_v19 }
 0x514   : > { %v2019_v42 = vpop.permute.xlu1 %2018 }
 0x515   : > { %1964 = vmatpush3.bf16.msk.msra.mxu1 %vm2255_vm7, %v1962_v21  ;;  %v2021_v44 = vunpack.i.h.bf16 %v2019_v42  ;;  %v2020_v45 = vunpack.i.l.bf16 %v2019_v42 }
 0x516   : > { %1965 = vmatprep.subr.bf16.mxu1 %v2055_v5 }
 0x517   : > { %v2034_v24 = vpop.eup %2033  ;;  %v1966_v48 = vpack.c.bf16 %v2021_v44, %v2020_v45 }
 0x518   : > { %v1057_v25 = vmul.f32 %v2034_v24, %v2032_v13 }
 0x51a   : > { %1878 = vmatmul.mubr.msk.f32.vlgmr.msra.gmra.mrb[4].mxu0 %vm875_vm4, %v1057_v25 }
 0x51b   : > { %1960 = vmatpush3.bf16.xpose.msk.msra.mxu0 %vm2208_vm3, %v1958_v27  ;;  %1884 = vmatprep.mubr.msk.f32.mxu0 %vm2056_vm0, %v2057_v12 }
 0x51c   : > { %1969 = vmatprep.subr.bf16.mxu0 %v2055_v5 }
 0x522   : > { %1885 = vmatmul.mubr.msk.f32.vlgmr.msra.gmra.mrb[6].mxu0 %vm795_vm2, %v1146_v28 }
 0x523   : > { %1905 = vmatprep.mubr.msk.f32.mxu0 %vm2056_vm0, %v2057_v12 }
 0x5ed   : > { %v1135_v30 = vpop.f32.mrb[4].mxu0 }
 0x5ee   : > { %v1879_v31 = vpop.f32.mrb[5].mxu0 }
 0x5ef   : > { %v1766_v31 = vld [vmem:[%s2375_s11] ss:$0 sm:$0xff] }
 0x5f5   : > { %v1223_v32 = vpop.f32.mrb[6].mxu0 }
 0x5f6   : > { %v1224_v33 = vadd.f32 %v1223_v32, %v2247_v36  ;;  %v1886_v34 = vpop.f32.mrb[7].mxu0 }
 0x5f8   : > { %v1227_v35 = vsel %vm875_vm4, %v1224_v33, -inf }
 0x5f9   : > { %1228 = vmax.xlane.f32.xlu0 %v1227_v35 }
 0x686   : > { %v1229_v37 = vpop.xlane.xlu0 %1228 }
 0x687   : > { %v1230_v38 = vsub.f32 %v1224_v33, %v1229_v37  ;;  %v1767_v33 = vld [vmem:[%s2376_s12] ss:$0 sm:$0xff] }
 0x689   : > { %v1231_v39 = vmul.f32 1.442695, %v1230_v38 }
 0x68b   : > { %2035 = vpow2.f32 %v1231_v39 }
 0x695   : > { %v2036_v40 = vpop.eup %2035 }
 0x696   : > { %v1233_v41 = vsel %vm875_vm4, %v2036_v40, 0.0 }
 0x697   : > { %1234 = vadd.xlane.f32.xlu1 %v1233_v41 }
 0x6a8   : > { %1324 = vrot.lane.b32.xlu1 %v2218_v29, %s2061_s21 }
 0x724   : > { %v1235_v43 = vpop.xlane.xlu1 %1234 }
 0x725   : > { %2037 = vrcp.f32 %v1235_v43 }
 0x728   : > { %v1325_v49 = vpop.permute.xlu1 %1324 }
 0x72f   : > { %v2038_v46 = vpop.eup %2037 }
 0x730   : > { %v1237_v47 = vmul.f32 %v2038_v46, %v2036_v40 }
 0x732   : > { %1892 = vmatmul.mubr.msk.f32.vlgmr.msra.gmra.mrb[8].mxu1 %vm875_vm4, %v1237_v47 }
 0x733   : > { %1968 = vmatpush3.bf16.xpose.msk.msra.mxu1 %vm2208_vm3, %v1966_v48  ;;  %1898 = vmatprep.mubr.msk.f32.mxu1 %vm2056_vm0, %v2057_v12 }
 0x73a   : > { %1899 = vmatmul.mubr.msk.f32.vlgmr.msra.gmra.mrb[10].mxu1 %vm795_vm2, %v1325_v49  ;;  %v1769_v49 = vld [vmem:[%s2378_s14] ss:$0 sm:$0xff] }
 0x805   : > { %v1314_v29 = vpop.f32.mrb[8].mxu1 }
 0x806   : > { %v1893_v50 = vpop.f32.mrb[9].mxu1 }
 0x80d   : > { %v1402_v51 = vpop.f32.mrb[10].mxu1 }
 0x80e   : > { %v1403_v53 = vadd.f32 %v1402_v51, %v2247_v36  ;;  %v1900_v54 = vpop.f32.mrb[11].mxu1 }
 0x810   : > { %v1406_v55 = vsel %vm875_vm4, %v1403_v53, -inf }
 0x811   : > { %1407 = vmax.xlane.f32.xlu0 %v1406_v55 }
 0x827   : > { %2023 = vrot.lane.b32.xlu0 %v2274_v3, %s2061_s21 }
 0x82b   : > { %1140 = vrot.lane.b32.xlu0 %v1135_v30, %s2062_s25 }
 0x82f   : > { %1319 = vrot.lane.b32.xlu0 %v1314_v29, %s2063_s26 }
 0x89e   : > { %v1408_v26 = vpop.xlane.xlu0 %1407 }
 0x89f   : > { %v1409_v56 = vsub.f32 %v1403_v53, %v1408_v26 }
 0x8a1   : > { %v1410_v57 = vmul.f32 1.442695, %v1409_v56 }
 0x8a2   : > { %v2024_v58 = vpop.permute.xlu0 %2023 }
 0x8a3   : > { %2039 = vpow2.f32 %v1410_v57  ;;  %v2026_v59 = vunpack.i.h.bf16 %v2024_v58  ;;  %v2025_v60 = vunpack.i.l.bf16 %v2024_v58 }
 0x8a5   : > { %v1970_v36 = vpack.c.bf16 %v2026_v59, %v2025_v60 }
 0x8a6   : > { %v1141_v61 = vpop.permute.xlu0 %1140 }
 0x8a7   : > { %1144 = vst.msk [vmem:[#allocation2] sm:$0xff] %vm1143_vm8, %v1141_v61  ;;  %1972 = vmatpush3.bf16.msk.msra.mxu0 %vm2255_vm7, %v1970_v36 }
 0x8a8   : > { %1973 = vmatprep.subr.bf16.mxu0 %v2055_v5 }
 0x8aa   : > { %v1320_v62 = vpop.permute.xlu0 %1319 }
 0x8ab   : > { %1323 = vst.msk [vmem:[#allocation2] sm:$0xff] %vm1322_vm9, %v1320_v62 }
 0x8ad   : > { %v2040_v63 = vpop.eup %2039 }
 0x8ae   : > { %v1412_v0 = vsel %vm875_vm4, %v2040_v63, 0.0 }
 0x8af   : > { %1413 = vadd.xlane.f32.xlu1 %v1412_v0 }
 0x93c   : > { %v1414_v1 = vpop.xlane.xlu1 %1413 }
 0x93d   : > { %2041 = vrcp.f32 %v1414_v1 }
 0x947   : > { %v2042_v2 = vpop.eup %2041 }
 0x948   : > { %v1416_v3 = vmul.f32 %v2042_v2, %v2040_v63 }
 0x94a   : > { %1906 = vmatmul.mubr.msk.f32.vlgmr.msra.gmra.mrb[8].mxu0 %vm875_vm4, %v1416_v3 }
 0x94b   : > { %1916 = vmatprep.mubr.msk.f32.mxu0 %vm2056_vm0, %v2057_v12  ;;  %1975 = vmatpush3.bf16.msra.mxu0 %v1974_v6 }
 0x94c   : > { %1976 = vmatprep.subr.bf16.mxu0 %v2055_v5 }
 0x94f   : > { %1978 = vmatpush3.bf16.msra.mxu0 %v1977_v9 }
 0xa1d   : > { %v1493_v12 = vpop.f32.mrb[8].mxu0 }
 0xa1e   : > { %1498 = vrot.lane.b32.xlu0 %v1493_v12, %s2064_s22  ;;  %v1907_v10 = vpop.f32.mrb[9].mxu0  ;;  %s526_s22 = scalar_lea.vmem %s2379_s15, %s2180_s23 }
 0xa90   : > { %v1499_v11 = vpop.permute.xlu0 %1498 }
 0xa91   : > { %1502 = vst.msk [vmem:[#allocation2] sm:$0xff] %vm1501_vm10, %v1499_v11 }
 0xa98   : > { %v1503_v13 = vld [vmem:[#allocation2] sm:$0xff] }
 0xa99   : > { %1917 = vmatmul.mubr.msk.f32.vlgmr.msra.gmra.mrb[10].mxu0 %vm542_vm1, %v1503_v13 }
 0xb6c   : > { %v1584_v15 = vpop.f32.mrb[10].mxu0 }
 0xb6d   : > { %v1585_v17 = vadd.f32 %v1764_v14, %v1584_v15  ;;  %v1918_v18 = vpop.f32.mrb[11].mxu0 }
 0xb6f   : > { %v1588_v5 = vadd.f32 %v1585_v17, %v2191_v16 }
 0xb71   : > { %v1591_v19 = vsel %vm542_vm1, %v1588_v5, 0.0 }
 0xb72   : > { %1592 = vadd.xlane.f32.xlu1 %v1591_v19 }
 0xbff   : > { %v1593_v20 = vpop.xlane.xlu1 %1592 }
 0xc00   : > { %v1594_v21 = vmul.f32 0.03125, %v1593_v20 }
 0xc02   : > { %v1595_v22 = vsub.f32 %v1588_v5, %v1594_v21 }
 0xc04   : > { %v1596_v23 = vmul.f32 %v1595_v22, %v1595_v22 }
 0xc06   : > { %v1597_v24 = vsel %vm542_vm1, %v1596_v23, 0.0 }
 0xc07   : > { %1598 = vadd.xlane.f32.xlu0 %v1597_v24 }
 0xc94   : > { %v1599_v25 = vpop.xlane.xlu0 %1598 }
 0xc95   : > { %v1600_v27 = vmul.f32 0.03125, %v1599_v25 }
 0xc97   : > { %v1601_v28 = vadd.f32 1e-05, %v1600_v27 }
 0xc99   : > { %2043 = vrsqrt.f32 %v1601_v28 }
 0xca3   : > { %v2044_v30 = vpop.eup %2043 }
 0xca4   : > { %v1603_v32 = vmul.f32 %v2044_v30, %v1595_v22 }
 0xca6   : > { %v1610_v34 = vmul.f32 %v1766_v31, %v1603_v32 }
 0xca8   : > { %v1617_v35 = vadd.f32 %v1767_v33, %v1610_v34 }
 0xcaa   : > { %v1618_v37 = vadd.f32 %v1617_v35, %v2191_v16  ;;  %v1768_v16 = vld [vmem:[%s2377_s13] ss:$0 sm:$0xff] }
 0xcac   : > { %v1621_v38 = vsel %vm542_vm1, %v1618_v37, 0.0 }
 0xcad   : > { %1622 = vadd.xlane.f32.xlu1 %v1621_v38 }
 0xd3a   : > { %v1623_v39 = vpop.xlane.xlu1 %1622 }
 0xd3b   : > { %v1624_v40 = vmul.f32 0.03125, %v1623_v39 }
 0xd3d   : > { %v1625_v41 = vsub.f32 %v1618_v37, %v1624_v40 }
 0xd3f   : > { %v1626_v42 = vmul.f32 %v1625_v41, %v1625_v41 }
 0xd41   : > { %v1627_v43 = vsel %vm542_vm1, %v1626_v42, 0.0 }
 0xd42   : > { %1628 = vadd.xlane.f32.xlu1 %v1627_v43 }
 0xdcf   : > { %v1629_v44 = vpop.xlane.xlu1 %1628 }
 0xdd0   : > { %v1630_v45 = vmul.f32 0.03125, %v1629_v44 }
 0xdd2   : > { %v1631_v46 = vadd.f32 1e-05, %v1630_v45 }
 0xdd4   : > { %2045 = vrsqrt.f32 %v1631_v46 }
 0xdde   : > { %v2046_v47 = vpop.eup %2045 }
 0xddf   : > { %v1633_v48 = vmul.f32 %v2046_v47, %v1625_v41 }
 0xde1   : > { %v1640_v29 = vmul.f32 %v1768_v16, %v1633_v48 }
 0xde3   : > { %v1647_v50 = vadd.f32 %v1769_v49, %v1640_v29 }
 0xde5   : > { %1648 = vst.msk [vmem:[%s526_s22] sm:$0xff] %vm542_vm1, %v1647_v50 }
 0xde6 PF: > { %s25_s18 = sadd.s32 1, %s2053_s18  }
 0xde7   : > { %p22_p4 = scmp.ge.s32.totalorder %s25_s18, 4  }
 0xde9   :  { %24 = sbr.rel (!%p22_p4) target bundleno = 1 (0x1), region = 116 }

// kernel: decoder_forward.13
= control target key start
LH: loop header
LB: loop body
LE: loop exit
PB: predicated region body
PF: predicated region fallthrough
CT: control target
= control target key end

     0   :  { %vm37_vm0 = vcmask 261120   ;;  %s639_s0 = inlined_call_operand.vmem [shape: f32[16,32], index: 0, kind: input, shape index: {}]   ;;  %s640_s1 = inlined_call_operand.vmem [shape: f32[32,64], index: 1, kind: input, shape index: {}]   ;;  %s641_s2 = inlined_call_operand.vmem [shape: f32[1,64], index: 2, kind: input, shape index: {}]   ;;  %s642_s3 = inlined_call_operand.vmem [shape: f32[64,32], index: 3, kind: input, shape index: {}]   ;;  %s643_s4 = inlined_call_operand.vmem [shape: f32[1,32], index: 4, kind: input, shape index: {}]   ;;  %s644_s5 = inlined_call_operand.vmem [shape: f32[1,32], index: 5, kind: input, shape index: {}]   ;;  %s645_s6 = inlined_call_operand.vmem [shape: f32[1,32], index: 6, kind: input, shape index: {}]   ;;  %s646_s7 = inlined_call_operand.vmem [shape: f32[1,32], index: 7, kind: input, shape index: {}]   ;;  %s647_s8 = inlined_call_operand.vmem [shape: f32[1,32], index: 8, kind: input, shape index: {}]   ;;  %s648_s9 = inlined_call_operand.hbm [shape: f32[16,32], index: 9, kind: output, shape index: {}]  }
   0x1   :  { %v42_v0 = vld [vmem:[%s640_s1] sm:$0xff]  ;;  %v43_v1 = vld [vmem:[%s640_s1 + $0x8] sm:$0xff]  ;;  %v44_v2 = vld [vmem:[%s640_s1 + $0x10] sm:$0xff] }
   0x2   :  { %v423_v3 = vpack.c.bf16 %v43_v1, %v42_v0  ;;  %v45_v4 = vld [vmem:[%s640_s1 + $0x18] sm:$0xff]  ;;  %v556_v5 = vld [vmem:[%s639_s0] sm:$0xff] }
   0x3   :  { %v427_v6 = vpack.c.bf16 %v45_v4, %v44_v2  ;;  %401 = vmatprep.mubr.msk.f32.mxu0 %vm37_vm0, %v556_v5 }
   0x4   :  { %14 = vsyncpa [#allocation4], 0  ;;  %424 = vmatprep.subr.bf16.mxu0 %v423_v3  ;;  %v563_v7 = vld [vmem:[%s639_s0 + $0x8] sm:$0xff]  ;;  %v147_v8 = vld [vmem:[%s642_s3] sm:$0xff]  ;;  %v487_v20 = vmov 0.0   ;;  %vm155_vm1 = vcmask 523264  }
   0x5   :  { %426 = vmatpush3.bf16.msra.mxu0 %v423_v3  ;;  %v148_v9 = vld [vmem:[%s642_s3 + $0x8] sm:$0xff]  ;;  %v149_v11 = vld [vmem:[%s642_s3 + $0x10] sm:$0xff]  ;;  %v150_v12 = vld [vmem:[%s642_s3 + $0x18] sm:$0xff]  ;;  %39 = vst.msk [vmem:[#allocation2 + $0x8] sm:$0xff] %vm37_vm0, %v487_v20  ;;  %s488_s1 = smov [#allocation3]  }
   0x6   :  { %428 = vmatprep.subr.bf16.mxu0 %v427_v6  ;;  %v431_v10 = vpack.c.bf16 %v148_v9, %v147_v8  ;;  %v435_v13 = vpack.c.bf16 %v150_v12, %v149_v11  ;;  %v151_v14 = vld [vmem:[%s642_s3 + $0x20] sm:$0xff]  ;;  %v152_v15 = vld [vmem:[%s642_s3 + $0x28] sm:$0xff]  ;;  %v153_v17 = vld [vmem:[%s642_s3 + $0x30] sm:$0xff]  ;;  %38 = vst.msk [vmem:[#allocation2] sm:$0xff] %vm37_vm0, %v487_v20  ;;  %s356_s21 = sshll.u32 %s488_s1, 4  ;;  %s357_s21 = int_to_ptr.vmem [resolvable:$true] %s356_s21 }
   0x7   :  { %v439_v16 = vpack.c.bf16 %v152_v15, %v151_v14  ;;  %v154_v18 = vld [vmem:[%s642_s3 + $0x38] sm:$0xff]  ;;  %v367_v21 = vld [vmem:[%s641_s2] ss:$0 sm:$0xff]  ;;  %s463_s22 = scalar_lea.vmem %s357_s21, 256  ;;  %p468_p1 = scmp.lt.s32.totalorder %s357_s21, %s357_s21 }
   0x8   :  { %432 = vmatprep.subr.bf16.mxu1 %v431_v10  ;;  %v443_v19 = vpack.c.bf16 %v154_v18, %v153_v17  ;;  %v372_v42 = vld [vmem:[%s643_s4] ss:$0 sm:$0xff]  ;;  %p464_p0 = scmp.ne.s32.totalorder %s357_s21, %s463_s22  ;;  %p469_p2 = scmp.lt.s32.totalorder %s463_s22, %s463_s22 }
   0x9   :  { %430 = vmatpush3.bf16.msra.mxu0 %v427_v6  ;;  %434 = vmatpush3.bf16.msra.mxu1 %v431_v10  ;;  %v373_v4 = vld [vmem:[%s644_s5] ss:$0 sm:$0xff] }
   0xa   :  { %436 = vmatprep.subr.bf16.mxu1 %v435_v13  ;;  %v374_v8 = vld [vmem:[%s645_s6] ss:$0 sm:$0xff]  ;;  %p470_p3 = por %p469_p2, %p468_p1 }
   0xc   :  { %402 = vmatmul.mubr.msk.f32.vlgmr.msra.gmra.mrb[0].mxu0 %vm37_vm0, %v563_v7  ;;  %v146_v36 = vld [vmem:[#allocation2 + $0x8] sm:$0xff]  ;;  %p471_p4 = pnand %p470_p3, %p464_p0 }
   0xd   :  { %438 = vmatpush3.bf16.msra.mxu1 %v435_v13  ;;  %v145_v37 = vld [vmem:[#allocation2] sm:$0xff] }
   0xe   :  { %440 = vmatprep.subr.bf16.mxu1 %v439_v16 }
  0x11   :  { %442 = vmatpush3.bf16.msra.mxu1 %v439_v16 }
  0x12   :  { %444 = vmatprep.subr.bf16.mxu1 %v443_v19 }
  0x15   :  { %446 = vmatpush3.bf16.msra.mxu1 %v443_v19 }
  0xdf   :  { %v403_v22 = vpop.f32.mrb[0].mxu0 }
  0xe0   :  { %v132_v23 = vadd.f32 %v403_v22, %v367_v21  ;;  %v126_v24 = vpop.f32.mrb[1].mxu0 }
  0xe1   :  { %v127_v25 = vadd.f32 %v367_v21, %v126_v24 }
  0xe2   :  { %v138_v26 = vmul.f32 0.70710677, %v132_v23  ;;  %v136_v33 = vmul.f32 0.5, %v132_v23 }
  0xe3   :  { %v137_v27 = vmul.f32 0.70710677, %v127_v25  ;;  %v135_v31 = vmul.f32 0.5, %v127_v25 }
  0xe4   :  { %451 = verf.f32 %v138_v26 }
  0xe5   :  { %453 = verf.f32 %v137_v27 }
  0xee   :  { %v452_v28 = vpop.eup %451 }
  0xef   :  { %v454_v29 = vpop.eup %453  ;;  %v142_v30 = vadd.f32 1.0, %v452_v28 }
  0xf0   :  { %v141_v32 = vadd.f32 1.0, %v454_v29 }
  0xf1   :  { %v144_v35 = vmul.f32 %v142_v30, %v136_v33 }
  0xf2   :  { %v143_v34 = vmul.f32 %v141_v32, %v135_v31 }
  0xf4   :  { %420 = vmatprep.mubr.msk.f32.mxu1 %vm155_vm1, %v143_v34  ;;  %v375_v34 = vld [vmem:[%s646_s7] ss:$0 sm:$0xff] }
  0xf5   :  { %421 = vmatmul.mubr.msk.f32.vlgmr.msra.gmra.mrb[0].mxu1 %vm155_vm1, %v144_v35 }
 0x1c8   :  { %v422_v38 = vpop.f32.mrb[0].mxu1 }
 0x1c9   :  { %v238_v39 = vadd.f32 %v422_v38, %v146_v36  ;;  %v228_v40 = vpop.f32.mrb[1].mxu1  ;;  %v376_v36 = vld [vmem:[%s647_s8] ss:$0 sm:$0xff] }
 0x1ca   :  { %v237_v41 = vadd.f32 %v228_v40, %v145_v37 }
 0x1cb   :  { %240 = vst.msk [vmem:[#allocation2 + $0x8] sm:$0xff] %vm37_vm0, %v238_v39 }
 0x1cc   :  { %239 = vst.msk [vmem:[#allocation2] sm:$0xff] %vm37_vm0, %v237_v41 }
 0x1d2   :  { %v247_v43 = vld [vmem:[#allocation2 + $0x8] sm:$0xff] }
 0x1d3   :  { %v246_v44 = vld [vmem:[#allocation2] sm:$0xff]  ;;  %v256_v46 = vadd.f32 %v372_v42, %v247_v43 }
 0x1d4   :  { %v255_v45 = vadd.f32 %v372_v42, %v246_v44 }
 0x1d5   :  { %v258_v49 = vadd.f32 %v256_v46, %v563_v7 }
 0x1d6   :  { %v257_v47 = vadd.f32 %v255_v45, %v556_v5 }
 0x1d7   :  { %v264_v50 = vsel %vm37_vm0, %v258_v49, 0.0 }
 0x1d8   :  { %v261_v48 = vsel %vm37_vm0, %v257_v47, 0.0 }
 0x1d9   :  { %262 = vadd.xlane.f32.xlu0 %v261_v48 }
 0x1dd   :  { %265 = vadd.xlane.f32.xlu0 %v264_v50 }
 0x266   :  { %v263_v51 = vpop.xlane.xlu0 %262 }
 0x267   :  { %v267_v52 = vmul.f32 0.03125, %v263_v51 }
 0x269   :  { %v269_v53 = vsub.f32 %v257_v47, %v267_v52 }
 0x26a   :  { %v266_v54 = vpop.xlane.xlu0 %265 }
 0x26b   :  { %v268_v55 = vmul.f32 0.03125, %v266_v54  ;;  %v271_v56 = vmul.f32 %v269_v53, %v269_v53 }
 0x26d   :  { %v270_v57 = vsub.f32 %v258_v49, %v268_v55  ;;  %v273_v58 = vsel %vm37_vm0, %v271_v56, 0.0 }
 0x26e   :  { %274 = vadd.xlane.f32.xlu1 %v273_v58 }
 0x26f   :  { %v272_v59 = vmul.f32 %v270_v57, %v270_v57 }
 0x271   :  { %v276_v60 = vsel %vm37_vm0, %v272_v59, 0.0 }
 0x272   :  { %277 = vadd.xlane.f32.xlu1 %v276_v60 }
 0x2fb   :  { %v275_v61 = vpop.xlane.xlu1 %274 }
 0x2fc   :  { %v279_v62 = vmul.f32 0.03125, %v275_v61 }
 0x2fe   :  { %v281_v63 = vadd.f32 1e-05, %v279_v62 }
 0x2ff   :  { %v278_v0 = vpop.xlane.xlu1 %277 }
 0x300   :  { %455 = vrsqrt.f32 %v281_v63  ;;  %v280_v1 = vmul.f32 0.03125, %v278_v0 }
 0x302   :  { %v282_v2 = vadd.f32 1e-05, %v280_v1 }
 0x304   :  { %457 = vrsqrt.f32 %v282_v2 }
 0x30a   :  { %v456_v3 = vpop.eup %455 }
 0x30b   :  { %v285_v6 = vmul.f32 %v456_v3, %v269_v53 }
 0x30d   :  { %v293_v9 = vmul.f32 %v373_v4, %v285_v6 }
 0x30e   :  { %v458_v10 = vpop.eup %457 }
 0x30f   :  { %v301_v11 = vadd.f32 %v374_v8, %v293_v9  ;;  %v286_v12 = vmul.f32 %v458_v10, %v270_v57 }
 0x311   :  { %v303_v13 = vadd.f32 %v301_v11, %v556_v5  ;;  %v294_v14 = vmul.f32 %v373_v4, %v286_v12 }
 0x313   :  { %v307_v15 = vsel %vm37_vm0, %v303_v13, 0.0  ;;  %v302_v16 = vadd.f32 %v374_v8, %v294_v14 }
 0x314   :  { %308 = vadd.xlane.f32.xlu0 %v307_v15 }
 0x315   :  { %v304_v17 = vadd.f32 %v302_v16, %v563_v7 }
 0x317   :  { %v310_v18 = vsel %vm37_vm0, %v304_v17, 0.0 }
 0x318   :  { %311 = vadd.xlane.f32.xlu1 %v310_v18 }
 0x3a1   :  { %v309_v19 = vpop.xlane.xlu0 %308 }
 0x3a2   :  { %v313_v20 = vmul.f32 0.03125, %v309_v19 }
 0x3a4   :  { %v315_v21 = vsub.f32 %v303_v13, %v313_v20 }
 0x3a5   :  { %v312_v22 = vpop.xlane.xlu1 %311 }
 0x3a6   :  { %v314_v23 = vmul.f32 0.03125, %v312_v22  ;;  %v317_v24 = vmul.f32 %v315_v21, %v315_v21 }
 0x3a8   :  { %v316_v25 = vsub.f32 %v304_v17, %v314_v23  ;;  %v319_v26 = vsel %vm37_vm0, %v317_v24, 0.0 }
 0x3a9   :  { %320 = vadd.xlane.f32.xlu0 %v319_v26 }
 0x3aa   :  { %v318_v5 = vmul.f32 %v316_v25, %v316_v25 }
 0x3ac   :  { %v322_v27 = vsel %vm37_vm0, %v318_v5, 0.0 }
 0x3ad   :  { %323 = vadd.xlane.f32.xlu1 %v322_v27 }
 0x436   :  { %v321_v28 = vpop.xlane.xlu0 %320 }
 0x437   :  { %v325_v29 = vmul.f32 0.03125, %v321_v28 }
 0x439   :  { %v327_v7 = vadd.f32 1e-05, %v325_v29 }
 0x43a   :  { %v324_v30 = vpop.xlane.xlu1 %323 }
 0x43b   :  { %459 = vrsqrt.f32 %v327_v7  ;;  %v326_v31 = vmul.f32 0.03125, %v324_v30 }
 0x43d   :  { %v328_v32 = vadd.f32 1e-05, %v326_v31 }
 0x43f   :  { %461 = vrsqrt.f32 %v328_v32 }
 0x445   :  { %v460_v33 = vpop.eup %459 }
 0x446   :  { %v331_v35 = vmul.f32 %v460_v33, %v315_v21 }
 0x448   :  { %v339_v37 = vmul.f32 %v375_v34, %v331_v35 }
 0x449   :  { %v462_v38 = vpop.eup %461 }
 0x44a   :  { %v332_v39 = vmul.f32 %v462_v38, %v316_v25  ;;  %v347_v40 = vadd.f32 %v376_v36, %v339_v37 }
 0x44c   :  { %v340_v41 = vmul.f32 %v375_v34, %v332_v39  ;;  %349 = vst.msk [vmem:[#allocation3] sm:$0xff] %vm37_vm0, %v347_v40 }
 0x44e   :  { %v348_v42 = vadd.f32 %v376_v36, %v340_v41 }
 0x450   :  { %350 = vst.msk [vmem:[#allocation3 + $0x8] sm:$0xff] %vm37_vm0, %v348_v42 }
 0x451   :  { %474 = shalt.err (!%p471_p4)
}
 0x452   :  { %s475_s23 = scalar_lea.hbm %s648_s9, 256 }
 0x453   :  { %p476_p5 = scmp.ne.s32.totalorder %s648_s9, %s475_s23  ;;  %p479_p6 = scmp.lt.u32.totalorder %s475_s23, %s648_s9 }
 0x455   :  { %p481_p7 = pnand %p479_p6, %p476_p5 }
 0x457   :  { %484 = shalt.err (!%p481_p7)
}
 0x458   :  { %s489_s27 = smov 128   ;;  %s490_s28 = smov 8  }
 0x459   :  { %362 = dma.vmem_to_hbm [thread:$0]  %s357_s21, 256, %s648_s9, [#allocation4], %s489_s27, %s489_s27, %s490_s28  }
 0x45a   :  { %485 = dma.done.wait [#allocation4], 256  }
 0x45b   :  { %486 = vsyncadd [#allocation4], 4294967040 }
 0x45c   :  { %366 = vsyncpa [#allocation4], 1 }

</bundles_post_ra>
